<compile_context>
chip_gen: v7x
topology: tpu7x:2x2x1
jax: 0.10.0
libtpu: 0.0.40
codegen_flags: <defaults>
</compile_context>

<pallas_src>
import jax
import jax.numpy as jnp
from jax import lax
from jax.experimental import pallas as pl
from jax.experimental.pallas import tpu as pltpu

H = 768        # hidden size (fixed by the module)
N_OUT = 3072   # linear out_features (fixed by the module)
EPS = 1e-12


def _fused_kernel(x177_ref, x206_ref, gamma_ref, beta_ref, w_ref, b_ref,
                  o_ref, y_ref):
    # Residual + LayerNorm + bf16 cast computed once per row tile (first N
    # step) and cached in VMEM scratch; every N step then only does the MXU
    # matmul + bias add on the cached activations.
    @pl.when(pl.program_id(1) == 0)
    def _():
        # Dropout in eval mode is the identity, so the add is x177 + x206.
        # TODO(synk): train-mode dropout mask (pltpu.prng_*) is not modeled.
        x = x177_ref[...] + x206_ref[...]                    # (tm, H) f32

        # LayerNorm over H (biased variance, eps=1e-12), all in f32.
        mean = jnp.mean(x, axis=-1, keepdims=True)
        xc = x - mean
        var = jnp.mean(xc * xc, axis=-1, keepdims=True)
        inv = lax.rsqrt(var + EPS)
        y = xc * inv * gamma_ref[...] + beta_ref[...]        # (tm, H) f32
        y_ref[...] = y.astype(jnp.bfloat16)

    # Linear on the MXU: bf16 inputs, f32 accumulation, f32 bias add.
    acc = jnp.dot(y_ref[...], w_ref[...],
                  preferred_element_type=jnp.float32)        # (tm, tn) f32
    o_ref[...] = (acc + b_ref[...]).astype(o_ref.dtype)


def _num_tensorcores():
    """Best-effort TensorCores per device (2 on v7x, else 1). Never raises."""
    try:
        kind = (getattr(jax.devices()[0], "device_kind", "") or "").lower()
        if "v7" in kind:
            return 2
    except Exception:
        pass
    return 1


def _pick_tm(rows, n_tc):
    # Prefer one row tile per TensorCore: the row axis is "parallel" so
    # megacore chips split it evenly and each core streams the weight once.
    # NOTE: with (rows-outer, N-inner) nesting the weight is re-streamed once
    # per row tile, so for rows >> 768 callers should raise tm accordingly.
    if n_tc > 1 and rows % n_tc == 0 and (rows // n_tc) % 8 == 0:
        return rows // n_tc
    for cand in (768, 512, 384, 256, 128, 64, 32, 16, 8):
        if rows % cand == 0:
            return cand
    return rows  # full-extent block (fine for small row counts)


def fused_dropout_add_ln_linear(x206, x177, gamma, beta, w_t, bias, *,
                                tm=None, tn=768, out_dtype=None):
    """x206, x177: (B, S, H) f32; gamma/beta: (H,); w_t: (H, N) [bf16 preferred];
    bias: (N,).  out_dtype defaults to the activation dtype (f32 = module
    semantics); pass jnp.bfloat16 to halve the output HBM stream."""
    B, S, Hh = x177.shape
    assert Hh == H and x206.shape == x177.shape
    rows = B * S
    if tm is None:
        tm = _pick_tm(rows, _num_tensorcores())
    assert rows % tm == 0 and tm % 8 == 0

    n_out = w_t.shape[1]
    assert w_t.shape[0] == H and bias.shape == (n_out,)
    assert n_out % tn == 0 and tn % 128 == 0

    if out_dtype is None:
        out_dtype = x177.dtype

    x177_2d = x177.reshape(rows, H)
    x206_2d = x206.reshape(rows, H)
    gamma2d = gamma.reshape(1, H).astype(jnp.float32)
    beta2d = beta.reshape(1, H).astype(jnp.float32)
    bias2d = bias.reshape(1, n_out).astype(jnp.float32)

    # Hot-path callers should pass the weight pre-cast to bf16 (done once at
    # parameter-load time); this fallback cast is only a cold-path convenience.
    if w_t.dtype != jnp.bfloat16:
        w_t = w_t.astype(jnp.bfloat16)

    grid = (rows // tm, n_out // tn)

    out = pl.pallas_call(
        _fused_kernel,
        out_shape=jax.ShapeDtypeStruct((rows, n_out), out_dtype),
        grid_spec=pltpu.PrefetchScalarGridSpec(
            num_scalar_prefetch=0,
            grid=grid,
            in_specs=[
                pl.BlockSpec((tm, H), lambda i, j: (i, 0)),   # x177 tile
                pl.BlockSpec((tm, H), lambda i, j: (i, 0)),   # x206 tile
                pl.BlockSpec((1, H), lambda i, j: (0, 0)),    # gamma
                pl.BlockSpec((1, H), lambda i, j: (0, 0)),    # beta
                pl.BlockSpec((H, tn), lambda i, j: (0, j)),   # W^T tile (bf16)
                pl.BlockSpec((1, tn), lambda i, j: (0, j)),   # bias tile
            ],
            out_specs=pl.BlockSpec((tm, tn), lambda i, j: (i, j)),
            scratch_shapes=[pltpu.VMEM((tm, H), jnp.bfloat16)],  # cached LN out
        ),
        compiler_params=pltpu.CompilerParams(
            # Row axis parallel (megacore split); N axis arbitrary so the
            # LayerNorm scratch persists across the N steps of a row tile.
            dimension_semantics=("parallel", "arbitrary"),
            vmem_limit_bytes=48 * 1024 * 1024,
        ),
    )(x177_2d, x206_2d, gamma2d, beta2d, w_t, bias2d)

    return out.reshape(B, S, n_out)


if __name__ == "__main__":
    key = jax.random.PRNGKey(0)
    k1, k2, k3, k4, k5, k6 = jax.random.split(key, 6)

    B, S = 1, 384
    x206 = jax.random.normal(k1, (B, S, H), dtype=jnp.float32)
    x177 = jax.random.normal(k2, (B, S, H), dtype=jnp.float32)

    # Deterministic synthetic parameters (not a checkpoint load).
    gamma = 1.0 + 0.02 * jax.random.normal(k3, (H,), dtype=jnp.float32)
    beta = 0.02 * jax.random.normal(k4, (H,), dtype=jnp.float32)
    # PyTorch Linear weight is (N, H); kernel expects the transpose (H, N).
    w_t_f32 = jax.random.normal(k5, (H, N_OUT), dtype=jnp.float32) * (1.0 / jnp.sqrt(H))
    bias = 0.01 * jax.random.normal(k6, (N_OUT,), dtype=jnp.float32)

    # Parameter-load-time cast: done exactly once, OUTSIDE the per-call path.
    w_t_bf16 = jax.block_until_ready(w_t_f32.astype(jnp.bfloat16))

    out = fused_dropout_add_ln_linear(x206, x177, gamma, beta, w_t_bf16, bias)
    out = jax.block_until_ready(out)
    assert out.shape == (B, S, N_OUT)

    # Reference LayerNorm path in f32.
    x = x177 + x206
    mean = jnp.mean(x, axis=-1, keepdims=True)
    var = jnp.mean((x - mean) ** 2, axis=-1, keepdims=True)
    y = (x - mean) * lax.rsqrt(var + EPS) * gamma + beta

    # (1) Tight check vs a reference using the same bf16 matmul inputs
    #     (isolates the kernel's f32-accumulated MXU path).
    y_bf = y.astype(jnp.bfloat16).astype(jnp.float32)
    w_bf = w_t_bf16.astype(jnp.float32)
    ref_bf = jnp.dot(y_bf.reshape(-1, H), w_bf,
                     precision=lax.Precision.HIGHEST).reshape(B, S, N_OUT) + bias
    assert jnp.allclose(out, ref_bf, atol=5e-3, rtol=5e-3)

    # (2) Loose check vs the pure-f32 module semantics (bf16 weight/activation
    #     rounding accounts for the remaining difference).
    ref_f32 = jnp.dot(y.reshape(-1, H), w_t_f32,
                      precision=lax.Precision.HIGHEST).reshape(B, S, N_OUT) + bias
    assert jnp.allclose(out, ref_f32, atol=5e-2, rtol=5e-2)

    print("KERNEL_OK")
</pallas_src>

<mosaic_0001>
module attributes {stable_mosaic.version = 11 : i64} {
  func.func @_fused_kernel(%arg0: i32, %arg1: i32, %arg2: memref<384x768xf32, #tpu.memory_space<vmem>>, %arg3: memref<384x768xf32, #tpu.memory_space<vmem>>, %arg4: memref<1x768xf32, #tpu.memory_space<vmem>>, %arg5: memref<1x768xf32, #tpu.memory_space<vmem>>, %arg6: memref<768x768xbf16, #tpu.memory_space<vmem>>, %arg7: memref<1x768xf32, #tpu.memory_space<vmem>>, %arg8: memref<384x768xf32, #tpu.memory_space<vmem>>, %arg9: memref<384x768xbf16, #tpu.memory_space<vmem>>) attributes {dimension_semantics = [#tpu.dimension_semantics<parallel>, #tpu.dimension_semantics<arbitrary>], iteration_bounds = array<i64: 1, 4>, scalar_prefetch = 0 : i64, scratch_operands = 1 : i64, tpu.core_type = #tpu.core_type<tc>, window_params = [{transform_indices = @transform_0, window_bounds = array<i64: 384, 768>}, {transform_indices = @transform_1, window_bounds = array<i64: 384, 768>}, {pipeline_mode = #tpu.pipeline_mode<synchronous>, transform_indices = @transform_2, window_bounds = array<i64: 1, 768>}, {pipeline_mode = #tpu.pipeline_mode<synchronous>, transform_indices = @transform_3, window_bounds = array<i64: 1, 768>}, {transform_indices = @transform_4, window_bounds = array<i64: 768, 768>}, {transform_indices = @transform_5, window_bounds = array<i64: 1, 768>}, {transform_indices = @transform_6, window_bounds = array<i64: 384, 768>}]} {
    %c0_i32 = arith.constant 0 : i32
    %0 = arith.cmpi eq, %arg1, %c0_i32 : i32
    %1 = arith.extui %0 : i1 to i32
    %c0_i32_0 = arith.constant 0 : i32
    %2 = arith.cmpi ne, %1, %c0_i32_0 : i32
    scf.if %2 {
      %c0_8 = arith.constant 0 : index
      %c0_9 = arith.constant 0 : index
      %10 = vector.load %arg2[%c0_8, %c0_9] : memref<384x768xf32, #tpu.memory_space<vmem>>, vector<384x768xf32>
      %c0_10 = arith.constant 0 : index
      %c0_11 = arith.constant 0 : index
      %11 = vector.load %arg3[%c0_10, %c0_11] : memref<384x768xf32, #tpu.memory_space<vmem>>, vector<384x768xf32>
      %12 = arith.addf %10, %11 : vector<384x768xf32>
      %cst_12 = arith.constant dense<0.000000e+00> : vector<384xf32>
      %13 = vector.multi_reduction <add>, %12, %cst_12 [1] : vector<384x768xf32> to vector<384xf32>
      %14 = vector.shape_cast %13 : vector<384xf32> to vector<384x1xf32>
      %cst_13 = arith.constant 7.680000e+02 : f32
      %15 = vector.broadcast %cst_13 : f32 to vector<384x1xf32>
      %16 = arith.divf %14, %15 : vector<384x1xf32>
      %17 = vector.broadcast %16 : vector<384x1xf32> to vector<384x768xf32>
      %18 = arith.subf %12, %17 : vector<384x768xf32>
      %19 = arith.mulf %18, %18 : vector<384x768xf32>
      %cst_14 = arith.constant dense<0.000000e+00> : vector<384xf32>
      %20 = vector.multi_reduction <add>, %19, %cst_14 [1] : vector<384x768xf32> to vector<384xf32>
      %21 = vector.shape_cast %20 : vector<384xf32> to vector<384x1xf32>
      %cst_15 = arith.constant 7.680000e+02 : f32
      %22 = vector.broadcast %cst_15 : f32 to vector<384x1xf32>
      %23 = arith.divf %21, %22 : vector<384x1xf32>
      %cst_16 = arith.constant 9.99999996E-13 : f32
      %24 = vector.broadcast %cst_16 : f32 to vector<384x1xf32>
      %25 = arith.addf %23, %24 : vector<384x1xf32>
      %26 = math.rsqrt %25 : vector<384x1xf32>
      %27 = vector.broadcast %26 : vector<384x1xf32> to vector<384x768xf32>
      %28 = arith.mulf %18, %27 : vector<384x768xf32>
      %c0_17 = arith.constant 0 : index
      %c0_18 = arith.constant 0 : index
      %29 = vector.load %arg4[%c0_17, %c0_18] : memref<1x768xf32, #tpu.memory_space<vmem>>, vector<1x768xf32>
      %30 = vector.broadcast %29 : vector<1x768xf32> to vector<384x768xf32>
      %31 = arith.mulf %28, %30 : vector<384x768xf32>
      %c0_19 = arith.constant 0 : index
      %c0_20 = arith.constant 0 : index
      %32 = vector.load %arg5[%c0_19, %c0_20] : memref<1x768xf32, #tpu.memory_space<vmem>>, vector<1x768xf32>
      %33 = vector.broadcast %32 : vector<1x768xf32> to vector<384x768xf32>
      %34 = arith.addf %31, %33 : vector<384x768xf32>
      %35 = arith.truncf %34 : vector<384x768xf32> to vector<384x768xbf16>
      %c0_21 = arith.constant 0 : index
      %c0_22 = arith.constant 0 : index
      %36 = vector.load %arg9[%c0_21, %c0_22] : memref<384x768xbf16, #tpu.memory_space<vmem>>, vector<384x768xbf16>
      tpu.vector_store %arg9[%c0_21, %c0_22], %35 {strides = array<i32>} : memref<384x768xbf16, #tpu.memory_space<vmem>>, vector<384x768xbf16>,
    } else {
    }
    %c0 = arith.constant 0 : index
    %c0_1 = arith.constant 0 : index
    %3 = vector.load %arg9[%c0, %c0_1] : memref<384x768xbf16, #tpu.memory_space<vmem>>, vector<384x768xbf16>
    %c0_2 = arith.constant 0 : index
    %c0_3 = arith.constant 0 : index
    %4 = vector.load %arg6[%c0_2, %c0_3] : memref<768x768xbf16, #tpu.memory_space<vmem>>, vector<768x768xbf16>
    %cst = arith.constant dense<0.000000e+00> : vector<384x768xf32>
    %5 = tpu.matmul %3, %4, %cst {dimension_numbers = #tpu.dot_dimension_numbers<[1], [0], [0], [1], [0, 0, 1, 1], [], []>} : vector<384x768xbf16>, vector<768x768xbf16>, vector<384x768xf32> -> vector<384x768xf32>
    %c0_4 = arith.constant 0 : index
    %c0_5 = arith.constant 0 : index
    %6 = vector.load %arg7[%c0_4, %c0_5] : memref<1x768xf32, #tpu.memory_space<vmem>>, vector<1x768xf32>
    %7 = vector.broadcast %6 : vector<1x768xf32> to vector<384x768xf32>
    %8 = arith.addf %5, %7 : vector<384x768xf32>
    %c0_6 = arith.constant 0 : index
    %c0_7 = arith.constant 0 : index
    %9 = vector.load %arg8[%c0_6, %c0_7] : memref<384x768xf32, #tpu.memory_space<vmem>>, vector<384x768xf32>
    tpu.vector_store %arg8[%c0_6, %c0_7], %8 {strides = array<i32>} : memref<384x768xf32, #tpu.memory_space<vmem>>, vector<384x768xf32>,
    return
  }
  func.func @transform_0(%arg0: i32, %arg1: i32) -> (i32, i32) {
    %c0_i32 = arith.constant 0 : i32
    %c0_i32_0 = arith.constant 0 : i32
    return %arg0, %c0_i32 : i32, i32
  }
  func.func @transform_1(%arg0: i32, %arg1: i32) -> (i32, i32) {
    %c0_i32 = arith.constant 0 : i32
    %c0_i32_0 = arith.constant 0 : i32
    return %arg0, %c0_i32 : i32, i32
  }
  func.func @transform_2(%arg0: i32, %arg1: i32) -> (i32, i32) {
    %c0_i32 = arith.constant 0 : i32
    %c0_i32_0 = arith.constant 0 : i32
    %c0_i32_1 = arith.constant 0 : i32
    return %c0_i32, %c0_i32_0 : i32, i32
  }
  func.func @transform_3(%arg0: i32, %arg1: i32) -> (i32, i32) {
    %c0_i32 = arith.constant 0 : i32
    %c0_i32_0 = arith.constant 0 : i32
    %c0_i32_1 = arith.constant 0 : i32
    return %c0_i32, %c0_i32_0 : i32, i32
  }
  func.func @transform_4(%arg0: i32, %arg1: i32) -> (i32, i32) {
    %c0_i32 = arith.constant 0 : i32
    %c0_i32_0 = arith.constant 0 : i32
    return %c0_i32, %arg1 : i32, i32
  }
  func.func @transform_5(%arg0: i32, %arg1: i32) -> (i32, i32) {
    %c0_i32 = arith.constant 0 : i32
    %c0_i32_0 = arith.constant 0 : i32
    return %c0_i32, %arg1 : i32, i32
  }
  func.func @transform_6(%arg0: i32, %arg1: i32) -> (i32, i32) {
    %c0_i32 = arith.constant 0 : i32
    return %arg0, %arg1 : i32, i32
  }
}

</mosaic_0001>

<bundles_post_ra>
// kernel: tpu_custom_call.1
= control target key start
LH: loop header
LB: loop body
LE: loop exit
PB: predicated region body
PF: predicated region fallthrough
CT: control target
= control target key end

     0   :  { %s16563_s0 = inlined_call_operand.hbm [shape: f32[384,768], index: 0, kind: input, shape index: {}]   ;;  %s16564_s1 = inlined_call_operand.hbm [shape: f32[384,768], index: 1, kind: input, shape index: {}]   ;;  %s16565_s2 = inlined_call_operand.hbm [shape: f32[1,768], index: 2, kind: input, shape index: {}]   ;;  %s16566_s3 = inlined_call_operand.hbm [shape: f32[1,768], index: 3, kind: input, shape index: {}]   ;;  %s16567_s4 = inlined_call_operand.hbm [shape: bf16[768,3072], index: 4, kind: input, shape index: {}]   ;;  %s16568_s5 = inlined_call_operand.hbm [shape: f32[1,3072], index: 5, kind: input, shape index: {}]   ;;  %s16569_s6 = inlined_call_operand.hbm [shape: f32[384,3072], index: 6, kind: output, shape index: {}]  }
   0x1   :  { %17102 = sst [smem:[#allocation301_spill]] %s16563_s0 }
   0x2   :  { %17103 = sst [smem:[#allocation302_spill]] %s16564_s1 }
   0x3   :  { %17104 = sst [smem:[#allocation303_spill]] %s16567_s4 }
   0x4   :  { %11 = vsyncpa [#allocation4], 0 }
   0x5   :  { %12 = vsyncpa [#allocation7], 0 }
   0x6   :  { %13 = vsyncpa [#allocation10], 0 }
   0x7   :  { %14 = vsyncpa [#allocation5], 0 }
   0x8   :  { %16 = vsyncpa [#allocation5 + $0x1], 0  ;;  %s11049_s21 = smov 0   ;;  %s11051_s22 = smov 0  }
   0x9   :  { %s11053_s23 = smov 0   ;;  %s11055_s24 = smov 0  }
   0xa   :  { %s11057_s25 = smov 0   ;;  %s11059_s26 = smov 0  }
   0xb LB: > { %17105 = sst [smem:[#allocation19_spill]] %s10977_s21  ;;  %s11080_s27 = sadd.s32 4294967295, %s10997_s26   ;;  %s10997_s26 = sphi %s11059_s26, %s22_s26   ;;  %s10993_s25 = sphi %s11057_s25, %s18187_s25   ;;  %s10989_s24 = sphi %s11055_s24, %s18186_s24   ;;  %s10985_s23 = sphi %s11053_s23, %s18185_s23   ;;  %s10981_s22 = sphi %s11051_s22, %s18184_s22   ;;  %s10977_s21 = sphi %s11049_s21, %s18183_s21  }
   0xc   : > { %s8733_s28 = sadd.s32 4294967294, %s10997_s26   ;;  %p142_p0 = scmp.ne.s32.totalorder %s10985_s23, %s10981_s22 }
   0xd   : > { %p143_p1 = scmp.eq.s32.totalorder %s10997_s26, 0  ;;  %p148_p2 = scmp.ne.s32.totalorder %s10981_s22, %s10977_s21 }
   0xe   : > { %p16570_p3 = scmp.eq.s32.totalorder %s11080_s27, 0  ;;  %p200_p4 = scmp.eq.s32.totalorder %s11080_s27, 3 }
   0xf   : > { %p11091_p5 = por %p143_p1, %p142_p0  ;;  %p206_p6 = scmp.eq.s32.totalorder %s8733_s28, 3 }
  0x10   : > { %p11097_p7 = por %p16570_p3, %p148_p2  ;;  %p11101_p8 = por %p200_p4, %p142_p0 }
  0x11   : > { %p11105_p9 = por %p206_p6, %p148_p2  ;;  %p8734_p10 = scmp.ge.s32.totalorder %s10997_s26, 1 }
  0x12   : > { %s17107_s7 = scalar_select %p11097_p7, 1, 0 }
  0x13   : > { %s17108_s8 = scalar_select %p11101_p8, 1, 0 }
  0x14   : > { %s17110_s9 = scalar_select %p11105_p9, 1, 0 }
  0x15   : > { %17109 = sst [smem:[#allocation20_spill]] %s17108_s8  ;;  %p213_p11 = scmp.lt.s32.totalorder %s10997_s26, 5 }
  0x16   : > { %17111 = sst [smem:[#allocation21_spill]] %s17110_s9  ;;  %s10999_s11 = smov [#allocation3]  }
  0x17   : > { %p11111_p12 = pnand %p8734_p10, %p213_p11  ;;  %s229_s12 = sshll.u32 %s10999_s11, 4  ;;  %s11115_s12 = int_to_ptr.vmem [resolvable:$true] %s229_s12 }
  0x18   : > { %p9992_p0 = scmp.lt.s32.totalorder %s10997_s26, 4  ;;  %s11000_s14 = smov [#allocation6]  }
  0x19   : > { %s17112_s10 = scalar_select %p11111_p12, 1, 0 }
  0x1a   : > { %p9964_p13 = pneg %p11111_p12  ;;  %s246_s15 = sshll.u32 %s11000_s14, 4  ;;  %s11132_s15 = int_to_ptr.vmem [resolvable:$true] %s246_s15 }
  0x1b   : > { %p11128_p2 = pnand %p9992_p0, %p11091_p5  ;;  %s17115_s0 = sld [smem:[#allocation301_spill]] }
  0x1c   : > { %p11122_p1 = pnand %p9964_p13, %p16570_p3 }
  0x1e   : > { %s17113_s13 = scalar_select %p11122_p1, 1, 0 }
  0x1f   : > { %p11142_p6 = pneg %p11122_p1 }
  0x21   : > { %s10731_s19 = scalar_lea.hbm %s17115_s0, 36864 }
  0x22   : > { %p10732_p4 = scmp.ne.s32.totalorder %s17115_s0, %s10731_s19  ;;  %p10738_p11 = scmp.lt.u32.totalorder %s10731_s19, %s17115_s0 }
  0x24   : > { %p10734_p5 = pnand %p11142_p6, %p10732_p4 }
  0x26   : > { %p10735_p10 = pneg %p10734_p5 }
  0x28   : > { %p10740_p13 = pnand %p10738_p11, %p10735_p10 }
  0x2a   : > { %10743 = shalt.err (!%p10740_p13)
}
  0x2b   : > { %s10744_s17 = scalar_lea.vmem %s11115_s12, 36864  ;;  %p10752_p8 = scmp.lt.s32.totalorder %s11115_s12, %s11115_s12 }
  0x2c   : > { %p10745_p0 = scmp.ne.s32.totalorder %s11115_s12, %s10744_s17  ;;  %p10753_p7 = scmp.lt.s32.totalorder %s10744_s17, %s10744_s17 }
  0x2e   : > { %p10747_p3 = pnand %p10745_p0, %p11142_p6  ;;  %p10754_p4 = por %p10753_p7, %p10752_p8 }
  0x30   : > { %p10748_p9 = pneg %p10747_p3 }
  0x32   : > { %p10755_p5 = pnand %p10754_p4, %p10748_p9 }
  0x34   : > { %10758 = shalt.err (!%p10755_p5)
}
  0x35   : > { %s11001_s18 = smov 768   ;;  %s11002_s19 = smov 48  }
  0x36   : > { %9967 = dma.hbm_to_vmem [thread:$0]  (!%p11122_p1), %s17115_s0, 36864, %s11115_s12, [#allocation4], %s11001_s18, %s11001_s18, %s11002_s19  }
  0x37   : > { %s17117_s1 = sld [smem:[#allocation302_spill]] }
  0x3d   : > { %s10759_s29 = scalar_lea.hbm %s17117_s1, 36864 }
  0x3e   : > { %p10760_p3 = scmp.ne.s32.totalorder %s17117_s1, %s10759_s29  ;;  %p10766_p9 = scmp.lt.u32.totalorder %s10759_s29, %s17117_s1 }
  0x40   : > { %p10762_p7 = pnand %p10760_p3, %p11142_p6 }
  0x42   : > { %p10763_p8 = pneg %p10762_p7 }
  0x44   : > { %p10768_p10 = pnand %p10766_p9, %p10763_p8 }
  0x46   : > { %10771 = shalt.err (!%p10768_p10)
}
  0x47   : > { %s10772_s12 = scalar_lea.vmem %s11132_s15, 36864  ;;  %p10780_p4 = scmp.lt.s32.totalorder %s11132_s15, %s11132_s15 }
  0x48   : > { %p10773_p11 = scmp.ne.s32.totalorder %s11132_s15, %s10772_s12  ;;  %p10781_p5 = scmp.lt.s32.totalorder %s10772_s12, %s10772_s12 }
  0x4a   : > { %p10775_p13 = pnand %p10773_p11, %p11142_p6  ;;  %p10782_p3 = por %p10781_p5, %p10780_p4 }
  0x4c   : > { %p10776_p0 = pneg %p10775_p13 }
  0x4e   : > { %p10783_p7 = pnand %p10782_p3, %p10776_p0 }
  0x50   : > { %10786 = shalt.err (!%p10783_p7)
}
  0x51   : > { %9970 = dma.hbm_to_vmem [thread:$0]  (!%p11122_p1), %s17117_s1, 36864, %s11132_s15, [#allocation7], %s11001_s18, %s11001_s18, %s11002_s19  }
  0x52   : > { %s31_s8 = sadd.s32 1, %s10993_s25  ;;  %s282_s9 = sand.u32 1, %s10997_s26  }
  0x53   : > { %p32_p8 = scmp.ge.s32.totalorder %s31_s8, 4  ;;  %s16577_s20 = sand.u32 1, %s10985_s23  }
  0x54   : > { %s9039_s28 = smul.u32 384, %s10993_s25  ;;  %s17119_s4 = sld [smem:[#allocation303_spill]] }
  0x55   : > { %s18189_s8 = smov (%p32_p8, %s31_s8), 0  ;;  %s9938_s30 = smul.u32 2304, %s16577_s20 }
  0x56   : > { %17118 = sst [smem:[#allocation22_spill]] %s18189_s8  ;;  %s132_s15 = ssub.s32 %s10993_s25, %s18189_s8 }
  0x57   : > { %p133_p9 = scmp.eq.s32.totalorder %s132_s15, 0  ;;  %s286_s18 = scalar_lea.vmem [#allocation11], %s9938_s30 }
  0x58   : > { %s293_s19 = sshll.u32 %s286_s18, 4  ;;  %s17120_s21 = sadd.s32 1, %s10985_s23  ;;  %s11206_s19 = int_to_ptr.vmem [resolvable:$true] %s293_s19 }
  0x59   : > { %s11204_s29 = scalar_select %p133_p9, %s10985_s23, %s17120_s21  }
  0x5a   : > { %s11197_s12 = scalar_lea.hbm %s17119_s4, %s9039_s28  ;;  %s11208_s0 = scalar_lea.sflag [#allocation4], %s282_s9 }
  0x5b   : > { %17121 = sst [smem:[#allocation23_spill]] %s11204_s29  ;;  %s10787_s20 = scalar_lea.hbm %s11197_s12, 36864 }
  0x5c   : > { %p10788_p10 = scmp.ne.s32.totalorder %s11197_s12, %s10787_s20  ;;  %p16582_p11 = pneg %p11128_p2 }
  0x5d   : > { %s10792_s30 = scalar_lea.hbm %s17119_s4, 147456  ;;  %p10793_p4 = scmp.lt.u32.totalorder %s11197_s12, %s17119_s4 }
  0x5e   : > { %p10790_p13 = pnand %p16582_p11, %p10788_p10  ;;  %p10794_p5 = scmp.lt.u32.totalorder %s10792_s30, %s10787_s20 }
  0x5f   : > { %p10796_p7 = scmp.lt.u32.totalorder %s10787_s20, %s11197_s12 }
  0x60   : > { %p10791_p0 = pneg %p10790_p13  ;;  %p10795_p3 = por %p10794_p5, %p10793_p4 }
  0x62   : > { %p10797_p8 = por %p10796_p7, %p10795_p3 }
  0x64   : > { %p10798_p9 = pnand %p10797_p8, %p10791_p0 }
  0x66   : > { %10801 = shalt.err (!%p10798_p9)
}
  0x67   : > { %s10802_s9 = scalar_lea.vmem %s11206_s19, 36864  ;;  %s11003_s18 = smov [#allocation11]  }
  0x68   : > { %p10803_p10 = scmp.ne.s32.totalorder %s11206_s19, %s10802_s9  ;;  %s10807_s21 = sshll.u32 %s11003_s18, 4  ;;  %s10808_s21 = int_to_ptr.vmem [resolvable:$false] %s10807_s21 }
  0x69   : > { %s10809_s28 = scalar_lea.vmem %s10808_s21, 73728  ;;  %p10810_p1 = scmp.lt.s32.totalorder %s11206_s19, %s10808_s21 }
  0x6a   : > { %p10805_p13 = pnand %p10803_p10, %p16582_p11  ;;  %p10811_p4 = scmp.lt.s32.totalorder %s10809_s28, %s10802_s9 }
  0x6c   : > { %p10806_p12 = pneg %p10805_p13  ;;  %p10812_p5 = por %p10811_p4, %p10810_p1 }
  0x6e   : > { %p10813_p3 = pnand %p10812_p5, %p10806_p12 }
  0x70   : > { %10816 = shalt.err (!%p10813_p3)
}
  0x71   : > { %s11004_s20 = smov 1536   ;;  %s11005_s14 = smov 384  }
  0x72   : > { %s11006_s30 = smov 24   ;;  %s11007_s17 = smov [#allocation8]  }
  0x73   : > { %9980 = dma.hbm_to_vmem [thread:$0]  (!%p11128_p2), %s11197_s12, 36864, %s11206_s19, %s11208_s0, %s11004_s20, %s11005_s14, %s11006_s30  }
  0x74   : > { %s260_s15 = sshll.u32 %s11007_s17, 4  ;;  %s11008_s18 = smov [#allocation9]   ;;  %s261_s15 = int_to_ptr.vmem [resolvable:$true] %s260_s15 }
  0x75   : > { %s271_s1 = sshll.u32 %s11008_s18, 4  ;;  %s10817_s28 = scalar_lea.hbm %s16565_s2, 96  ;;  %s11236_s1 = int_to_ptr.vmem [resolvable:$true] %s271_s1 }
  0x76   : > { %p10818_p12 = scmp.ne.s32.totalorder %s16565_s2, %s10817_s28  ;;  %p10824_p7 = scmp.lt.u32.totalorder %s10817_s28, %s16565_s2 }
  0x78   : > { %p10820_p1 = pnand %p10818_p12, %p11142_p6 }
  0x7a   : > { %p10821_p0 = pneg %p10820_p1 }
  0x7c   : > { %p10826_p8 = pnand %p10824_p7, %p10821_p0 }
  0x7e   : > { %10829 = shalt.err (!%p10826_p8)
}
  0x7f   : > { %s10830_s19 = scalar_lea.vmem %s261_s15, 96  ;;  %p10838_p4 = scmp.lt.s32.totalorder %s261_s15, %s261_s15 }
  0x80   : > { %p10831_p9 = scmp.ne.s32.totalorder %s261_s15, %s10830_s19  ;;  %p10839_p5 = scmp.lt.s32.totalorder %s10830_s19, %s10830_s19 }
  0x82   : > { %p10833_p10 = pnand %p10831_p9, %p11142_p6  ;;  %p10840_p3 = por %p10839_p5, %p10838_p4 }
  0x84   : > { %p10834_p13 = pneg %p10833_p10 }
  0x86   : > { %p10841_p11 = pnand %p10840_p3, %p10834_p13 }
  0x88   : > { %10844 = shalt.err (!%p10841_p11)
}
  0x89   : > { %p17122_p12 = scmp.ne.s32.totalorder %s17113_s13, 0  ;;  %s10845_s14 = scalar_lea.hbm %s16566_s3, 96 }
  0x8a   : > { %p10846_p1 = scmp.ne.s32.totalorder %s16566_s3, %s10845_s14  ;;  %p10852_p11 = scmp.lt.u32.totalorder %s10845_s14, %s16566_s3 }
  0x8b   : > { %9973 = dma.hbm_to_vmem [thread:$0]  (!%p17122_p12), %s16565_s2, 96, %s261_s15, [#allocation7]  }
  0x8c   : > { %p10848_p0 = pnand %p10846_p1, %p11142_p6 }
  0x8e   : > { %p10849_p7 = pneg %p10848_p0 }
  0x90   : > { %p10854_p8 = pnand %p10852_p11, %p10849_p7 }
  0x92   : > { %10857 = shalt.err (!%p10854_p8)
}
  0x93   : > { %s10858_s15 = scalar_lea.vmem %s11236_s1, 96  ;;  %p10866_p4 = scmp.lt.s32.totalorder %s11236_s1, %s11236_s1 }
  0x94   : > { %p10859_p9 = scmp.ne.s32.totalorder %s11236_s1, %s10858_s15  ;;  %p10867_p5 = scmp.lt.s32.totalorder %s10858_s15, %s10858_s15 }
  0x96   : > { %p10861_p10 = pnand %p10859_p9, %p11142_p6  ;;  %p10868_p3 = por %p10867_p5, %p10866_p4 }
  0x98   : > { %p10862_p13 = pneg %p10861_p10 }
  0x9a   : > { %p10869_p1 = pnand %p10868_p3, %p10862_p13 }
  0x9c   : > { %10872 = shalt.err (!%p10869_p1)
}
  0x9d   : > { %9976 = dma.hbm_to_vmem [thread:$0]  (!%p17122_p12), %s16566_s3, 96, %s11236_s1, [#allocation10]  }
  0x9e   : > { %s17123_s12 = sand.u32 1, %s10985_s23   ;;  %s9040_s19 = smul.u32 96, %s10993_s25 }
  0x9f   : > { %s9939_s11 = smul.u32 6, %s17123_s12  ;;  %p17124_p0 = pneg %p11128_p2 }
  0xa0   : > { %s11285_s29 = scalar_lea.hbm %s16568_s5, %s9040_s19  ;;  %s10878_s17 = scalar_lea.hbm %s16568_s5, 384 }
  0xa1   : > { %s307_s13 = scalar_lea.vmem [#allocation12], %s9939_s11  ;;  %s10873_s14 = scalar_lea.hbm %s11285_s29, 96 }
  0xa2   : > { %s315_s20 = sshll.u32 %s307_s13, 4  ;;  %p10874_p6 = scmp.ne.s32.totalorder %s11285_s29, %s10873_s14  ;;  %s316_s20 = int_to_ptr.vmem [resolvable:$true] %s315_s20 }
  0xa3   : > { %p10879_p11 = scmp.lt.u32.totalorder %s11285_s29, %s16568_s5  ;;  %p10880_p8 = scmp.lt.u32.totalorder %s10878_s17, %s10873_s14 }
  0xa4   : > { %p10876_p12 = pnand %p10874_p6, %p17124_p0  ;;  %p10882_p10 = scmp.lt.u32.totalorder %s10873_s14, %s11285_s29 }
  0xa5   : > { %p10881_p9 = por %p10880_p8, %p10879_p11 }
  0xa6   : > { %p10877_p7 = pneg %p10876_p12 }
  0xa7   : > { %p10883_p13 = por %p10882_p10, %p10881_p9 }
  0xa9   : > { %p10884_p4 = pnand %p10883_p13, %p10877_p7 }
  0xab   : > { %10887 = shalt.err (!%p10884_p4)
}
  0xac   : > { %s10888_s15 = scalar_lea.vmem %s316_s20, 96  ;;  %p17125_p3 = pmov %p17124_p0 }
  0xad   : > { %p10889_p5 = scmp.ne.s32.totalorder %s316_s20, %s10888_s15  ;;  %s11009_s21 = smov [#allocation12]  }
  0xae   : > { %s10893_s28 = sshll.u32 %s11009_s21, 4  ;;  %s10894_s28 = int_to_ptr.vmem [resolvable:$false] %s10893_s28 }
  0xaf   : > { %p10891_p1 = pnand %p10889_p5, %p17125_p3  ;;  %s10895_s12 = scalar_lea.vmem %s10894_s28, 192 }
  0xb0   : > { %p10896_p0 = scmp.lt.s32.totalorder %s316_s20, %s10894_s28  ;;  %p10897_p12 = scmp.lt.s32.totalorder %s10895_s12, %s10888_s15 }
  0xb1   : > { %p10892_p6 = pneg %p10891_p1 }
  0xb2   : > { %p10898_p8 = por %p10897_p12, %p10896_p0 }
  0xb4   : > { %p10899_p11 = pnand %p10898_p8, %p10892_p6 }
  0xb6   : > { %10902 = shalt.err (!%p10899_p11)
}
  0xb7   : > { %9983 = dma.hbm_to_vmem [thread:$0]  (!%p11128_p2), %s11285_s29, 96, %s316_s20, %s11208_s0  }
  0xb8   : > { %p17126_p7 = scmp.ne.s32.totalorder %s17112_s10, 0 }
  0xba   : > { %324 = sbr.rel (%p17126_p7) target bundleno = 2125 (0x84d), region = 44 }
  0xc1   : > { %p17127_p9 = scmp.eq.s32.totalorder %s11080_s27, 0 }
  0xc3   : > { %10956 = dma.done.wait (%p17127_p9), [#allocation4], 36864   ;;  %p17128_p10 = pmov %p17127_p9 }
  0xc4   : > { %p17129_p13 = pmov %p17127_p9 }
  0xc5   : > { %10958 = vsyncadd (%p17128_p10), [#allocation4], 4294930432 }
  0xc6   : > { %10960 = dma.done.wait (%p17129_p13), [#allocation7], 36960   ;;  %p17130_p4 = pmov %p17127_p9 }
  0xc8   : > { %10962 = vsyncadd (%p17130_p4), [#allocation7], 4294930336  ;;  %p17131_p5 = pmov %p17130_p4 }
  0xc9   : > { %p17132_p2 = pmov %p17130_p4 }
  0xca   : > { %10964 = dma.done.wait (%p17131_p5), [#allocation10], 96  }
  0xcb   : > { %10966 = vsyncadd (%p17132_p2), [#allocation10], 4294967200  ;;  %s342_s0 = sand.u32 1, %s11080_s27   ;;  %s11323_s10 = sand.u32 1, %s10981_s22  }
  0xcc   : > { %s9940_s16 = smul.u32 2304, %s11323_s10  ;;  %s343_s11 = scalar_lea.sflag [#allocation4], %s342_s0 }
  0xcd   : > { %p17133_p3 = scmp.ne.s32.totalorder %s17107_s7, 0 }
  0xce   : > { %s11326_s19 = scalar_lea.vmem [#allocation11], %s9940_s16 }
  0xcf   : > { %10968 = dma.done.wait (%p17133_p3), %s343_s11, 36960  }
  0xd0   : > { %10970 = vsyncadd (%p17133_p3), %s343_s11, 4294930336  ;;  %s9941_s4 = smul.u32 6, %s11323_s10  ;;  %s11335_s29 = scalar_lea.vmem [#allocation13], %s9940_s16 }
  0xd1   : > { %p8747_p1 = scmp.ne.s32.totalorder %s10989_s24, 0 }
  0xd2   : > { %s11333_s8 = scalar_lea.vmem [#allocation12], %s9941_s4 }
  0xd3   : > { %398 = sbr.rel (%p8747_p1) target bundleno = 970 (0x3ca), region = 72 }
  0xda   : > { %v411_v0 = vld [vmem:[#allocation3 + $0x60] sm:$0xff]  ;;  %v412_v1 = vld [vmem:[#allocation3 + $0x68] sm:$0xff]  ;;  %v413_v2 = vld [vmem:[#allocation3 + $0x70] sm:$0xff] }
  0xdb   : > { %v414_v3 = vld [vmem:[#allocation3 + $0x78] sm:$0xff]  ;;  %v699_v4 = vld [vmem:[#allocation6 + $0x60] sm:$0xff]  ;;  %v700_v5 = vld [vmem:[#allocation6 + $0x68] sm:$0xff] }
  0xdc   : > { %v701_v6 = vld [vmem:[#allocation6 + $0x70] sm:$0xff]  ;;  %v415_v7 = vld [vmem:[#allocation3 + $0x80] sm:$0xff]  ;;  %v702_v8 = vld [vmem:[#allocation6 + $0x78] sm:$0xff]  ;;  %v11338_v10 = vadd.f32 %v699_v4, %v411_v0  ;;  %v11340_v11 = vadd.f32 %v700_v5, %v412_v1 }
  0xdd   : > { %v703_v9 = vld [vmem:[#allocation6 + $0x80] sm:$0xff]  ;;  %v11342_v12 = vadd.f32 %v701_v6, %v413_v2  ;;  %v416_v13 = vld [vmem:[#allocation3 + $0x88] sm:$0xff]  ;;  %v401_v16 = vld [vmem:[#allocation3 + $0x10] sm:$0xff]  ;;  %v11344_v18 = vadd.f32 %v702_v8, %v414_v3 }
  0xde   : > { %v399_v14 = vld [vmem:[#allocation3] sm:$0xff]  ;;  %v400_v15 = vld [vmem:[#allocation3 + $0x8] sm:$0xff]  ;;  %v1277_v19 = vadd.f32 %v11340_v11, %v11338_v10  ;;  %v402_v20 = vld [vmem:[#allocation3 + $0x18] sm:$0xff]  ;;  %v11348_v22 = vadd.f32 %v703_v9, %v415_v7 }
  0xdf   : > { %v704_v17 = vld [vmem:[#allocation6 + $0x88] sm:$0xff]  ;;  %v403_v21 = vld [vmem:[#allocation3 + $0x20] sm:$0xff]  ;;  %v689_v25 = vld [vmem:[#allocation6 + $0x10] sm:$0xff] }
  0xe0   : > { %v687_v23 = vld [vmem:[#allocation6] sm:$0xff]  ;;  %v688_v24 = vld [vmem:[#allocation6 + $0x8] sm:$0xff]  ;;  %v1278_v26 = vadd.f32 %v1277_v19, %v11342_v12  ;;  %v690_v28 = vld [vmem:[#allocation6 + $0x18] sm:$0xff]  ;;  %v11355_v32 = vadd.f32 %v689_v25, %v401_v16  ;;  %v11357_v36 = vadd.f32 %v704_v17, %v416_v13 }
  0xe1   : > { %v404_v27 = vld [vmem:[#allocation3 + $0x28] sm:$0xff]  ;;  %v691_v29 = vld [vmem:[#allocation6 + $0x20] sm:$0xff]  ;;  %v11351_v30 = vadd.f32 %v687_v23, %v399_v14  ;;  %v11353_v31 = vadd.f32 %v688_v24, %v400_v15  ;;  %v417_v34 = vld [vmem:[#allocation3 + $0x90] sm:$0xff]  ;;  %v11360_v38 = vadd.f32 %v690_v28, %v402_v20 }
  0xe2   : > { %v692_v33 = vld [vmem:[#allocation6 + $0x28] sm:$0xff]  ;;  %v418_v35 = vld [vmem:[#allocation3 + $0x98] sm:$0xff]  ;;  %v1279_v37 = vadd.f32 %v1278_v26, %v11344_v18  ;;  %v419_v40 = vld [vmem:[#allocation3 + $0xa0] sm:$0xff]  ;;  %v11364_v43 = vadd.f32 %v691_v29, %v403_v21 }
  0xe3   : > { %v1263_v39 = vadd.f32 %v11353_v31, %v11351_v30  ;;  %v420_v41 = vld [vmem:[#allocation3 + $0xa8] sm:$0xff]  ;;  %v421_v42 = vld [vmem:[#allocation3 + $0xb0] sm:$0xff]  ;;  %v706_v45 = vld [vmem:[#allocation6 + $0x98] sm:$0xff]  ;;  %v11372_v54 = vadd.f32 %v692_v33, %v404_v27 }
  0xe4   : > { %v705_v44 = vld [vmem:[#allocation6 + $0x90] sm:$0xff]  ;;  %v707_v46 = vld [vmem:[#allocation6 + $0xa0] sm:$0xff]  ;;  %v1280_v47 = vadd.f32 %v1279_v37, %v11348_v22  ;;  %v422_v49 = vld [vmem:[#allocation3 + $0xb8] sm:$0xff]  ;;  %v11370_v53 = vadd.f32 %v706_v45, %v418_v35 }
  0xe5   : > { %v1264_v48 = vadd.f32 %v1263_v39, %v11355_v32  ;;  %v708_v50 = vld [vmem:[#allocation6 + $0xa8] sm:$0xff]  ;;  %v709_v51 = vld [vmem:[#allocation6 + $0xb0] sm:$0xff]  ;;  %v11368_v52 = vadd.f32 %v705_v44, %v417_v34  ;;  %v710_v55 = vld [vmem:[#allocation6 + $0xb8] sm:$0xff]  ;;  %v11374_v56 = vadd.f32 %v707_v46, %v419_v40 }
  0xe6   : > { %v405_v57 = vld [vmem:[#allocation3 + $0x30] sm:$0xff]  ;;  %v406_v58 = vld [vmem:[#allocation3 + $0x38] sm:$0xff]  ;;  %v1281_v59 = vadd.f32 %v1280_v47, %v11357_v36  ;;  %v11378_v61 = vadd.f32 %v708_v50, %v420_v41  ;;  %v407_v63 = vld [vmem:[#allocation3 + $0x40] sm:$0xff]  ;;  %v11382_v2 = vadd.f32 %v709_v51, %v421_v42  ;;  %v11390_v16 = vadd.f32 %v710_v55, %v422_v49 }
  0xe7   : > { %v1265_v60 = vadd.f32 %v1264_v48, %v11360_v38  ;;  %v1284_v62 = vadd.f32 %v11370_v53, %v11368_v52  ;;  %v408_v0 = vld [vmem:[#allocation3 + $0x48] sm:$0xff]  ;;  %v409_v1 = vld [vmem:[#allocation3 + $0x50] sm:$0xff]  ;;  %v694_v4 = vld [vmem:[#allocation6 + $0x38] sm:$0xff] }
  0xe8   : > { %v693_v3 = vld [vmem:[#allocation6 + $0x30] sm:$0xff]  ;;  %v695_v5 = vld [vmem:[#allocation6 + $0x40] sm:$0xff]  ;;  %1282 = vadd.xlane.f32.xlu1 %v1281_v59  ;;  %v410_v8 = vld [vmem:[#allocation3 + $0x58] sm:$0xff]  ;;  %v11388_v15 = vadd.f32 %v694_v4, %v406_v58 }
  0xe9   : > { %v1266_v6 = vadd.f32 %v1265_v60, %v11364_v43  ;;  %v1285_v7 = vadd.f32 %v1284_v62, %v11374_v56  ;;  %v696_v9 = vld [vmem:[#allocation6 + $0x48] sm:$0xff]  ;;  %v697_v13 = vld [vmem:[#allocation6 + $0x50] sm:$0xff]  ;;  %v11386_v14 = vadd.f32 %v693_v3, %v405_v57  ;;  %v698_v17 = vld [vmem:[#allocation6 + $0x58] sm:$0xff]  ;;  %v11392_v19 = vadd.f32 %v695_v5, %v407_v63 }
  0xea   : > { %v429_v20 = vld [vmem:[#allocation3 + $0xf0] sm:$0xff]  ;;  %v430_v21 = vld [vmem:[#allocation3 + $0xf8] sm:$0xff]  ;;  %v11396_v25 = vadd.f32 %v696_v9, %v408_v0  ;;  %v431_v27 = vld [vmem:[#allocation3 + $0x100] sm:$0xff]  ;;  %v11400_v33 = vadd.f32 %v697_v13, %v409_v1  ;;  %v11408_v47 = vadd.f32 %v698_v17, %v410_v8 }
  0xeb   : > { %v1267_v23 = vadd.f32 %v1266_v6, %v11372_v54  ;;  %v1286_v24 = vadd.f32 %v1285_v7, %v11378_v61  ;;  %v1270_v26 = vadd.f32 %v11388_v15, %v11386_v14  ;;  %v432_v28 = vld [vmem:[#allocation3 + $0x108] sm:$0xff]  ;;  %v433_v29 = vld [vmem:[#allocation3 + $0x110] sm:$0xff]  ;;  %v718_v35 = vld [vmem:[#allocation6 + $0xf8] sm:$0xff] }
  0xec   : > { %v717_v34 = vld [vmem:[#allocation6 + $0xf0] sm:$0xff]  ;;  %v719_v37 = vld [vmem:[#allocation6 + $0x100] sm:$0xff]  ;;  %v434_v41 = vld [vmem:[#allocation3 + $0x118] sm:$0xff]  ;;  %v11406_v46 = vadd.f32 %v718_v35, %v430_v21 }
  0xed   : > { %1268 = vadd.xlane.f32.xlu0 %v1267_v23  ;;  %v1287_v39 = vadd.f32 %v1286_v24, %v11382_v2  ;;  %v1271_v40 = vadd.f32 %v1270_v26, %v11392_v19  ;;  %v720_v42 = vld [vmem:[#allocation6 + $0x108] sm:$0xff]  ;;  %v721_v44 = vld [vmem:[#allocation6 + $0x110] sm:$0xff]  ;;  %v11404_v45 = vadd.f32 %v717_v34, %v429_v20  ;;  %v722_v48 = vld [vmem:[#allocation6 + $0x118] sm:$0xff]  ;;  %v11410_v49 = vadd.f32 %v719_v37, %v431_v27 }
  0xee   : > { %17135 = vst [vmem:[#allocation25_spill] sm:$0xff] %v11406_v46  ;;  %v423_v50 = vld [vmem:[#allocation3 + $0xc0] sm:$0xff]  ;;  %v424_v51 = vld [vmem:[#allocation3 + $0xc8] sm:$0xff]  ;;  %v11414_v58 = vadd.f32 %v720_v42, %v432_v28  ;;  %v425_v60 = vld [vmem:[#allocation3 + $0xd0] sm:$0xff]  ;;  %v11418_v0 = vadd.f32 %v721_v44, %v433_v29  ;;  %v11426_v20 = vadd.f32 %v722_v48, %v434_v41 }
  0xef   : > { %17134 = vst [vmem:[#allocation24_spill] sm:$0xff] %v11404_v45  ;;  %17136 = vst [vmem:[#allocation26_spill] sm:$0xff] %v11410_v49  ;;  %v1288_v55 = vadd.f32 %v1287_v39, %v11390_v16  ;;  %v1272_v57 = vadd.f32 %v1271_v40, %v11396_v25  ;;  %v1298_v59 = vadd.f32 %v11406_v46, %v11404_v45  ;;  %v426_v62 = vld [vmem:[#allocation3 + $0xd8] sm:$0xff]  ;;  %v427_v63 = vld [vmem:[#allocation3 + $0xe0] sm:$0xff] }
  0xf0   : > { %17137 = vst [vmem:[#allocation27_spill] sm:$0xff] %v11414_v58  ;;  %17138 = vst [vmem:[#allocation28_spill] sm:$0xff] %v11418_v0  ;;  %v711_v1 = vld [vmem:[#allocation6 + $0xc0] sm:$0xff]  ;;  %v712_v3 = vld [vmem:[#allocation6 + $0xc8] sm:$0xff] }
  0xf1   : > { %v713_v4 = vld [vmem:[#allocation6 + $0xd0] sm:$0xff]  ;;  %1289 = vadd.xlane.f32.xlu1 %v1288_v55  ;;  %v1273_v5 = vadd.f32 %v1272_v57, %v11400_v33  ;;  %v1299_v6 = vadd.f32 %v1298_v59, %v11410_v49  ;;  %v428_v7 = vld [vmem:[#allocation3 + $0xe8] sm:$0xff]  ;;  %v714_v8 = vld [vmem:[#allocation6 + $0xd8] sm:$0xff]  ;;  %v11422_v13 = vadd.f32 %v711_v1, %v423_v50  ;;  %v11424_v17 = vadd.f32 %v712_v3, %v424_v51 }
  0xf2   : > { %v715_v9 = vld [vmem:[#allocation6 + $0xe0] sm:$0xff]  ;;  %17139 = vst [vmem:[#allocation29_spill] sm:$0xff] %v11426_v20  ;;  %v716_v21 = vld [vmem:[#allocation6 + $0xe8] sm:$0xff]  ;;  %v11428_v23 = vadd.f32 %v713_v4, %v425_v60  ;;  %v441_v24 = vld [vmem:[#allocation3 + $0x150] sm:$0xff]  ;;  %v11432_v29 = vadd.f32 %v714_v8, %v426_v62 }
  0xf3   : > { %v442_v26 = vld [vmem:[#allocation3 + $0x158] sm:$0xff]  ;;  %v1274_v27 = vadd.f32 %v1273_v5, %v11408_v47  ;;  %v1300_v28 = vadd.f32 %v1299_v6, %v11414_v58  ;;  %v1291_v34 = vadd.f32 %v11424_v17, %v11422_v13  ;;  %v443_v35 = vld [vmem:[#allocation3 + $0x160] sm:$0xff]  ;;  %v444_v37 = vld [vmem:[#allocation3 + $0x168] sm:$0xff]  ;;  %v11436_v40 = vadd.f32 %v715_v9, %v427_v63 }
  0xf4   : > { %v445_v39 = vld [vmem:[#allocation3 + $0x170] sm:$0xff]  ;;  %v730_v42 = vld [vmem:[#allocation6 + $0x158] sm:$0xff]  ;;  %v731_v44 = vld [vmem:[#allocation6 + $0x160] sm:$0xff]  ;;  %v11444_v62 = vadd.f32 %v716_v21, %v428_v7 }
  0xf5   : > { %v729_v41 = vld [vmem:[#allocation6 + $0x150] sm:$0xff]  ;;  %1275 = vadd.xlane.f32.xlu0 %v1274_v27  ;;  %v1301_v48 = vadd.f32 %v1300_v28, %v11418_v0  ;;  %v1292_v50 = vadd.f32 %v1291_v34, %v11428_v23  ;;  %v446_v51 = vld [vmem:[#allocation3 + $0x178] sm:$0xff]  ;;  %v732_v55 = vld [vmem:[#allocation6 + $0x168] sm:$0xff]  ;;  %v11442_v60 = vadd.f32 %v730_v42, %v442_v26  ;;  %v11446_v63 = vadd.f32 %v731_v44, %v443_v35 }
  0xf6   : > { %v733_v57 = vld [vmem:[#allocation6 + $0x170] sm:$0xff]  ;;  %v11440_v59 = vadd.f32 %v729_v41, %v441_v24  ;;  %17142 = vst [vmem:[#allocation32_spill] sm:$0xff] %v11444_v62  ;;  %v734_v1 = vld [vmem:[#allocation6 + $0x178] sm:$0xff]  ;;  %v435_v3 = vld [vmem:[#allocation3 + $0x120] sm:$0xff]  ;;  %v11450_v8 = vadd.f32 %v732_v55, %v444_v37 }
  0xf7   : > { %17141 = vst [vmem:[#allocation31_spill] sm:$0xff] %v11442_v60  ;;  %17143 = vst [vmem:[#allocation33_spill] sm:$0xff] %v11446_v63  ;;  %v436_v4 = vld [vmem:[#allocation3 + $0x128] sm:$0xff]  ;;  %v1302_v5 = vadd.f32 %v1301_v48, %v11426_v20  ;;  %v1293_v6 = vadd.f32 %v1292_v50, %v11432_v29  ;;  %v437_v24 = vld [vmem:[#allocation3 + $0x130] sm:$0xff]  ;;  %v11454_v28 = vadd.f32 %v733_v57, %v445_v39 }
  0xf8   : > { %17140 = vst [vmem:[#allocation30_spill] sm:$0xff] %v11440_v59  ;;  %17144 = vst [vmem:[#allocation34_spill] sm:$0xff] %v11450_v8  ;;  %v1312_v9 = vadd.f32 %v11442_v60, %v11440_v59  ;;  %v438_v27 = vld [vmem:[#allocation3 + $0x138] sm:$0xff]  ;;  %v439_v26 = vld [vmem:[#allocation3 + $0x140] sm:$0xff]  ;;  %v11462_v55 = vadd.f32 %v734_v1, %v446_v51 }
  0xf9   : > { %17145 = vst [vmem:[#allocation35_spill] sm:$0xff] %v11454_v28  ;;  %v723_v7 = vld [vmem:[#allocation6 + $0x120] sm:$0xff]  ;;  %v724_v21 = vld [vmem:[#allocation6 + $0x128] sm:$0xff]  ;;  %v725_v34 = vld [vmem:[#allocation6 + $0x130] sm:$0xff]  ;;  %1303 = vadd.xlane.f32.xlu1 %v1302_v5  ;;  %v1294_v35 = vadd.f32 %v1293_v6, %v11436_v40 }
  0xfa   : > { %v1313_v41 = vadd.f32 %v1312_v9, %v11446_v63  ;;  %v440_v42 = vld [vmem:[#allocation3 + $0x148] sm:$0xff]  ;;  %v726_v44 = vld [vmem:[#allocation6 + $0x138] sm:$0xff]  ;;  %v727_v37 = vld [vmem:[#allocation6 + $0x140] sm:$0xff]  ;;  %v11458_v48 = vadd.f32 %v723_v7, %v435_v3  ;;  %v11460_v50 = vadd.f32 %v724_v21, %v436_v4  ;;  %17148 = vst [vmem:[#allocation38_spill] sm:$0xff] %v11462_v55  ;;  %v11464_v39 = vadd.f32 %v725_v34, %v437_v24 }
  0xfb   : > { %v728_v60 = vld [vmem:[#allocation6 + $0x148] sm:$0xff]  ;;  %v453_v57 = vld [vmem:[#allocation3 + $0x1b0] sm:$0xff]  ;;  %v454_v59 = vld [vmem:[#allocation3 + $0x1b8] sm:$0xff]  ;;  %v1295_v5 = vadd.f32 %v1294_v35, %v11444_v62  ;;  %v11468_v20 = vadd.f32 %v726_v44, %v438_v27  ;;  %v11472_v21 = vadd.f32 %v727_v37, %v439_v26 }
  0xfc   : > { %17146 = vst [vmem:[#allocation36_spill] sm:$0xff] %v11458_v48  ;;  %17147 = vst [vmem:[#allocation37_spill] sm:$0xff] %v11460_v50  ;;  %v1314_v6 = vadd.f32 %v1313_v41, %v11450_v8  ;;  %v1305_v9 = vadd.f32 %v11460_v50, %v11458_v48  ;;  %v455_v3 = vld [vmem:[#allocation3 + $0x1c0] sm:$0xff]  ;;  %v456_v7 = vld [vmem:[#allocation3 + $0x1c8] sm:$0xff]  ;;  %v11480_v50 = vadd.f32 %v728_v60, %v440_v42 }
  0xfd   : > { %17149 = vst [vmem:[#allocation39_spill] sm:$0xff] %v11464_v39  ;;  %17150 = vst [vmem:[#allocation40_spill] sm:$0xff] %v11468_v20  ;;  %v457_v4 = vld [vmem:[#allocation3 + $0x1d0] sm:$0xff]  ;;  %v742_v1 = vld [vmem:[#allocation6 + $0x1b8] sm:$0xff]  ;;  %1296 = vadd.xlane.f32.xlu0 %v1295_v5 }
  0xfe   : > { %17151 = vst [vmem:[#allocation41_spill] sm:$0xff] %v11472_v21  ;;  %v741_v51 = vld [vmem:[#allocation6 + $0x1b0] sm:$0xff]  ;;  %v743_v24 = vld [vmem:[#allocation6 + $0x1c0] sm:$0xff]  ;;  %v1315_v34 = vadd.f32 %v1314_v6, %v11454_v28  ;;  %v1306_v35 = vadd.f32 %v1305_v9, %v11464_v39  ;;  %v458_v63 = vld [vmem:[#allocation3 + $0x1d8] sm:$0xff]  ;;  %v11478_v8 = vadd.f32 %v742_v1, %v454_v59 }
  0xff   : > { %v744_v41 = vld [vmem:[#allocation6 + $0x1c8] sm:$0xff]  ;;  %v745_v27 = vld [vmem:[#allocation6 + $0x1d0] sm:$0xff]  ;;  %v11476_v44 = vadd.f32 %v741_v51, %v453_v57  ;;  %17154 = vst [vmem:[#allocation44_spill] sm:$0xff] %v11480_v50  ;;  %v746_v48 = vld [vmem:[#allocation6 + $0x1d8] sm:$0xff]  ;;  %v11482_v26 = vadd.f32 %v743_v24, %v455_v3 }
 0x100   : > { %17153 = vst [vmem:[#allocation43_spill] sm:$0xff] %v11478_v8  ;;  %v447_v37 = vld [vmem:[#allocation3 + $0x180] sm:$0xff]  ;;  %v448_v0 = vld [vmem:[#allocation3 + $0x188] sm:$0xff]  ;;  %v1316_v5 = vadd.f32 %v1315_v34, %v11462_v55  ;;  %v1307_v6 = vadd.f32 %v1306_v35, %v11468_v20  ;;  %v11486_v28 = vadd.f32 %v744_v41, %v456_v7  ;;  %v449_v57 = vld [vmem:[#allocation3 + $0x190] sm:$0xff]  ;;  %v11490_v1 = vadd.f32 %v745_v27, %v457_v4 }
 0x101   : > { %17152 = vst [vmem:[#allocation42_spill] sm:$0xff] %v11476_v44  ;;  %17155 = vst [vmem:[#allocation45_spill] sm:$0xff] %v11482_v26  ;;  %v1326_v9 = vadd.f32 %v11478_v8, %v11476_v44  ;;  %v450_v51 = vld [vmem:[#allocation3 + $0x198] sm:$0xff]  ;;  %v451_v59 = vld [vmem:[#allocation3 + $0x1a0] sm:$0xff]  ;;  %v11498_v8 = vadd.f32 %v746_v48, %v458_v63 }
 0x102   : > { %17156 = vst [vmem:[#allocation46_spill] sm:$0xff] %v11486_v28  ;;  %17157 = vst [vmem:[#allocation47_spill] sm:$0xff] %v11490_v1  ;;  %v735_v60 = vld [vmem:[#allocation6 + $0x180] sm:$0xff]  ;;  %v736_v42 = vld [vmem:[#allocation6 + $0x188] sm:$0xff]  ;;  %1317 = vadd.xlane.f32.xlu1 %v1316_v5  ;;  %v1308_v24 = vadd.f32 %v1307_v6, %v11472_v21 }
 0x103   : > { %v737_v3 = vld [vmem:[#allocation6 + $0x190] sm:$0xff]  ;;  %v1327_v34 = vadd.f32 %v1326_v9, %v11482_v26  ;;  %v452_v55 = vld [vmem:[#allocation3 + $0x1a8] sm:$0xff]  ;;  %v738_v35 = vld [vmem:[#allocation6 + $0x198] sm:$0xff]  ;;  %v11494_v41 = vadd.f32 %v735_v60, %v447_v37  ;;  %v11496_v20 = vadd.f32 %v736_v42, %v448_v0  ;;  %17160 = vst [vmem:[#allocation50_spill] sm:$0xff] %v11498_v8 }
 0x104   : > { %v739_v7 = vld [vmem:[#allocation6 + $0x1a0] sm:$0xff]  ;;  %v740_v44 = vld [vmem:[#allocation6 + $0x1a8] sm:$0xff]  ;;  %v11500_v4 = vadd.f32 %v737_v3, %v449_v57  ;;  %v465_v27 = vld [vmem:[#allocation3 + $0x210] sm:$0xff]  ;;  %v1309_v5 = vadd.f32 %v1308_v24, %v11480_v50  ;;  %v11504_v21 = vadd.f32 %v738_v35, %v450_v51 }
 0x105   : > { %17158 = vst [vmem:[#allocation48_spill] sm:$0xff] %v11494_v41  ;;  %17159 = vst [vmem:[#allocation49_spill] sm:$0xff] %v11496_v20  ;;  %v466_v39 = vld [vmem:[#allocation3 + $0x218] sm:$0xff]  ;;  %v1328_v6 = vadd.f32 %v1327_v34, %v11486_v28  ;;  %v1319_v9 = vadd.f32 %v11496_v20, %v11494_v41  ;;  %v467_v37 = vld [vmem:[#allocation3 + $0x220] sm:$0xff]  ;;  %v11508_v42 = vadd.f32 %v739_v7, %v451_v59 }
 0x106   : > { %17161 = vst [vmem:[#allocation51_spill] sm:$0xff] %v11500_v4  ;;  %17162 = vst [vmem:[#allocation52_spill] sm:$0xff] %v11504_v21  ;;  %v468_v60 = vld [vmem:[#allocation3 + $0x228] sm:$0xff]  ;;  %v469_v0 = vld [vmem:[#allocation3 + $0x230] sm:$0xff]  ;;  %1310 = vadd.xlane.f32.xlu0 %v1309_v5  ;;  %v11516_v20 = vadd.f32 %v740_v44, %v452_v55 }
 0x107   : > { %17163 = vst [vmem:[#allocation53_spill] sm:$0xff] %v11508_v42  ;;  %v753_v63 = vld [vmem:[#allocation6 + $0x210] sm:$0xff]  ;;  %v754_v48 = vld [vmem:[#allocation6 + $0x218] sm:$0xff]  ;;  %v755_v57 = vld [vmem:[#allocation6 + $0x220] sm:$0xff]  ;;  %v1329_v3 = vadd.f32 %v1328_v6, %v11490_v1  ;;  %v1320_v24 = vadd.f32 %v1319_v9, %v11500_v4 }
 0x108   : > { %v470_v26 = vld [vmem:[#allocation3 + $0x238] sm:$0xff]  ;;  %v756_v34 = vld [vmem:[#allocation6 + $0x228] sm:$0xff]  ;;  %v757_v51 = vld [vmem:[#allocation6 + $0x230] sm:$0xff]  ;;  %v11512_v35 = vadd.f32 %v753_v63, %v465_v27  ;;  %v11514_v28 = vadd.f32 %v754_v48, %v466_v39  ;;  %17166 = vst [vmem:[#allocation56_spill] sm:$0xff] %v11516_v20  ;;  %v11518_v59 = vadd.f32 %v755_v57, %v467_v37 }
 0x109   : > { %v758_v41 = vld [vmem:[#allocation6 + $0x238] sm:$0xff]  ;;  %v459_v7 = vld [vmem:[#allocation3 + $0x1e0] sm:$0xff]  ;;  %v460_v50 = vld [vmem:[#allocation3 + $0x1e8] sm:$0xff]  ;;  %v1330_v5 = vadd.f32 %v1329_v3, %v11498_v8  ;;  %v1321_v6 = vadd.f32 %v1320_v24, %v11504_v21  ;;  %v11522_v1 = vadd.f32 %v756_v34, %v468_v60  ;;  %v11526_v48 = vadd.f32 %v757_v51, %v469_v0 }
 0x10a   : > { %17164 = vst [vmem:[#allocation54_spill] sm:$0xff] %v11512_v35  ;;  %17165 = vst [vmem:[#allocation55_spill] sm:$0xff] %v11514_v28  ;;  %v1340_v9 = vadd.f32 %v11514_v28, %v11512_v35  ;;  %v461_v27 = vld [vmem:[#allocation3 + $0x1f0] sm:$0xff]  ;;  %v462_v63 = vld [vmem:[#allocation3 + $0x1f8] sm:$0xff]  ;;  %v11534_v28 = vadd.f32 %v758_v41, %v470_v26 }
 0x10b   : > { %17167 = vst [vmem:[#allocation57_spill] sm:$0xff] %v11518_v59  ;;  %17168 = vst [vmem:[#allocation58_spill] sm:$0xff] %v11522_v1  ;;  %v463_v39 = vld [vmem:[#allocation3 + $0x200] sm:$0xff]  ;;  %v748_v44 = vld [vmem:[#allocation6 + $0x1e8] sm:$0xff]  ;;  %1331 = vadd.xlane.f32.xlu1 %v1330_v5  ;;  %v1322_v57 = vadd.f32 %v1321_v6, %v11508_v42 }
 0x10c   : > { %17169 = vst [vmem:[#allocation59_spill] sm:$0xff] %v11526_v48  ;;  %v747_v55 = vld [vmem:[#allocation6 + $0x1e0] sm:$0xff]  ;;  %v749_v37 = vld [vmem:[#allocation6 + $0x1f0] sm:$0xff]  ;;  %v1341_v3 = vadd.f32 %v1340_v9, %v11518_v59  ;;  %v464_v8 = vld [vmem:[#allocation3 + $0x208] sm:$0xff]  ;;  %v11532_v21 = vadd.f32 %v748_v44, %v460_v50 }
 0x10d   : > { %v750_v24 = vld [vmem:[#allocation6 + $0x1f8] sm:$0xff]  ;;  %v751_v60 = vld [vmem:[#allocation6 + $0x200] sm:$0xff]  ;;  %v11530_v34 = vadd.f32 %v747_v55, %v459_v7  ;;  %17172 = vst [vmem:[#allocation62_spill] sm:$0xff] %v11534_v28  ;;  %v752_v35 = vld [vmem:[#allocation6 + $0x208] sm:$0xff]  ;;  %v11536_v0 = vadd.f32 %v749_v37, %v461_v27  ;;  %v1323_v5 = vadd.f32 %v1322_v57, %v11516_v20 }
 0x10e   : > { %17171 = vst [vmem:[#allocation61_spill] sm:$0xff] %v11532_v21  ;;  %v477_v51 = vld [vmem:[#allocation3 + $0x270] sm:$0xff]  ;;  %v478_v4 = vld [vmem:[#allocation3 + $0x278] sm:$0xff]  ;;  %v1342_v6 = vadd.f32 %v1341_v3, %v11522_v1  ;;  %v11540_v42 = vadd.f32 %v750_v24, %v462_v63  ;;  %v479_v7 = vld [vmem:[#allocation3 + $0x280] sm:$0xff]  ;;  %v11544_v44 = vadd.f32 %v751_v60, %v463_v39 }
 0x10f   : > { %17170 = vst [vmem:[#allocation60_spill] sm:$0xff] %v11530_v34  ;;  %17173 = vst [vmem:[#allocation63_spill] sm:$0xff] %v11536_v0  ;;  %v1333_v9 = vadd.f32 %v11532_v21, %v11530_v34  ;;  %v480_v55 = vld [vmem:[#allocation3 + $0x288] sm:$0xff]  ;;  %v481_v50 = vld [vmem:[#allocation3 + $0x290] sm:$0xff]  ;;  %1324 = vadd.xlane.f32.xlu0 %v1323_v5  ;;  %v11552_v21 = vadd.f32 %v752_v35, %v464_v8 }
 0x110   : > { %17174 = vst [vmem:[#allocation64_spill] sm:$0xff] %v11540_v42  ;;  %17175 = vst [vmem:[#allocation65_spill] sm:$0xff] %v11544_v44  ;;  %v765_v26 = vld [vmem:[#allocation6 + $0x270] sm:$0xff]  ;;  %v766_v41 = vld [vmem:[#allocation6 + $0x278] sm:$0xff]  ;;  %v1343_v37 = vadd.f32 %v1342_v6, %v11526_v48 }
 0x111   : > { %v767_v27 = vld [vmem:[#allocation6 + $0x280] sm:$0xff]  ;;  %v1334_v57 = vadd.f32 %v1333_v9, %v11536_v0  ;;  %v482_v59 = vld [vmem:[#allocation3 + $0x298] sm:$0xff]  ;;  %v768_v3 = vld [vmem:[#allocation6 + $0x288] sm:$0xff]  ;;  %v11548_v24 = vadd.f32 %v765_v26, %v477_v51  ;;  %v11550_v1 = vadd.f32 %v766_v41, %v478_v4  ;;  %17178 = vst [vmem:[#allocation68_spill] sm:$0xff] %v11552_v21 }
 0x112   : > { %v769_v63 = vld [vmem:[#allocation6 + $0x290] sm:$0xff]  ;;  %v770_v34 = vld [vmem:[#allocation6 + $0x298] sm:$0xff]  ;;  %v11554_v39 = vadd.f32 %v767_v27, %v479_v7  ;;  %v471_v60 = vld [vmem:[#allocation3 + $0x240] sm:$0xff]  ;;  %v1344_v5 = vadd.f32 %v1343_v37, %v11534_v28  ;;  %v11558_v48 = vadd.f32 %v768_v3, %v480_v55 }
 0x113   : > { %17176 = vst [vmem:[#allocation66_spill] sm:$0xff] %v11548_v24  ;;  %17177 = vst [vmem:[#allocation67_spill] sm:$0xff] %v11550_v1  ;;  %v472_v20 = vld [vmem:[#allocation3 + $0x248] sm:$0xff]  ;;  %v1335_v6 = vadd.f32 %v1334_v57, %v11540_v42  ;;  %v1354_v9 = vadd.f32 %v11550_v1, %v11548_v24  ;;  %v473_v51 = vld [vmem:[#allocation3 + $0x250] sm:$0xff]  ;;  %v11562_v41 = vadd.f32 %v769_v63, %v481_v50 }
 0x114   : > { %17179 = vst [vmem:[#allocation69_spill] sm:$0xff] %v11554_v39  ;;  %17180 = vst [vmem:[#allocation70_spill] sm:$0xff] %v11558_v48  ;;  %v474_v26 = vld [vmem:[#allocation3 + $0x258] sm:$0xff]  ;;  %v475_v4 = vld [vmem:[#allocation3 + $0x260] sm:$0xff]  ;;  %1345 = vadd.xlane.f32.xlu1 %v1344_v5  ;;  %v11570_v1 = vadd.f32 %v770_v34, %v482_v59 }
 0x115   : > { %17181 = vst [vmem:[#allocation71_spill] sm:$0xff] %v11562_v41  ;;  %v759_v8 = vld [vmem:[#allocation6 + $0x240] sm:$0xff]  ;;  %v760_v35 = vld [vmem:[#allocation6 + $0x248] sm:$0xff]  ;;  %v761_v7 = vld [vmem:[#allocation6 + $0x250] sm:$0xff]  ;;  %v1336_v27 = vadd.f32 %v1335_v6, %v11544_v44  ;;  %v1355_v37 = vadd.f32 %v1354_v9, %v11554_v39 }
 0x116   : > { %v476_v28 = vld [vmem:[#allocation3 + $0x268] sm:$0xff]  ;;  %v762_v57 = vld [vmem:[#allocation6 + $0x258] sm:$0xff]  ;;  %v763_v55 = vld [vmem:[#allocation6 + $0x260] sm:$0xff]  ;;  %v11566_v3 = vadd.f32 %v759_v8, %v471_v60  ;;  %v11568_v42 = vadd.f32 %v760_v35, %v472_v20  ;;  %17184 = vst [vmem:[#allocation74_spill] sm:$0xff] %v11570_v1  ;;  %v11572_v50 = vadd.f32 %v761_v7, %v473_v51 }
 0x117   : > { %v764_v24 = vld [vmem:[#allocation6 + $0x268] sm:$0xff]  ;;  %v489_v63 = vld [vmem:[#allocation3 + $0x2d0] sm:$0xff]  ;;  %v490_v0 = vld [vmem:[#allocation3 + $0x2d8] sm:$0xff]  ;;  %v1337_v5 = vadd.f32 %v1336_v27, %v11552_v21  ;;  %v1356_v6 = vadd.f32 %v1355_v37, %v11558_v48  ;;  %v11576_v44 = vadd.f32 %v762_v57, %v474_v26  ;;  %v11580_v35 = vadd.f32 %v763_v55, %v475_v4 }
 0x118   : > { %17182 = vst [vmem:[#allocation72_spill] sm:$0xff] %v11566_v3  ;;  %17183 = vst [vmem:[#allocation73_spill] sm:$0xff] %v11568_v42  ;;  %v1347_v9 = vadd.f32 %v11568_v42, %v11566_v3  ;;  %v491_v60 = vld [vmem:[#allocation3 + $0x2e0] sm:$0xff]  ;;  %v492_v8 = vld [vmem:[#allocation3 + $0x2e8] sm:$0xff]  ;;  %v11588_v42 = vadd.f32 %v764_v24, %v476_v28 }
 0x119   : > { %17185 = vst [vmem:[#allocation75_spill] sm:$0xff] %v11572_v50  ;;  %17186 = vst [vmem:[#allocation76_spill] sm:$0xff] %v11576_v44  ;;  %v493_v20 = vld [vmem:[#allocation3 + $0x2f0] sm:$0xff]  ;;  %v778_v34 = vld [vmem:[#allocation6 + $0x2d8] sm:$0xff]  ;;  %1338 = vadd.xlane.f32.xlu0 %v1337_v5  ;;  %v1357_v7 = vadd.f32 %v1356_v6, %v11562_v41 }
 0x11a   : > { %17187 = vst [vmem:[#allocation77_spill] sm:$0xff] %v11580_v35  ;;  %v777_v59 = vld [vmem:[#allocation6 + $0x2d0] sm:$0xff]  ;;  %v779_v51 = vld [vmem:[#allocation6 + $0x2e0] sm:$0xff]  ;;  %v1348_v27 = vadd.f32 %v1347_v9, %v11572_v50  ;;  %v494_v39 = vld [vmem:[#allocation3 + $0x2f8] sm:$0xff]  ;;  %v11586_v48 = vadd.f32 %v778_v34, %v490_v0 }
 0x11b   : > { %v780_v37 = vld [vmem:[#allocation6 + $0x2e8] sm:$0xff]  ;;  %v781_v26 = vld [vmem:[#allocation6 + $0x2f0] sm:$0xff]  ;;  %v11584_v57 = vadd.f32 %v777_v59, %v489_v63  ;;  %17190 = vst [vmem:[#allocation80_spill] sm:$0xff] %v11588_v42  ;;  %v782_v3 = vld [vmem:[#allocation6 + $0x2f8] sm:$0xff]  ;;  %v11590_v4 = vadd.f32 %v779_v51, %v491_v60  ;;  %v1358_v5 = vadd.f32 %v1357_v7, %v11570_v1 }
 0x11c   : > { %17189 = vst [vmem:[#allocation79_spill] sm:$0xff] %v11586_v48  ;;  %v483_v55 = vld [vmem:[#allocation3 + $0x2a0] sm:$0xff]  ;;  %v484_v21 = vld [vmem:[#allocation3 + $0x2a8] sm:$0xff]  ;;  %v1349_v6 = vadd.f32 %v1348_v27, %v11576_v44  ;;  %v11594_v41 = vadd.f32 %v780_v37, %v492_v8  ;;  %v485_v63 = vld [vmem:[#allocation3 + $0x2b0] sm:$0xff]  ;;  %v11598_v34 = vadd.f32 %v781_v26, %v493_v20 }
 0x11d   : > { %17188 = vst [vmem:[#allocation78_spill] sm:$0xff] %v11584_v57  ;;  %17191 = vst [vmem:[#allocation81_spill] sm:$0xff] %v11590_v4  ;;  %v1368_v9 = vadd.f32 %v11586_v48, %v11584_v57  ;;  %v486_v59 = vld [vmem:[#allocation3 + $0x2b8] sm:$0xff]  ;;  %v487_v0 = vld [vmem:[#allocation3 + $0x2c0] sm:$0xff]  ;;  %1359 = vadd.xlane.f32.xlu1 %v1358_v5  ;;  %v11606_v48 = vadd.f32 %v782_v3, %v494_v39 }
 0x11e   : > { %17192 = vst [vmem:[#allocation82_spill] sm:$0xff] %v11594_v41  ;;  %17193 = vst [vmem:[#allocation83_spill] sm:$0xff] %v11598_v34  ;;  %v771_v28 = vld [vmem:[#allocation6 + $0x2a0] sm:$0xff]  ;;  %v772_v24 = vld [vmem:[#allocation6 + $0x2a8] sm:$0xff]  ;;  %v1350_v51 = vadd.f32 %v1349_v6, %v11580_v35 }
 0x11f   : > { %v773_v60 = vld [vmem:[#allocation6 + $0x2b0] sm:$0xff]  ;;  %v1369_v7 = vadd.f32 %v1368_v9, %v11590_v4  ;;  %v488_v1 = vld [vmem:[#allocation3 + $0x2c8] sm:$0xff]  ;;  %v774_v27 = vld [vmem:[#allocation6 + $0x2b8] sm:$0xff]  ;;  %v11602_v37 = vadd.f32 %v771_v28, %v483_v55  ;;  %v11604_v44 = vadd.f32 %v772_v24, %v484_v21  ;;  %17196 = vst [vmem:[#allocation86_spill] sm:$0xff] %v11606_v48 }
 0x120   : > { %v775_v8 = vld [vmem:[#allocation6 + $0x2c0] sm:$0xff]  ;;  %v776_v57 = vld [vmem:[#allocation6 + $0x2c8] sm:$0xff]  ;;  %v11608_v20 = vadd.f32 %v773_v60, %v485_v63  ;;  %v501_v26 = vld [vmem:[#allocation3 + $0x330] sm:$0xff]  ;;  %v1351_v5 = vadd.f32 %v1350_v51, %v11588_v42  ;;  %v11612_v35 = vadd.f32 %v774_v27, %v486_v59 }
 0x121   : > { %17194 = vst [vmem:[#allocation84_spill] sm:$0xff] %v11602_v37  ;;  %17195 = vst [vmem:[#allocation85_spill] sm:$0xff] %v11604_v44  ;;  %v502_v50 = vld [vmem:[#allocation3 + $0x338] sm:$0xff]  ;;  %v1370_v6 = vadd.f32 %v1369_v7, %v11594_v41  ;;  %v1361_v9 = vadd.f32 %v11604_v44, %v11602_v37  ;;  %v503_v55 = vld [vmem:[#allocation3 + $0x340] sm:$0xff]  ;;  %v11616_v24 = vadd.f32 %v775_v8, %v487_v0 }
 0x122   : > { %17197 = vst [vmem:[#allocation87_spill] sm:$0xff] %v11608_v20  ;;  %17198 = vst [vmem:[#allocation88_spill] sm:$0xff] %v11612_v35  ;;  %v504_v28 = vld [vmem:[#allocation3 + $0x348] sm:$0xff]  ;;  %v505_v21 = vld [vmem:[#allocation3 + $0x350] sm:$0xff]  ;;  %1352 = vadd.xlane.f32.xlu0 %v1351_v5  ;;  %v11624_v44 = vadd.f32 %v776_v57, %v488_v1 }
 0x123   : > { %17199 = vst [vmem:[#allocation89_spill] sm:$0xff] %v11616_v24  ;;  %v789_v39 = vld [vmem:[#allocation6 + $0x330] sm:$0xff]  ;;  %v790_v3 = vld [vmem:[#allocation6 + $0x338] sm:$0xff]  ;;  %v791_v63 = vld [vmem:[#allocation6 + $0x340] sm:$0xff]  ;;  %v1371_v60 = vadd.f32 %v1370_v6, %v11598_v34  ;;  %v1362_v51 = vadd.f32 %v1361_v9, %v11608_v20 }
 0x124   : > { %v506_v4 = vld [vmem:[#allocation3 + $0x358] sm:$0xff]  ;;  %v792_v7 = vld [vmem:[#allocation6 + $0x348] sm:$0xff]  ;;  %v793_v59 = vld [vmem:[#allocation6 + $0x350] sm:$0xff]  ;;  %v11620_v27 = vadd.f32 %v789_v39, %v501_v26  ;;  %v11622_v41 = vadd.f32 %v790_v3, %v502_v50  ;;  %17202 = vst [vmem:[#allocation92_spill] sm:$0xff] %v11624_v44  ;;  %v11626_v0 = vadd.f32 %v791_v63, %v503_v55 }
 0x125   : > { %v794_v37 = vld [vmem:[#allocation6 + $0x358] sm:$0xff]  ;;  %v495_v8 = vld [vmem:[#allocation3 + $0x300] sm:$0xff]  ;;  %v496_v42 = vld [vmem:[#allocation3 + $0x308] sm:$0xff]  ;;  %v1372_v5 = vadd.f32 %v1371_v60, %v11606_v48  ;;  %v1363_v6 = vadd.f32 %v1362_v51, %v11612_v35  ;;  %v11630_v34 = vadd.f32 %v792_v7, %v504_v28  ;;  %v11634_v3 = vadd.f32 %v793_v59, %v505_v21 }
 0x126   : > { %17200 = vst [vmem:[#allocation90_spill] sm:$0xff] %v11620_v27  ;;  %17201 = vst [vmem:[#allocation91_spill] sm:$0xff] %v11622_v41  ;;  %v1382_v9 = vadd.f32 %v11622_v41, %v11620_v27  ;;  %v497_v26 = vld [vmem:[#allocation3 + $0x310] sm:$0xff]  ;;  %v498_v39 = vld [vmem:[#allocation3 + $0x318] sm:$0xff]  ;;  %v11642_v41 = vadd.f32 %v794_v37, %v506_v4 }
 0x127   : > { %17203 = vst [vmem:[#allocation93_spill] sm:$0xff] %v11626_v0  ;;  %17204 = vst [vmem:[#allocation94_spill] sm:$0xff] %v11630_v34  ;;  %v499_v50 = vld [vmem:[#allocation3 + $0x320] sm:$0xff]  ;;  %v784_v57 = vld [vmem:[#allocation6 + $0x308] sm:$0xff]  ;;  %1373 = vadd.xlane.f32.xlu1 %v1372_v5  ;;  %v1364_v63 = vadd.f32 %v1363_v6, %v11616_v24 }
 0x128   : > { %17205 = vst [vmem:[#allocation95_spill] sm:$0xff] %v11634_v3  ;;  %v783_v1 = vld [vmem:[#allocation6 + $0x300] sm:$0xff]  ;;  %v785_v55 = vld [vmem:[#allocation6 + $0x310] sm:$0xff]  ;;  %v1383_v60 = vadd.f32 %v1382_v9, %v11626_v0  ;;  %v500_v48 = vld [vmem:[#allocation3 + $0x328] sm:$0xff]  ;;  %v11640_v35 = vadd.f32 %v784_v57, %v496_v42 }
 0x129   : > { %v786_v51 = vld [vmem:[#allocation6 + $0x318] sm:$0xff]  ;;  %v787_v28 = vld [vmem:[#allocation6 + $0x320] sm:$0xff]  ;;  %v11638_v7 = vadd.f32 %v783_v1, %v495_v8  ;;  %17208 = vst [vmem:[#allocation98_spill] sm:$0xff] %v11642_v41  ;;  %v788_v27 = vld [vmem:[#allocation6 + $0x328] sm:$0xff]  ;;  %v11644_v21 = vadd.f32 %v785_v55, %v497_v26  ;;  %v1365_v5 = vadd.f32 %v1364_v63, %v11624_v44 }
 0x12a   : > { %17207 = vst [vmem:[#allocation97_spill] sm:$0xff] %v11640_v35  ;;  %v513_v59 = vld [vmem:[#allocation3 + $0x390] sm:$0xff]  ;;  %v514_v20 = vld [vmem:[#allocation3 + $0x398] sm:$0xff]  ;;  %v1384_v6 = vadd.f32 %v1383_v60, %v11630_v34  ;;  %v11648_v24 = vadd.f32 %v786_v51, %v498_v39  ;;  %v515_v8 = vld [vmem:[#allocation3 + $0x3a0] sm:$0xff]  ;;  %v11652_v57 = vadd.f32 %v787_v28, %v499_v50 }
 0x12b   : > { %17206 = vst [vmem:[#allocation96_spill] sm:$0xff] %v11638_v7  ;;  %17209 = vst [vmem:[#allocation99_spill] sm:$0xff] %v11644_v21  ;;  %v1375_v9 = vadd.f32 %v11640_v35, %v11638_v7  ;;  %v516_v1 = vld [vmem:[#allocation3 + $0x3a8] sm:$0xff]  ;;  %v517_v42 = vld [vmem:[#allocation3 + $0x3b0] sm:$0xff]  ;;  %1366 = vadd.xlane.f32.xlu0 %v1365_v5  ;;  %v11660_v35 = vadd.f32 %v788_v27, %v500_v48 }
 0x12c   : > { %17210 = vst [vmem:[#allocation100_spill] sm:$0xff] %v11648_v24  ;;  %17211 = vst [vmem:[#allocation101_spill] sm:$0xff] %v11652_v57  ;;  %v801_v4 = vld [vmem:[#allocation6 + $0x390] sm:$0xff]  ;;  %v802_v37 = vld [vmem:[#allocation6 + $0x398] sm:$0xff]  ;;  %v1385_v55 = vadd.f32 %v1384_v6, %v11634_v3 }
 0x12d   : > { %v803_v26 = vld [vmem:[#allocation6 + $0x3a0] sm:$0xff]  ;;  %v1376_v63 = vadd.f32 %v1375_v9, %v11644_v21  ;;  %v518_v0 = vld [vmem:[#allocation3 + $0x3b8] sm:$0xff]  ;;  %v804_v60 = vld [vmem:[#allocation6 + $0x3a8] sm:$0xff]  ;;  %v11656_v51 = vadd.f32 %v801_v4, %v513_v59  ;;  %v11658_v34 = vadd.f32 %v802_v37, %v514_v20  ;;  %17214 = vst [vmem:[#allocation104_spill] sm:$0xff] %v11660_v35 }
 0x12e   : > { %v805_v39 = vld [vmem:[#allocation6 + $0x3b0] sm:$0xff]  ;;  %v806_v7 = vld [vmem:[#allocation6 + $0x3b8] sm:$0xff]  ;;  %v11662_v50 = vadd.f32 %v803_v26, %v515_v8  ;;  %v507_v28 = vld [vmem:[#allocation3 + $0x360] sm:$0xff]  ;;  %v1386_v5 = vadd.f32 %v1385_v55, %v11642_v41  ;;  %v11666_v3 = vadd.f32 %v804_v60, %v516_v1 }
 0x12f   : > { %17212 = vst [vmem:[#allocation102_spill] sm:$0xff] %v11656_v51  ;;  %17213 = vst [vmem:[#allocation103_spill] sm:$0xff] %v11658_v34  ;;  %v508_v44 = vld [vmem:[#allocation3 + $0x368] sm:$0xff]  ;;  %v1377_v6 = vadd.f32 %v1376_v63, %v11648_v24  ;;  %v1396_v9 = vadd.f32 %v11658_v34, %v11656_v51  ;;  %v509_v59 = vld [vmem:[#allocation3 + $0x370] sm:$0xff]  ;;  %v11670_v37 = vadd.f32 %v805_v39, %v517_v42 }
 0x130   : > { %17215 = vst [vmem:[#allocation105_spill] sm:$0xff] %v11662_v50  ;;  %17216 = vst [vmem:[#allocation106_spill] sm:$0xff] %v11666_v3  ;;  %v510_v4 = vld [vmem:[#allocation3 + $0x378] sm:$0xff]  ;;  %v511_v20 = vld [vmem:[#allocation3 + $0x380] sm:$0xff]  ;;  %1387 = vadd.xlane.f32.xlu1 %v1386_v5  ;;  %v11678_v34 = vadd.f32 %v806_v7, %v518_v0 }
 0x131   : > { %17217 = vst [vmem:[#allocation107_spill] sm:$0xff] %v11670_v37  ;;  %v795_v48 = vld [vmem:[#allocation6 + $0x360] sm:$0xff]  ;;  %v796_v27 = vld [vmem:[#allocation6 + $0x368] sm:$0xff]  ;;  %v797_v8 = vld [vmem:[#allocation6 + $0x370] sm:$0xff]  ;;  %v1378_v26 = vadd.f32 %v1377_v6, %v11652_v57  ;;  %v1397_v55 = vadd.f32 %v1396_v9, %v11662_v50 }
 0x132   : > { %v512_v41 = vld [vmem:[#allocation3 + $0x388] sm:$0xff]  ;;  %v798_v63 = vld [vmem:[#allocation6 + $0x378] sm:$0xff]  ;;  %v799_v1 = vld [vmem:[#allocation6 + $0x380] sm:$0xff]  ;;  %v11674_v60 = vadd.f32 %v795_v48, %v507_v28  ;;  %v11676_v24 = vadd.f32 %v796_v27, %v508_v44  ;;  %17220 = vst [vmem:[#allocation110_spill] sm:$0xff] %v11678_v34  ;;  %v11680_v42 = vadd.f32 %v797_v8, %v509_v59 }
 0x133   : > { %v800_v51 = vld [vmem:[#allocation6 + $0x388] sm:$0xff]  ;;  %v525_v39 = vld [vmem:[#allocation3 + $0x3f0] sm:$0xff]  ;;  %v526_v21 = vld [vmem:[#allocation3 + $0x3f8] sm:$0xff]  ;;  %v1379_v5 = vadd.f32 %v1378_v26, %v11660_v35  ;;  %v1398_v6 = vadd.f32 %v1397_v55, %v11666_v3  ;;  %v11684_v57 = vadd.f32 %v798_v63, %v510_v4  ;;  %v11688_v27 = vadd.f32 %v799_v1, %v511_v20 }
 0x134   : > { %17218 = vst [vmem:[#allocation108_spill] sm:$0xff] %v11674_v60  ;;  %17219 = vst [vmem:[#allocation109_spill] sm:$0xff] %v11676_v24  ;;  %v1389_v9 = vadd.f32 %v11676_v24, %v11674_v60  ;;  %v527_v28 = vld [vmem:[#allocation3 + $0x400] sm:$0xff]  ;;  %v528_v48 = vld [vmem:[#allocation3 + $0x408] sm:$0xff]  ;;  %v11696_v24 = vadd.f32 %v800_v51, %v512_v41 }
 0x135   : > { %17221 = vst [vmem:[#allocation111_spill] sm:$0xff] %v11680_v42  ;;  %17222 = vst [vmem:[#allocation112_spill] sm:$0xff] %v11684_v57  ;;  %v529_v44 = vld [vmem:[#allocation3 + $0x410] sm:$0xff]  ;;  %v814_v7 = vld [vmem:[#allocation6 + $0x3f8] sm:$0xff]  ;;  %1380 = vadd.xlane.f32.xlu0 %v1379_v5  ;;  %v1399_v8 = vadd.f32 %v1398_v6, %v11670_v37 }
 0x136   : > { %17223 = vst [vmem:[#allocation113_spill] sm:$0xff] %v11688_v27  ;;  %v813_v0 = vld [vmem:[#allocation6 + $0x3f0] sm:$0xff]  ;;  %v815_v59 = vld [vmem:[#allocation6 + $0x400] sm:$0xff]  ;;  %v1390_v26 = vadd.f32 %v1389_v9, %v11680_v42  ;;  %v530_v50 = vld [vmem:[#allocation3 + $0x418] sm:$0xff]  ;;  %v11694_v3 = vadd.f32 %v814_v7, %v526_v21 }
 0x137   : > { %v816_v55 = vld [vmem:[#allocation6 + $0x408] sm:$0xff]  ;;  %v817_v4 = vld [vmem:[#allocation6 + $0x410] sm:$0xff]  ;;  %v11692_v63 = vadd.f32 %v813_v0, %v525_v39  ;;  %17226 = vst [vmem:[#allocation116_spill] sm:$0xff] %v11696_v24  ;;  %v818_v60 = vld [vmem:[#allocation6 + $0x418] sm:$0xff]  ;;  %v11698_v20 = vadd.f32 %v815_v59, %v527_v28  ;;  %v1400_v5 = vadd.f32 %v1399_v8, %v11678_v34 }
 0x138   : > { %17225 = vst [vmem:[#allocation115_spill] sm:$0xff] %v11694_v3  ;;  %v519_v1 = vld [vmem:[#allocation3 + $0x3c0] sm:$0xff]  ;;  %v520_v35 = vld [vmem:[#allocation3 + $0x3c8] sm:$0xff]  ;;  %v1391_v6 = vadd.f32 %v1390_v26, %v11684_v57  ;;  %v11702_v37 = vadd.f32 %v816_v55, %v528_v48  ;;  %v521_v39 = vld [vmem:[#allocation3 + $0x3d0] sm:$0xff]  ;;  %v11706_v7 = vadd.f32 %v817_v4, %v529_v44 }
 0x139   : > { %17224 = vst [vmem:[#allocation114_spill] sm:$0xff] %v11692_v63  ;;  %17227 = vst [vmem:[#allocation117_spill] sm:$0xff] %v11698_v20  ;;  %v1410_v9 = vadd.f32 %v11694_v3, %v11692_v63  ;;  %v522_v0 = vld [vmem:[#allocation3 + $0x3d8] sm:$0xff]  ;;  %v523_v21 = vld [vmem:[#allocation3 + $0x3e0] sm:$0xff]  ;;  %1401 = vadd.xlane.f32.xlu1 %v1400_v5  ;;  %v11714_v3 = vadd.f32 %v818_v60, %v530_v50 }
 0x13a   : > { %17228 = vst [vmem:[#allocation118_spill] sm:$0xff] %v11702_v37  ;;  %17229 = vst [vmem:[#allocation119_spill] sm:$0xff] %v11706_v7  ;;  %v807_v41 = vld [vmem:[#allocation6 + $0x3c0] sm:$0xff]  ;;  %v808_v51 = vld [vmem:[#allocation6 + $0x3c8] sm:$0xff]  ;;  %v1392_v59 = vadd.f32 %v1391_v6, %v11688_v27 }
 0x13b   : > { %v809_v28 = vld [vmem:[#allocation6 + $0x3d0] sm:$0xff]  ;;  %v1411_v8 = vadd.f32 %v1410_v9, %v11698_v20  ;;  %v524_v34 = vld [vmem:[#allocation3 + $0x3e8] sm:$0xff]  ;;  %v810_v26 = vld [vmem:[#allocation6 + $0x3d8] sm:$0xff]  ;;  %v11710_v55 = vadd.f32 %v807_v41, %v519_v1  ;;  %v11712_v57 = vadd.f32 %v808_v51, %v520_v35  ;;  %17232 = vst [vmem:[#allocation122_spill] sm:$0xff] %v11714_v3 }
 0x13c   : > { %v811_v48 = vld [vmem:[#allocation6 + $0x3e0] sm:$0xff]  ;;  %v812_v63 = vld [vmem:[#allocation6 + $0x3e8] sm:$0xff]  ;;  %v11716_v44 = vadd.f32 %v809_v28, %v521_v39  ;;  %v537_v4 = vld [vmem:[#allocation3 + $0x450] sm:$0xff]  ;;  %v1393_v5 = vadd.f32 %v1392_v59, %v11696_v24  ;;  %v11720_v27 = vadd.f32 %v810_v26, %v522_v0 }
 0x13d   : > { %17230 = vst [vmem:[#allocation120_spill] sm:$0xff] %v11710_v55  ;;  %17231 = vst [vmem:[#allocation121_spill] sm:$0xff] %v11712_v57  ;;  %v538_v42 = vld [vmem:[#allocation3 + $0x458] sm:$0xff]  ;;  %v1412_v6 = vadd.f32 %v1411_v8, %v11702_v37  ;;  %v1403_v9 = vadd.f32 %v11712_v57, %v11710_v55  ;;  %v539_v1 = vld [vmem:[#allocation3 + $0x460] sm:$0xff]  ;;  %v11724_v51 = vadd.f32 %v811_v48, %v523_v21 }
 0x13e   : > { %17233 = vst [vmem:[#allocation123_spill] sm:$0xff] %v11716_v44  ;;  %17234 = vst [vmem:[#allocation124_spill] sm:$0xff] %v11720_v27  ;;  %v540_v41 = vld [vmem:[#allocation3 + $0x468] sm:$0xff]  ;;  %v541_v35 = vld [vmem:[#allocation3 + $0x470] sm:$0xff]  ;;  %1394 = vadd.xlane.f32.xlu0 %v1393_v5  ;;  %v11732_v57 = vadd.f32 %v812_v63, %v524_v34 }
 0x13f   : > { %17235 = vst [vmem:[#allocation125_spill] sm:$0xff] %v11724_v51  ;;  %v825_v50 = vld [vmem:[#allocation6 + $0x450] sm:$0xff]  ;;  %v826_v60 = vld [vmem:[#allocation6 + $0x458] sm:$0xff]  ;;  %v827_v39 = vld [vmem:[#allocation6 + $0x460] sm:$0xff]  ;;  %v1413_v28 = vadd.f32 %v1412_v6, %v11706_v7  ;;  %v1404_v59 = vadd.f32 %v1403_v9, %v11716_v44 }
 0x140   : > { %v542_v20 = vld [vmem:[#allocation3 + $0x478] sm:$0xff]  ;;  %v828_v8 = vld [vmem:[#allocation6 + $0x468] sm:$0xff]  ;;  %v829_v0 = vld [vmem:[#allocation6 + $0x470] sm:$0xff]  ;;  %v11728_v26 = vadd.f32 %v825_v50, %v537_v4  ;;  %v11730_v37 = vadd.f32 %v826_v60, %v538_v42  ;;  %17238 = vst [vmem:[#allocation128_spill] sm:$0xff] %v11732_v57  ;;  %v11734_v21 = vadd.f32 %v827_v39, %v539_v1 }
 0x141   : > { %v830_v55 = vld [vmem:[#allocation6 + $0x478] sm:$0xff]  ;;  %v531_v48 = vld [vmem:[#allocation3 + $0x420] sm:$0xff]  ;;  %v532_v24 = vld [vmem:[#allocation3 + $0x428] sm:$0xff]  ;;  %v1414_v5 = vadd.f32 %v1413_v28, %v11714_v3  ;;  %v1405_v6 = vadd.f32 %v1404_v59, %v11720_v27  ;;  %v11738_v7 = vadd.f32 %v828_v8, %v540_v41  ;;  %v11742_v60 = vadd.f32 %v829_v0, %v541_v35 }
 0x142   : > { %17236 = vst [vmem:[#allocation126_spill] sm:$0xff] %v11728_v26  ;;  %17237 = vst [vmem:[#allocation127_spill] sm:$0xff] %v11730_v37  ;;  %v1424_v9 = vadd.f32 %v11730_v37, %v11728_v26  ;;  %v533_v4 = vld [vmem:[#allocation3 + $0x430] sm:$0xff]  ;;  %v534_v50 = vld [vmem:[#allocation3 + $0x438] sm:$0xff]  ;;  %v11750_v37 = vadd.f32 %v830_v55, %v542_v20 }
 0x143   : > { %17239 = vst [vmem:[#allocation129_spill] sm:$0xff] %v11734_v21  ;;  %17240 = vst [vmem:[#allocation130_spill] sm:$0xff] %v11738_v7  ;;  %v535_v42 = vld [vmem:[#allocation3 + $0x440] sm:$0xff]  ;;  %v820_v63 = vld [vmem:[#allocation6 + $0x428] sm:$0xff]  ;;  %1415 = vadd.xlane.f32.xlu1 %v1414_v5  ;;  %v1406_v39 = vadd.f32 %v1405_v6, %v11724_v51 }
 0x144   : > { %17241 = vst [vmem:[#allocation131_spill] sm:$0xff] %v11742_v60  ;;  %v819_v34 = vld [vmem:[#allocation6 + $0x420] sm:$0xff]  ;;  %v821_v1 = vld [vmem:[#allocation6 + $0x430] sm:$0xff]  ;;  %v1425_v28 = vadd.f32 %v1424_v9, %v11734_v21  ;;  %v536_v3 = vld [vmem:[#allocation3 + $0x448] sm:$0xff]  ;;  %v11748_v27 = vadd.f32 %v820_v63, %v532_v24 }
 0x145   : > { %v822_v59 = vld [vmem:[#allocation6 + $0x438] sm:$0xff]  ;;  %v823_v41 = vld [vmem:[#allocation6 + $0x440] sm:$0xff]  ;;  %v11746_v8 = vadd.f32 %v819_v34, %v531_v48  ;;  %17244 = vst [vmem:[#allocation134_spill] sm:$0xff] %v11750_v37  ;;  %v824_v26 = vld [vmem:[#allocation6 + $0x448] sm:$0xff]  ;;  %v11752_v35 = vadd.f32 %v821_v1, %v533_v4  ;;  %v1407_v5 = vadd.f32 %v1406_v39, %v11732_v57 }
 0x146   : > { %17243 = vst [vmem:[#allocation133_spill] sm:$0xff] %v11748_v27  ;;  %v549_v0 = vld [vmem:[#allocation3 + $0x4b0] sm:$0xff]  ;;  %v550_v44 = vld [vmem:[#allocation3 + $0x4b8] sm:$0xff]  ;;  %v1426_v6 = vadd.f32 %v1425_v28, %v11738_v7  ;;  %v11756_v51 = vadd.f32 %v822_v59, %v534_v50  ;;  %v551_v48 = vld [vmem:[#allocation3 + $0x4c0] sm:$0xff]  ;;  %v11760_v63 = vadd.f32 %v823_v41, %v535_v42 }
 0x147   : > { %17242 = vst [vmem:[#allocation132_spill] sm:$0xff] %v11746_v8  ;;  %17245 = vst [vmem:[#allocation135_spill] sm:$0xff] %v11752_v35  ;;  %v1417_v9 = vadd.f32 %v11748_v27, %v11746_v8  ;;  %v552_v34 = vld [vmem:[#allocation3 + $0x4c8] sm:$0xff]  ;;  %v553_v24 = vld [vmem:[#allocation3 + $0x4d0] sm:$0xff]  ;;  %1408 = vadd.xlane.f32.xlu0 %v1407_v5  ;;  %v11768_v27 = vadd.f32 %v824_v26, %v536_v3 }
 0x148   : > { %17246 = vst [vmem:[#allocation136_spill] sm:$0xff] %v11756_v51  ;;  %17247 = vst [vmem:[#allocation137_spill] sm:$0xff] %v11760_v63  ;;  %v837_v20 = vld [vmem:[#allocation6 + $0x4b0] sm:$0xff]  ;;  %v838_v55 = vld [vmem:[#allocation6 + $0x4b8] sm:$0xff]  ;;  %v1427_v1 = vadd.f32 %v1426_v6, %v11742_v60 }
 0x149   : > { %v839_v4 = vld [vmem:[#allocation6 + $0x4c0] sm:$0xff]  ;;  %v1418_v39 = vadd.f32 %v1417_v9, %v11752_v35  ;;  %v554_v21 = vld [vmem:[#allocation3 + $0x4d8] sm:$0xff]  ;;  %v840_v28 = vld [vmem:[#allocation6 + $0x4c8] sm:$0xff]  ;;  %v11764_v59 = vadd.f32 %v837_v20, %v549_v0  ;;  %v11766_v7 = vadd.f32 %v838_v55, %v550_v44  ;;  %17250 = vst [vmem:[#allocation140_spill] sm:$0xff] %v11768_v27 }
 0x14a   : > { %v841_v50 = vld [vmem:[#allocation6 + $0x4d0] sm:$0xff]  ;;  %v842_v8 = vld [vmem:[#allocation6 + $0x4d8] sm:$0xff]  ;;  %v11770_v42 = vadd.f32 %v839_v4, %v551_v48  ;;  %v543_v41 = vld [vmem:[#allocation3 + $0x480] sm:$0xff]  ;;  %v1428_v5 = vadd.f32 %v1427_v1, %v11750_v37  ;;  %v11774_v60 = vadd.f32 %v840_v28, %v552_v34 }
 0x14b   : > { %17248 = vst [vmem:[#allocation138_spill] sm:$0xff] %v11764_v59  ;;  %17249 = vst [vmem:[#allocation139_spill] sm:$0xff] %v11766_v7  ;;  %v544_v57 = vld [vmem:[#allocation3 + $0x488] sm:$0xff]  ;;  %v1419_v6 = vadd.f32 %v1418_v39, %v11756_v51  ;;  %v1438_v9 = vadd.f32 %v11766_v7, %v11764_v59  ;;  %v545_v0 = vld [vmem:[#allocation3 + $0x490] sm:$0xff]  ;;  %v11778_v55 = vadd.f32 %v841_v50, %v553_v24 }
 0x14c   : > { %17251 = vst [vmem:[#allocation141_spill] sm:$0xff] %v11770_v42  ;;  %17252 = vst [vmem:[#allocation142_spill] sm:$0xff] %v11774_v60  ;;  %v546_v20 = vld [vmem:[#allocation3 + $0x498] sm:$0xff]  ;;  %v547_v44 = vld [vmem:[#allocation3 + $0x4a0] sm:$0xff]  ;;  %1429 = vadd.xlane.f32.xlu1 %v1428_v5  ;;  %v11786_v7 = vadd.f32 %v842_v8, %v554_v21 }
 0x14d   : > { %17253 = vst [vmem:[#allocation143_spill] sm:$0xff] %v11778_v55  ;;  %v831_v3 = vld [vmem:[#allocation6 + $0x480] sm:$0xff]  ;;  %v832_v26 = vld [vmem:[#allocation6 + $0x488] sm:$0xff]  ;;  %v833_v48 = vld [vmem:[#allocation6 + $0x490] sm:$0xff]  ;;  %v1420_v4 = vadd.f32 %v1419_v6, %v11760_v63  ;;  %v1439_v1 = vadd.f32 %v1438_v9, %v11770_v42 }
 0x14e   : > { %v548_v37 = vld [vmem:[#allocation3 + $0x4a8] sm:$0xff]  ;;  %v834_v39 = vld [vmem:[#allocation6 + $0x498] sm:$0xff]  ;;  %v835_v34 = vld [vmem:[#allocation6 + $0x4a0] sm:$0xff]  ;;  %v11782_v28 = vadd.f32 %v831_v3, %v543_v41  ;;  %v11784_v51 = vadd.f32 %v832_v26, %v544_v57  ;;  %17256 = vst [vmem:[#allocation146_spill] sm:$0xff] %v11786_v7  ;;  %v11788_v24 = vadd.f32 %v833_v48, %v545_v0 }
 0x14f   : > { %v836_v59 = vld [vmem:[#allocation6 + $0x4a8] sm:$0xff]  ;;  %v561_v50 = vld [vmem:[#allocation3 + $0x510] sm:$0xff]  ;;  %v562_v35 = vld [vmem:[#allocation3 + $0x518] sm:$0xff]  ;;  %v1421_v5 = vadd.f32 %v1420_v4, %v11768_v27  ;;  %v1440_v6 = vadd.f32 %v1439_v1, %v11774_v60  ;;  %v11792_v63 = vadd.f32 %v834_v39, %v546_v20  ;;  %v11796_v26 = vadd.f32 %v835_v34, %v547_v44 }
 0x150   : > { %17254 = vst [vmem:[#allocation144_spill] sm:$0xff] %v11782_v28  ;;  %17255 = vst [vmem:[#allocation145_spill] sm:$0xff] %v11784_v51  ;;  %v1431_v9 = vadd.f32 %v11784_v51, %v11782_v28  ;;  %v563_v41 = vld [vmem:[#allocation3 + $0x520] sm:$0xff]  ;;  %v564_v3 = vld [vmem:[#allocation3 + $0x528] sm:$0xff]  ;;  %v11804_v51 = vadd.f32 %v836_v59, %v548_v37 }
 0x151   : > { %17257 = vst [vmem:[#allocation147_spill] sm:$0xff] %v11788_v24  ;;  %17258 = vst [vmem:[#allocation148_spill] sm:$0xff] %v11792_v63  ;;  %v565_v57 = vld [vmem:[#allocation3 + $0x530] sm:$0xff]  ;;  %v850_v8 = vld [vmem:[#allocation6 + $0x518] sm:$0xff]  ;;  %1422 = vadd.xlane.f32.xlu0 %v1421_v5  ;;  %v1441_v48 = vadd.f32 %v1440_v6, %v11778_v55 }
 0x152   : > { %17259 = vst [vmem:[#allocation149_spill] sm:$0xff] %v11796_v26  ;;  %v849_v21 = vld [vmem:[#allocation6 + $0x510] sm:$0xff]  ;;  %v851_v0 = vld [vmem:[#allocation6 + $0x520] sm:$0xff]  ;;  %v1432_v4 = vadd.f32 %v1431_v9, %v11788_v24  ;;  %v566_v42 = vld [vmem:[#allocation3 + $0x538] sm:$0xff]  ;;  %v11802_v60 = vadd.f32 %v850_v8, %v562_v35 }
 0x153   : > { %v852_v1 = vld [vmem:[#allocation6 + $0x528] sm:$0xff]  ;;  %v853_v20 = vld [vmem:[#allocation6 + $0x530] sm:$0xff]  ;;  %v11800_v39 = vadd.f32 %v849_v21, %v561_v50  ;;  %17262 = vst [vmem:[#allocation152_spill] sm:$0xff] %v11804_v51  ;;  %v854_v28 = vld [vmem:[#allocation6 + $0x538] sm:$0xff]  ;;  %v11806_v44 = vadd.f32 %v851_v0, %v563_v41  ;;  %v1442_v5 = vadd.f32 %v1441_v48, %v11786_v7 }
 0x154   : > { %17261 = vst [vmem:[#allocation151_spill] sm:$0xff] %v11802_v60  ;;  %v555_v34 = vld [vmem:[#allocation3 + $0x4e0] sm:$0xff]  ;;  %v556_v27 = vld [vmem:[#allocation3 + $0x4e8] sm:$0xff]  ;;  %v1433_v6 = vadd.f32 %v1432_v4, %v11792_v63  ;;  %v11810_v55 = vadd.f32 %v852_v1, %v564_v3  ;;  %v557_v50 = vld [vmem:[#allocation3 + $0x4f0] sm:$0xff]  ;;  %v11814_v8 = vadd.f32 %v853_v20, %v565_v57 }
 0x155   : > { %17260 = vst [vmem:[#allocation150_spill] sm:$0xff] %v11800_v39  ;;  %17263 = vst [vmem:[#allocation153_spill] sm:$0xff] %v11806_v44  ;;  %v1452_v9 = vadd.f32 %v11802_v60, %v11800_v39  ;;  %v558_v21 = vld [vmem:[#allocation3 + $0x4f8] sm:$0xff]  ;;  %v559_v35 = vld [vmem:[#allocation3 + $0x500] sm:$0xff]  ;;  %1443 = vadd.xlane.f32.xlu1 %v1442_v5  ;;  %v11822_v60 = vadd.f32 %v854_v28, %v566_v42 }
 0x156   : > { %17264 = vst [vmem:[#allocation154_spill] sm:$0xff] %v11810_v55  ;;  %17265 = vst [vmem:[#allocation155_spill] sm:$0xff] %v11814_v8  ;;  %v843_v37 = vld [vmem:[#allocation6 + $0x4e0] sm:$0xff]  ;;  %v844_v59 = vld [vmem:[#allocation6 + $0x4e8] sm:$0xff]  ;;  %v1434_v0 = vadd.f32 %v1433_v6, %v11796_v26 }
 0x157   : > { %v845_v41 = vld [vmem:[#allocation6 + $0x4f0] sm:$0xff]  ;;  %v1453_v48 = vadd.f32 %v1452_v9, %v11806_v44  ;;  %v560_v7 = vld [vmem:[#allocation3 + $0x508] sm:$0xff]  ;;  %v846_v4 = vld [vmem:[#allocation6 + $0x4f8] sm:$0xff]  ;;  %v11818_v1 = vadd.f32 %v843_v37, %v555_v34  ;;  %v11820_v63 = vadd.f32 %v844_v59, %v556_v27  ;;  %17268 = vst [vmem:[#allocation158_spill] sm:$0xff] %v11822_v60 }
 0x158   : > { %v847_v3 = vld [vmem:[#allocation6 + $0x500] sm:$0xff]  ;;  %v848_v39 = vld [vmem:[#allocation6 + $0x508] sm:$0xff]  ;;  %v11824_v57 = vadd.f32 %v845_v41, %v557_v50  ;;  %v573_v20 = vld [vmem:[#allocation3 + $0x570] sm:$0xff]  ;;  %v1435_v5 = vadd.f32 %v1434_v0, %v11804_v51  ;;  %v11828_v26 = vadd.f32 %v846_v4, %v558_v21 }
 0x159   : > { %17266 = vst [vmem:[#allocation156_spill] sm:$0xff] %v11818_v1  ;;  %17267 = vst [vmem:[#allocation157_spill] sm:$0xff] %v11820_v63  ;;  %v574_v24 = vld [vmem:[#allocation3 + $0x578] sm:$0xff]  ;;  %v1454_v6 = vadd.f32 %v1453_v48, %v11810_v55  ;;  %v1445_v9 = vadd.f32 %v11820_v63, %v11818_v1  ;;  %v575_v34 = vld [vmem:[#allocation3 + $0x580] sm:$0xff]  ;;  %v11832_v59 = vadd.f32 %v847_v3, %v559_v35 }
 0x15a   : > { %17269 = vst [vmem:[#allocation159_spill] sm:$0xff] %v11824_v57  ;;  %17270 = vst [vmem:[#allocation160_spill] sm:$0xff] %v11828_v26  ;;  %v576_v37 = vld [vmem:[#allocation3 + $0x588] sm:$0xff]  ;;  %v577_v27 = vld [vmem:[#allocation3 + $0x590] sm:$0xff]  ;;  %1436 = vadd.xlane.f32.xlu0 %v1435_v5  ;;  %v11840_v63 = vadd.f32 %v848_v39, %v560_v7 }
 0x15b   : > { %17271 = vst [vmem:[#allocation161_spill] sm:$0xff] %v11832_v59  ;;  %v861_v42 = vld [vmem:[#allocation6 + $0x570] sm:$0xff]  ;;  %v862_v28 = vld [vmem:[#allocation6 + $0x578] sm:$0xff]  ;;  %v863_v50 = vld [vmem:[#allocation6 + $0x580] sm:$0xff]  ;;  %v1455_v41 = vadd.f32 %v1454_v6, %v11814_v8  ;;  %v1446_v0 = vadd.f32 %v1445_v9, %v11824_v57 }
 0x15c   : > { %v578_v44 = vld [vmem:[#allocation3 + $0x598] sm:$0xff]  ;;  %v864_v48 = vld [vmem:[#allocation6 + $0x588] sm:$0xff]  ;;  %v865_v21 = vld [vmem:[#allocation6 + $0x590] sm:$0xff]  ;;  %v11836_v4 = vadd.f32 %v861_v42, %v573_v20  ;;  %v11838_v55 = vadd.f32 %v862_v28, %v574_v24  ;;  %17274 = vst [vmem:[#allocation164_spill] sm:$0xff] %v11840_v63  ;;  %v11842_v35 = vadd.f32 %v863_v50, %v575_v34 }
 0x15d   : > { %v866_v1 = vld [vmem:[#allocation6 + $0x598] sm:$0xff]  ;;  %v567_v3 = vld [vmem:[#allocation3 + $0x540] sm:$0xff]  ;;  %v568_v51 = vld [vmem:[#allocation3 + $0x548] sm:$0xff]  ;;  %v1456_v5 = vadd.f32 %v1455_v41, %v11822_v60  ;;  %v1447_v6 = vadd.f32 %v1446_v0, %v11828_v26  ;;  %v11846_v8 = vadd.f32 %v864_v48, %v576_v37  ;;  %v11850_v28 = vadd.f32 %v865_v21, %v577_v27 }
 0x15e   : > { %17272 = vst [vmem:[#allocation162_spill] sm:$0xff] %v11836_v4  ;;  %17273 = vst [vmem:[#allocation163_spill] sm:$0xff] %v11838_v55  ;;  %v1466_v9 = vadd.f32 %v11838_v55, %v11836_v4  ;;  %v569_v20 = vld [vmem:[#allocation3 + $0x550] sm:$0xff]  ;;  %v570_v42 = vld [vmem:[#allocation3 + $0x558] sm:$0xff]  ;;  %v11858_v55 = vadd.f32 %v866_v1, %v578_v44 }
 0x15f   : > { %17275 = vst [vmem:[#allocation165_spill] sm:$0xff] %v11842_v35  ;;  %17276 = vst [vmem:[#allocation166_spill] sm:$0xff] %v11846_v8  ;;  %v571_v24 = vld [vmem:[#allocation3 + $0x560] sm:$0xff]  ;;  %v856_v39 = vld [vmem:[#allocation6 + $0x548] sm:$0xff]  ;;  %1457 = vadd.xlane.f32.xlu1 %v1456_v5  ;;  %v1448_v50 = vadd.f32 %v1447_v6, %v11832_v59 }
 0x160   : > { %17277 = vst [vmem:[#allocation167_spill] sm:$0xff] %v11850_v28  ;;  %v855_v7 = vld [vmem:[#allocation6 + $0x540] sm:$0xff]  ;;  %v857_v34 = vld [vmem:[#allocation6 + $0x550] sm:$0xff]  ;;  %v1467_v41 = vadd.f32 %v1466_v9, %v11842_v35  ;;  %v572_v60 = vld [vmem:[#allocation3 + $0x568] sm:$0xff]  ;;  %v11856_v26 = vadd.f32 %v856_v39, %v568_v51 }
 0x161   : > { %v858_v0 = vld [vmem:[#allocation6 + $0x558] sm:$0xff]  ;;  %v859_v37 = vld [vmem:[#allocation6 + $0x560] sm:$0xff]  ;;  %v11854_v48 = vadd.f32 %v855_v7, %v567_v3  ;;  %17280 = vst [vmem:[#allocation170_spill] sm:$0xff] %v11858_v55  ;;  %v860_v4 = vld [vmem:[#allocation6 + $0x568] sm:$0xff]  ;;  %v11860_v27 = vadd.f32 %v857_v34, %v569_v20  ;;  %v1449_v5 = vadd.f32 %v1448_v50, %v11840_v63 }
 0x162   : > { %17279 = vst [vmem:[#allocation169_spill] sm:$0xff] %v11856_v26  ;;  %v585_v21 = vld [vmem:[#allocation3 + $0x5d0] sm:$0xff]  ;;  %v586_v57 = vld [vmem:[#allocation3 + $0x5d8] sm:$0xff]  ;;  %v1468_v6 = vadd.f32 %v1467_v41, %v11846_v8  ;;  %v11864_v59 = vadd.f32 %v858_v0, %v570_v42  ;;  %v587_v3 = vld [vmem:[#allocation3 + $0x5e0] sm:$0xff]  ;;  %v11868_v39 = vadd.f32 %v859_v37, %v571_v24 }
 0x163   : > { %17278 = vst [vmem:[#allocation168_spill] sm:$0xff] %v11854_v48  ;;  %17281 = vst [vmem:[#allocation171_spill] sm:$0xff] %v11860_v27  ;;  %v1459_v9 = vadd.f32 %v11856_v26, %v11854_v48  ;;  %v588_v7 = vld [vmem:[#allocation3 + $0x5e8] sm:$0xff]  ;;  %v589_v51 = vld [vmem:[#allocation3 + $0x5f0] sm:$0xff]  ;;  %1450 = vadd.xlane.f32.xlu0 %v1449_v5  ;;  %v11876_v26 = vadd.f32 %v860_v4, %v572_v60 }
 0x164   : > { %17282 = vst [vmem:[#allocation172_spill] sm:$0xff] %v11864_v59  ;;  %17283 = vst [vmem:[#allocation173_spill] sm:$0xff] %v11868_v39  ;;  %v873_v44 = vld [vmem:[#allocation6 + $0x5d0] sm:$0xff]  ;;  %v874_v1 = vld [vmem:[#allocation6 + $0x5d8] sm:$0xff]  ;;  %v1469_v34 = vadd.f32 %v1468_v6, %v11850_v28 }
 0x165   : > { %v875_v20 = vld [vmem:[#allocation6 + $0x5e0] sm:$0xff]  ;;  %v1460_v50 = vadd.f32 %v1459_v9, %v11860_v27  ;;  %v590_v35 = vld [vmem:[#allocation3 + $0x5f8] sm:$0xff]  ;;  %v876_v41 = vld [vmem:[#allocation6 + $0x5e8] sm:$0xff]  ;;  %v11872_v0 = vadd.f32 %v873_v44, %v585_v21  ;;  %v11874_v8 = vadd.f32 %v874_v1, %v586_v57  ;;  %17286 = vst [vmem:[#allocation176_spill] sm:$0xff] %v11876_v26 }
 0x166   : > { %v877_v42 = vld [vmem:[#allocation6 + $0x5f0] sm:$0xff]  ;;  %v878_v48 = vld [vmem:[#allocation6 + $0x5f8] sm:$0xff]  ;;  %v11878_v24 = vadd.f32 %v875_v20, %v587_v3  ;;  %v579_v37 = vld [vmem:[#allocation3 + $0x5a0] sm:$0xff]  ;;  %v1470_v5 = vadd.f32 %v1469_v34, %v11858_v55  ;;  %v11882_v28 = vadd.f32 %v876_v41, %v588_v7 }
 0x167   : > { %17284 = vst [vmem:[#allocation174_spill] sm:$0xff] %v11872_v0  ;;  %17285 = vst [vmem:[#allocation175_spill] sm:$0xff] %v11874_v8  ;;  %v580_v63 = vld [vmem:[#allocation3 + $0x5a8] sm:$0xff]  ;;  %v1461_v6 = vadd.f32 %v1460_v50, %v11864_v59  ;;  %v1480_v9 = vadd.f32 %v11874_v8, %v11872_v0  ;;  %v581_v21 = vld [vmem:[#allocation3 + $0x5b0] sm:$0xff]  ;;  %v11886_v1 = vadd.f32 %v877_v42, %v589_v51 }
 0x168   : > { %17287 = vst [vmem:[#allocation177_spill] sm:$0xff] %v11878_v24  ;;  %17288 = vst [vmem:[#allocation178_spill] sm:$0xff] %v11882_v28  ;;  %v582_v44 = vld [vmem:[#allocation3 + $0x5b8] sm:$0xff]  ;;  %v583_v57 = vld [vmem:[#allocation3 + $0x5c0] sm:$0xff]  ;;  %1471 = vadd.xlane.f32.xlu1 %v1470_v5  ;;  %v11894_v8 = vadd.f32 %v878_v48, %v590_v35 }
 0x169   : > { %17289 = vst [vmem:[#allocation179_spill] sm:$0xff] %v11886_v1  ;;  %v867_v60 = vld [vmem:[#allocation6 + $0x5a0] sm:$0xff]  ;;  %v868_v4 = vld [vmem:[#allocation6 + $0x5a8] sm:$0xff]  ;;  %v869_v3 = vld [vmem:[#allocation6 + $0x5b0] sm:$0xff]  ;;  %v1462_v20 = vadd.f32 %v1461_v6, %v11868_v39  ;;  %v1481_v34 = vadd.f32 %v1480_v9, %v11878_v24 }
 0x16a   : > { %v584_v55 = vld [vmem:[#allocation3 + $0x5c8] sm:$0xff]  ;;  %v870_v50 = vld [vmem:[#allocation6 + $0x5b8] sm:$0xff]  ;;  %v871_v7 = vld [vmem:[#allocation6 + $0x5c0] sm:$0xff]  ;;  %v11890_v41 = vadd.f32 %v867_v60, %v579_v37  ;;  %v11892_v59 = vadd.f32 %v868_v4, %v580_v63  ;;  %17292 = vst [vmem:[#allocation182_spill] sm:$0xff] %v11894_v8  ;;  %v11896_v51 = vadd.f32 %v869_v3, %v581_v21 }
 0x16b   : > { %v872_v0 = vld [vmem:[#allocation6 + $0x5c8] sm:$0xff]  ;;  %v597_v42 = vld [vmem:[#allocation3 + $0x630] sm:$0xff]  ;;  %v598_v27 = vld [vmem:[#allocation3 + $0x638] sm:$0xff]  ;;  %v1463_v5 = vadd.f32 %v1462_v20, %v11876_v26  ;;  %v1482_v6 = vadd.f32 %v1481_v34, %v11882_v28  ;;  %v11900_v39 = vadd.f32 %v870_v50, %v582_v44  ;;  %v11904_v4 = vadd.f32 %v871_v7, %v583_v57 }
 0x16c   : > { %17290 = vst [vmem:[#allocation180_spill] sm:$0xff] %v11890_v41  ;;  %17291 = vst [vmem:[#allocation181_spill] sm:$0xff] %v11892_v59  ;;  %v1473_v9 = vadd.f32 %v11892_v59, %v11890_v41  ;;  %v599_v37 = vld [vmem:[#allocation3 + $0x640] sm:$0xff]  ;;  %v600_v60 = vld [vmem:[#allocation3 + $0x648] sm:$0xff]  ;;  %v11912_v59 = vadd.f32 %v872_v0, %v584_v55 }
 0x16d   : > { %17293 = vst [vmem:[#allocation183_spill] sm:$0xff] %v11896_v51  ;;  %17294 = vst [vmem:[#allocation184_spill] sm:$0xff] %v11900_v39  ;;  %v601_v63 = vld [vmem:[#allocation3 + $0x650] sm:$0xff]  ;;  %v886_v48 = vld [vmem:[#allocation6 + $0x638] sm:$0xff]  ;;  %1464 = vadd.xlane.f32.xlu0 %v1463_v5  ;;  %v1483_v3 = vadd.f32 %v1482_v6, %v11886_v1 }
 0x16e   : > { %17295 = vst [vmem:[#allocation185_spill] sm:$0xff] %v11904_v4  ;;  %v885_v35 = vld [vmem:[#allocation6 + $0x630] sm:$0xff]  ;;  %v887_v21 = vld [vmem:[#allocation6 + $0x640] sm:$0xff]  ;;  %v1474_v20 = vadd.f32 %v1473_v9, %v11896_v51  ;;  %v602_v24 = vld [vmem:[#allocation3 + $0x658] sm:$0xff]  ;;  %v11910_v28 = vadd.f32 %v886_v48, %v598_v27 }
 0x16f   : > { %v888_v34 = vld [vmem:[#allocation6 + $0x648] sm:$0xff]  ;;  %v889_v44 = vld [vmem:[#allocation6 + $0x650] sm:$0xff]  ;;  %v11908_v50 = vadd.f32 %v885_v35, %v597_v42  ;;  %17298 = vst [vmem:[#allocation188_spill] sm:$0xff] %v11912_v59  ;;  %v890_v41 = vld [vmem:[#allocation6 + $0x658] sm:$0xff]  ;;  %v11914_v57 = vadd.f32 %v887_v21, %v599_v37  ;;  %v1484_v5 = vadd.f32 %v1483_v3, %v11894_v8 }
 0x170   : > { %17297 = vst [vmem:[#allocation187_spill] sm:$0xff] %v11910_v28  ;;  %v591_v7 = vld [vmem:[#allocation3 + $0x600] sm:$0xff]  ;;  %v592_v26 = vld [vmem:[#allocation3 + $0x608] sm:$0xff]  ;;  %v1475_v6 = vadd.f32 %v1474_v20, %v11900_v39  ;;  %v11918_v1 = vadd.f32 %v888_v34, %v600_v60  ;;  %v593_v42 = vld [vmem:[#allocation3 + $0x610] sm:$0xff]  ;;  %v11922_v48 = vadd.f32 %v889_v44, %v601_v63 }
 0x171   : > { %17296 = vst [vmem:[#allocation186_spill] sm:$0xff] %v11908_v50  ;;  %17299 = vst [vmem:[#allocation189_spill] sm:$0xff] %v11914_v57  ;;  %v1494_v9 = vadd.f32 %v11910_v28, %v11908_v50  ;;  %v594_v35 = vld [vmem:[#allocation3 + $0x618] sm:$0xff]  ;;  %v595_v27 = vld [vmem:[#allocation3 + $0x620] sm:$0xff]  ;;  %1485 = vadd.xlane.f32.xlu1 %v1484_v5  ;;  %v11930_v28 = vadd.f32 %v890_v41, %v602_v24 }
 0x172   : > { %17300 = vst [vmem:[#allocation190_spill] sm:$0xff] %v11918_v1  ;;  %17301 = vst [vmem:[#allocation191_spill] sm:$0xff] %v11922_v48  ;;  %v879_v55 = vld [vmem:[#allocation6 + $0x600] sm:$0xff]  ;;  %v880_v0 = vld [vmem:[#allocation6 + $0x608] sm:$0xff]  ;;  %v1476_v21 = vadd.f32 %v1475_v6, %v11904_v4 }
 0x173   : > { %v881_v37 = vld [vmem:[#allocation6 + $0x610] sm:$0xff]  ;;  %v1495_v3 = vadd.f32 %v1494_v9, %v11914_v57  ;;  %v596_v8 = vld [vmem:[#allocation3 + $0x628] sm:$0xff]  ;;  %v882_v20 = vld [vmem:[#allocation6 + $0x618] sm:$0xff]  ;;  %v11926_v34 = vadd.f32 %v879_v55, %v591_v7  ;;  %v11928_v39 = vadd.f32 %v880_v0, %v592_v26  ;;  %17304 = vst [vmem:[#allocation194_spill] sm:$0xff] %v11930_v28 }
 0x174   : > { %v883_v60 = vld [vmem:[#allocation6 + $0x620] sm:$0xff]  ;;  %v884_v50 = vld [vmem:[#allocation6 + $0x628] sm:$0xff]  ;;  %v11932_v63 = vadd.f32 %v881_v37, %v593_v42  ;;  %v609_v44 = vld [vmem:[#allocation3 + $0x690] sm:$0xff]  ;;  %v1477_v5 = vadd.f32 %v1476_v21, %v11912_v59  ;;  %v11936_v4 = vadd.f32 %v882_v20, %v594_v35 }
 0x175   : > { %17302 = vst [vmem:[#allocation192_spill] sm:$0xff] %v11926_v34  ;;  %17303 = vst [vmem:[#allocation193_spill] sm:$0xff] %v11928_v39  ;;  %v610_v51 = vld [vmem:[#allocation3 + $0x698] sm:$0xff]  ;;  %v1496_v6 = vadd.f32 %v1495_v3, %v11918_v1  ;;  %v1487_v9 = vadd.f32 %v11928_v39, %v11926_v34  ;;  %v611_v7 = vld [vmem:[#allocation3 + $0x6a0] sm:$0xff]  ;;  %v11940_v0 = vadd.f32 %v883_v60, %v595_v27 }
 0x176   : > { %17305 = vst [vmem:[#allocation195_spill] sm:$0xff] %v11932_v63  ;;  %17306 = vst [vmem:[#allocation196_spill] sm:$0xff] %v11936_v4  ;;  %v612_v55 = vld [vmem:[#allocation3 + $0x6a8] sm:$0xff]  ;;  %v613_v26 = vld [vmem:[#allocation3 + $0x6b0] sm:$0xff]  ;;  %1478 = vadd.xlane.f32.xlu0 %v1477_v5  ;;  %v11948_v39 = vadd.f32 %v884_v50, %v596_v8 }
 0x177   : > { %17307 = vst [vmem:[#allocation197_spill] sm:$0xff] %v11940_v0  ;;  %v897_v24 = vld [vmem:[#allocation6 + $0x690] sm:$0xff]  ;;  %v898_v41 = vld [vmem:[#allocation6 + $0x698] sm:$0xff]  ;;  %v899_v42 = vld [vmem:[#allocation6 + $0x6a0] sm:$0xff]  ;;  %v1497_v37 = vadd.f32 %v1496_v6, %v11922_v48  ;;  %v1488_v21 = vadd.f32 %v1487_v9, %v11932_v63 }
 0x178   : > { %v614_v57 = vld [vmem:[#allocation3 + $0x6b8] sm:$0xff]  ;;  %v900_v3 = vld [vmem:[#allocation6 + $0x6a8] sm:$0xff]  ;;  %v901_v35 = vld [vmem:[#allocation6 + $0x6b0] sm:$0xff]  ;;  %v11944_v20 = vadd.f32 %v897_v24, %v609_v44  ;;  %v11946_v1 = vadd.f32 %v898_v41, %v610_v51  ;;  %17310 = vst [vmem:[#allocation200_spill] sm:$0xff] %v11948_v39  ;;  %v11950_v27 = vadd.f32 %v899_v42, %v611_v7 }
 0x179   : > { %v902_v34 = vld [vmem:[#allocation6 + $0x6b8] sm:$0xff]  ;;  %v603_v60 = vld [vmem:[#allocation3 + $0x660] sm:$0xff]  ;;  %v604_v59 = vld [vmem:[#allocation3 + $0x668] sm:$0xff]  ;;  %v1498_v5 = vadd.f32 %v1497_v37, %v11930_v28  ;;  %v1489_v6 = vadd.f32 %v1488_v21, %v11936_v4  ;;  %v11954_v48 = vadd.f32 %v900_v3, %v612_v55  ;;  %v11958_v41 = vadd.f32 %v901_v35, %v613_v26 }
 0x17a   : > { %17308 = vst [vmem:[#allocation198_spill] sm:$0xff] %v11944_v20  ;;  %17309 = vst [vmem:[#allocation199_spill] sm:$0xff] %v11946_v1  ;;  %v1508_v9 = vadd.f32 %v11946_v1, %v11944_v20  ;;  %v605_v44 = vld [vmem:[#allocation3 + $0x670] sm:$0xff]  ;;  %v606_v24 = vld [vmem:[#allocation3 + $0x678] sm:$0xff]  ;;  %v11966_v1 = vadd.f32 %v902_v34, %v614_v57  ;;  %v1269_v46 = vpop.xlane.xlu0 %1268 }
 0x17b   : > { %17311 = vst [vmem:[#allocation201_spill] sm:$0xff] %v11950_v27  ;;  %17312 = vst [vmem:[#allocation202_spill] sm:$0xff] %v11954_v48  ;;  %v607_v51 = vld [vmem:[#allocation3 + $0x680] sm:$0xff]  ;;  %v892_v50 = vld [vmem:[#allocation6 + $0x668] sm:$0xff]  ;;  %1499 = vadd.xlane.f32.xlu1 %v1498_v5  ;;  %v1490_v42 = vadd.f32 %v1489_v6, %v11940_v0 }
 0x17c   : > { %17313 = vst [vmem:[#allocation203_spill] sm:$0xff] %v11958_v41  ;;  %v891_v8 = vld [vmem:[#allocation6 + $0x660] sm:$0xff]  ;;  %v893_v7 = vld [vmem:[#allocation6 + $0x670] sm:$0xff]  ;;  %v1509_v37 = vadd.f32 %v1508_v9, %v11950_v27  ;;  %v608_v28 = vld [vmem:[#allocation3 + $0x688] sm:$0xff]  ;;  %v11964_v4 = vadd.f32 %v892_v50, %v604_v59 }
 0x17d   : > { %v894_v21 = vld [vmem:[#allocation6 + $0x678] sm:$0xff]  ;;  %v895_v55 = vld [vmem:[#allocation6 + $0x680] sm:$0xff]  ;;  %v11962_v3 = vadd.f32 %v891_v8, %v603_v60  ;;  %17316 = vst [vmem:[#allocation206_spill] sm:$0xff] %v11966_v1  ;;  %v896_v20 = vld [vmem:[#allocation6 + $0x688] sm:$0xff]  ;;  %v11968_v26 = vadd.f32 %v893_v7, %v605_v44  ;;  %v1491_v5 = vadd.f32 %v1490_v42, %v11948_v39 }
 0x17e   : > { %17315 = vst [vmem:[#allocation205_spill] sm:$0xff] %v11964_v4  ;;  %v621_v35 = vld [vmem:[#allocation3 + $0x6f0] sm:$0xff]  ;;  %v622_v63 = vld [vmem:[#allocation3 + $0x6f8] sm:$0xff]  ;;  %v1510_v6 = vadd.f32 %v1509_v37, %v11954_v48  ;;  %v11972_v0 = vadd.f32 %v894_v21, %v606_v24  ;;  %v623_v60 = vld [vmem:[#allocation3 + $0x700] sm:$0xff]  ;;  %v11976_v50 = vadd.f32 %v895_v55, %v607_v51 }
 0x17f   : > { %17314 = vst [vmem:[#allocation204_spill] sm:$0xff] %v11962_v3  ;;  %17317 = vst [vmem:[#allocation207_spill] sm:$0xff] %v11968_v26  ;;  %v1501_v9 = vadd.f32 %v11964_v4, %v11962_v3  ;;  %v624_v8 = vld [vmem:[#allocation3 + $0x708] sm:$0xff]  ;;  %v625_v59 = vld [vmem:[#allocation3 + $0x710] sm:$0xff]  ;;  %1492 = vadd.xlane.f32.xlu0 %v1491_v5  ;;  %v11984_v4 = vadd.f32 %v896_v20, %v608_v28 }
 0x180   : > { %17318 = vst [vmem:[#allocation208_spill] sm:$0xff] %v11972_v0  ;;  %17319 = vst [vmem:[#allocation209_spill] sm:$0xff] %v11976_v50  ;;  %v909_v57 = vld [vmem:[#allocation6 + $0x6f0] sm:$0xff]  ;;  %v910_v34 = vld [vmem:[#allocation6 + $0x6f8] sm:$0xff]  ;;  %v1511_v7 = vadd.f32 %v1510_v6, %v11958_v41 }
 0x181   : > { %v911_v44 = vld [vmem:[#allocation6 + $0x700] sm:$0xff]  ;;  %v1502_v42 = vadd.f32 %v1501_v9, %v11968_v26  ;;  %v626_v27 = vld [vmem:[#allocation3 + $0x718] sm:$0xff]  ;;  %v912_v37 = vld [vmem:[#allocation6 + $0x708] sm:$0xff]  ;;  %v11980_v21 = vadd.f32 %v909_v57, %v621_v35  ;;  %v11982_v48 = vadd.f32 %v910_v34, %v622_v63  ;;  %17322 = vst [vmem:[#allocation212_spill] sm:$0xff] %v11984_v4 }
 0x182   : > { %v913_v24 = vld [vmem:[#allocation6 + $0x710] sm:$0xff]  ;;  %v914_v3 = vld [vmem:[#allocation6 + $0x718] sm:$0xff]  ;;  %v11986_v51 = vadd.f32 %v911_v44, %v623_v60  ;;  %v615_v55 = vld [vmem:[#allocation3 + $0x6c0] sm:$0xff]  ;;  %v1512_v5 = vadd.f32 %v1511_v7, %v11966_v1  ;;  %v11990_v41 = vadd.f32 %v912_v37, %v624_v8 }
 0x183   : > { %17320 = vst [vmem:[#allocation210_spill] sm:$0xff] %v11980_v21  ;;  %17321 = vst [vmem:[#allocation211_spill] sm:$0xff] %v11982_v48  ;;  %v616_v39 = vld [vmem:[#allocation3 + $0x6c8] sm:$0xff]  ;;  %v1503_v6 = vadd.f32 %v1502_v42, %v11972_v0  ;;  %v1522_v9 = vadd.f32 %v11982_v48, %v11980_v21  ;;  %v617_v35 = vld [vmem:[#allocation3 + $0x6d0] sm:$0xff]  ;;  %v11994_v34 = vadd.f32 %v913_v24, %v625_v59 }
 0x184   : > { %17323 = vst [vmem:[#allocation213_spill] sm:$0xff] %v11986_v51  ;;  %17324 = vst [vmem:[#allocation214_spill] sm:$0xff] %v11990_v41  ;;  %v618_v57 = vld [vmem:[#allocation3 + $0x6d8] sm:$0xff]  ;;  %v619_v63 = vld [vmem:[#allocation3 + $0x6e0] sm:$0xff]  ;;  %1513 = vadd.xlane.f32.xlu1 %v1512_v5  ;;  %v12002_v48 = vadd.f32 %v914_v3, %v626_v27 }
 0x185   : > { %17325 = vst [vmem:[#allocation215_spill] sm:$0xff] %v11994_v34  ;;  %v903_v28 = vld [vmem:[#allocation6 + $0x6c0] sm:$0xff]  ;;  %v904_v20 = vld [vmem:[#allocation6 + $0x6c8] sm:$0xff]  ;;  %v905_v60 = vld [vmem:[#allocation6 + $0x6d0] sm:$0xff]  ;;  %v1504_v44 = vadd.f32 %v1503_v6, %v11976_v50  ;;  %v1523_v7 = vadd.f32 %v1522_v9, %v11986_v51 }
 0x186   : > { %v620_v1 = vld [vmem:[#allocation3 + $0x6e8] sm:$0xff]  ;;  %v906_v42 = vld [vmem:[#allocation6 + $0x6d8] sm:$0xff]  ;;  %v907_v8 = vld [vmem:[#allocation6 + $0x6e0] sm:$0xff]  ;;  %v11998_v37 = vadd.f32 %v903_v28, %v615_v55  ;;  %v12000_v0 = vadd.f32 %v904_v20, %v616_v39  ;;  %17328 = vst [vmem:[#allocation218_spill] sm:$0xff] %v12002_v48  ;;  %v12004_v59 = vadd.f32 %v905_v60, %v617_v35 }
 0x187   : > { %v908_v21 = vld [vmem:[#allocation6 + $0x6e8] sm:$0xff]  ;;  %v633_v24 = vld [vmem:[#allocation3 + $0x750] sm:$0xff]  ;;  %v634_v26 = vld [vmem:[#allocation3 + $0x758] sm:$0xff]  ;;  %v1505_v5 = vadd.f32 %v1504_v44, %v11984_v4  ;;  %v1524_v6 = vadd.f32 %v1523_v7, %v11990_v41  ;;  %v12008_v50 = vadd.f32 %v906_v42, %v618_v57  ;;  %v12012_v20 = vadd.f32 %v907_v8, %v619_v63 }
 0x188   : > { %17326 = vst [vmem:[#allocation216_spill] sm:$0xff] %v11998_v37  ;;  %17327 = vst [vmem:[#allocation217_spill] sm:$0xff] %v12000_v0  ;;  %v1515_v9 = vadd.f32 %v12000_v0, %v11998_v37  ;;  %v635_v55 = vld [vmem:[#allocation3 + $0x760] sm:$0xff]  ;;  %v636_v28 = vld [vmem:[#allocation3 + $0x768] sm:$0xff]  ;;  %v12020_v37 = vadd.f32 %v908_v21, %v620_v1 }
 0x189   : > { %17329 = vst [vmem:[#allocation219_spill] sm:$0xff] %v12004_v59  ;;  %17330 = vst [vmem:[#allocation220_spill] sm:$0xff] %v12008_v50  ;;  %v637_v39 = vld [vmem:[#allocation3 + $0x770] sm:$0xff]  ;;  %v922_v3 = vld [vmem:[#allocation6 + $0x758] sm:$0xff]  ;;  %1506 = vadd.xlane.f32.xlu0 %v1505_v5  ;;  %v1525_v60 = vadd.f32 %v1524_v6, %v11994_v34  ;;  %v1283_v5 = vpop.xlane.xlu1 %1282 }
 0x18a   : > { %17331 = vst [vmem:[#allocation221_spill] sm:$0xff] %v12012_v20  ;;  %v921_v27 = vld [vmem:[#allocation6 + $0x750] sm:$0xff]  ;;  %v923_v35 = vld [vmem:[#allocation6 + $0x760] sm:$0xff]  ;;  %v1516_v44 = vadd.f32 %v1515_v9, %v12004_v59  ;;  %v638_v51 = vld [vmem:[#allocation3 + $0x778] sm:$0xff]  ;;  %v12018_v0 = vadd.f32 %v922_v3, %v634_v26  ;;  %v12032_v59 = vmul.f32 0.0013020834, %v1283_v5 }
 0x18b   : > { %v924_v7 = vld [vmem:[#allocation6 + $0x768] sm:$0xff]  ;;  %v925_v57 = vld [vmem:[#allocation6 + $0x770] sm:$0xff]  ;;  %v926_v42 = vld [vmem:[#allocation6 + $0x778] sm:$0xff]  ;;  %v12016_v41 = vadd.f32 %v921_v27, %v633_v24  ;;  %17334 = vst [vmem:[#allocation224_spill] sm:$0xff] %v12020_v37  ;;  %v12022_v63 = vadd.f32 %v923_v35, %v635_v55  ;;  %v1526_v6 = vadd.f32 %v1525_v60, %v12002_v48 }
 0x18c   : > { %17333 = vst [vmem:[#allocation223_spill] sm:$0xff] %v12018_v0  ;;  %v627_v8 = vld [vmem:[#allocation3 + $0x720] sm:$0xff]  ;;  %v628_v4 = vld [vmem:[#allocation3 + $0x728] sm:$0xff]  ;;  %v629_v58 = vld [vmem:[#allocation3 + $0x730] sm:$0xff]  ;;  %v1517_v9 = vadd.f32 %v1516_v44, %v12008_v50  ;;  %v12026_v34 = vadd.f32 %v924_v7, %v636_v28  ;;  %v12030_v1 = vadd.f32 %v925_v57, %v637_v39 }
 0x18d   : > { %17332 = vst [vmem:[#allocation222_spill] sm:$0xff] %v12016_v41  ;;  %17335 = vst [vmem:[#allocation225_spill] sm:$0xff] %v12022_v63  ;;  %v1536_v24 = vadd.f32 %v12018_v0, %v12016_v41  ;;  %v630_v27 = vld [vmem:[#allocation3 + $0x738] sm:$0xff]  ;;  %v631_v26 = vld [vmem:[#allocation3 + $0x740] sm:$0xff]  ;;  %1527 = vadd.xlane.f32.xlu1 %v1526_v6  ;;  %v12040_v41 = vadd.f32 %v926_v42, %v638_v51 }
 0x18e   : > { %17336 = vst [vmem:[#allocation226_spill] sm:$0xff] %v12026_v34  ;;  %v632_v3 = vld [vmem:[#allocation3 + $0x748] sm:$0xff]  ;;  %17337 = vst [vmem:[#allocation227_spill] sm:$0xff] %v12030_v1  ;;  %v915_v21 = vld [vmem:[#allocation6 + $0x720] sm:$0xff]  ;;  %v1518_v60 = vadd.f32 %v1517_v9, %v12012_v20  ;;  %v12054_v20 = vmul.f32 0.0013020834, %v1269_v46 }
 0x18f   : > { %v916_v55 = vld [vmem:[#allocation6 + $0x728] sm:$0xff]  ;;  %v917_v35 = vld [vmem:[#allocation6 + $0x730] sm:$0xff]  ;;  %v1537_v44 = vadd.f32 %v1536_v24, %v12022_v63  ;;  %v918_v28 = vld [vmem:[#allocation6 + $0x738] sm:$0xff]  ;;  %v12036_v50 = vadd.f32 %v915_v21, %v627_v8  ;;  %17340 = vst [vmem:[#allocation230_spill] sm:$0xff] %v12040_v41 }
 0x190   : > { %v919_v7 = vld [vmem:[#allocation6 + $0x740] sm:$0xff]  ;;  %v920_v48 = vld [vmem:[#allocation6 + $0x748] sm:$0xff]  ;;  %v12038_v0 = vadd.f32 %v916_v55, %v628_v4  ;;  %v12042_v39 = vadd.f32 %v917_v35, %v629_v58  ;;  %v645_v57 = vld [vmem:[#allocation3 + $0x7b0] sm:$0xff]  ;;  %v1519_v6 = vadd.f32 %v1518_v60, %v12020_v37  ;;  %v12046_v24 = vadd.f32 %v918_v28, %v630_v27  ;;  %v1290_v37 = vpop.xlane.xlu1 %1289 }
 0x191   : > { %17338 = vst [vmem:[#allocation228_spill] sm:$0xff] %v12036_v50  ;;  %v646_v49 = vld [vmem:[#allocation3 + $0x7b8] sm:$0xff]  ;;  %v647_v5 = vld [vmem:[#allocation3 + $0x7c0] sm:$0xff]  ;;  %v1538_v9 = vadd.f32 %v1537_v44, %v12026_v34  ;;  %v648_v21 = vld [vmem:[#allocation3 + $0x7c8] sm:$0xff]  ;;  %v12050_v51 = vadd.f32 %v919_v7, %v631_v26  ;;  %v12052_v58 = vadd.f32 %v920_v48, %v632_v3  ;;  %v12058_v60 = vsub.f32 %v11338_v10, %v12032_v59 }
 0x192   : > { %17339 = vst [vmem:[#allocation229_spill] sm:$0xff] %v12038_v0  ;;  %17341 = vst [vmem:[#allocation231_spill] sm:$0xff] %v12042_v39  ;;  %v1529_v8 = vadd.f32 %v12038_v0, %v12036_v50  ;;  %v649_v4 = vld [vmem:[#allocation3 + $0x7d0] sm:$0xff]  ;;  %v650_v55 = vld [vmem:[#allocation3 + $0x7d8] sm:$0xff]  ;;  %1520 = vadd.xlane.f32.xlu0 %v1519_v6  ;;  %v12070_v10 = vsub.f32 %v11340_v11, %v12032_v59  ;;  %v12074_v6 = vsub.f32 %v11342_v12, %v12032_v59 }
 0x193   : > { %17342 = vst [vmem:[#allocation232_spill] sm:$0xff] %v12046_v24  ;;  %17343 = vst [vmem:[#allocation233_spill] sm:$0xff] %v12050_v51  ;;  %v933_v42 = vld [vmem:[#allocation6 + $0x7b0] sm:$0xff]  ;;  %v934_v35 = vld [vmem:[#allocation6 + $0x7b8] sm:$0xff]  ;;  %v1539_v27 = vadd.f32 %v1538_v9, %v12030_v1  ;;  %v12090_v45 = vmul.f32 0.0013020834, %v1290_v37 }
 0x194   : > { %17344 = vst [vmem:[#allocation234_spill] sm:$0xff] %v12052_v58  ;;  %v935_v63 = vld [vmem:[#allocation6 + $0x7c0] sm:$0xff]  ;;  %17345 = vst [vmem:[#allocation235_spill] sm:$0xff] %v12058_v60  ;;  %v1530_v44 = vadd.f32 %v1529_v8, %v12042_v39  ;;  %v936_v28 = vld [vmem:[#allocation6 + $0x7c8] sm:$0xff]  ;;  %v12062_v7 = vadd.f32 %v933_v42, %v645_v57  ;;  %v12064_v48 = vadd.f32 %v934_v35, %v646_v49 }
 0x195   : > { %v937_v34 = vld [vmem:[#allocation6 + $0x7d0] sm:$0xff]  ;;  %v938_v26 = vld [vmem:[#allocation6 + $0x7d8] sm:$0xff]  ;;  %v12066_v3 = vadd.f32 %v935_v63, %v647_v5  ;;  %v639_v46 = vld [vmem:[#allocation3 + $0x780] sm:$0xff]  ;;  %17349 = vst [vmem:[#allocation239_spill] sm:$0xff] %v12070_v10  ;;  %v12078_v57 = vsub.f32 %v11344_v18, %v12032_v59  ;;  %v1540_v49 = vadd.f32 %v1539_v27, %v12040_v41  ;;  %v12082_v5 = vadd.f32 %v936_v28, %v648_v21 }
 0x196   : > { %17346 = vst [vmem:[#allocation236_spill] sm:$0xff] %v12062_v7  ;;  %17347 = vst [vmem:[#allocation237_spill] sm:$0xff] %v12064_v48  ;;  %v640_v0 = vld [vmem:[#allocation3 + $0x788] sm:$0xff]  ;;  %v641_v50 = vld [vmem:[#allocation3 + $0x790] sm:$0xff]  ;;  %v1531_v63 = vadd.f32 %v1530_v44, %v12046_v24  ;;  %v1550_v9 = vadd.f32 %v12064_v48, %v12062_v7  ;;  %v12086_v35 = vadd.f32 %v937_v34, %v649_v4  ;;  %v1276_v24 = vpop.xlane.xlu0 %1275 }
 0x197   : > { %17348 = vst [vmem:[#allocation238_spill] sm:$0xff] %v12066_v3  ;;  %17350 = vst [vmem:[#allocation240_spill] sm:$0xff] %v12074_v6  ;;  %v642_v8 = vld [vmem:[#allocation3 + $0x798] sm:$0xff]  ;;  %v643_v11 = vld [vmem:[#allocation3 + $0x7a0] sm:$0xff]  ;;  %v12088_v12 = vadd.f32 %v938_v26, %v650_v55  ;;  %v12094_v27 = vsub.f32 %v11351_v30, %v12054_v20  ;;  %1541 = vadd.xlane.f32.xlu1 %v1540_v49  ;;  %v12106_v30 = vsub.f32 %v11353_v31, %v12054_v20 }
 0x198   : > { %17351 = vst [vmem:[#allocation241_spill] sm:$0xff] %v12078_v57  ;;  %17352 = vst [vmem:[#allocation242_spill] sm:$0xff] %v12082_v5  ;;  %v644_v42 = vld [vmem:[#allocation3 + $0x7a8] sm:$0xff]  ;;  %v927_v1 = vld [vmem:[#allocation6 + $0x780] sm:$0xff]  ;;  %v1532_v21 = vadd.f32 %v1531_v63, %v12050_v51  ;;  %v1551_v44 = vadd.f32 %v1550_v9, %v12066_v3  ;;  %v12110_v49 = vsub.f32 %v11355_v32, %v12054_v20  ;;  %v12126_v62 = vmul.f32 0.0013020834, %v1276_v24 }
 0x199   : > { %17353 = vst [vmem:[#allocation243_spill] sm:$0xff] %v12086_v35  ;;  %17354 = vst [vmem:[#allocation244_spill] sm:$0xff] %v12088_v12  ;;  %v928_v39 = vld [vmem:[#allocation6 + $0x788] sm:$0xff]  ;;  %v929_v18 = vld [vmem:[#allocation6 + $0x790] sm:$0xff]  ;;  %v12098_v4 = vadd.f32 %v927_v1, %v639_v46  ;;  %v12114_v1 = vsub.f32 %v11360_v38, %v12054_v20 }
 0x19a   : > { %17355 = vst [vmem:[#allocation245_spill] sm:$0xff] %v12094_v27  ;;  %v930_v28 = vld [vmem:[#allocation6 + $0x798] sm:$0xff]  ;;  %v931_v48 = vld [vmem:[#allocation6 + $0x7a0] sm:$0xff]  ;;  %v932_v34 = vld [vmem:[#allocation6 + $0x7a8] sm:$0xff]  ;;  %v12100_v55 = vadd.f32 %v928_v39, %v640_v0  ;;  %v12102_v26 = vadd.f32 %v929_v18, %v641_v50  ;;  %v1533_v0 = vadd.f32 %v1532_v21, %v12052_v58  ;;  %v1552_v50 = vadd.f32 %v1551_v44, %v12082_v5  ;;  %v1304_v58 = vpop.xlane.xlu1 %1303 }
 0x19b   : > { %17356 = vst [vmem:[#allocation246_spill] sm:$0xff] %v12098_v4  ;;  %v657_v37 = vld [vmem:[#allocation3 + $0x810] sm:$0xff]  ;;  %v658_v7 = vld [vmem:[#allocation3 + $0x818] sm:$0xff]  ;;  %v659_v41 = vld [vmem:[#allocation3 + $0x820] sm:$0xff]  ;;  %v12118_v39 = vadd.f32 %v930_v28, %v642_v8  ;;  %v12122_v18 = vadd.f32 %v931_v48, %v643_v11  ;;  %v12124_v32 = vadd.f32 %v932_v34, %v644_v42  ;;  %v12130_v21 = vsub.f32 %v11364_v43, %v12054_v20 }
 0x19c   : > { %17357 = vst [vmem:[#allocation247_spill] sm:$0xff] %v12100_v55  ;;  %17358 = vst [vmem:[#allocation248_spill] sm:$0xff] %v12102_v26  ;;  %v1543_v46 = vadd.f32 %v12100_v55, %v12098_v4  ;;  %v660_v63 = vld [vmem:[#allocation3 + $0x828] sm:$0xff]  ;;  %v661_v31 = vld [vmem:[#allocation3 + $0x830] sm:$0xff]  ;;  %1534 = vadd.xlane.f32.xlu0 %v1533_v0  ;;  %v1553_v8 = vadd.f32 %v1552_v50, %v12086_v35  ;;  %v12142_v43 = vsub.f32 %v11372_v54, %v12054_v20 }
 0x19d   : > { %17359 = vst [vmem:[#allocation249_spill] sm:$0xff] %v12106_v30  ;;  %17360 = vst [vmem:[#allocation250_spill] sm:$0xff] %v12110_v49  ;;  %v662_v9 = vld [vmem:[#allocation3 + $0x838] sm:$0xff]  ;;  %v945_v3 = vld [vmem:[#allocation6 + $0x810] sm:$0xff]  ;;  %v1936_v0 = vmul.f32 %v12094_v27, %v12094_v27  ;;  %v1937_v50 = vmul.f32 %v12106_v30, %v12106_v30  ;;  %v12158_v30 = vmul.f32 0.0013020834, %v1304_v58 }
 0x19e   : > { %17361 = vst [vmem:[#allocation251_spill] sm:$0xff] %v12114_v1  ;;  %17362 = vst [vmem:[#allocation252_spill] sm:$0xff] %v12118_v39  ;;  %v946_v51 = vld [vmem:[#allocation6 + $0x818] sm:$0xff]  ;;  %v947_v38 = vld [vmem:[#allocation6 + $0x820] sm:$0xff]  ;;  %v1544_v44 = vadd.f32 %v1543_v46, %v12102_v26  ;;  %v12134_v11 = vadd.f32 %v945_v3, %v657_v37  ;;  %v1554_v3 = vadd.f32 %v1553_v8, %v12088_v12 }
 0x19f   : > { %17363 = vst [vmem:[#allocation253_spill] sm:$0xff] %v12122_v18  ;;  %17364 = vst [vmem:[#allocation254_spill] sm:$0xff] %v12124_v32  ;;  %v948_v28 = vld [vmem:[#allocation6 + $0x828] sm:$0xff]  ;;  %v949_v5 = vld [vmem:[#allocation6 + $0x830] sm:$0xff]  ;;  %v12136_v42 = vadd.f32 %v946_v51, %v658_v7  ;;  %v12138_v34 = vadd.f32 %v947_v38, %v659_v41  ;;  %v12162_v8 = vmul.f32 %v12110_v49, %v12110_v49 }
 0x1a0   : > { %17365 = vst [vmem:[#allocation255_spill] sm:$0xff] %v12130_v21  ;;  %v950_v48 = vld [vmem:[#allocation6 + $0x838] sm:$0xff]  ;;  %17366 = vst [vmem:[#allocation256_spill] sm:$0xff] %v12134_v11  ;;  %v651_v24 = vld [vmem:[#allocation3 + $0x7e0] sm:$0xff]  ;;  %v1545_v51 = vadd.f32 %v1544_v44, %v12118_v39  ;;  %v12150_v41 = vadd.f32 %v948_v28, %v660_v63  ;;  %v12154_v54 = vadd.f32 %v949_v5, %v661_v31  ;;  %1555 = vadd.xlane.f32.xlu1 %v1554_v3  ;;  %v1297_v39 = vpop.xlane.xlu0 %1296 }
 0x1a1   : > { %17367 = vst [vmem:[#allocation257_spill] sm:$0xff] %v12136_v42  ;;  %17368 = vst [vmem:[#allocation258_spill] sm:$0xff] %v12138_v34  ;;  %v652_v55 = vld [vmem:[#allocation3 + $0x7e8] sm:$0xff]  ;;  %v653_v4 = vld [vmem:[#allocation3 + $0x7f0] sm:$0xff]  ;;  %v1564_v7 = vadd.f32 %v12136_v42, %v12134_v11  ;;  %v12156_v20 = vadd.f32 %v950_v48, %v662_v9  ;;  %v12174_v3 = vmul.f32 %v12114_v1, %v12114_v1 }
 0x1a2   : > { %17369 = vst [vmem:[#allocation259_spill] sm:$0xff] %v12142_v43  ;;  %17370 = vst [vmem:[#allocation260_spill] sm:$0xff] %v12150_v41  ;;  %v654_v37 = vld [vmem:[#allocation3 + $0x7f8] sm:$0xff]  ;;  %v655_v46 = vld [vmem:[#allocation3 + $0x800] sm:$0xff]  ;;  %v1546_v63 = vadd.f32 %v1545_v51, %v12122_v18  ;;  %v12178_v51 = vmul.f32 %v12130_v21, %v12130_v21 }
 0x1a3   : > { %v656_v38 = vld [vmem:[#allocation3 + $0x808] sm:$0xff]  ;;  %17371 = vst [vmem:[#allocation261_spill] sm:$0xff] %v12154_v54  ;;  %17372 = vst [vmem:[#allocation262_spill] sm:$0xff] %v12156_v20  ;;  %v939_v27 = vld [vmem:[#allocation6 + $0x7e0] sm:$0xff]  ;;  %v1565_v44 = vadd.f32 %v1564_v7, %v12138_v34 }
 0x1a4   : > { %v940_v35 = vld [vmem:[#allocation6 + $0x7e8] sm:$0xff]  ;;  %v941_v26 = vld [vmem:[#allocation6 + $0x7f0] sm:$0xff]  ;;  %17373 = vst [vmem:[#allocation263_spill] sm:$0xff] %v12158_v30  ;;  %v942_v28 = vld [vmem:[#allocation6 + $0x7f8] sm:$0xff]  ;;  %v12166_v31 = vadd.f32 %v939_v27, %v651_v24  ;;  %v12182_v27 = vmul.f32 %v12142_v43, %v12142_v43  ;;  %v12194_v30 = vmul.f32 0.0013020834, %v1297_v39  ;;  %v1318_v39 = vpop.xlane.xlu1 %1317 }
 0x1a5   : > { %v943_v42 = vld [vmem:[#allocation6 + $0x800] sm:$0xff]  ;;  %v944_v5 = vld [vmem:[#allocation6 + $0x808] sm:$0xff]  ;;  %v12168_v9 = vadd.f32 %v940_v35, %v652_v55  ;;  %v12170_v48 = vadd.f32 %v941_v26, %v653_v4  ;;  %v669_v58 = vld [vmem:[#allocation3 + $0x870] sm:$0xff]  ;;  %v1547_v35 = vadd.f32 %v1546_v63, %v12124_v32  ;;  %v1566_v4 = vadd.f32 %v1565_v44, %v12150_v41 }
 0x1a6   : > { %17374 = vst [vmem:[#allocation264_spill] sm:$0xff] %v12166_v31  ;;  %v670_v11 = vld [vmem:[#allocation3 + $0x878] sm:$0xff]  ;;  %v671_v12 = vld [vmem:[#allocation3 + $0x880] sm:$0xff]  ;;  %v12186_v55 = vadd.f32 %v942_v28, %v654_v37  ;;  %v672_v24 = vld [vmem:[#allocation3 + $0x888] sm:$0xff]  ;;  %v12190_v49 = vadd.f32 %v943_v42, %v655_v46  ;;  %v12192_v21 = vadd.f32 %v944_v5, %v656_v38  ;;  %v2224_v63 = vadd.f32 %v1937_v50, %v1936_v0 }
 0x1a7   : > { %17375 = vst [vmem:[#allocation265_spill] sm:$0xff] %v12168_v9  ;;  %v1557_v26 = vadd.f32 %v12168_v9, %v12166_v31  ;;  %v673_v7 = vld [vmem:[#allocation3 + $0x890] sm:$0xff]  ;;  %v674_v1 = vld [vmem:[#allocation3 + $0x898] sm:$0xff]  ;;  %v959_v43 = vld [vmem:[#allocation6 + $0x880] sm:$0xff]  ;;  %1548 = vadd.xlane.f32.xlu0 %v1547_v35  ;;  %v1567_v37 = vadd.f32 %v1566_v4, %v12154_v54  ;;  %v12206_v0 = vsub.f32 %v11348_v22, %v12032_v59 }
 0x1a8   : > { %17376 = vst [vmem:[#allocation266_spill] sm:$0xff] %v12186_v55  ;;  %17377 = vst [vmem:[#allocation267_spill] sm:$0xff] %v12190_v49  ;;  %v957_v34 = vld [vmem:[#allocation6 + $0x870] sm:$0xff]  ;;  %v958_v18 = vld [vmem:[#allocation6 + $0x878] sm:$0xff]  ;;  %v12202_v46 = vadd.f32 %v959_v43, %v671_v12  ;;  %v12210_v50 = vsub.f32 %v11357_v36, %v12032_v59 }
 0x1a9   : > { %17378 = vst [vmem:[#allocation268_spill] sm:$0xff] %v12192_v21  ;;  %v1558_v44 = vadd.f32 %v1557_v26, %v12170_v48  ;;  %v960_v28 = vld [vmem:[#allocation6 + $0x888] sm:$0xff]  ;;  %v961_v41 = vld [vmem:[#allocation6 + $0x890] sm:$0xff]  ;;  %v962_v9 = vld [vmem:[#allocation6 + $0x898] sm:$0xff]  ;;  %v12198_v31 = vadd.f32 %v957_v34, %v669_v58  ;;  %v12200_v42 = vadd.f32 %v958_v18, %v670_v11  ;;  %v1948_v34 = vmul.f32 %v12058_v60, %v12058_v60 }
 0x1aa   : > { %17381 = vst [vmem:[#allocation271_spill] sm:$0xff] %v12202_v46  ;;  %v663_v38 = vld [vmem:[#allocation3 + $0x840] sm:$0xff]  ;;  %v664_v5 = vld [vmem:[#allocation3 + $0x848] sm:$0xff]  ;;  %v665_v32 = vld [vmem:[#allocation3 + $0x850] sm:$0xff]  ;;  %v1568_v18 = vadd.f32 %v1567_v37, %v12156_v20  ;;  %v12216_v11 = vadd.f32 %v960_v28, %v672_v24  ;;  %v12220_v4 = vadd.f32 %v961_v41, %v673_v7  ;;  %v12222_v26 = vadd.f32 %v962_v9, %v674_v1 }
 0x1ab   : > { %17379 = vst [vmem:[#allocation269_spill] sm:$0xff] %v12198_v31  ;;  %17380 = vst [vmem:[#allocation270_spill] sm:$0xff] %v12200_v42  ;;  %v1559_v12 = vadd.f32 %v1558_v44, %v12186_v55  ;;  %v1578_v43 = vadd.f32 %v12200_v42, %v12198_v31  ;;  %v666_v58 = vld [vmem:[#allocation3 + $0x858] sm:$0xff]  ;;  %v667_v35 = vld [vmem:[#allocation3 + $0x860] sm:$0xff]  ;;  %v12224_v60 = vmul.f32 0.0013020834, %v1318_v39  ;;  %v1949_v37 = vmul.f32 %v12070_v10, %v12070_v10  ;;  %v1311_v55 = vpop.xlane.xlu0 %1310 }
 0x1ac   : > { %17382 = vst [vmem:[#allocation272_spill] sm:$0xff] %v12206_v0  ;;  %17383 = vst [vmem:[#allocation273_spill] sm:$0xff] %v12210_v50  ;;  %v668_v22 = vld [vmem:[#allocation3 + $0x868] sm:$0xff]  ;;  %v951_v36 = vld [vmem:[#allocation6 + $0x840] sm:$0xff]  ;;  %1569 = vadd.xlane.f32.xlu1 %v1568_v18  ;;  %v2225_v10 = vadd.f32 %v2224_v63, %v12162_v8  ;;  %v1950_v18 = vmul.f32 %v12074_v6, %v12074_v6 }
 0x1ad   : > { %17384 = vst [vmem:[#allocation274_spill] sm:$0xff] %v12216_v11  ;;  %17385 = vst [vmem:[#allocation275_spill] sm:$0xff] %v12222_v26  ;;  %v952_v59 = vld [vmem:[#allocation6 + $0x848] sm:$0xff]  ;;  %v953_v54 = vld [vmem:[#allocation6 + $0x850] sm:$0xff]  ;;  %v1560_v24 = vadd.f32 %v1559_v12, %v12190_v49  ;;  %v1579_v44 = vadd.f32 %v1578_v43, %v12202_v46  ;;  %v12230_v41 = vadd.f32 %v951_v36, %v663_v38  ;;  %v12253_v49 = vmul.f32 0.0013020834, %v1311_v55 }
 0x1ae   : > { %v954_v28 = vld [vmem:[#allocation6 + $0x858] sm:$0xff]  ;;  %v955_v42 = vld [vmem:[#allocation6 + $0x860] sm:$0xff]  ;;  %v956_v31 = vld [vmem:[#allocation6 + $0x868] sm:$0xff]  ;;  %v12232_v1 = vadd.f32 %v952_v59, %v664_v5  ;;  %v12234_v9 = vadd.f32 %v953_v54, %v665_v32  ;;  %v12241_v12 = vmul.f32 %v12078_v57, %v12078_v57  ;;  %v2226_v55 = vadd.f32 %v2225_v10, %v12174_v3 }
 0x1af   : > { %17386 = vst [vmem:[#allocation276_spill] sm:$0xff] %v12230_v41  ;;  %v681_v7 = vld [vmem:[#allocation3 + $0x8d0] sm:$0xff]  ;;  %v682_v39 = vld [vmem:[#allocation3 + $0x8d8] sm:$0xff]  ;;  %v683_v20 = vld [vmem:[#allocation3 + $0x8e0] sm:$0xff]  ;;  %v1561_v38 = vadd.f32 %v1560_v24, %v12192_v21  ;;  %v1580_v5 = vadd.f32 %v1579_v44, %v12216_v11  ;;  %v12245_v43 = vadd.f32 %v954_v28, %v666_v58  ;;  %v12249_v8 = vadd.f32 %v955_v42, %v667_v35  ;;  %v1332_v21 = vpop.xlane.xlu1 %1331 }
 0x1b0   : > { %17387 = vst [vmem:[#allocation277_spill] sm:$0xff] %v12232_v1  ;;  %v1571_v32 = vadd.f32 %v12232_v1, %v12230_v41  ;;  %v684_v54 = vld [vmem:[#allocation3 + $0x8e8] sm:$0xff]  ;;  %v685_v36 = vld [vmem:[#allocation3 + $0x8f0] sm:$0xff]  ;;  %v686_v59 = vld [vmem:[#allocation3 + $0x8f8] sm:$0xff]  ;;  %v12251_v63 = vadd.f32 %v956_v31, %v668_v22  ;;  %v2238_v24 = vadd.f32 %v1949_v37, %v1948_v34  ;;  %v1952_v34 = vmul.f32 %v12206_v0, %v12206_v0 }
 0x1b1   : > { %v969_v6 = vld [vmem:[#allocation6 + $0x8d0] sm:$0xff]  ;;  %v970_v46 = vld [vmem:[#allocation6 + $0x8d8] sm:$0xff]  ;;  %v971_v57 = vld [vmem:[#allocation6 + $0x8e0] sm:$0xff]  ;;  %1562 = vadd.xlane.f32.xlu0 %v1561_v38  ;;  %v1581_v58 = vadd.f32 %v1580_v5, %v12220_v4  ;;  %v1953_v37 = vmul.f32 %v12210_v50, %v12210_v50  ;;  %v12278_v0 = vmul.f32 0.0013020834, %v1332_v21  ;;  %v2227_v21 = vadd.f32 %v2226_v55, %v12178_v51 }
 0x1b2   : > { %v1572_v44 = vadd.f32 %v1571_v32, %v12234_v9  ;;  %v972_v28 = vld [vmem:[#allocation6 + $0x8e8] sm:$0xff]  ;;  %v973_v11 = vld [vmem:[#allocation6 + $0x8f0] sm:$0xff]  ;;  %v974_v1 = vld [vmem:[#allocation6 + $0x8f8] sm:$0xff]  ;;  %v12257_v41 = vadd.f32 %v969_v6, %v681_v7  ;;  %v12259_v42 = vadd.f32 %v970_v46, %v682_v39  ;;  %v12261_v31 = vadd.f32 %v971_v57, %v683_v20 }
 0x1b3   : > { %v675_v35 = vld [vmem:[#allocation3 + $0x8a0] sm:$0xff]  ;;  %v676_v22 = vld [vmem:[#allocation3 + $0x8a8] sm:$0xff]  ;;  %v1582_v38 = vadd.f32 %v1581_v58, %v12222_v26  ;;  %v12270_v7 = vadd.f32 %v972_v28, %v684_v54  ;;  %v677_v20 = vld [vmem:[#allocation3 + $0x8b0] sm:$0xff]  ;;  %v12274_v39 = vadd.f32 %v973_v11, %v685_v36  ;;  %v12276_v10 = vadd.f32 %v974_v1, %v686_v59  ;;  %v1325_v26 = vpop.xlane.xlu0 %1324 }
 0x1b4   : > { %17388 = vst [vmem:[#allocation278_spill] sm:$0xff] %v12257_v41  ;;  %17389 = vst [vmem:[#allocation279_spill] sm:$0xff] %v12259_v42  ;;  %v1573_v6 = vadd.f32 %v1572_v44, %v12245_v43  ;;  %v1592_v57 = vadd.f32 %v12259_v42, %v12257_v41  ;;  %v678_v46 = vld [vmem:[#allocation3 + $0x8b8] sm:$0xff]  ;;  %v963_v3 = vld [vmem:[#allocation6 + $0x8a0] sm:$0xff]  ;;  %v2239_v50 = vadd.f32 %v2238_v24, %v1950_v18 }
 0x1b5   : > { %v964_v5 = vld [vmem:[#allocation6 + $0x8a8] sm:$0xff]  ;;  %v965_v32 = vld [vmem:[#allocation6 + $0x8b0] sm:$0xff]  ;;  %1583 = vadd.xlane.f32.xlu1 %v1582_v38  ;;  %v679_v44 = vld [vmem:[#allocation3 + $0x8c0] sm:$0xff]  ;;  %v12282_v41 = vadd.f32 %v963_v3, %v675_v35  ;;  %v12291_v18 = vsub.f32 %v11386_v14, %v12126_v62  ;;  %v12295_v24 = vsub.f32 %v11388_v15, %v12126_v62  ;;  %v12308_v14 = vsub.f32 %v11392_v19, %v12126_v62 }
 0x1b6   : > { %v1574_v58 = vadd.f32 %v1573_v6, %v12249_v8  ;;  %v1593_v54 = vadd.f32 %v1592_v57, %v12261_v31  ;;  %v966_v28 = vld [vmem:[#allocation6 + $0x8b8] sm:$0xff]  ;;  %v967_v42 = vld [vmem:[#allocation6 + $0x8c0] sm:$0xff]  ;;  %v12284_v11 = vadd.f32 %v964_v5, %v676_v22  ;;  %v680_v1 = vld [vmem:[#allocation3 + $0x8c8] sm:$0xff]  ;;  %v12286_v59 = vadd.f32 %v965_v32, %v677_v20 }
 0x1b7   : > { %v968_v36 = vld [vmem:[#allocation6 + $0x8c8] sm:$0xff]  ;;  %v12299_v38 = vadd.f32 %v966_v28, %v678_v46  ;;  %v12303_v57 = vadd.f32 %v967_v42, %v679_v44  ;;  %v2240_v51 = vadd.f32 %v2239_v50, %v12241_v12  ;;  %v12312_v15 = vsub.f32 %v11396_v25, %v12126_v62  ;;  %v1346_v42 = vpop.xlane.xlu1 %1345 }
 0x1b8   : > { %v1575_v35 = vadd.f32 %v1574_v58, %v12251_v63  ;;  %v1594_v22 = vadd.f32 %v1593_v54, %v12270_v7  ;;  %v1585_v6 = vadd.f32 %v12284_v11, %v12282_v41  ;;  %v12315_v20 = vadd.f32 %v968_v36, %v680_v1 }
 0x1b9   : > { %v12318_v3 = vmul.f32 0.0013020834, %v1325_v26  ;;  %v2241_v5 = vadd.f32 %v2240_v51, %v1952_v34  ;;  %v12322_v50 = vsub.f32 %v11400_v33, %v12126_v62  ;;  %v1942_v19 = vmul.f32 %v12291_v18, %v12291_v18 }
 0x1ba   : > { %1576 = vadd.xlane.f32.xlu0 %v1575_v35  ;;  %v1595_v55 = vadd.f32 %v1594_v22, %v12274_v39  ;;  %v1586_v46 = vadd.f32 %v1585_v6, %v12286_v59  ;;  %v1943_v25 = vmul.f32 %v12295_v24, %v12295_v24  ;;  %v2228_v58 = vadd.f32 %v2227_v21, %v12182_v27  ;;  %v1339_v22 = vpop.xlane.xlu0 %1338 }
 0x1bb   : > { %v12333_v26 = vsub.f32 %v11408_v47, %v12126_v62  ;;  %v12335_v34 = vmul.f32 0.0013020834, %v1346_v42  ;;  %v1944_v33 = vmul.f32 %v12308_v14, %v12308_v14  ;;  %v1945_v54 = vmul.f32 %v12312_v15, %v12312_v15 }
 0x1bc   : > { %v1596_v12 = vadd.f32 %v1595_v55, %v12276_v10  ;;  %v1587_v32 = vadd.f32 %v1586_v46, %v12299_v38  ;;  %v2231_v44 = vadd.f32 %v1943_v25, %v1942_v19  ;;  %v12344_v1 = vsub.f32 %v11368_v52, %v12090_v45 }
 0x1bd   : > { %v12348_v47 = vsub.f32 %v11370_v53, %v12090_v45  ;;  %v12352_v62 = vsub.f32 %v11374_v56, %v12090_v45  ;;  %v2242_v27 = vadd.f32 %v2241_v5, %v1953_v37  ;;  %v1946_v36 = vmul.f32 %v12322_v50, %v12322_v50 }
 0x1be   : > { %1597 = vadd.xlane.f32.xlu1 %v1596_v12  ;;  %v1588_v28 = vadd.f32 %v1587_v32, %v12303_v57  ;;  %v2232_v21 = vadd.f32 %v2231_v44, %v1944_v33  ;;  %v12358_v35 = vsub.f32 %v11378_v61, %v12090_v45  ;;  %v12363_v53 = vsub.f32 %v11382_v2, %v12090_v45 }
 0x1bf   : > { %v1954_v56 = vmul.f32 %v12344_v1, %v12344_v1  ;;  %v1955_v37 = vmul.f32 %v12348_v47, %v12348_v47  ;;  %v1947_v6 = vmul.f32 %v12333_v26, %v12333_v26  ;;  %v12373_v61 = vsub.f32 %v11390_v16, %v12090_v45 }
 0x1c0   : > { %v1589_v52 = vadd.f32 %v1588_v28, %v12315_v20  ;;  %v2233_v51 = vadd.f32 %v2232_v21, %v1945_v54  ;;  %v1956_v55 = vmul.f32 %v12352_v62, %v12352_v62  ;;  %v1957_v2 = vmul.f32 %v12358_v35, %v12358_v35  ;;  %v1360_v54 = vpop.xlane.xlu1 %1359 }
 0x1c1   : > { %v2245_v46 = vadd.f32 %v1955_v37, %v1954_v56  ;;  %v12381_v42 = vsub.f32 %v11422_v13, %v12194_v30  ;;  %v12385_v5 = vsub.f32 %v11424_v17, %v12194_v30  ;;  %v12387_v19 = vmul.f32 0.0013020834, %v1339_v22  ;;  %v17395_v22 = vld [vmem:[#allocation24_spill] sm:$0xff] }
 0x1c2   : > { %1590 = vadd.xlane.f32.xlu0 %v1589_v52  ;;  %v2234_v16 = vadd.f32 %v2233_v51, %v1946_v36  ;;  %v12391_v45 = vsub.f32 %v11428_v23, %v12194_v30  ;;  %v12395_v25 = vsub.f32 %v11432_v29, %v12194_v30  ;;  %v1958_v12 = vmul.f32 %v12363_v53, %v12363_v53  ;;  %v17392_v36 = vld [vmem:[#allocation32_spill] sm:$0xff]  ;;  %v17394_v52 = vld [vmem:[#allocation263_spill] sm:$0xff] }
 0x1c3   : > { %v2246_v13 = vadd.f32 %v2245_v46, %v1956_v55  ;;  %v12401_v32 = vsub.f32 %v11436_v40, %v12194_v30  ;;  %v1960_v17 = vmul.f32 %v12381_v42, %v12381_v42  ;;  %v1959_v23 = vmul.f32 %v12373_v61, %v12373_v61 }
 0x1c4   : > { %17390 = vst [vmem:[#allocation280_spill] sm:$0xff] %v12395_v25  ;;  %v2235_v33 = vadd.f32 %v2234_v16, %v1947_v6  ;;  %v1961_v29 = vmul.f32 %v12385_v5, %v12385_v5  ;;  %v1962_v44 = vmul.f32 %v12391_v45, %v12391_v45  ;;  %v12413_v40 = vsub.f32 %v17392_v36, %v12194_v30  ;;  %v17397_v6 = vld [vmem:[#allocation25_spill] sm:$0xff]  ;;  %v17401_v30 = vld [vmem:[#allocation27_spill] sm:$0xff] }
 0x1c5   : > { %17391 = vst [vmem:[#allocation281_spill] sm:$0xff] %v12401_v32  ;;  %v2247_v28 = vadd.f32 %v2246_v13, %v1957_v2  ;;  %v1963_v21 = vmul.f32 %v12395_v25, %v12395_v25  ;;  %v12419_v56 = vsub.f32 %v17395_v22, %v17394_v52  ;;  %v12423_v51 = vsub.f32 %v17397_v6, %v17394_v52 }
 0x1c6   : > { %2229 = vadd.xlane.f32.xlu0 %v2228_v58  ;;  %17393 = vst [vmem:[#allocation32_spill] sm:$0xff] %v12413_v40  ;;  %2236 = vadd.xlane.f32.xlu1 %v2235_v33  ;;  %v2252_v37 = vadd.f32 %v1961_v29, %v1960_v17  ;;  %v17399_v58 = vld [vmem:[#allocation26_spill] sm:$0xff]  ;;  %v12431_v2 = vsub.f32 %v17401_v30, %v17394_v52  ;;  %v12433_v46 = vmul.f32 0.0013020834, %v1360_v54  ;;  %v17403_v17 = vld [vmem:[#allocation28_spill] sm:$0xff]  ;;  %v1353_v29 = vpop.xlane.xlu0 %1352 }
 0x1c7   : > { %17396 = vst [vmem:[#allocation263_spill] sm:$0xff] %v12419_v56  ;;  %17398 = vst [vmem:[#allocation24_spill] sm:$0xff] %v12423_v51  ;;  %v12427_v55 = vsub.f32 %v17399_v58, %v17394_v52  ;;  %v2248_v16 = vadd.f32 %v2247_v28, %v1958_v12  ;;  %v1964_v13 = vmul.f32 %v12401_v32, %v12401_v32  ;;  %v17405_v58 = vld [vmem:[#allocation29_spill] sm:$0xff] }
 0x1c8   : > { %17402 = vst [vmem:[#allocation26_spill] sm:$0xff] %v12431_v2  ;;  %v12439_v33 = vsub.f32 %v17403_v17, %v17394_v52  ;;  %v2253_v36 = vadd.f32 %v2252_v37, %v1962_v44  ;;  %v1966_v22 = vmul.f32 %v12419_v56, %v12419_v56  ;;  %v1967_v6 = vmul.f32 %v12423_v51, %v12423_v51  ;;  %v1374_v17 = vpop.xlane.xlu1 %1373  ;;  %v17407_v51 = vld [vmem:[#allocation36_spill] sm:$0xff] }
 0x1c9   : > { %17400 = vst [vmem:[#allocation25_spill] sm:$0xff] %v12427_v55  ;;  %v1968_v54 = vmul.f32 %v12427_v55, %v12427_v55  ;;  %v2249_v12 = vadd.f32 %v2248_v16, %v1959_v23  ;;  %v1965_v28 = vmul.f32 %v12413_v40, %v12413_v40  ;;  %v12451_v30 = vsub.f32 %v17405_v58, %v17394_v52  ;;  %v17411_v58 = vld [vmem:[#allocation39_spill] sm:$0xff] }
 0x1ca   : > { %17404 = vst [vmem:[#allocation27_spill] sm:$0xff] %v12439_v33  ;;  %2243 = vadd.xlane.f32.xlu0 %v2242_v27  ;;  %v1969_v44 = vmul.f32 %v12431_v2, %v12431_v2  ;;  %v2254_v37 = vadd.f32 %v2253_v36, %v1963_v21  ;;  %v2259_v56 = vadd.f32 %v1967_v6, %v1966_v22  ;;  %v17409_v27 = vld [vmem:[#allocation37_spill] sm:$0xff]  ;;  %v12463_v16 = vmul.f32 0.0013020834, %v1353_v29  ;;  %v17413_v21 = vld [vmem:[#allocation40_spill] sm:$0xff] }
 0x1cb   : > { %17406 = vst [vmem:[#allocation28_spill] sm:$0xff] %v12451_v30  ;;  %v12457_v32 = vsub.f32 %v17407_v51, %v12253_v49  ;;  %v12461_v23 = vsub.f32 %v17409_v27, %v12253_v49  ;;  %2250 = vadd.xlane.f32.xlu1 %v2249_v12  ;;  %v1970_v52 = vmul.f32 %v12439_v33, %v12439_v33  ;;  %v17415_v6 = vld [vmem:[#allocation41_spill] sm:$0xff]  ;;  %v12481_v12 = vmul.f32 0.0013020834, %v1374_v17  ;;  %v1367_v17 = vpop.xlane.xlu0 %1366 }
 0x1cc   : > { %v12469_v2 = vsub.f32 %v17411_v58, %v12253_v49  ;;  %v12473_v36 = vsub.f32 %v17413_v21, %v12253_v49  ;;  %v2255_v51 = vadd.f32 %v2254_v37, %v1964_v13  ;;  %v2260_v22 = vadd.f32 %v2259_v56, %v1968_v54  ;;  %v17417_v54 = vld [vmem:[#allocation44_spill] sm:$0xff] }
 0x1cd   : > { %17408 = vst [vmem:[#allocation29_spill] sm:$0xff] %v12457_v32  ;;  %17410 = vst [vmem:[#allocation36_spill] sm:$0xff] %v12461_v23  ;;  %v12477_v27 = vsub.f32 %v17415_v6, %v12253_v49  ;;  %v1972_v29 = vmul.f32 %v12457_v32, %v12457_v32  ;;  %v1971_v33 = vmul.f32 %v12451_v30, %v12451_v30  ;;  %v17419_v6 = vld [vmem:[#allocation30_spill] sm:$0xff] }
 0x1ce   : > { %17412 = vst [vmem:[#allocation37_spill] sm:$0xff] %v12469_v2  ;;  %17414 = vst [vmem:[#allocation39_spill] sm:$0xff] %v12473_v36  ;;  %v1973_v58 = vmul.f32 %v12461_v23, %v12461_v23  ;;  %v1974_v21 = vmul.f32 %v12469_v2, %v12469_v2  ;;  %v2256_v13 = vadd.f32 %v2255_v51, %v1965_v28  ;;  %v17421_v23 = vld [vmem:[#allocation31_spill] sm:$0xff]  ;;  %v17423_v28 = vld [vmem:[#allocation33_spill] sm:$0xff] }
 0x1cf   : > { %17416 = vst [vmem:[#allocation40_spill] sm:$0xff] %v12477_v27  ;;  %v2261_v56 = vadd.f32 %v2260_v22, %v1969_v44  ;;  %v12491_v37 = vsub.f32 %v17417_v54, %v12253_v49  ;;  %v12495_v32 = vsub.f32 %v17419_v6, %v12224_v60  ;;  %v1975_v30 = vmul.f32 %v12473_v36, %v12473_v36  ;;  %v17425_v22 = vld [vmem:[#allocation34_spill] sm:$0xff]  ;;  %v17427_v6 = vld [vmem:[#allocation35_spill] sm:$0xff] }
 0x1d0   : > { %v2266_v55 = vadd.f32 %v1973_v58, %v1972_v29  ;;  %v12501_v40 = vsub.f32 %v17421_v23, %v12224_v60  ;;  %v12505_v44 = vsub.f32 %v17423_v28, %v12224_v60  ;;  %2257 = vadd.xlane.f32.xlu0 %v2256_v13  ;;  %v1976_v51 = vmul.f32 %v12477_v27, %v12477_v27  ;;  %v17429_v27 = vld [vmem:[#allocation38_spill] sm:$0xff] }
 0x1d1   : > { %17418 = vst [vmem:[#allocation41_spill] sm:$0xff] %v12491_v37  ;;  %17420 = vst [vmem:[#allocation44_spill] sm:$0xff] %v12495_v32  ;;  %v2262_v49 = vadd.f32 %v2261_v56, %v1970_v52  ;;  %v12511_v54 = vsub.f32 %v17425_v22, %v12224_v60  ;;  %v12515_v29 = vsub.f32 %v17427_v6, %v12224_v60  ;;  %v12523_v13 = vmul.f32 0.0013020834, %v1367_v17  ;;  %v17433_v17 = vld [vmem:[#allocation49_spill] sm:$0xff] }
 0x1d2   : > { %17422 = vst [vmem:[#allocation30_spill] sm:$0xff] %v12501_v40  ;;  %17424 = vst [vmem:[#allocation31_spill] sm:$0xff] %v12505_v44  ;;  %v2267_v58 = vadd.f32 %v2266_v55, %v1974_v21  ;;  %v1978_v23 = vmul.f32 %v12495_v32, %v12495_v32  ;;  %v1979_v28 = vmul.f32 %v12501_v40, %v12501_v40  ;;  %v1388_v21 = vpop.xlane.xlu1 %1387  ;;  %v17431_v40 = vld [vmem:[#allocation48_spill] sm:$0xff] }
 0x1d3   : > { %17426 = vst [vmem:[#allocation33_spill] sm:$0xff] %v12511_v54  ;;  %17428 = vst [vmem:[#allocation34_spill] sm:$0xff] %v12515_v29  ;;  %v1980_v52 = vmul.f32 %v12505_v44, %v12505_v44  ;;  %v2263_v56 = vadd.f32 %v2262_v49, %v1971_v33  ;;  %v1977_v22 = vmul.f32 %v12491_v37, %v12491_v37 }
 0x1d4   : > { %v12529_v6 = vsub.f32 %v17429_v27, %v12224_v60  ;;  %v2268_v55 = vadd.f32 %v2267_v58, %v1975_v30  ;;  %v1981_v32 = vmul.f32 %v12511_v54, %v12511_v54  ;;  %v2273_v36 = vadd.f32 %v1979_v28, %v1978_v23  ;;  %v17435_v60 = vld [vmem:[#allocation51_spill] sm:$0xff]  ;;  %v17437_v27 = vld [vmem:[#allocation52_spill] sm:$0xff] }
 0x1d5   : > { %v12535_v2 = vsub.f32 %v17431_v40, %v12318_v3  ;;  %2264 = vadd.xlane.f32.xlu1 %v2263_v56  ;;  %v1982_v33 = vmul.f32 %v12515_v29, %v12515_v29  ;;  %v12541_v49 = vsub.f32 %v17433_v17, %v12318_v3  ;;  %v12545_v30 = vsub.f32 %v17435_v60, %v12318_v3  ;;  %v17439_v40 = vld [vmem:[#allocation53_spill] sm:$0xff]  ;;  %v1381_v17 = vpop.xlane.xlu0 %1380 }
 0x1d6   : > { %17430 = vst [vmem:[#allocation35_spill] sm:$0xff] %v12529_v6  ;;  %v12549_v58 = vsub.f32 %v17437_v27, %v12318_v3  ;;  %v2269_v23 = vadd.f32 %v2268_v55, %v1976_v51  ;;  %v2274_v28 = vadd.f32 %v2273_v36, %v1980_v52  ;;  %v12553_v56 = vsub.f32 %v17439_v40, %v12318_v3  ;;  %v17441_v55 = vld [vmem:[#allocation56_spill] sm:$0xff] }
 0x1d7   : > { %17432 = vst [vmem:[#allocation38_spill] sm:$0xff] %v12535_v2  ;;  %17434 = vst [vmem:[#allocation48_spill] sm:$0xff] %v12541_v49  ;;  %v1984_v29 = vmul.f32 %v12535_v2, %v12535_v2  ;;  %v12557_v54 = vmul.f32 0.0013020834, %v1388_v21  ;;  %v1983_v60 = vmul.f32 %v12529_v6, %v12529_v6  ;;  %v1985_v44 = vmul.f32 %v12541_v49, %v12541_v49  ;;  %v17443_v2 = vld [vmem:[#allocation42_spill] sm:$0xff]  ;;  %v17445_v6 = vld [vmem:[#allocation43_spill] sm:$0xff] }
 0x1d8   : > { %17436 = vst [vmem:[#allocation49_spill] sm:$0xff] %v12545_v30  ;;  %17438 = vst [vmem:[#allocation51_spill] sm:$0xff] %v12549_v58  ;;  %v1986_v51 = vmul.f32 %v12545_v30, %v12545_v30  ;;  %v2270_v36 = vadd.f32 %v2269_v23, %v1977_v22  ;;  %v2275_v52 = vadd.f32 %v2274_v28, %v1981_v32  ;;  %v17447_v30 = vld [vmem:[#allocation45_spill] sm:$0xff]  ;;  %v12583_v32 = vmul.f32 0.0013020834, %v1381_v17  ;;  %v1402_v28 = vpop.xlane.xlu1 %1401 }
 0x1d9   : > { %17440 = vst [vmem:[#allocation52_spill] sm:$0xff] %v12553_v56  ;;  %v12567_v27 = vsub.f32 %v17441_v55, %v12318_v3  ;;  %v1987_v21 = vmul.f32 %v12549_v58, %v12549_v58  ;;  %v2280_v40 = vadd.f32 %v1985_v44, %v1984_v29  ;;  %v12573_v37 = vsub.f32 %v17443_v2, %v12278_v0  ;;  %v17449_v44 = vld [vmem:[#allocation46_spill] sm:$0xff] }
 0x1da   : > { %v12577_v49 = vsub.f32 %v17445_v6, %v12278_v0  ;;  %v12581_v22 = vsub.f32 %v17447_v30, %v12278_v0  ;;  %2271 = vadd.xlane.f32.xlu0 %v2270_v36  ;;  %v2276_v3 = vadd.f32 %v2275_v52, %v1982_v33  ;;  %v1988_v23 = vmul.f32 %v12553_v56, %v12553_v56  ;;  %v17451_v52 = vld [vmem:[#allocation47_spill] sm:$0xff]  ;;  %v17455_v56 = vld [vmem:[#allocation60_spill] sm:$0xff] }
 0x1db   : > { %17442 = vst [vmem:[#allocation53_spill] sm:$0xff] %v12567_v27  ;;  %17444 = vst [vmem:[#allocation56_spill] sm:$0xff] %v12573_v37  ;;  %v12589_v29 = vsub.f32 %v17449_v44, %v12278_v0  ;;  %v2281_v2 = vadd.f32 %v2280_v40, %v1986_v51  ;;  %v1990_v6 = vmul.f32 %v12573_v37, %v12573_v37  ;;  %v17453_v51 = vld [vmem:[#allocation50_spill] sm:$0xff] }
 0x1dc   : > { %17446 = vst [vmem:[#allocation42_spill] sm:$0xff] %v12577_v49  ;;  %17448 = vst [vmem:[#allocation43_spill] sm:$0xff] %v12581_v22  ;;  %v1991_v30 = vmul.f32 %v12577_v49, %v12577_v49  ;;  %v1992_v17 = vmul.f32 %v12581_v22, %v12581_v22  ;;  %v2277_v36 = vadd.f32 %v2276_v3, %v1983_v60  ;;  %v12613_v60 = vmul.f32 0.0013020834, %v1402_v28  ;;  %v17457_v3 = vld [vmem:[#allocation61_spill] sm:$0xff] }
 0x1dd   : > { %17450 = vst [vmem:[#allocation45_spill] sm:$0xff] %v12589_v29  ;;  %v1989_v33 = vmul.f32 %v12567_v27, %v12567_v27  ;;  %v12601_v55 = vsub.f32 %v17451_v52, %v12278_v0  ;;  %v12605_v40 = vsub.f32 %v17453_v51, %v12278_v0  ;;  %v2282_v44 = vadd.f32 %v2281_v2, %v1987_v21  ;;  %v17459_v27 = vld [vmem:[#allocation63_spill] sm:$0xff]  ;;  %v17461_v21 = vld [vmem:[#allocation64_spill] sm:$0xff] }
 0x1de   : > { %v1993_v37 = vmul.f32 %v12589_v29, %v12589_v29  ;;  %v2287_v49 = vadd.f32 %v1991_v30, %v1990_v6  ;;  %v12611_v22 = vsub.f32 %v17455_v56, %v12387_v19  ;;  %2278 = vadd.xlane.f32.xlu1 %v2277_v36  ;;  %v12617_v52 = vsub.f32 %v17457_v3, %v12387_v19  ;;  %v17463_v56 = vld [vmem:[#allocation65_spill] sm:$0xff]  ;;  %v1395_v36 = vpop.xlane.xlu0 %1394 }
 0x1df   : > { %17452 = vst [vmem:[#allocation46_spill] sm:$0xff] %v12601_v55  ;;  %17454 = vst [vmem:[#allocation47_spill] sm:$0xff] %v12605_v40  ;;  %v12621_v0 = vsub.f32 %v17459_v27, %v12387_v19  ;;  %v12625_v2 = vsub.f32 %v17461_v21, %v12387_v19  ;;  %v2283_v6 = vadd.f32 %v2282_v44, %v1988_v23  ;;  %v17465_v44 = vld [vmem:[#allocation68_spill] sm:$0xff] }
 0x1e0   : > { %17456 = vst [vmem:[#allocation50_spill] sm:$0xff] %v12611_v22  ;;  %17458 = vst [vmem:[#allocation60_spill] sm:$0xff] %v12617_v52  ;;  %v2288_v30 = vadd.f32 %v2287_v49, %v1992_v17  ;;  %v12629_v51 = vsub.f32 %v17463_v56, %v12387_v19  ;;  %v1996_v28 = vmul.f32 %v12611_v22, %v12611_v22 }
 0x1e1   : > { %17460 = vst [vmem:[#allocation61_spill] sm:$0xff] %v12621_v0  ;;  %17462 = vst [vmem:[#allocation63_spill] sm:$0xff] %v12625_v2  ;;  %v1994_v3 = vmul.f32 %v12601_v55, %v12601_v55  ;;  %v1995_v27 = vmul.f32 %v12605_v40, %v12605_v40  ;;  %v1997_v21 = vmul.f32 %v12617_v52, %v12617_v52  ;;  %v17467_v55 = vld [vmem:[#allocation54_spill] sm:$0xff]  ;;  %v17469_v40 = vld [vmem:[#allocation55_spill] sm:$0xff] }
 0x1e2   : > { %17464 = vst [vmem:[#allocation64_spill] sm:$0xff] %v12629_v51  ;;  %v1998_v49 = vmul.f32 %v12621_v0, %v12621_v0  ;;  %v2284_v23 = vadd.f32 %v2283_v6, %v1989_v33  ;;  %v2289_v17 = vadd.f32 %v2288_v30, %v1993_v37  ;;  %v12643_v56 = vsub.f32 %v17465_v44, %v12387_v19  ;;  %v17471_v0 = vld [vmem:[#allocation57_spill] sm:$0xff]  ;;  %v17473_v30 = vld [vmem:[#allocation58_spill] sm:$0xff] }
 0x1e3   : > { %v1999_v22 = vmul.f32 %v12625_v2, %v12625_v2  ;;  %v2294_v29 = vadd.f32 %v1997_v21, %v1996_v28  ;;  %v12649_v58 = vsub.f32 %v17467_v55, %v12335_v34  ;;  %v12653_v52 = vsub.f32 %v17469_v40, %v12335_v34  ;;  %v1416_v21 = vpop.xlane.xlu1 %1415  ;;  %v17475_v40 = vld [vmem:[#allocation59_spill] sm:$0xff] }
 0x1e4   : > { %17466 = vst [vmem:[#allocation65_spill] sm:$0xff] %v12643_v56  ;;  %v12657_v33 = vsub.f32 %v17471_v0, %v12335_v34  ;;  %2285 = vadd.xlane.f32.xlu0 %v2284_v23  ;;  %v12659_v37 = vmul.f32 0.0013020834, %v1395_v36  ;;  %v2290_v19 = vadd.f32 %v2289_v17, %v1994_v3  ;;  %v2000_v6 = vmul.f32 %v12629_v51, %v12629_v51  ;;  %v17477_v17 = vld [vmem:[#allocation62_spill] sm:$0xff] }
 0x1e5   : > { %17468 = vst [vmem:[#allocation68_spill] sm:$0xff] %v12649_v58  ;;  %17470 = vst [vmem:[#allocation54_spill] sm:$0xff] %v12653_v52  ;;  %v12665_v28 = vsub.f32 %v17473_v30, %v12335_v34  ;;  %v2295_v55 = vadd.f32 %v2294_v29, %v1998_v49  ;;  %v12669_v44 = vsub.f32 %v17475_v40, %v12335_v34 }
 0x1e6   : > { %17472 = vst [vmem:[#allocation55_spill] sm:$0xff] %v12657_v33  ;;  %v2002_v0 = vmul.f32 %v12649_v58, %v12649_v58  ;;  %v2003_v36 = vmul.f32 %v12653_v52, %v12653_v52  ;;  %v2291_v3 = vadd.f32 %v2290_v19, %v1995_v27  ;;  %v2001_v23 = vmul.f32 %v12643_v56, %v12643_v56  ;;  %v17479_v58 = vld [vmem:[#allocation72_spill] sm:$0xff]  ;;  %v17481_v19 = vld [vmem:[#allocation73_spill] sm:$0xff] }
 0x1e7   : > { %17474 = vst [vmem:[#allocation57_spill] sm:$0xff] %v12665_v28  ;;  %17476 = vst [vmem:[#allocation58_spill] sm:$0xff] %v12669_v44  ;;  %v12679_v30 = vsub.f32 %v17477_v17, %v12335_v34  ;;  %v2004_v29 = vmul.f32 %v12657_v33, %v12657_v33  ;;  %v2296_v49 = vadd.f32 %v2295_v55, %v1999_v22  ;;  %v12689_v27 = vmul.f32 0.0013020834, %v1416_v21  ;;  %v17483_v34 = vld [vmem:[#allocation75_spill] sm:$0xff]  ;;  %v17485_v22 = vld [vmem:[#allocation76_spill] sm:$0xff] }
 0x1e8   : > { %v2005_v40 = vmul.f32 %v12665_v28, %v12665_v28  ;;  %v2301_v51 = vadd.f32 %v2003_v36, %v2002_v0  ;;  %v12687_v2 = vsub.f32 %v17479_v58, %v12463_v16  ;;  %2292 = vadd.xlane.f32.xlu1 %v2291_v3  ;;  %v12693_v52 = vsub.f32 %v17481_v19, %v12463_v16  ;;  %v17487_v21 = vld [vmem:[#allocation77_spill] sm:$0xff]  ;;  %v1409_v28 = vpop.xlane.xlu0 %1408 }
 0x1e9   : > { %17478 = vst [vmem:[#allocation59_spill] sm:$0xff] %v12679_v30  ;;  %v12697_v17 = vsub.f32 %v17483_v34, %v12463_v16  ;;  %v12701_v55 = vsub.f32 %v17485_v22, %v12463_v16  ;;  %v2297_v0 = vadd.f32 %v2296_v49, %v2000_v6  ;;  %v2006_v58 = vmul.f32 %v12669_v44, %v12669_v44 }
 0x1ea   : > { %17480 = vst [vmem:[#allocation62_spill] sm:$0xff] %v12687_v2  ;;  %17482 = vst [vmem:[#allocation72_spill] sm:$0xff] %v12693_v52  ;;  %v2302_v36 = vadd.f32 %v2301_v51, %v2004_v29  ;;  %v12707_v3 = vsub.f32 %v17487_v21, %v12463_v16  ;;  %v2007_v19 = vmul.f32 %v12679_v30, %v12679_v30  ;;  %v17489_v51 = vld [vmem:[#allocation80_spill] sm:$0xff]  ;;  %v17491_v30 = vld [vmem:[#allocation66_spill] sm:$0xff] }
 0x1eb   : > { %17484 = vst [vmem:[#allocation73_spill] sm:$0xff] %v12697_v17  ;;  %17486 = vst [vmem:[#allocation75_spill] sm:$0xff] %v12701_v55  ;;  %v2008_v34 = vmul.f32 %v12687_v2, %v12687_v2  ;;  %v2009_v22 = vmul.f32 %v12693_v52, %v12693_v52  ;;  %v2010_v6 = vmul.f32 %v12697_v17, %v12697_v17  ;;  %v17493_v2 = vld [vmem:[#allocation67_spill] sm:$0xff]  ;;  %v17495_v17 = vld [vmem:[#allocation69_spill] sm:$0xff] }
 0x1ec   : > { %17488 = vst [vmem:[#allocation76_spill] sm:$0xff] %v12707_v3  ;;  %v2298_v49 = vadd.f32 %v2297_v0, %v2001_v23  ;;  %v2303_v44 = vadd.f32 %v2302_v36, %v2005_v40  ;;  %v12719_v29 = vsub.f32 %v17489_v51, %v12463_v16  ;;  %v2011_v21 = vmul.f32 %v12701_v55, %v12701_v55  ;;  %v17497_v36 = vld [vmem:[#allocation70_spill] sm:$0xff] }
 0x1ed   : > { %v2308_v33 = vadd.f32 %v2009_v22, %v2008_v34  ;;  %v12725_v56 = vsub.f32 %v17491_v30, %v12433_v46  ;;  %v12729_v52 = vsub.f32 %v17493_v2, %v12433_v46  ;;  %v12733_v23 = vsub.f32 %v17495_v17, %v12433_v46  ;;  %v1430_v22 = vpop.xlane.xlu1 %1429  ;;  %v17499_v2 = vld [vmem:[#allocation71_spill] sm:$0xff] }
 0x1ee   : > { %17490 = vst [vmem:[#allocation77_spill] sm:$0xff] %v12719_v29  ;;  %2299 = vadd.xlane.f32.xlu0 %v2298_v49  ;;  %v12735_v40 = vmul.f32 0.0013020834, %v1409_v28  ;;  %v2304_v16 = vadd.f32 %v2303_v44, %v2006_v58  ;;  %v2012_v0 = vmul.f32 %v12707_v3, %v12707_v3  ;;  %v12741_v34 = vsub.f32 %v17497_v36, %v12433_v46  ;;  %v17501_v49 = vld [vmem:[#allocation74_spill] sm:$0xff] }
 0x1ef   : > { %17492 = vst [vmem:[#allocation80_spill] sm:$0xff] %v12725_v56  ;;  %17494 = vst [vmem:[#allocation66_spill] sm:$0xff] %v12729_v52  ;;  %v2309_v30 = vadd.f32 %v2308_v33, %v2010_v6  ;;  %v12745_v51 = vsub.f32 %v17499_v2, %v12433_v46  ;;  %v2014_v17 = vmul.f32 %v12725_v56, %v12725_v56  ;;  %v17503_v56 = vld [vmem:[#allocation84_spill] sm:$0xff] }
 0x1f0   : > { %17496 = vst [vmem:[#allocation67_spill] sm:$0xff] %v12733_v23  ;;  %17498 = vst [vmem:[#allocation69_spill] sm:$0xff] %v12741_v34  ;;  %v2015_v28 = vmul.f32 %v12729_v52, %v12729_v52  ;;  %v2305_v44 = vadd.f32 %v2304_v16, %v2007_v19  ;;  %v2013_v58 = vmul.f32 %v12719_v29, %v12719_v29  ;;  %v12765_v19 = vmul.f32 0.0013020834, %v1430_v22  ;;  %v1423_v16 = vpop.xlane.xlu0 %1422  ;;  %v17505_v52 = vld [vmem:[#allocation85_spill] sm:$0xff] }
 0x1f1   : > { %17500 = vst [vmem:[#allocation70_spill] sm:$0xff] %v12745_v51  ;;  %v12755_v36 = vsub.f32 %v17501_v49, %v12433_v46  ;;  %v2016_v33 = vmul.f32 %v12733_v23, %v12733_v23  ;;  %v2310_v6 = vadd.f32 %v2309_v30, %v2011_v21  ;;  %v2017_v2 = vmul.f32 %v12741_v34, %v12741_v34  ;;  %v17507_v49 = vld [vmem:[#allocation87_spill] sm:$0xff]  ;;  %v17509_v21 = vld [vmem:[#allocation88_spill] sm:$0xff]  ;;  %v17511_v22 = vld [vmem:[#allocation89_spill] sm:$0xff]  ;;  %v1444_v29 = vpop.xlane.xlu1 %1443 }
 0x1f2   : > { %v2315_v3 = vadd.f32 %v2015_v28, %v2014_v17  ;;  %v12763_v55 = vsub.f32 %v17503_v56, %v12523_v13  ;;  %2306 = vadd.xlane.f32.xlu1 %v2305_v44  ;;  %v12769_v46 = vsub.f32 %v17505_v52, %v12523_v13  ;;  %v12773_v23 = vsub.f32 %v17507_v49, %v12523_v13 }
 0x1f3   : > { %17502 = vst [vmem:[#allocation71_spill] sm:$0xff] %v12755_v36  ;;  %v12777_v30 = vsub.f32 %v17509_v21, %v12523_v13  ;;  %v2311_v17 = vadd.f32 %v2310_v6, %v2012_v0  ;;  %v2018_v56 = vmul.f32 %v12745_v51, %v12745_v51  ;;  %v12783_v44 = vsub.f32 %v17511_v22, %v12523_v13 }
 0x1f4   : > { %17504 = vst [vmem:[#allocation74_spill] sm:$0xff] %v12763_v55  ;;  %17506 = vst [vmem:[#allocation84_spill] sm:$0xff] %v12769_v46  ;;  %v2316_v28 = vadd.f32 %v2315_v3, %v2016_v33  ;;  %v2019_v52 = vmul.f32 %v12755_v36, %v12755_v36  ;;  %v2020_v49 = vmul.f32 %v12763_v55, %v12763_v55  ;;  %v12793_v21 = vmul.f32 0.0013020834, %v1423_v16  ;;  %v17513_v33 = vld [vmem:[#allocation92_spill] sm:$0xff]  ;;  %v17515_v55 = vld [vmem:[#allocation78_spill] sm:$0xff] }
 0x1f5   : > { %17508 = vst [vmem:[#allocation85_spill] sm:$0xff] %v12773_v23  ;;  %17510 = vst [vmem:[#allocation87_spill] sm:$0xff] %v12777_v30  ;;  %v2021_v34 = vmul.f32 %v12769_v46, %v12769_v46  ;;  %v2022_v0 = vmul.f32 %v12773_v23, %v12773_v23  ;;  %v2312_v6 = vadd.f32 %v2311_v17, %v2013_v58  ;;  %v17517_v46 = vld [vmem:[#allocation79_spill] sm:$0xff] }
 0x1f6   : > { %17512 = vst [vmem:[#allocation88_spill] sm:$0xff] %v12783_v44  ;;  %v2317_v3 = vadd.f32 %v2316_v28, %v2017_v2  ;;  %v12797_v22 = vsub.f32 %v17513_v33, %v12523_v13  ;;  %v2023_v36 = vmul.f32 %v12777_v30, %v12777_v30  ;;  %v12803_v25 = vsub.f32 %v17515_v55, %v12481_v12  ;;  %v17519_v13 = vld [vmem:[#allocation81_spill] sm:$0xff]  ;;  %v17523_v55 = vld [vmem:[#allocation83_spill] sm:$0xff] }
 0x1f7   : > { %v2322_v51 = vadd.f32 %v2021_v34, %v2020_v49  ;;  %v12807_v23 = vsub.f32 %v17517_v46, %v12481_v12  ;;  %2313 = vadd.xlane.f32.xlu0 %v2312_v6  ;;  %v2024_v2 = vmul.f32 %v12783_v44, %v12783_v44  ;;  %v12813_v16 = vsub.f32 %v17519_v13, %v12481_v12  ;;  %v17521_v34 = vld [vmem:[#allocation82_spill] sm:$0xff] }
 0x1f8   : > { %17514 = vst [vmem:[#allocation89_spill] sm:$0xff] %v12797_v22  ;;  %17516 = vst [vmem:[#allocation92_spill] sm:$0xff] %v12803_v25  ;;  %v2318_v58 = vadd.f32 %v2317_v3, %v2018_v56  ;;  %v12817_v17 = vsub.f32 %v17521_v34, %v12481_v12  ;;  %v12821_v49 = vsub.f32 %v17523_v55, %v12481_v12  ;;  %v12829_v33 = vmul.f32 0.0013020834, %v1444_v29  ;;  %v17529_v29 = vld [vmem:[#allocation97_spill] sm:$0xff] }
 0x1f9   : > { %17518 = vst [vmem:[#allocation78_spill] sm:$0xff] %v12807_v23  ;;  %17520 = vst [vmem:[#allocation79_spill] sm:$0xff] %v12813_v16  ;;  %v2323_v28 = vadd.f32 %v2322_v51, %v2022_v0  ;;  %v2026_v46 = vmul.f32 %v12803_v25, %v12803_v25  ;;  %v2027_v56 = vmul.f32 %v12807_v23, %v12807_v23  ;;  %v17525_v0 = vld [vmem:[#allocation86_spill] sm:$0xff]  ;;  %v1437_v23 = vpop.xlane.xlu0 %1436 }
 0x1fa   : > { %17522 = vst [vmem:[#allocation81_spill] sm:$0xff] %v12817_v17  ;;  %17524 = vst [vmem:[#allocation82_spill] sm:$0xff] %v12821_v49  ;;  %v2319_v6 = vadd.f32 %v2318_v58, %v2019_v52  ;;  %v2025_v3 = vmul.f32 %v12797_v22, %v12797_v22  ;;  %v2028_v13 = vmul.f32 %v12813_v16, %v12813_v16  ;;  %v17527_v52 = vld [vmem:[#allocation96_spill] sm:$0xff] }
 0x1fb   : > { %v2324_v51 = vadd.f32 %v2323_v28, %v2023_v36  ;;  %v12835_v34 = vsub.f32 %v17525_v0, %v12481_v12  ;;  %v2029_v55 = vmul.f32 %v12817_v17, %v12817_v17  ;;  %v2329_v25 = vadd.f32 %v2027_v56, %v2026_v46  ;;  %v17531_v36 = vld [vmem:[#allocation99_spill] sm:$0xff]  ;;  %v17533_v12 = vld [vmem:[#allocation100_spill] sm:$0xff] }
 0x1fc   : > { %2320 = vadd.xlane.f32.xlu1 %v2319_v6  ;;  %v12841_v58 = vsub.f32 %v17527_v52, %v12583_v32  ;;  %v12845_v22 = vsub.f32 %v17529_v29, %v12583_v32  ;;  %v12849_v28 = vsub.f32 %v17531_v36, %v12583_v32  ;;  %v12853_v0 = vsub.f32 %v17533_v12, %v12583_v32  ;;  %v17535_v6 = vld [vmem:[#allocation101_spill] sm:$0xff]  ;;  %v17537_v29 = vld [vmem:[#allocation104_spill] sm:$0xff] }
 0x1fd   : > { %17526 = vst [vmem:[#allocation83_spill] sm:$0xff] %v12835_v34  ;;  %v2325_v17 = vadd.f32 %v2324_v51, %v2024_v2  ;;  %v2030_v46 = vmul.f32 %v12821_v49, %v12821_v49  ;;  %v2330_v56 = vadd.f32 %v2329_v25, %v2028_v13  ;;  %v12859_v52 = vsub.f32 %v17535_v6, %v12583_v32 }
 0x1fe   : > { %17528 = vst [vmem:[#allocation86_spill] sm:$0xff] %v12841_v58  ;;  %17530 = vst [vmem:[#allocation96_spill] sm:$0xff] %v12845_v22  ;;  %v12863_v16 = vsub.f32 %v17537_v29, %v12583_v32  ;;  %v2032_v36 = vmul.f32 %v12841_v58, %v12841_v58  ;;  %v2033_v12 = vmul.f32 %v12845_v22, %v12845_v22  ;;  %v12871_v49 = vmul.f32 0.0013020834, %v1437_v23  ;;  %v1458_v29 = vpop.xlane.xlu1 %1457  ;;  %v17539_v58 = vld [vmem:[#allocation90_spill] sm:$0xff]  ;;  %v17541_v22 = vld [vmem:[#allocation91_spill] sm:$0xff] }
 0x1ff   : > { %17532 = vst [vmem:[#allocation97_spill] sm:$0xff] %v12849_v28  ;;  %17534 = vst [vmem:[#allocation99_spill] sm:$0xff] %v12853_v0  ;;  %v2034_v2 = vmul.f32 %v12849_v28, %v12849_v28  ;;  %v2326_v51 = vadd.f32 %v2325_v17, %v2025_v3  ;;  %v2031_v25 = vmul.f32 %v12835_v34, %v12835_v34  ;;  %v17543_v3 = vld [vmem:[#allocation93_spill] sm:$0xff] }
 0x200   : > { %17536 = vst [vmem:[#allocation100_spill] sm:$0xff] %v12859_v52  ;;  %17538 = vst [vmem:[#allocation101_spill] sm:$0xff] %v12863_v16  ;;  %v2331_v13 = vadd.f32 %v2330_v56, %v2029_v55  ;;  %v2035_v32 = vmul.f32 %v12853_v0, %v12853_v0  ;;  %v2336_v6 = vadd.f32 %v2033_v12, %v2032_v36  ;;  %v17545_v56 = vld [vmem:[#allocation94_spill] sm:$0xff] }
 0x201   : > { %v12879_v44 = vsub.f32 %v17539_v58, %v12557_v54  ;;  %v12883_v30 = vsub.f32 %v17541_v22, %v12557_v54  ;;  %2327 = vadd.xlane.f32.xlu0 %v2326_v51  ;;  %v2036_v17 = vmul.f32 %v12859_v52, %v12859_v52  ;;  %v12889_v55 = vsub.f32 %v17543_v3, %v12557_v54  ;;  %v1451_v52 = vpop.xlane.xlu0 %1450  ;;  %v17547_v3 = vld [vmem:[#allocation95_spill] sm:$0xff] }
 0x202   : > { %v2332_v23 = vadd.f32 %v2331_v13, %v2030_v46  ;;  %v12893_v36 = vsub.f32 %v17545_v56, %v12557_v54  ;;  %v2037_v58 = vmul.f32 %v12863_v16, %v12863_v16  ;;  %v2337_v12 = vadd.f32 %v2336_v6, %v2034_v2  ;;  %v17549_v2 = vld [vmem:[#allocation98_spill] sm:$0xff] }
 0x203   : > { %17540 = vst [vmem:[#allocation104_spill] sm:$0xff] %v12879_v44  ;;  %17542 = vst [vmem:[#allocation90_spill] sm:$0xff] %v12883_v30  ;;  %v2038_v22 = vmul.f32 %v12879_v44, %v12879_v44  ;;  %v2039_v46 = vmul.f32 %v12883_v30, %v12883_v30  ;;  %v12901_v13 = vmul.f32 0.0013020834, %v1458_v29  ;;  %v12905_v0 = vsub.f32 %v17547_v3, %v12557_v54 }
 0x204   : > { %17544 = vst [vmem:[#allocation91_spill] sm:$0xff] %v12889_v55  ;;  %17546 = vst [vmem:[#allocation93_spill] sm:$0xff] %v12893_v36  ;;  %v2333_v51 = vadd.f32 %v2332_v23, %v2031_v25  ;;  %v2040_v56 = vmul.f32 %v12889_v55, %v12889_v55  ;;  %v2338_v28 = vadd.f32 %v2337_v12, %v2035_v32  ;;  %v17551_v25 = vld [vmem:[#allocation108_spill] sm:$0xff]  ;;  %v17553_v23 = vld [vmem:[#allocation109_spill] sm:$0xff] }
 0x205   : > { %17548 = vst [vmem:[#allocation94_spill] sm:$0xff] %v12905_v0  ;;  %v12911_v6 = vsub.f32 %v17549_v2, %v12557_v54  ;;  %v2041_v44 = vmul.f32 %v12893_v36, %v12893_v36  ;;  %v2343_v30 = vadd.f32 %v2039_v46, %v2038_v22  ;;  %v12917_v29 = vsub.f32 %v17551_v25, %v12659_v37  ;;  %v17555_v55 = vld [vmem:[#allocation111_spill] sm:$0xff]  ;;  %v17557_v54 = vld [vmem:[#allocation112_spill] sm:$0xff]  ;;  %v17559_v46 = vld [vmem:[#allocation113_spill] sm:$0xff] }
 0x206   : > { %2334 = vadd.xlane.f32.xlu1 %v2333_v51  ;;  %v12921_v3 = vsub.f32 %v17553_v23, %v12659_v37  ;;  %v12925_v32 = vsub.f32 %v17555_v55, %v12659_v37  ;;  %v12929_v12 = vsub.f32 %v17557_v54, %v12659_v37  ;;  %v2339_v2 = vadd.f32 %v2338_v28, %v2036_v17  ;;  %v17561_v25 = vld [vmem:[#allocation116_spill] sm:$0xff]  ;;  %v1472_v54 = vpop.xlane.xlu1 %1471 }
 0x207   : > { %17550 = vst [vmem:[#allocation95_spill] sm:$0xff] %v12911_v6  ;;  %17552 = vst [vmem:[#allocation98_spill] sm:$0xff] %v12917_v29  ;;  %v12931_v36 = vmul.f32 0.0013020834, %v1451_v52  ;;  %v2344_v22 = vadd.f32 %v2343_v30, %v2040_v56  ;;  %v12935_v51 = vsub.f32 %v17559_v46, %v12659_v37  ;;  %v12939_v23 = vsub.f32 %v17561_v25, %v12659_v37  ;;  %v17563_v25 = vld [vmem:[#allocation102_spill] sm:$0xff] }
 0x208   : > { %17554 = vst [vmem:[#allocation108_spill] sm:$0xff] %v12921_v3  ;;  %17556 = vst [vmem:[#allocation109_spill] sm:$0xff] %v12925_v32  ;;  %v2044_v55 = vmul.f32 %v12917_v29, %v12917_v29  ;;  %v2045_v16 = vmul.f32 %v12921_v3, %v12921_v3  ;;  %v2046_v28 = vmul.f32 %v12925_v32, %v12925_v32  ;;  %v17565_v3 = vld [vmem:[#allocation103_spill] sm:$0xff] }
 0x209   : > { %17558 = vst [vmem:[#allocation111_spill] sm:$0xff] %v12929_v12  ;;  %17560 = vst [vmem:[#allocation112_spill] sm:$0xff] %v12935_v51  ;;  %v2340_v52 = vadd.f32 %v2339_v2, %v2037_v58  ;;  %v2042_v30 = vmul.f32 %v12905_v0, %v12905_v0  ;;  %v2043_v17 = vmul.f32 %v12911_v6, %v12911_v6  ;;  %v12973_v6 = vmul.f32 0.0013020834, %v1472_v54  ;;  %v1465_v0 = vpop.xlane.xlu0 %1464 }
 0x20a   : > { %17562 = vst [vmem:[#allocation113_spill] sm:$0xff] %v12939_v23  ;;  %v2345_v56 = vadd.f32 %v2344_v22, %v2041_v44  ;;  %v2047_v37 = vmul.f32 %v12929_v12, %v12929_v12  ;;  %v2350_v46 = vadd.f32 %v2045_v16, %v2044_v55  ;;  %v12955_v29 = vsub.f32 %v17563_v25, %v12613_v60  ;;  %v17567_v44 = vld [vmem:[#allocation105_spill] sm:$0xff]  ;;  %v17569_v12 = vld [vmem:[#allocation106_spill] sm:$0xff] }
 0x20b   : > { %v12959_v32 = vsub.f32 %v17565_v3, %v12613_v60  ;;  %2341 = vadd.xlane.f32.xlu0 %v2340_v52  ;;  %v2048_v2 = vmul.f32 %v12935_v51, %v12935_v51  ;;  %v12965_v22 = vsub.f32 %v17567_v44, %v12613_v60  ;;  %v12969_v16 = vsub.f32 %v17569_v12, %v12613_v60 }
 0x20c   : > { %17564 = vst [vmem:[#allocation116_spill] sm:$0xff] %v12955_v29  ;;  %v2346_v58 = vadd.f32 %v2345_v56, %v2042_v30  ;;  %v2049_v55 = vmul.f32 %v12939_v23, %v12939_v23  ;;  %v2351_v25 = vadd.f32 %v2350_v46, %v2046_v28  ;;  %v2050_v3 = vmul.f32 %v12955_v29, %v12955_v29  ;;  %v17571_v30 = vld [vmem:[#allocation107_spill] sm:$0xff]  ;;  %v17573_v28 = vld [vmem:[#allocation110_spill] sm:$0xff] }
 0x20d   : > { %17566 = vst [vmem:[#allocation102_spill] sm:$0xff] %v12959_v32  ;;  %17568 = vst [vmem:[#allocation103_spill] sm:$0xff] %v12965_v22  ;;  %v12979_v56 = vsub.f32 %v17571_v30, %v12613_v60  ;;  %v2051_v44 = vmul.f32 %v12959_v32, %v12959_v32  ;;  %v2052_v12 = vmul.f32 %v12965_v22, %v12965_v22  ;;  %v17577_v32 = vld [vmem:[#allocation121_spill] sm:$0xff] }
 0x20e   : > { %17570 = vst [vmem:[#allocation105_spill] sm:$0xff] %v12969_v16  ;;  %v2347_v52 = vadd.f32 %v2346_v58, %v2043_v17  ;;  %v2352_v51 = vadd.f32 %v2351_v25, %v2047_v37  ;;  %v12987_v54 = vsub.f32 %v17573_v28, %v12613_v60  ;;  %v2053_v46 = vmul.f32 %v12969_v16, %v12969_v16  ;;  %v17575_v17 = vld [vmem:[#allocation120_spill] sm:$0xff]  ;;  %v17579_v37 = vld [vmem:[#allocation123_spill] sm:$0xff]  ;;  %v17583_v16 = vld [vmem:[#allocation125_spill] sm:$0xff] }
 0x20f   : > { %17572 = vst [vmem:[#allocation106_spill] sm:$0xff] %v12979_v56  ;;  %v12993_v58 = vsub.f32 %v17575_v17, %v12735_v40  ;;  %v2357_v30 = vadd.f32 %v2051_v44, %v2050_v3  ;;  %v12997_v29 = vsub.f32 %v17577_v32, %v12735_v40  ;;  %v13001_v25 = vsub.f32 %v17579_v37, %v12735_v40  ;;  %v17581_v60 = vld [vmem:[#allocation124_spill] sm:$0xff] }
 0x210   : > { %17574 = vst [vmem:[#allocation107_spill] sm:$0xff] %v12987_v54  ;;  %2348 = vadd.xlane.f32.xlu1 %v2347_v52  ;;  %v13005_v28 = vsub.f32 %v17581_v60, %v12735_v40  ;;  %v2353_v22 = vadd.f32 %v2352_v51, %v2048_v2  ;;  %v13009_v23 = vsub.f32 %v17583_v16, %v12735_v40  ;;  %v17585_v52 = vld [vmem:[#allocation128_spill] sm:$0xff]  ;;  %v13017_v44 = vmul.f32 0.0013020834, %v1465_v0 }
 0x211   : > { %17576 = vst [vmem:[#allocation110_spill] sm:$0xff] %v12993_v58  ;;  %17578 = vst [vmem:[#allocation120_spill] sm:$0xff] %v12997_v29  ;;  %v13013_v3 = vsub.f32 %v17585_v52, %v12735_v40  ;;  %v2056_v32 = vmul.f32 %v12993_v58, %v12993_v58  ;;  %v2358_v17 = vadd.f32 %v2357_v30, %v2052_v12  ;;  %v1486_v52 = vpop.xlane.xlu1 %1485  ;;  %v17587_v12 = vld [vmem:[#allocation114_spill] sm:$0xff] }
 0x212   : > { %17580 = vst [vmem:[#allocation121_spill] sm:$0xff] %v13001_v25  ;;  %17582 = vst [vmem:[#allocation123_spill] sm:$0xff] %v13005_v28  ;;  %v2057_v37 = vmul.f32 %v12997_v29, %v12997_v29  ;;  %v2058_v51 = vmul.f32 %v13001_v25, %v13001_v25  ;;  %v2354_v2 = vadd.f32 %v2353_v22, %v2049_v55  ;;  %v17589_v29 = vld [vmem:[#allocation115_spill] sm:$0xff] }
 0x213   : > { %17584 = vst [vmem:[#allocation124_spill] sm:$0xff] %v13009_v23  ;;  %17586 = vst [vmem:[#allocation125_spill] sm:$0xff] %v13013_v3  ;;  %v2054_v16 = vmul.f32 %v12979_v56, %v12979_v56  ;;  %v2055_v40 = vmul.f32 %v12987_v54, %v12987_v54  ;;  %v2059_v60 = vmul.f32 %v13005_v28, %v13005_v28  ;;  %v17591_v28 = vld [vmem:[#allocation117_spill] sm:$0xff] }
 0x214   : > { %v2359_v0 = vadd.f32 %v2358_v17, %v2053_v46  ;;  %v2364_v58 = vadd.f32 %v2057_v37, %v2056_v32  ;;  %v13031_v30 = vsub.f32 %v17587_v12, %v12689_v27  ;;  %v13035_v25 = vsub.f32 %v17589_v29, %v12689_v27  ;;  %2355 = vadd.xlane.f32.xlu0 %v2354_v2  ;;  %v17593_v46 = vld [vmem:[#allocation118_spill] sm:$0xff]  ;;  %v17595_v2 = vld [vmem:[#allocation119_spill] sm:$0xff] }
 0x215   : > { %v2060_v22 = vmul.f32 %v13009_v23, %v13009_v23  ;;  %v2061_v55 = vmul.f32 %v13013_v3, %v13013_v3  ;;  %v13043_v54 = vsub.f32 %v17591_v28, %v12689_v27  ;;  %v13047_v32 = vsub.f32 %v17593_v46, %v12689_v27  ;;  %v17597_v3 = vld [vmem:[#allocation122_spill] sm:$0xff]  ;;  %v17599_v46 = vld [vmem:[#allocation132_spill] sm:$0xff] }
 0x216   : > { %17588 = vst [vmem:[#allocation128_spill] sm:$0xff] %v13031_v30  ;;  %17590 = vst [vmem:[#allocation114_spill] sm:$0xff] %v13035_v25  ;;  %v2360_v17 = vadd.f32 %v2359_v0, %v2054_v16  ;;  %v2365_v37 = vadd.f32 %v2364_v58, %v2058_v51  ;;  %v13049_v12 = vmul.f32 0.0013020834, %v1486_v52  ;;  %v2062_v29 = vmul.f32 %v13031_v30, %v13031_v30  ;;  %v1479_v52 = vpop.xlane.xlu0 %1478 }
 0x217   : > { %17592 = vst [vmem:[#allocation115_spill] sm:$0xff] %v13043_v54  ;;  %17594 = vst [vmem:[#allocation117_spill] sm:$0xff] %v13047_v32  ;;  %v13055_v23 = vsub.f32 %v17595_v2, %v12689_v27  ;;  %v13059_v56 = vsub.f32 %v17597_v3, %v12689_v27  ;;  %v2063_v28 = vmul.f32 %v13035_v25, %v13035_v25  ;;  %v17601_v27 = vld [vmem:[#allocation133_spill] sm:$0xff]  ;;  %v17603_v25 = vld [vmem:[#allocation135_spill] sm:$0xff] }
 0x218   : > { %v2064_v16 = vmul.f32 %v13043_v54, %v13043_v54  ;;  %v2361_v58 = vadd.f32 %v2360_v17, %v2055_v40  ;;  %v2366_v51 = vadd.f32 %v2365_v37, %v2059_v60  ;;  %v2065_v0 = vmul.f32 %v13047_v32, %v13047_v32  ;;  %v17605_v40 = vld [vmem:[#allocation136_spill] sm:$0xff]  ;;  %v17607_v37 = vld [vmem:[#allocation137_spill] sm:$0xff] }
 0x219   : > { %17596 = vst [vmem:[#allocation118_spill] sm:$0xff] %v13055_v23  ;;  %17598 = vst [vmem:[#allocation119_spill] sm:$0xff] %v13059_v56  ;;  %v13069_v2 = vsub.f32 %v17599_v46, %v12793_v21  ;;  %v2371_v30 = vadd.f32 %v2063_v28, %v2062_v29  ;;  %v13073_v3 = vsub.f32 %v17601_v27, %v12793_v21  ;;  %v17609_v29 = vld [vmem:[#allocation140_spill] sm:$0xff]  ;;  %v13093_v27 = vmul.f32 0.0013020834, %v1479_v52 }
 0x21a   : > { %v13077_v34 = vsub.f32 %v17603_v25, %v12793_v21  ;;  %v13081_v60 = vsub.f32 %v17605_v40, %v12793_v21  ;;  %2362 = vadd.xlane.f32.xlu1 %v2361_v58  ;;  %v2367_v17 = vadd.f32 %v2366_v51, %v2060_v22  ;;  %v13085_v32 = vsub.f32 %v17607_v37, %v12793_v21 }
 0x21b   : > { %17600 = vst [vmem:[#allocation122_spill] sm:$0xff] %v13069_v2  ;;  %17602 = vst [vmem:[#allocation132_spill] sm:$0xff] %v13073_v3  ;;  %v13089_v28 = vsub.f32 %v17609_v29, %v12793_v21  ;;  %v2068_v46 = vmul.f32 %v13069_v2, %v13069_v2  ;;  %v2372_v25 = vadd.f32 %v2371_v30, %v2064_v16  ;;  %v1500_v29 = vpop.xlane.xlu1 %1499 }
 0x21c   : > { %17604 = vst [vmem:[#allocation133_spill] sm:$0xff] %v13077_v34  ;;  %17606 = vst [vmem:[#allocation135_spill] sm:$0xff] %v13081_v60  ;;  %v2069_v40 = vmul.f32 %v13073_v3, %v13073_v3  ;;  %v2070_v22 = vmul.f32 %v13077_v34, %v13077_v34  ;;  %v2368_v58 = vadd.f32 %v2367_v17, %v2061_v55  ;;  %v17611_v3 = vld [vmem:[#allocation126_spill] sm:$0xff]  ;;  %v17613_v17 = vld [vmem:[#allocation127_spill] sm:$0xff] }
 0x21d   : > { %17608 = vst [vmem:[#allocation136_spill] sm:$0xff] %v13085_v32  ;;  %17610 = vst [vmem:[#allocation137_spill] sm:$0xff] %v13089_v28  ;;  %v2066_v51 = vmul.f32 %v13055_v23, %v13055_v23  ;;  %v2067_v21 = vmul.f32 %v13059_v56, %v13059_v56  ;;  %v2071_v37 = vmul.f32 %v13081_v60, %v13081_v60  ;;  %v17615_v60 = vld [vmem:[#allocation129_spill] sm:$0xff] }
 0x21e   : > { %v2373_v52 = vadd.f32 %v2372_v25, %v2065_v0  ;;  %v2072_v30 = vmul.f32 %v13085_v32, %v13085_v32  ;;  %v2378_v16 = vadd.f32 %v2069_v40, %v2068_v46  ;;  %v13109_v2 = vsub.f32 %v17611_v3, %v12765_v19  ;;  %2369 = vadd.xlane.f32.xlu0 %v2368_v58  ;;  %v17617_v0 = vld [vmem:[#allocation130_spill] sm:$0xff] }
 0x21f   : > { %v2073_v55 = vmul.f32 %v13089_v28, %v13089_v28  ;;  %v13115_v34 = vsub.f32 %v17613_v17, %v12765_v19  ;;  %v13119_v56 = vsub.f32 %v17615_v60, %v12765_v19  ;;  %v13123_v25 = vsub.f32 %v17617_v0, %v12765_v19  ;;  %v17619_v28 = vld [vmem:[#allocation131_spill] sm:$0xff]  ;;  %v17621_v17 = vld [vmem:[#allocation134_spill] sm:$0xff]  ;;  %v17623_v0 = vld [vmem:[#allocation144_spill] sm:$0xff] }
 0x220   : > { %17612 = vst [vmem:[#allocation140_spill] sm:$0xff] %v13109_v2  ;;  %v2374_v46 = vadd.f32 %v2373_v52, %v2066_v51  ;;  %v2379_v40 = vadd.f32 %v2378_v16, %v2070_v22  ;;  %v13125_v3 = vmul.f32 0.0013020834, %v1500_v29  ;;  %v2074_v58 = vmul.f32 %v13109_v2, %v13109_v2  ;;  %v1493_v52 = vpop.xlane.xlu0 %1492 }
 0x221   : > { %17614 = vst [vmem:[#allocation126_spill] sm:$0xff] %v13115_v34  ;;  %17616 = vst [vmem:[#allocation127_spill] sm:$0xff] %v13119_v56  ;;  %v13131_v32 = vsub.f32 %v17619_v28, %v12765_v19  ;;  %v13135_v23 = vsub.f32 %v17621_v17, %v12765_v19  ;;  %v2075_v60 = vmul.f32 %v13115_v34, %v13115_v34  ;;  %v17625_v19 = vld [vmem:[#allocation145_spill] sm:$0xff]  ;;  %v17627_v34 = vld [vmem:[#allocation147_spill] sm:$0xff] }
 0x222   : > { %17618 = vst [vmem:[#allocation129_spill] sm:$0xff] %v13123_v25  ;;  %v2076_v51 = vmul.f32 %v13119_v56, %v13119_v56  ;;  %v2375_v22 = vadd.f32 %v2374_v46, %v2067_v21  ;;  %v2380_v29 = vadd.f32 %v2379_v40, %v2071_v37  ;;  %v2077_v16 = vmul.f32 %v13123_v25, %v13123_v25  ;;  %v17629_v21 = vld [vmem:[#allocation148_spill] sm:$0xff]  ;;  %v17631_v40 = vld [vmem:[#allocation149_spill] sm:$0xff] }
 0x223   : > { %17620 = vst [vmem:[#allocation130_spill] sm:$0xff] %v13131_v32  ;;  %17622 = vst [vmem:[#allocation131_spill] sm:$0xff] %v13135_v23  ;;  %v13145_v28 = vsub.f32 %v17623_v0, %v12871_v49  ;;  %v2385_v2 = vadd.f32 %v2075_v60, %v2074_v58  ;;  %v13149_v17 = vsub.f32 %v17625_v19, %v12871_v49  ;;  %v17633_v58 = vld [vmem:[#allocation152_spill] sm:$0xff]  ;;  %v13169_v19 = vmul.f32 0.0013020834, %v1493_v52 }
 0x224   : > { %v13153_v54 = vsub.f32 %v17627_v34, %v12871_v49  ;;  %v13157_v37 = vsub.f32 %v17629_v21, %v12871_v49  ;;  %2376 = vadd.xlane.f32.xlu1 %v2375_v22  ;;  %v2381_v46 = vadd.f32 %v2380_v29, %v2072_v30  ;;  %v13161_v25 = vsub.f32 %v17631_v40, %v12871_v49 }
 0x225   : > { %17624 = vst [vmem:[#allocation134_spill] sm:$0xff] %v13145_v28  ;;  %17626 = vst [vmem:[#allocation144_spill] sm:$0xff] %v13149_v17  ;;  %v13165_v60 = vsub.f32 %v17633_v58, %v12871_v49  ;;  %v2080_v0 = vmul.f32 %v13145_v28, %v13145_v28  ;;  %v2386_v34 = vadd.f32 %v2385_v2, %v2076_v51  ;;  %v1514_v58 = vpop.xlane.xlu1 %1513 }
 0x226   : > { %17628 = vst [vmem:[#allocation145_spill] sm:$0xff] %v13153_v54  ;;  %17630 = vst [vmem:[#allocation147_spill] sm:$0xff] %v13157_v37  ;;  %v2081_v21 = vmul.f32 %v13149_v17, %v13149_v17  ;;  %v2082_v30 = vmul.f32 %v13153_v54, %v13153_v54  ;;  %v2382_v22 = vadd.f32 %v2381_v46, %v2073_v55  ;;  %v17635_v17 = vld [vmem:[#allocation138_spill] sm:$0xff]  ;;  %v17637_v46 = vld [vmem:[#allocation139_spill] sm:$0xff] }
 0x227   : > { %17632 = vst [vmem:[#allocation148_spill] sm:$0xff] %v13161_v25  ;;  %17634 = vst [vmem:[#allocation149_spill] sm:$0xff] %v13165_v60  ;;  %v2078_v29 = vmul.f32 %v13131_v32, %v13131_v32  ;;  %v2079_v49 = vmul.f32 %v13135_v23, %v13135_v23  ;;  %v2083_v40 = vmul.f32 %v13157_v37, %v13157_v37  ;;  %v17639_v37 = vld [vmem:[#allocation141_spill] sm:$0xff] }
 0x228   : > { %v2387_v52 = vadd.f32 %v2386_v34, %v2077_v16  ;;  %v2084_v2 = vmul.f32 %v13161_v25, %v13161_v25  ;;  %v2392_v51 = vadd.f32 %v2081_v21, %v2080_v0  ;;  %v13185_v28 = vsub.f32 %v17635_v17, %v12829_v33  ;;  %2383 = vadd.xlane.f32.xlu0 %v2382_v22  ;;  %v17641_v16 = vld [vmem:[#allocation142_spill] sm:$0xff] }
 0x229   : > { %v2085_v55 = vmul.f32 %v13165_v60, %v13165_v60  ;;  %v13191_v54 = vsub.f32 %v17637_v46, %v12829_v33  ;;  %v13195_v23 = vsub.f32 %v17639_v37, %v12829_v33  ;;  %v13199_v34 = vsub.f32 %v17641_v16, %v12829_v33  ;;  %v17643_v60 = vld [vmem:[#allocation143_spill] sm:$0xff]  ;;  %v17645_v46 = vld [vmem:[#allocation146_spill] sm:$0xff]  ;;  %v17647_v16 = vld [vmem:[#allocation156_spill] sm:$0xff] }
 0x22a   : > { %17636 = vst [vmem:[#allocation152_spill] sm:$0xff] %v13185_v28  ;;  %v2388_v0 = vadd.f32 %v2387_v52, %v2078_v29  ;;  %v2393_v21 = vadd.f32 %v2392_v51, %v2082_v30  ;;  %v13201_v17 = vmul.f32 0.0013020834, %v1514_v58  ;;  %v2086_v22 = vmul.f32 %v13185_v28, %v13185_v28  ;;  %v1507_v52 = vpop.xlane.xlu0 %1506 }
 0x22b   : > { %17638 = vst [vmem:[#allocation138_spill] sm:$0xff] %v13191_v54  ;;  %17640 = vst [vmem:[#allocation139_spill] sm:$0xff] %v13195_v23  ;;  %v13207_v25 = vsub.f32 %v17643_v60, %v12829_v33  ;;  %v13211_v32 = vsub.f32 %v17645_v46, %v12829_v33  ;;  %v2087_v37 = vmul.f32 %v13191_v54, %v13191_v54  ;;  %v17649_v33 = vld [vmem:[#allocation157_spill] sm:$0xff]  ;;  %v17651_v54 = vld [vmem:[#allocation159_spill] sm:$0xff] }
 0x22c   : > { %17642 = vst [vmem:[#allocation141_spill] sm:$0xff] %v13199_v34  ;;  %v2088_v29 = vmul.f32 %v13195_v23, %v13195_v23  ;;  %v2389_v30 = vadd.f32 %v2388_v0, %v2079_v49  ;;  %v2394_v58 = vadd.f32 %v2393_v21, %v2083_v40  ;;  %v2089_v51 = vmul.f32 %v13199_v34, %v13199_v34  ;;  %v17653_v49 = vld [vmem:[#allocation160_spill] sm:$0xff]  ;;  %v17655_v21 = vld [vmem:[#allocation161_spill] sm:$0xff] }
 0x22d   : > { %17644 = vst [vmem:[#allocation142_spill] sm:$0xff] %v13207_v25  ;;  %17646 = vst [vmem:[#allocation143_spill] sm:$0xff] %v13211_v32  ;;  %v13221_v60 = vsub.f32 %v17647_v16, %v12931_v36  ;;  %v2399_v28 = vadd.f32 %v2087_v37, %v2086_v22  ;;  %v13225_v46 = vsub.f32 %v17649_v33, %v12931_v36  ;;  %v17657_v22 = vld [vmem:[#allocation164_spill] sm:$0xff]  ;;  %v13245_v33 = vmul.f32 0.0013020834, %v1507_v52 }
 0x22e   : > { %v13229_v56 = vsub.f32 %v17651_v54, %v12931_v36  ;;  %v13233_v40 = vsub.f32 %v17653_v49, %v12931_v36  ;;  %2390 = vadd.xlane.f32.xlu1 %v2389_v30  ;;  %v2395_v0 = vadd.f32 %v2394_v58, %v2084_v2  ;;  %v13237_v34 = vsub.f32 %v17655_v21, %v12931_v36 }
 0x22f   : > { %17648 = vst [vmem:[#allocation146_spill] sm:$0xff] %v13221_v60  ;;  %17650 = vst [vmem:[#allocation156_spill] sm:$0xff] %v13225_v46  ;;  %v13241_v37 = vsub.f32 %v17657_v22, %v12931_v36  ;;  %v2092_v16 = vmul.f32 %v13221_v60, %v13221_v60  ;;  %v2400_v54 = vadd.f32 %v2399_v28, %v2088_v29  ;;  %v1528_v22 = vpop.xlane.xlu1 %1527 }
 0x230   : > { %17652 = vst [vmem:[#allocation157_spill] sm:$0xff] %v13229_v56  ;;  %17654 = vst [vmem:[#allocation159_spill] sm:$0xff] %v13233_v40  ;;  %v2093_v49 = vmul.f32 %v13225_v46, %v13225_v46  ;;  %v2094_v2 = vmul.f32 %v13229_v56, %v13229_v56  ;;  %v2396_v30 = vadd.f32 %v2395_v0, %v2085_v55  ;;  %v17659_v46 = vld [vmem:[#allocation150_spill] sm:$0xff]  ;;  %v17661_v0 = vld [vmem:[#allocation151_spill] sm:$0xff] }
 0x231   : > { %17656 = vst [vmem:[#allocation160_spill] sm:$0xff] %v13237_v34  ;;  %17658 = vst [vmem:[#allocation161_spill] sm:$0xff] %v13241_v37  ;;  %v2090_v58 = vmul.f32 %v13207_v25, %v13207_v25  ;;  %v2091_v36 = vmul.f32 %v13211_v32, %v13211_v32  ;;  %v2095_v21 = vmul.f32 %v13233_v40, %v13233_v40  ;;  %v17663_v40 = vld [vmem:[#allocation153_spill] sm:$0xff] }
 0x232   : > { %v2401_v52 = vadd.f32 %v2400_v54, %v2089_v51  ;;  %v2096_v28 = vmul.f32 %v13237_v34, %v13237_v34  ;;  %v2406_v29 = vadd.f32 %v2093_v49, %v2092_v16  ;;  %v13261_v60 = vsub.f32 %v17659_v46, %v12901_v13  ;;  %2397 = vadd.xlane.f32.xlu0 %v2396_v30  ;;  %v17665_v51 = vld [vmem:[#allocation154_spill] sm:$0xff] }
 0x233   : > { %v2097_v55 = vmul.f32 %v13241_v37, %v13241_v37  ;;  %v13267_v56 = vsub.f32 %v17661_v0, %v12901_v13  ;;  %v13271_v32 = vsub.f32 %v17663_v40, %v12901_v13  ;;  %v13275_v54 = vsub.f32 %v17665_v51, %v12901_v13  ;;  %v17667_v37 = vld [vmem:[#allocation155_spill] sm:$0xff]  ;;  %v17669_v0 = vld [vmem:[#allocation158_spill] sm:$0xff]  ;;  %v17671_v51 = vld [vmem:[#allocation168_spill] sm:$0xff] }
 0x234   : > { %17660 = vst [vmem:[#allocation164_spill] sm:$0xff] %v13261_v60  ;;  %v2402_v16 = vadd.f32 %v2401_v52, %v2090_v58  ;;  %v2407_v49 = vadd.f32 %v2406_v29, %v2094_v2  ;;  %v13277_v46 = vmul.f32 0.0013020834, %v1528_v22  ;;  %v2098_v30 = vmul.f32 %v13261_v60, %v13261_v60  ;;  %v1521_v52 = vpop.xlane.xlu0 %1520 }
 0x235   : > { %17662 = vst [vmem:[#allocation150_spill] sm:$0xff] %v13267_v56  ;;  %17664 = vst [vmem:[#allocation151_spill] sm:$0xff] %v13271_v32  ;;  %v13283_v34 = vsub.f32 %v17667_v37, %v12901_v13  ;;  %v13287_v25 = vsub.f32 %v17669_v0, %v12901_v13  ;;  %v2099_v40 = vmul.f32 %v13267_v56, %v13267_v56  ;;  %v17673_v13 = vld [vmem:[#allocation169_spill] sm:$0xff]  ;;  %v17675_v56 = vld [vmem:[#allocation171_spill] sm:$0xff] }
 0x236   : > { %17666 = vst [vmem:[#allocation153_spill] sm:$0xff] %v13275_v54  ;;  %v2100_v58 = vmul.f32 %v13271_v32, %v13271_v32  ;;  %v2403_v2 = vadd.f32 %v2402_v16, %v2091_v36  ;;  %v2408_v22 = vadd.f32 %v2407_v49, %v2095_v21  ;;  %v2101_v29 = vmul.f32 %v13275_v54, %v13275_v54  ;;  %v17677_v36 = vld [vmem:[#allocation172_spill] sm:$0xff]  ;;  %v17679_v49 = vld [vmem:[#allocation173_spill] sm:$0xff] }
 0x237   : > { %17668 = vst [vmem:[#allocation154_spill] sm:$0xff] %v13283_v34  ;;  %17670 = vst [vmem:[#allocation155_spill] sm:$0xff] %v13287_v25  ;;  %v13297_v37 = vsub.f32 %v17671_v51, %v13017_v44  ;;  %v2413_v60 = vadd.f32 %v2099_v40, %v2098_v30  ;;  %v13301_v0 = vsub.f32 %v17673_v13, %v13017_v44  ;;  %v17681_v30 = vld [vmem:[#allocation176_spill] sm:$0xff]  ;;  %v13321_v13 = vmul.f32 0.0013020834, %v1521_v52 }
 0x238   : > { %v13305_v23 = vsub.f32 %v17675_v56, %v13017_v44  ;;  %v13309_v21 = vsub.f32 %v17677_v36, %v13017_v44  ;;  %2404 = vadd.xlane.f32.xlu1 %v2403_v2  ;;  %v2409_v16 = vadd.f32 %v2408_v22, %v2096_v28  ;;  %v13313_v54 = vsub.f32 %v17679_v49, %v13017_v44 }
 0x239   : > { %17672 = vst [vmem:[#allocation158_spill] sm:$0xff] %v13297_v37  ;;  %17674 = vst [vmem:[#allocation168_spill] sm:$0xff] %v13301_v0  ;;  %v13317_v40 = vsub.f32 %v17681_v30, %v13017_v44  ;;  %v2104_v51 = vmul.f32 %v13297_v37, %v13297_v37  ;;  %v2414_v56 = vadd.f32 %v2413_v60, %v2100_v58  ;;  %v1542_v30 = vpop.xlane.xlu1 %1541 }
 0x23a   : > { %17676 = vst [vmem:[#allocation169_spill] sm:$0xff] %v13305_v23  ;;  %17678 = vst [vmem:[#allocation171_spill] sm:$0xff] %v13309_v21  ;;  %v2105_v36 = vmul.f32 %v13301_v0, %v13301_v0  ;;  %v2106_v28 = vmul.f32 %v13305_v23, %v13305_v23  ;;  %v2410_v2 = vadd.f32 %v2409_v16, %v2097_v55  ;;  %v17683_v0 = vld [vmem:[#allocation162_spill] sm:$0xff]  ;;  %v17685_v16 = vld [vmem:[#allocation163_spill] sm:$0xff] }
 0x23b   : > { %17680 = vst [vmem:[#allocation172_spill] sm:$0xff] %v13313_v54  ;;  %17682 = vst [vmem:[#allocation173_spill] sm:$0xff] %v13317_v40  ;;  %v2102_v22 = vmul.f32 %v13283_v34, %v13283_v34  ;;  %v2103_v44 = vmul.f32 %v13287_v25, %v13287_v25  ;;  %v2107_v49 = vmul.f32 %v13309_v21, %v13309_v21  ;;  %v17687_v21 = vld [vmem:[#allocation165_spill] sm:$0xff] }
 0x23c   : > { %v2415_v52 = vadd.f32 %v2414_v56, %v2101_v29  ;;  %v2108_v60 = vmul.f32 %v13313_v54, %v13313_v54  ;;  %v2420_v58 = vadd.f32 %v2105_v36, %v2104_v51  ;;  %v13337_v37 = vsub.f32 %v17683_v0, %v12973_v6  ;;  %2411 = vadd.xlane.f32.xlu0 %v2410_v2  ;;  %v17689_v29 = vld [vmem:[#allocation166_spill] sm:$0xff] }
 0x23d   : > { %v2109_v55 = vmul.f32 %v13317_v40, %v13317_v40  ;;  %v13343_v23 = vsub.f32 %v17685_v16, %v12973_v6  ;;  %v13347_v25 = vsub.f32 %v17687_v21, %v12973_v6  ;;  %v13351_v56 = vsub.f32 %v17689_v29, %v12973_v6  ;;  %v17691_v40 = vld [vmem:[#allocation167_spill] sm:$0xff]  ;;  %v17693_v16 = vld [vmem:[#allocation170_spill] sm:$0xff]  ;;  %v17695_v29 = vld [vmem:[#allocation180_spill] sm:$0xff] }
 0x23e   : > { %17684 = vst [vmem:[#allocation176_spill] sm:$0xff] %v13337_v37  ;;  %v2416_v51 = vadd.f32 %v2415_v52, %v2102_v22  ;;  %v2421_v36 = vadd.f32 %v2420_v58, %v2106_v28  ;;  %v13353_v0 = vmul.f32 0.0013020834, %v1542_v30  ;;  %v2110_v2 = vmul.f32 %v13337_v37, %v13337_v37  ;;  %v1535_v52 = vpop.xlane.xlu0 %1534 }
 0x23f   : > { %17686 = vst [vmem:[#allocation162_spill] sm:$0xff] %v13343_v23  ;;  %17688 = vst [vmem:[#allocation163_spill] sm:$0xff] %v13347_v25  ;;  %v13359_v54 = vsub.f32 %v17691_v40, %v12973_v6  ;;  %v13363_v34 = vsub.f32 %v17693_v16, %v12973_v6  ;;  %v2111_v21 = vmul.f32 %v13343_v23, %v13343_v23  ;;  %v17697_v6 = vld [vmem:[#allocation181_spill] sm:$0xff]  ;;  %v17699_v23 = vld [vmem:[#allocation183_spill] sm:$0xff] }
 0x240   : > { %17690 = vst [vmem:[#allocation165_spill] sm:$0xff] %v13351_v56  ;;  %v2112_v22 = vmul.f32 %v13347_v25, %v13347_v25  ;;  %v2417_v28 = vadd.f32 %v2416_v51, %v2103_v44  ;;  %v2422_v30 = vadd.f32 %v2421_v36, %v2107_v49  ;;  %v2113_v58 = vmul.f32 %v13351_v56, %v13351_v56  ;;  %v17701_v44 = vld [vmem:[#allocation184_spill] sm:$0xff]  ;;  %v17703_v36 = vld [vmem:[#allocation185_spill] sm:$0xff] }
 0x241   : > { %17692 = vst [vmem:[#allocation166_spill] sm:$0xff] %v13359_v54  ;;  %17694 = vst [vmem:[#allocation167_spill] sm:$0xff] %v13363_v34  ;;  %v13373_v40 = vsub.f32 %v17695_v29, %v13093_v27  ;;  %v2427_v37 = vadd.f32 %v2111_v21, %v2110_v2  ;;  %v13377_v16 = vsub.f32 %v17697_v6, %v13093_v27  ;;  %v17705_v2 = vld [vmem:[#allocation188_spill] sm:$0xff]  ;;  %v13397_v6 = vmul.f32 0.0013020834, %v1535_v52 }
 0x242   : > { %v13381_v32 = vsub.f32 %v17699_v23, %v13093_v27  ;;  %v13385_v49 = vsub.f32 %v17701_v44, %v13093_v27  ;;  %2418 = vadd.xlane.f32.xlu1 %v2417_v28  ;;  %v2423_v51 = vadd.f32 %v2422_v30, %v2108_v60  ;;  %v13389_v56 = vsub.f32 %v17703_v36, %v13093_v27 }
 0x243   : > { %17696 = vst [vmem:[#allocation170_spill] sm:$0xff] %v13373_v40  ;;  %17698 = vst [vmem:[#allocation180_spill] sm:$0xff] %v13377_v16  ;;  %v13393_v21 = vsub.f32 %v17705_v2, %v13093_v27  ;;  %v2116_v29 = vmul.f32 %v13373_v40, %v13373_v40  ;;  %v2428_v23 = vadd.f32 %v2427_v37, %v2112_v22  ;;  %v1556_v2 = vpop.xlane.xlu1 %1555 }
 0x244   : > { %17700 = vst [vmem:[#allocation181_spill] sm:$0xff] %v13381_v32  ;;  %17702 = vst [vmem:[#allocation183_spill] sm:$0xff] %v13385_v49  ;;  %v2117_v44 = vmul.f32 %v13377_v16, %v13377_v16  ;;  %v2118_v60 = vmul.f32 %v13381_v32, %v13381_v32  ;;  %v2424_v28 = vadd.f32 %v2423_v51, %v2109_v55  ;;  %v17707_v16 = vld [vmem:[#allocation174_spill] sm:$0xff]  ;;  %v17709_v51 = vld [vmem:[#allocation175_spill] sm:$0xff] }
 0x245   : > { %17704 = vst [vmem:[#allocation184_spill] sm:$0xff] %v13389_v56  ;;  %17706 = vst [vmem:[#allocation185_spill] sm:$0xff] %v13393_v21  ;;  %v2114_v30 = vmul.f32 %v13359_v54, %v13359_v54  ;;  %v2115_v27 = vmul.f32 %v13363_v34, %v13363_v34  ;;  %v2119_v36 = vmul.f32 %v13385_v49, %v13385_v49  ;;  %v17711_v49 = vld [vmem:[#allocation177_spill] sm:$0xff] }
 0x246   : > { %v2429_v52 = vadd.f32 %v2428_v23, %v2113_v58  ;;  %v2120_v37 = vmul.f32 %v13389_v56, %v13389_v56  ;;  %v2434_v22 = vadd.f32 %v2117_v44, %v2116_v29  ;;  %v13413_v40 = vsub.f32 %v17707_v16, %v13049_v12  ;;  %2425 = vadd.xlane.f32.xlu0 %v2424_v28  ;;  %v17713_v58 = vld [vmem:[#allocation178_spill] sm:$0xff] }
 0x247   : > { %v2121_v55 = vmul.f32 %v13393_v21, %v13393_v21  ;;  %v13419_v32 = vsub.f32 %v17709_v51, %v13049_v12  ;;  %v13423_v34 = vsub.f32 %v17711_v49, %v13049_v12  ;;  %v13427_v23 = vsub.f32 %v17713_v58, %v13049_v12  ;;  %v17715_v21 = vld [vmem:[#allocation179_spill] sm:$0xff]  ;;  %v17717_v51 = vld [vmem:[#allocation182_spill] sm:$0xff]  ;;  %v17719_v58 = vld [vmem:[#allocation192_spill] sm:$0xff] }
 0x248   : > { %17708 = vst [vmem:[#allocation188_spill] sm:$0xff] %v13413_v40  ;;  %v2430_v29 = vadd.f32 %v2429_v52, %v2114_v30  ;;  %v2435_v44 = vadd.f32 %v2434_v22, %v2118_v60  ;;  %v13429_v16 = vmul.f32 0.0013020834, %v1556_v2  ;;  %v2122_v28 = vmul.f32 %v13413_v40, %v13413_v40  ;;  %v1549_v52 = vpop.xlane.xlu0 %1548 }
 0x249   : > { %17710 = vst [vmem:[#allocation174_spill] sm:$0xff] %v13419_v32  ;;  %17712 = vst [vmem:[#allocation175_spill] sm:$0xff] %v13423_v34  ;;  %v13435_v56 = vsub.f32 %v17715_v21, %v13049_v12  ;;  %v13439_v54 = vsub.f32 %v17717_v51, %v13049_v12  ;;  %v2123_v49 = vmul.f32 %v13419_v32, %v13419_v32  ;;  %v17721_v12 = vld [vmem:[#allocation193_spill] sm:$0xff]  ;;  %v17723_v32 = vld [vmem:[#allocation195_spill] sm:$0xff] }
 0x24a   : > { %17714 = vst [vmem:[#allocation177_spill] sm:$0xff] %v13427_v23  ;;  %v2124_v30 = vmul.f32 %v13423_v34, %v13423_v34  ;;  %v2431_v60 = vadd.f32 %v2430_v29, %v2115_v27  ;;  %v2436_v2 = vadd.f32 %v2435_v44, %v2119_v36  ;;  %v2125_v22 = vmul.f32 %v13427_v23, %v13427_v23  ;;  %v17725_v27 = vld [vmem:[#allocation196_spill] sm:$0xff]  ;;  %v17727_v44 = vld [vmem:[#allocation197_spill] sm:$0xff] }
 0x24b   : > { %17716 = vst [vmem:[#allocation178_spill] sm:$0xff] %v13435_v56  ;;  %17718 = vst [vmem:[#allocation179_spill] sm:$0xff] %v13439_v54  ;;  %v13449_v21 = vsub.f32 %v17719_v58, %v13169_v19  ;;  %v2441_v40 = vadd.f32 %v2123_v49, %v2122_v28  ;;  %v13453_v51 = vsub.f32 %v17721_v12, %v13169_v19  ;;  %v17729_v28 = vld [vmem:[#allocation200_spill] sm:$0xff]  ;;  %v13473_v12 = vmul.f32 0.0013020834, %v1549_v52 }
 0x24c   : > { %v13457_v25 = vsub.f32 %v17723_v32, %v13169_v19  ;;  %v13461_v36 = vsub.f32 %v17725_v27, %v13169_v19  ;;  %2432 = vadd.xlane.f32.xlu1 %v2431_v60  ;;  %v2437_v29 = vadd.f32 %v2436_v2, %v2120_v37  ;;  %v13465_v23 = vsub.f32 %v17727_v44, %v13169_v19 }
 0x24d   : > { %17720 = vst [vmem:[#allocation182_spill] sm:$0xff] %v13449_v21  ;;  %17722 = vst [vmem:[#allocation192_spill] sm:$0xff] %v13453_v51  ;;  %v13469_v49 = vsub.f32 %v17729_v28, %v13169_v19  ;;  %v2128_v58 = vmul.f32 %v13449_v21, %v13449_v21  ;;  %v2442_v32 = vadd.f32 %v2441_v40, %v2124_v30  ;;  %v1570_v28 = vpop.xlane.xlu1 %1569 }
 0x24e   : > { %17724 = vst [vmem:[#allocation193_spill] sm:$0xff] %v13457_v25  ;;  %17726 = vst [vmem:[#allocation195_spill] sm:$0xff] %v13461_v36  ;;  %v2129_v27 = vmul.f32 %v13453_v51, %v13453_v51  ;;  %v2130_v37 = vmul.f32 %v13457_v25, %v13457_v25  ;;  %v2438_v60 = vadd.f32 %v2437_v29, %v2121_v55  ;;  %v17731_v51 = vld [vmem:[#allocation186_spill] sm:$0xff]  ;;  %v17733_v29 = vld [vmem:[#allocation187_spill] sm:$0xff] }
 0x24f   : > { %17728 = vst [vmem:[#allocation196_spill] sm:$0xff] %v13465_v23  ;;  %17730 = vst [vmem:[#allocation197_spill] sm:$0xff] %v13469_v49  ;;  %v2126_v2 = vmul.f32 %v13435_v56, %v13435_v56  ;;  %v2127_v19 = vmul.f32 %v13439_v54, %v13439_v54  ;;  %v2131_v44 = vmul.f32 %v13461_v36, %v13461_v36  ;;  %v17735_v36 = vld [vmem:[#allocation189_spill] sm:$0xff] }
 0x250   : > { %v2443_v52 = vadd.f32 %v2442_v32, %v2125_v22  ;;  %v2132_v40 = vmul.f32 %v13465_v23, %v13465_v23  ;;  %v2448_v30 = vadd.f32 %v2129_v27, %v2128_v58  ;;  %v13489_v21 = vsub.f32 %v17731_v51, %v13125_v3  ;;  %2439 = vadd.xlane.f32.xlu0 %v2438_v60  ;;  %v17737_v22 = vld [vmem:[#allocation190_spill] sm:$0xff] }
 0x251   : > { %v2133_v55 = vmul.f32 %v13469_v49, %v13469_v49  ;;  %v13495_v25 = vsub.f32 %v17733_v29, %v13125_v3  ;;  %v13499_v54 = vsub.f32 %v17735_v36, %v13125_v3  ;;  %v13503_v32 = vsub.f32 %v17737_v22, %v13125_v3  ;;  %v17739_v49 = vld [vmem:[#allocation191_spill] sm:$0xff]  ;;  %v17741_v29 = vld [vmem:[#allocation194_spill] sm:$0xff]  ;;  %v17743_v22 = vld [vmem:[#allocation204_spill] sm:$0xff] }
 0x252   : > { %17732 = vst [vmem:[#allocation200_spill] sm:$0xff] %v13489_v21  ;;  %v2444_v58 = vadd.f32 %v2443_v52, %v2126_v2  ;;  %v2449_v27 = vadd.f32 %v2448_v30, %v2130_v37  ;;  %v13505_v51 = vmul.f32 0.0013020834, %v1570_v28  ;;  %v2134_v60 = vmul.f32 %v13489_v21, %v13489_v21  ;;  %v1563_v52 = vpop.xlane.xlu0 %1562 }
 0x253   : > { %17734 = vst [vmem:[#allocation186_spill] sm:$0xff] %v13495_v25  ;;  %17736 = vst [vmem:[#allocation187_spill] sm:$0xff] %v13499_v54  ;;  %v13511_v23 = vsub.f32 %v17739_v49, %v13125_v3  ;;  %v13515_v56 = vsub.f32 %v17741_v29, %v13125_v3  ;;  %v2135_v36 = vmul.f32 %v13495_v25, %v13495_v25  ;;  %v17745_v3 = vld [vmem:[#allocation205_spill] sm:$0xff]  ;;  %v17747_v25 = vld [vmem:[#allocation207_spill] sm:$0xff] }
 0x254   : > { %17738 = vst [vmem:[#allocation189_spill] sm:$0xff] %v13503_v32  ;;  %v2136_v2 = vmul.f32 %v13499_v54, %v13499_v54  ;;  %v2445_v37 = vadd.f32 %v2444_v58, %v2127_v19  ;;  %v2450_v28 = vadd.f32 %v2449_v27, %v2131_v44  ;;  %v2137_v30 = vmul.f32 %v13503_v32, %v13503_v32  ;;  %v17749_v19 = vld [vmem:[#allocation208_spill] sm:$0xff]  ;;  %v17751_v27 = vld [vmem:[#allocation209_spill] sm:$0xff] }
 0x255   : > { %17740 = vst [vmem:[#allocation190_spill] sm:$0xff] %v13511_v23  ;;  %17742 = vst [vmem:[#allocation191_spill] sm:$0xff] %v13515_v56  ;;  %v13525_v49 = vsub.f32 %v17743_v22, %v13245_v33  ;;  %v2455_v21 = vadd.f32 %v2135_v36, %v2134_v60  ;;  %v13529_v29 = vsub.f32 %v17745_v3, %v13245_v33  ;;  %v17753_v60 = vld [vmem:[#allocation212_spill] sm:$0xff]  ;;  %v13549_v3 = vmul.f32 0.0013020834, %v1563_v52 }
 0x256   : > { %v13533_v34 = vsub.f32 %v17747_v25, %v13245_v33  ;;  %v13537_v44 = vsub.f32 %v17749_v19, %v13245_v33  ;;  %2446 = vadd.xlane.f32.xlu1 %v2445_v37  ;;  %v2451_v58 = vadd.f32 %v2450_v28, %v2132_v40  ;;  %v13541_v32 = vsub.f32 %v17751_v27, %v13245_v33 }
 0x257   : > { %17744 = vst [vmem:[#allocation194_spill] sm:$0xff] %v13525_v49  ;;  %17746 = vst [vmem:[#allocation204_spill] sm:$0xff] %v13529_v29  ;;  %v13545_v36 = vsub.f32 %v17753_v60, %v13245_v33  ;;  %v2140_v22 = vmul.f32 %v13525_v49, %v13525_v49  ;;  %v2456_v25 = vadd.f32 %v2455_v21, %v2136_v2  ;;  %v1584_v60 = vpop.xlane.xlu1 %1583 }
 0x258   : > { %17748 = vst [vmem:[#allocation205_spill] sm:$0xff] %v13533_v34  ;;  %17750 = vst [vmem:[#allocation207_spill] sm:$0xff] %v13537_v44  ;;  %v2141_v19 = vmul.f32 %v13529_v29, %v13529_v29  ;;  %v2142_v40 = vmul.f32 %v13533_v34, %v13533_v34  ;;  %v2452_v37 = vadd.f32 %v2451_v58, %v2133_v55  ;;  %v17755_v29 = vld [vmem:[#allocation198_spill] sm:$0xff]  ;;  %v17757_v58 = vld [vmem:[#allocation199_spill] sm:$0xff] }
 0x259   : > { %17752 = vst [vmem:[#allocation208_spill] sm:$0xff] %v13541_v32  ;;  %17754 = vst [vmem:[#allocation209_spill] sm:$0xff] %v13545_v36  ;;  %v2138_v28 = vmul.f32 %v13511_v23, %v13511_v23  ;;  %v2139_v33 = vmul.f32 %v13515_v56, %v13515_v56  ;;  %v2143_v27 = vmul.f32 %v13537_v44, %v13537_v44  ;;  %v17759_v44 = vld [vmem:[#allocation201_spill] sm:$0xff] }
 0x25a   : > { %v2457_v52 = vadd.f32 %v2456_v25, %v2137_v30  ;;  %v2144_v21 = vmul.f32 %v13541_v32, %v13541_v32  ;;  %v2462_v2 = vadd.f32 %v2141_v19, %v2140_v22  ;;  %v13565_v49 = vsub.f32 %v17755_v29, %v13201_v17  ;;  %2453 = vadd.xlane.f32.xlu0 %v2452_v37  ;;  %v17761_v30 = vld [vmem:[#allocation202_spill] sm:$0xff] }
 0x25b   : > { %v2145_v55 = vmul.f32 %v13545_v36, %v13545_v36  ;;  %v13571_v34 = vsub.f32 %v17757_v58, %v13201_v17  ;;  %v13575_v56 = vsub.f32 %v17759_v44, %v13201_v17  ;;  %v13579_v25 = vsub.f32 %v17761_v30, %v13201_v17  ;;  %v17763_v36 = vld [vmem:[#allocation203_spill] sm:$0xff]  ;;  %v17765_v58 = vld [vmem:[#allocation206_spill] sm:$0xff]  ;;  %v17767_v30 = vld [vmem:[#allocation216_spill] sm:$0xff] }
 0x25c   : > { %17756 = vst [vmem:[#allocation212_spill] sm:$0xff] %v13565_v49  ;;  %v2458_v22 = vadd.f32 %v2457_v52, %v2138_v28  ;;  %v2463_v19 = vadd.f32 %v2462_v2, %v2142_v40  ;;  %v13581_v29 = vmul.f32 0.0013020834, %v1584_v60  ;;  %v2146_v37 = vmul.f32 %v13565_v49, %v13565_v49  ;;  %v1577_v52 = vpop.xlane.xlu0 %1576 }
 0x25d   : > { %17758 = vst [vmem:[#allocation198_spill] sm:$0xff] %v13571_v34  ;;  %17760 = vst [vmem:[#allocation199_spill] sm:$0xff] %v13575_v56  ;;  %v13587_v32 = vsub.f32 %v17763_v36, %v13201_v17  ;;  %v13591_v23 = vsub.f32 %v17765_v58, %v13201_v17  ;;  %v2147_v44 = vmul.f32 %v13571_v34, %v13571_v34  ;;  %v17769_v17 = vld [vmem:[#allocation217_spill] sm:$0xff]  ;;  %v17771_v34 = vld [vmem:[#allocation219_spill] sm:$0xff] }
 0x25e   : > { %17762 = vst [vmem:[#allocation201_spill] sm:$0xff] %v13579_v25  ;;  %v2148_v28 = vmul.f32 %v13575_v56, %v13575_v56  ;;  %v2459_v40 = vadd.f32 %v2458_v22, %v2139_v33  ;;  %v2464_v60 = vadd.f32 %v2463_v19, %v2143_v27  ;;  %v2149_v2 = vmul.f32 %v13579_v25, %v13579_v25  ;;  %v17773_v33 = vld [vmem:[#allocation220_spill] sm:$0xff]  ;;  %v17775_v19 = vld [vmem:[#allocation221_spill] sm:$0xff] }
 0x25f   : > { %17764 = vst [vmem:[#allocation202_spill] sm:$0xff] %v13587_v32  ;;  %17766 = vst [vmem:[#allocation203_spill] sm:$0xff] %v13591_v23  ;;  %v13601_v36 = vsub.f32 %v17767_v30, %v13321_v13  ;;  %v2469_v49 = vadd.f32 %v2147_v44, %v2146_v37  ;;  %v13605_v58 = vsub.f32 %v17769_v17, %v13321_v13  ;;  %v17777_v37 = vld [vmem:[#allocation224_spill] sm:$0xff]  ;;  %v13625_v17 = vmul.f32 0.0013020834, %v1577_v52  ;;  %v1598_v52 = vpop.xlane.xlu1 %1597  ;;  %v17793_v56 = vld [vmem:[#allocation229_spill] sm:$0xff] }
 0x260   : > { %v13609_v54 = vsub.f32 %v17771_v34, %v13321_v13  ;;  %v13613_v27 = vsub.f32 %v17773_v33, %v13321_v13  ;;  %2460 = vadd.xlane.f32.xlu1 %v2459_v40  ;;  %v2465_v22 = vadd.f32 %v2464_v60, %v2144_v21  ;;  %v13617_v25 = vsub.f32 %v17775_v19, %v13321_v13 }
 0x261   : > { %17768 = vst [vmem:[#allocation206_spill] sm:$0xff] %v13601_v36  ;;  %17770 = vst [vmem:[#allocation216_spill] sm:$0xff] %v13605_v58  ;;  %v13621_v44 = vsub.f32 %v17777_v37, %v13321_v13  ;;  %v2152_v30 = vmul.f32 %v13601_v36, %v13601_v36  ;;  %v2470_v34 = vadd.f32 %v2469_v49, %v2148_v28 }
 0x262   : > { %17772 = vst [vmem:[#allocation217_spill] sm:$0xff] %v13609_v54  ;;  %17774 = vst [vmem:[#allocation219_spill] sm:$0xff] %v13613_v27  ;;  %v2153_v33 = vmul.f32 %v13605_v58, %v13605_v58  ;;  %v2154_v21 = vmul.f32 %v13609_v54, %v13609_v54  ;;  %v2466_v40 = vadd.f32 %v2465_v22, %v2145_v55  ;;  %v17779_v58 = vld [vmem:[#allocation210_spill] sm:$0xff]  ;;  %v17781_v22 = vld [vmem:[#allocation211_spill] sm:$0xff] }
 0x263   : > { %17776 = vst [vmem:[#allocation220_spill] sm:$0xff] %v13617_v25  ;;  %17778 = vst [vmem:[#allocation221_spill] sm:$0xff] %v13621_v44  ;;  %v2150_v60 = vmul.f32 %v13587_v32, %v13587_v32  ;;  %v2151_v13 = vmul.f32 %v13591_v23, %v13591_v23  ;;  %v2155_v19 = vmul.f32 %v13613_v27, %v13613_v27  ;;  %v17783_v27 = vld [vmem:[#allocation213_spill] sm:$0xff]  ;;  %v13663_v23 = vmul.f32 0.0013020834, %v1598_v52  ;;  %v17789_v32 = vld [vmem:[#allocation218_spill] sm:$0xff] }
 0x264   : > { %v2471_v37 = vadd.f32 %v2470_v34, %v2149_v2  ;;  %v2156_v49 = vmul.f32 %v13617_v25, %v13617_v25  ;;  %v2476_v28 = vadd.f32 %v2153_v33, %v2152_v30  ;;  %v13641_v36 = vsub.f32 %v17779_v58, %v13277_v46  ;;  %2467 = vadd.xlane.f32.xlu0 %v2466_v40  ;;  %v17785_v34 = vld [vmem:[#allocation214_spill] sm:$0xff]  ;;  %v17787_v58 = vld [vmem:[#allocation215_spill] sm:$0xff] }
 0x265   : > { %v2157_v55 = vmul.f32 %v13621_v44, %v13621_v44  ;;  %v13647_v54 = vsub.f32 %v17781_v22, %v13277_v46  ;;  %v13651_v2 = vsub.f32 %v17783_v27, %v13277_v46  ;;  %v13655_v30 = vsub.f32 %v17785_v34, %v13277_v46  ;;  %v1591_v22 = vpop.xlane.xlu0 %1590 }
 0x266   : > { %17780 = vst [vmem:[#allocation224_spill] sm:$0xff] %v13641_v36  ;;  %v2472_v33 = vadd.f32 %v2471_v37, %v2150_v60  ;;  %v2477_v25 = vadd.f32 %v2476_v28, %v2154_v21  ;;  %v13659_v40 = vsub.f32 %v17787_v58, %v13277_v46  ;;  %v2158_v44 = vmul.f32 %v13641_v36, %v13641_v36  ;;  %v17791_v58 = vld [vmem:[#allocation228_spill] sm:$0xff] }
 0x267   : > { %17782 = vst [vmem:[#allocation210_spill] sm:$0xff] %v13647_v54  ;;  %17784 = vst [vmem:[#allocation211_spill] sm:$0xff] %v13651_v2  ;;  %v13667_v27 = vsub.f32 %v17789_v32, %v13277_v46  ;;  %v2159_v34 = vmul.f32 %v13647_v54, %v13647_v54  ;;  %v2160_v21 = vmul.f32 %v13651_v2, %v13651_v2  ;;  %v17795_v32 = vld [vmem:[#allocation231_spill] sm:$0xff]  ;;  %v17797_v2 = vld [vmem:[#allocation232_spill] sm:$0xff] }
 0x268   : > { %17786 = vst [vmem:[#allocation213_spill] sm:$0xff] %v13655_v30  ;;  %17788 = vst [vmem:[#allocation214_spill] sm:$0xff] %v13659_v40  ;;  %v2473_v60 = vadd.f32 %v2472_v33, %v2151_v13  ;;  %v2478_v37 = vadd.f32 %v2477_v25, %v2155_v19  ;;  %v2161_v28 = vmul.f32 %v13655_v30, %v13655_v30  ;;  %v13691_v19 = vmul.f32 0.0013020834, %v1591_v22 }
 0x269   : > { %17790 = vst [vmem:[#allocation215_spill] sm:$0xff] %v13667_v27  ;;  %v13677_v52 = vsub.f32 %v17791_v58, %v13397_v6  ;;  %v2483_v36 = vadd.f32 %v2159_v34, %v2158_v44  ;;  %v13681_v46 = vsub.f32 %v17793_v56, %v13397_v6  ;;  %v13685_v54 = vsub.f32 %v17795_v32, %v13397_v6  ;;  %v17801_v32 = vld [vmem:[#allocation222_spill] sm:$0xff] }
 0x26a   : > { %v13689_v13 = vsub.f32 %v17797_v2, %v13397_v6  ;;  %2474 = vadd.xlane.f32.xlu1 %v2473_v60  ;;  %v2479_v25 = vadd.f32 %v2478_v37, %v2156_v49  ;;  %v2162_v33 = vmul.f32 %v13659_v40, %v13659_v40  ;;  %v2163_v56 = vmul.f32 %v13667_v27, %v13667_v27  ;;  %v17799_v49 = vld [vmem:[#allocation233_spill] sm:$0xff] }
 0x26b   : > { %17792 = vst [vmem:[#allocation218_spill] sm:$0xff] %v13677_v52  ;;  %17794 = vst [vmem:[#allocation228_spill] sm:$0xff] %v13681_v46  ;;  %v2164_v44 = vmul.f32 %v13677_v52, %v13677_v52  ;;  %v2484_v34 = vadd.f32 %v2483_v36, %v2160_v21  ;;  %v2165_v58 = vmul.f32 %v13681_v46, %v13681_v46  ;;  %v17803_v21 = vld [vmem:[#allocation223_spill] sm:$0xff] }
 0x26c   : > { %17796 = vst [vmem:[#allocation229_spill] sm:$0xff] %v13685_v54  ;;  %17798 = vst [vmem:[#allocation231_spill] sm:$0xff] %v13689_v13  ;;  %v2166_v2 = vmul.f32 %v13685_v54, %v13685_v54  ;;  %v2480_v60 = vadd.f32 %v2479_v25, %v2157_v55  ;;  %v13705_v22 = vsub.f32 %v17799_v49, %v13397_v6  ;;  %v17805_v54 = vld [vmem:[#allocation225_spill] sm:$0xff]  ;;  %v17807_v25 = vld [vmem:[#allocation234_spill] sm:$0xff] }
 0x26d   : > { %v2167_v37 = vmul.f32 %v13689_v13, %v13689_v13  ;;  %v13711_v52 = vsub.f32 %v17801_v32, %v13353_v0  ;;  %v2485_v27 = vadd.f32 %v2484_v34, %v2161_v28  ;;  %v2490_v36 = vadd.f32 %v2165_v58, %v2164_v44  ;;  %v17809_v13 = vld [vmem:[#allocation226_spill] sm:$0xff]  ;;  %v17811_v28 = vld [vmem:[#allocation227_spill] sm:$0xff] }
 0x26e   : > { %17800 = vst [vmem:[#allocation232_spill] sm:$0xff] %v13705_v22  ;;  %v13715_v46 = vsub.f32 %v17803_v21, %v13353_v0  ;;  %v13719_v55 = vsub.f32 %v17805_v54, %v13353_v0  ;;  %2481 = vadd.xlane.f32.xlu0 %v2480_v60  ;;  %v13723_v49 = vsub.f32 %v17807_v25, %v13397_v6 }
 0x26f   : > { %17802 = vst [vmem:[#allocation233_spill] sm:$0xff] %v13711_v52  ;;  %v13727_v40 = vsub.f32 %v17809_v13, %v13353_v0  ;;  %v13731_v44 = vsub.f32 %v17811_v28, %v13353_v0  ;;  %v2170_v34 = vmul.f32 %v13711_v52, %v13711_v52  ;;  %v2486_v58 = vadd.f32 %v2485_v27, %v2162_v33  ;;  %v17813_v13 = vld [vmem:[#allocation230_spill] sm:$0xff] }
 0x270   : > { %17804 = vst [vmem:[#allocation222_spill] sm:$0xff] %v13715_v46  ;;  %17806 = vst [vmem:[#allocation223_spill] sm:$0xff] %v13719_v55  ;;  %v2491_v32 = vadd.f32 %v2490_v36, %v2166_v2  ;;  %v2171_v54 = vmul.f32 %v13715_v46, %v13715_v46  ;;  %v2172_v6 = vmul.f32 %v13719_v55, %v13719_v55  ;;  %v17815_v28 = vld [vmem:[#allocation246_spill] sm:$0xff]  ;;  %v17817_v46 = vld [vmem:[#allocation247_spill] sm:$0xff] }
 0x271   : > { %17808 = vst [vmem:[#allocation225_spill] sm:$0xff] %v13723_v49  ;;  %17810 = vst [vmem:[#allocation234_spill] sm:$0xff] %v13727_v40  ;;  %v2168_v60 = vmul.f32 %v13705_v22, %v13705_v22  ;;  %v13743_v21 = vsub.f32 %v17813_v13, %v13353_v0  ;;  %v2173_v25 = vmul.f32 %v13727_v40, %v13727_v40  ;;  %v17819_v13 = vld [vmem:[#allocation248_spill] sm:$0xff] }
 0x272   : > { %17812 = vst [vmem:[#allocation226_spill] sm:$0xff] %v13731_v44  ;;  %v13749_v27 = vsub.f32 %v17815_v28, %v13473_v12  ;;  %v2487_v33 = vadd.f32 %v2486_v58, %v2163_v56  ;;  %v2492_v2 = vadd.f32 %v2491_v32, %v2167_v37  ;;  %v2497_v36 = vadd.f32 %v2171_v54, %v2170_v34  ;;  %v17821_v28 = vld [vmem:[#allocation252_spill] sm:$0xff]  ;;  %v17823_v32 = vld [vmem:[#allocation253_spill] sm:$0xff] }
 0x273   : > { %17814 = vst [vmem:[#allocation227_spill] sm:$0xff] %v13743_v21  ;;  %v13753_v55 = vsub.f32 %v17817_v46, %v13473_v12  ;;  %v2169_v52 = vmul.f32 %v13723_v49, %v13723_v49  ;;  %v2174_v0 = vmul.f32 %v13731_v44, %v13731_v44  ;;  %v13761_v40 = vsub.f32 %v17819_v13, %v13473_v12  ;;  %v17907_v49 = vld [vmem:[#allocation272_spill] sm:$0xff] }
 0x274   : > { %17816 = vst [vmem:[#allocation230_spill] sm:$0xff] %v13749_v27  ;;  %v13765_v22 = vsub.f32 %v17821_v28, %v13473_v12  ;;  %2488 = vadd.xlane.f32.xlu1 %v2487_v33  ;;  %v2493_v56 = vadd.f32 %v2492_v2, %v2168_v60  ;;  %v2498_v37 = vadd.f32 %v2497_v36, %v2172_v6  ;;  %v13781_v6 = vpop.xlane.xlu0 %2229  ;;  %v17825_v28 = vld [vmem:[#allocation236_spill] sm:$0xff] }
 0x275   : > { %17818 = vst [vmem:[#allocation246_spill] sm:$0xff] %v13753_v55  ;;  %17820 = vst [vmem:[#allocation247_spill] sm:$0xff] %v13761_v40  ;;  %v2176_v46 = vmul.f32 %v13749_v27, %v13749_v27  ;;  %v2177_v34 = vmul.f32 %v13753_v55, %v13753_v55  ;;  %v2175_v58 = vmul.f32 %v13743_v21, %v13743_v21  ;;  %v17827_v27 = vld [vmem:[#allocation254_spill] sm:$0xff] }
 0x276   : > { %17822 = vst [vmem:[#allocation248_spill] sm:$0xff] %v13765_v22  ;;  %v13775_v54 = vsub.f32 %v17823_v32, %v13473_v12  ;;  %v2178_v13 = vmul.f32 %v13761_v40, %v13761_v40  ;;  %v2179_v60 = vmul.f32 %v13765_v22, %v13765_v22  ;;  %v2494_v33 = vadd.f32 %v2493_v56, %v2169_v52  ;;  %v17829_v32 = vld [vmem:[#allocation237_spill] sm:$0xff]  ;;  %v17831_v40 = vld [vmem:[#allocation238_spill] sm:$0xff] }
 0x277   : > { %v2499_v2 = vadd.f32 %v2498_v37, %v2173_v25  ;;  %v2504_v36 = vadd.f32 %v2177_v34, %v2176_v46  ;;  %v13785_v55 = vsub.f32 %v17825_v28, %v13429_v16  ;;  %v13789_v21 = vsub.f32 %v17827_v27, %v13473_v12  ;;  %v17833_v52 = vld [vmem:[#allocation242_spill] sm:$0xff]  ;;  %v17835_v46 = vld [vmem:[#allocation243_spill] sm:$0xff]  ;;  %v13809_v27 = vpop.xlane.xlu1 %2236  ;;  %v17837_v28 = vld [vmem:[#allocation244_spill] sm:$0xff] }
 0x278   : > { %17824 = vst [vmem:[#allocation252_spill] sm:$0xff] %v13775_v54  ;;  %v13793_v44 = vsub.f32 %v17829_v32, %v13429_v16  ;;  %v13797_v22 = vsub.f32 %v17831_v40, %v13429_v16  ;;  %v13801_v25 = vsub.f32 %v17833_v52, %v13429_v16  ;;  %2495 = vadd.xlane.f32.xlu0 %v2494_v33  ;;  %v17839_v52 = vld [vmem:[#allocation264_spill] sm:$0xff] }
 0x279   : > { %17826 = vst [vmem:[#allocation253_spill] sm:$0xff] %v13785_v55  ;;  %17828 = vst [vmem:[#allocation236_spill] sm:$0xff] %v13789_v21  ;;  %v2500_v56 = vadd.f32 %v2499_v2, %v2174_v0  ;;  %v2505_v37 = vadd.f32 %v2504_v36, %v2178_v13  ;;  %v13805_v34 = vsub.f32 %v17835_v46, %v13429_v16 }
 0x27a   : > { %17830 = vst [vmem:[#allocation254_spill] sm:$0xff] %v13793_v44  ;;  %17832 = vst [vmem:[#allocation237_spill] sm:$0xff] %v13797_v22  ;;  %v2182_v12 = vmul.f32 %v13785_v55, %v13785_v55  ;;  %v2180_v40 = vmul.f32 %v13775_v54, %v13775_v54  ;;  %v13815_v32 = vsub.f32 %v17837_v28, %v13429_v16  ;;  %v17841_v54 = vld [vmem:[#allocation265_spill] sm:$0xff] }
 0x27b   : > { %17834 = vst [vmem:[#allocation238_spill] sm:$0xff] %v13801_v25  ;;  %17836 = vst [vmem:[#allocation242_spill] sm:$0xff] %v13805_v34  ;;  %v2183_v0 = vmul.f32 %v13793_v44, %v13793_v44  ;;  %v2184_v13 = vmul.f32 %v13797_v22, %v13797_v22  ;;  %v2501_v33 = vadd.f32 %v2500_v56, %v2175_v58  ;;  %v17844_v22 = vld [vmem:[#allocation266_spill] sm:$0xff] }
 0x27c   : > { %17838 = vst [vmem:[#allocation243_spill] sm:$0xff] %v13815_v32  ;;  %v2506_v2 = vadd.f32 %v2505_v37, %v2179_v60  ;;  %v2185_v36 = vmul.f32 %v13801_v25, %v13801_v25  ;;  %v13825_v46 = vsub.f32 %v17839_v52, %v13549_v3  ;;  %v13829_v16 = vsub.f32 %v17841_v54, %v13549_v3  ;;  %v13839_v60 = vpop.xlane.xlu0 %2243  ;;  %v17846_v25 = vld [vmem:[#allocation267_spill] sm:$0xff] }
 0x27d   : > { %v2511_v55 = vadd.f32 %v2183_v0, %v2182_v12  ;;  %v13833_v28 = vsub.f32 %v12170_v48, %v13549_v3  ;;  %v13837_v58 = vsub.f32 %v17844_v22, %v13549_v3  ;;  %2502 = vadd.xlane.f32.xlu1 %v2501_v33  ;;  %v2181_v56 = vmul.f32 %v13789_v21, %v13789_v21 }
 0x27e   : > { %17840 = vst [vmem:[#allocation244_spill] sm:$0xff] %v13825_v46  ;;  %17842 = vst [vmem:[#allocation264_spill] sm:$0xff] %v13829_v16  ;;  %v2507_v37 = vadd.f32 %v2506_v2, %v2180_v40  ;;  %v2186_v12 = vmul.f32 %v13805_v34, %v13805_v34  ;;  %v2188_v54 = vmul.f32 %v13825_v46, %v13825_v46  ;;  %v17848_v46 = vld [vmem:[#allocation256_spill] sm:$0xff] }
 0x27f   : > { %17843 = vst [vmem:[#allocation265_spill] sm:$0xff] %v13833_v28  ;;  %17845 = vst [vmem:[#allocation266_spill] sm:$0xff] %v13837_v58  ;;  %v2187_v48 = vmul.f32 %v13815_v32, %v13815_v32  ;;  %v2512_v0 = vadd.f32 %v2511_v55, %v2184_v13  ;;  %v2189_v22 = vmul.f32 %v13829_v16, %v13829_v16  ;;  %v13863_v32 = vpop.xlane.xlu1 %2250  ;;  %v17850_v16 = vld [vmem:[#allocation257_spill] sm:$0xff] }
 0x280   : > { %v2190_v33 = vmul.f32 %v13833_v28, %v13833_v28  ;;  %v2508_v52 = vadd.f32 %v2507_v37, %v2181_v56  ;;  %v13855_v40 = vsub.f32 %v17846_v25, %v13549_v3  ;;  %v2191_v2 = vmul.f32 %v13837_v58, %v13837_v58  ;;  %v17852_v56 = vld [vmem:[#allocation258_spill] sm:$0xff]  ;;  %v17854_v25 = vld [vmem:[#allocation268_spill] sm:$0xff] }
 0x281   : > { %v13861_v34 = vsub.f32 %v17848_v46, %v13505_v51  ;;  %v2513_v55 = vadd.f32 %v2512_v0, %v2185_v36  ;;  %v2518_v13 = vadd.f32 %v2189_v22, %v2188_v54  ;;  %v13867_v44 = vsub.f32 %v17850_v16, %v13505_v51  ;;  %v17856_v46 = vld [vmem:[#allocation260_spill] sm:$0xff]  ;;  %v17858_v36 = vld [vmem:[#allocation261_spill] sm:$0xff] }
 0x282   : > { %17847 = vst [vmem:[#allocation267_spill] sm:$0xff] %v13855_v40  ;;  %v13871_v37 = vsub.f32 %v17852_v56, %v13505_v51  ;;  %2509 = vadd.xlane.f32.xlu0 %v2508_v52  ;;  %v13875_v58 = vsub.f32 %v17854_v25, %v13549_v3  ;;  %v13879_v28 = vsub.f32 %v17856_v46, %v13505_v51  ;;  %v13891_v56 = vpop.xlane.xlu0 %2257  ;;  %v17860_v46 = vld [vmem:[#allocation262_spill] sm:$0xff] }
 0x283   : > { %17849 = vst [vmem:[#allocation256_spill] sm:$0xff] %v13861_v34  ;;  %17851 = vst [vmem:[#allocation257_spill] sm:$0xff] %v13867_v44  ;;  %v13883_v54 = vsub.f32 %v17858_v36, %v13505_v51  ;;  %v2194_v16 = vmul.f32 %v13861_v34, %v13861_v34  ;;  %v2514_v0 = vadd.f32 %v2513_v55, %v2186_v12  ;;  %v17862_v12 = vld [vmem:[#allocation276_spill] sm:$0xff] }
 0x284   : > { %17853 = vst [vmem:[#allocation258_spill] sm:$0xff] %v13871_v37  ;;  %17855 = vst [vmem:[#allocation268_spill] sm:$0xff] %v13875_v58  ;;  %v2519_v22 = vadd.f32 %v2518_v13, %v2190_v33  ;;  %v2195_v52 = vmul.f32 %v13867_v44, %v13867_v44  ;;  %v2196_v3 = vmul.f32 %v13871_v37, %v13871_v37  ;;  %v17864_v37 = vld [vmem:[#allocation277_spill] sm:$0xff] }
 0x285   : > { %17857 = vst [vmem:[#allocation260_spill] sm:$0xff] %v13879_v28  ;;  %17859 = vst [vmem:[#allocation261_spill] sm:$0xff] %v13883_v54  ;;  %v2192_v25 = vmul.f32 %v13855_v40, %v13855_v40  ;;  %v13897_v36 = vsub.f32 %v17860_v46, %v13505_v51  ;;  %v2197_v34 = vmul.f32 %v13879_v28, %v13879_v28 }
 0x286   : > { %v13903_v33 = vsub.f32 %v17862_v12, %v13625_v17  ;;  %v2515_v55 = vadd.f32 %v2514_v0, %v2187_v48  ;;  %v2520_v13 = vadd.f32 %v2519_v22, %v2191_v2  ;;  %v2525_v44 = vadd.f32 %v2195_v52, %v2194_v16  ;;  %v13921_v48 = vpop.xlane.xlu1 %2264 }
 0x287   : > { %17861 = vst [vmem:[#allocation262_spill] sm:$0xff] %v13897_v36  ;;  %v13907_v21 = vsub.f32 %v17864_v37, %v13625_v17  ;;  %v2193_v40 = vmul.f32 %v13875_v58, %v13875_v58  ;;  %v2198_v51 = vmul.f32 %v13883_v54, %v13883_v54  ;;  %v13915_v46 = vsub.f32 %v12234_v9, %v13625_v17 }
 0x288   : > { %17863 = vst [vmem:[#allocation276_spill] sm:$0xff] %v13903_v33  ;;  %v13919_v12 = vsub.f32 %v12245_v43, %v13625_v17  ;;  %2516 = vadd.xlane.f32.xlu1 %v2515_v55  ;;  %v2521_v2 = vadd.f32 %v2520_v13, %v2192_v25  ;;  %v2526_v37 = vadd.f32 %v2525_v44, %v2196_v3  ;;  %v17869_v55 = vld [vmem:[#allocation269_spill] sm:$0xff] }
 0x289   : > { %17865 = vst [vmem:[#allocation277_spill] sm:$0xff] %v13907_v21  ;;  %17866 = vst [vmem:[#allocation282_spill] sm:$0xff] %v13915_v46  ;;  %v2200_v16 = vmul.f32 %v13903_v33, %v13903_v33  ;;  %v2201_v0 = vmul.f32 %v13907_v21, %v13907_v21  ;;  %v2199_v22 = vmul.f32 %v13897_v36, %v13897_v36  ;;  %v13941_v21 = vpop.xlane.xlu0 %2271 }
 0x28a   : > { %17867 = vst [vmem:[#allocation283_spill] sm:$0xff] %v13919_v12  ;;  %v13931_v9 = vsub.f32 %v12249_v8, %v13625_v17  ;;  %v2202_v43 = vmul.f32 %v13915_v46, %v13915_v46  ;;  %v2203_v52 = vmul.f32 %v13919_v12, %v13919_v12  ;;  %v2522_v44 = vadd.f32 %v2521_v2, %v2193_v40  ;;  %v17872_v8 = vld [vmem:[#allocation270_spill] sm:$0xff]  ;;  %v17874_v46 = vld [vmem:[#allocation271_spill] sm:$0xff] }
 0x28b   : > { %v2527_v3 = vadd.f32 %v2526_v37, %v2197_v34  ;;  %v2532_v25 = vadd.f32 %v2201_v0, %v2200_v16  ;;  %v13939_v13 = vsub.f32 %v17869_v55, %v13581_v29  ;;  %v13945_v33 = vsub.f32 %v12251_v63, %v13625_v17  ;;  %v17876_v34 = vld [vmem:[#allocation274_spill] sm:$0xff] }
 0x28c   : > { %17868 = vst [vmem:[#allocation284_spill] sm:$0xff] %v13931_v9  ;;  %v13949_v36 = vsub.f32 %v17872_v8, %v13581_v29  ;;  %v13953_v12 = vsub.f32 %v17874_v46, %v13581_v29  ;;  %v13957_v40 = vsub.f32 %v17876_v34, %v13581_v29  ;;  %2523 = vadd.xlane.f32.xlu0 %v2522_v44  ;;  %v17879_v46 = vld [vmem:[#allocation275_spill] sm:$0xff] }
 0x28d   : > { %17870 = vst [vmem:[#allocation269_spill] sm:$0xff] %v13939_v13  ;;  %17871 = vst [vmem:[#allocation285_spill] sm:$0xff] %v13945_v33  ;;  %v2528_v2 = vadd.f32 %v2527_v3, %v2198_v51  ;;  %v2533_v37 = vadd.f32 %v2532_v25, %v2202_v43  ;;  %v13961_v16 = vsub.f32 %v12220_v4, %v13581_v29  ;;  %v13975_v43 = vpop.xlane.xlu1 %2278 }
 0x28e   : > { %17873 = vst [vmem:[#allocation270_spill] sm:$0xff] %v13949_v36  ;;  %17875 = vst [vmem:[#allocation271_spill] sm:$0xff] %v13953_v12  ;;  %v2206_v63 = vmul.f32 %v13939_v13, %v13939_v13  ;;  %v2204_v17 = vmul.f32 %v13931_v9, %v13931_v9  ;;  %v13969_v0 = vsub.f32 %v17879_v46, %v13581_v29  ;;  %v17906_v9 = vld [vmem:[#allocation241_spill] sm:$0xff] }
 0x28f   : > { %17877 = vst [vmem:[#allocation274_spill] sm:$0xff] %v13957_v40  ;;  %17878 = vst [vmem:[#allocation286_spill] sm:$0xff] %v13961_v16  ;;  %v2207_v55 = vmul.f32 %v13949_v36, %v13949_v36  ;;  %v2208_v51 = vmul.f32 %v13953_v12, %v13953_v12  ;;  %v2529_v4 = vadd.f32 %v2528_v2, %v2199_v22  ;;  %v17903_v12 = vld [vmem:[#allocation235_spill] sm:$0xff] }
 0x290   : > { %17880 = vst [vmem:[#allocation275_spill] sm:$0xff] %v13969_v0  ;;  %v2534_v44 = vadd.f32 %v2533_v37, %v2203_v52  ;;  %v2209_v3 = vmul.f32 %v13957_v40, %v13957_v40  ;;  %v13981_v25 = vsub.f32 %v12282_v41, %v13691_v19  ;;  %v13985_v29 = vsub.f32 %v12284_v11, %v13691_v19  ;;  %v14001_v37 = vpop.xlane.xlu0 %2285  ;;  %v17904_v36 = vld [vmem:[#allocation239_spill] sm:$0xff] }
 0x291   : > { %v2539_v8 = vadd.f32 %v2207_v55, %v2206_v63  ;;  %v13989_v34 = vsub.f32 %v12286_v59, %v13691_v19  ;;  %v13993_v22 = vsub.f32 %v12299_v38, %v13691_v19  ;;  %2530 = vadd.xlane.f32.xlu1 %v2529_v4  ;;  %v2205_v52 = vmul.f32 %v13945_v33, %v13945_v33  ;;  %v17905_v33 = vld [vmem:[#allocation240_spill] sm:$0xff] }
 0x292   : > { %17881 = vst [vmem:[#allocation287_spill] sm:$0xff] %v13981_v25  ;;  %17882 = vst [vmem:[#allocation288_spill] sm:$0xff] %v13985_v29  ;;  %v2535_v2 = vadd.f32 %v2534_v44, %v2204_v17  ;;  %v2210_v41 = vmul.f32 %v13961_v16, %v13961_v16  ;;  %v2212_v11 = vmul.f32 %v13981_v25, %v13981_v25  ;;  %v17886_v44 = vld [vmem:[#allocation278_spill] sm:$0xff]  ;;  %v2566_v16 = vmul.f32 0.0013020834, %v13941_v21 }
 0x293   : > { %17883 = vst [vmem:[#allocation289_spill] sm:$0xff] %v13989_v34  ;;  %17884 = vst [vmem:[#allocation290_spill] sm:$0xff] %v13993_v22  ;;  %v2211_v59 = vmul.f32 %v13969_v0, %v13969_v0  ;;  %v2540_v63 = vadd.f32 %v2539_v8, %v2208_v51  ;;  %v2213_v38 = vmul.f32 %v13985_v29, %v13985_v29  ;;  %v17888_v8 = vld [vmem:[#allocation279_spill] sm:$0xff]  ;;  %v2567_v40 = vmul.f32 0.0013020834, %v13975_v43 }
 0x294   : > { %v2214_v46 = vmul.f32 %v13989_v34, %v13989_v34  ;;  %v2536_v55 = vadd.f32 %v2535_v2, %v2205_v52  ;;  %v14011_v17 = vsub.f32 %v12303_v57, %v13691_v19  ;;  %v2215_v4 = vmul.f32 %v13993_v22, %v13993_v22  ;;  %v14027_v2 = vpop.xlane.xlu1 %2292 }
 0x295   : > { %v14017_v25 = vsub.f32 %v17886_v44, %v13663_v23  ;;  %v2541_v0 = vadd.f32 %v2540_v63, %v2209_v3  ;;  %v2546_v51 = vadd.f32 %v2213_v38, %v2212_v11  ;;  %v14021_v29 = vsub.f32 %v17888_v8, %v13663_v23 }
 0x296   : > { %17885 = vst [vmem:[#allocation291_spill] sm:$0xff] %v14011_v17  ;;  %v14025_v52 = vsub.f32 %v12261_v31, %v13663_v23  ;;  %2537 = vadd.xlane.f32.xlu0 %v2536_v55  ;;  %v14031_v57 = vsub.f32 %v12315_v20, %v13691_v19  ;;  %v14035_v44 = vsub.f32 %v12270_v7, %v13663_v23  ;;  %v2994_v55 = vlaneseq }
 0x297   : > { %17887 = vst [vmem:[#allocation278_spill] sm:$0xff] %v14017_v25  ;;  %17889 = vst [vmem:[#allocation279_spill] sm:$0xff] %v14021_v29  ;;  %v14039_v3 = vsub.f32 %v12274_v39, %v13663_v23  ;;  %v2218_v11 = vmul.f32 %v14017_v25, %v14017_v25  ;;  %v2542_v31 = vadd.f32 %v2541_v0, %v2210_v41  ;;  %v2300_v39 = vpop.xlane.xlu0 %2299  ;;  %v2560_v0 = vmul.f32 0.0013020834, %v13781_v6  ;;  %v2992_v6 = vld [vmem:[#allocation8] sm:$0x3f] }
 0x298   : > { %17890 = vst [vmem:[#allocation292_spill] sm:$0xff] %v14025_v52  ;;  %17891 = vst [vmem:[#allocation293_spill] sm:$0xff] %v14031_v57  ;;  %v2547_v63 = vadd.f32 %v2546_v51, %v2214_v46  ;;  %v2219_v38 = vmul.f32 %v14021_v29, %v14021_v29  ;;  %v2220_v20 = vmul.f32 %v14025_v52, %v14025_v52  ;;  %v14060_v52 = vshrl.u32 %v2994_v55, 7  ;;  %v3312_v25 = vld [vmem:[#allocation9] sm:$0x3f] }
 0x299   : > { %17892 = vst [vmem:[#allocation294_spill] sm:$0xff] %v14035_v44  ;;  %17893 = vst [vmem:[#allocation295_spill] sm:$0xff] %v14039_v3  ;;  %v2216_v19 = vmul.f32 %v14011_v17, %v14011_v17  ;;  %v2221_v7 = vmul.f32 %v14035_v44, %v14035_v44  ;;  %v2543_v8 = vadd.f32 %v2542_v31, %v2211_v59  ;;  %v2608_v59 = vadd.f32 1e-12, %v2560_v0 }
 0x29a   : > { %v2548_v22 = vadd.f32 %v2547_v63, %v2215_v4  ;;  %v2553_v34 = vadd.f32 %v2219_v38, %v2218_v11  ;;  %v2217_v41 = vmul.f32 %v14031_v57, %v14031_v57  ;;  %v14056_v46 = vsub.f32 %v12276_v10, %v13663_v23  ;;  %v2307_v11 = vpop.xlane.xlu1 %2306 }
 0x29b   : > { %v2222_v51 = vmul.f32 %v14039_v3, %v14039_v3  ;;  %2544 = vadd.xlane.f32.xlu1 %v2543_v8  ;;  %v2561_v4 = vmul.f32 0.0013020834, %v13809_v27  ;;  %v2996_v31 = vsub.s32 0, %v14060_v52  ;;  %v3000_v63 = vsub.s32 1, %v14060_v52 }
 0x29c   : > { %17894 = vst [vmem:[#allocation296_spill] sm:$0xff] %v14056_v46  ;;  %v2549_v44 = vadd.f32 %v2548_v22, %v2216_v19  ;;  %v2554_v29 = vadd.f32 %v2553_v34, %v2220_v20  ;;  %v3004_v10 = vsub.s32 2, %v14060_v52  ;;  %v3008_v23 = vsub.s32 3, %v14060_v52  ;;  %v2314_v20 = vpop.xlane.xlu0 %2313 }
 0x29d   : > { %v3012_v55 = vsub.s32 4, %v14060_v52  ;;  %v3016_v22 = vsub.s32 5, %v14060_v52  ;;  %v2562_v34 = vmul.f32 0.0013020834, %v13839_v60  ;;  %v2563_v27 = vmul.f32 0.0013020834, %v13863_v32 }
 0x29e   : > { %v2550_v38 = vadd.f32 %v2549_v44, %v2217_v41  ;;  %v2555_v3 = vadd.f32 %v2554_v29, %v2221_v7  ;;  %v2223_v19 = vmul.f32 %v14056_v46, %v14056_v46  ;;  %v14073_v0 = vrot.slane %v2992_v6, %v2996_v31  ;;  %v2321_v41 = vpop.xlane.xlu1 %2320 }
 0x29f   : > { %v14075_v57 = vrot.slane %v2992_v6, %v3000_v63  ;;  %v14077_v29 = vrot.slane %v2992_v6, %v3004_v10  ;;  %v14079_v44 = vrot.slane %v2992_v6, %v3008_v23  ;;  %v14081_v52 = vrot.slane %v2992_v6, %v3012_v55 }
 0x2a0   : > { %2551 = vadd.xlane.f32.xlu0 %v2550_v38  ;;  %v2556_v8 = vadd.f32 %v2555_v3, %v2222_v51  ;;  %v14083_v7 = vrot.slane %v2992_v6, %v3016_v22  ;;  %10058 = vrsqrt.f32 %v2608_v59  ;;  %v2609_v32 = vadd.f32 1e-12, %v2561_v4 }
 0x2a1   : > { %v14085_v38 = vrot.slane %v3312_v25, %v2996_v31  ;;  %v2610_v3 = vadd.f32 1e-12, %v2562_v34  ;;  %v2611_v51 = vadd.f32 1e-12, %v2563_v27  ;;  %v2564_v46 = vmul.f32 0.0013020834, %v13891_v56  ;;  %v2328_v31 = vpop.xlane.xlu0 %2327 }
 0x2a2   : > { %v2557_v60 = vadd.f32 %v2556_v8, %v2223_v19  ;;  %10060 = vrsqrt.f32 %v2609_v32  ;;  %v2565_v17 = vmul.f32 0.0013020834, %v13921_v48  ;;  %v2568_v59 = vmul.f32 0.0013020834, %v14001_v37  ;;  %v2335_v43 = vpop.xlane.xlu1 %2334 }
 0x2a3   : > { %10062 = vrsqrt.f32 %v2610_v3  ;;  %v2612_v6 = vadd.f32 1e-12, %v2564_v46  ;;  %v2569_v4 = vmul.f32 0.0013020834, %v14027_v2  ;;  %v2614_v27 = vadd.f32 1e-12, %v2566_v16 }
 0x2a4   : > { %2558 = vadd.xlane.f32.xlu1 %v2557_v60  ;;  %10064 = vrsqrt.f32 %v2611_v51  ;;  %v2613_v34 = vadd.f32 1e-12, %v2565_v17  ;;  %v2615_v19 = vadd.f32 1e-12, %v2567_v40  ;;  %v2616_v56 = vadd.f32 1e-12, %v2568_v59 }
 0x2a5   : > { %10066 = vrsqrt.f32 %v2612_v6  ;;  %v2617_v8 = vadd.f32 1e-12, %v2569_v4  ;;  %v2570_v60 = vmul.f32 0.0013020834, %v2300_v39  ;;  %v2571_v48 = vmul.f32 0.0013020834, %v2307_v11 }
 0x2a6   : > { %10068 = vrsqrt.f32 %v2613_v34  ;;  %v2572_v21 = vmul.f32 0.0013020834, %v2314_v20  ;;  %v2573_v32 = vmul.f32 0.0013020834, %v2321_v41  ;;  %v14093_v3 = vrot.slane %v3312_v25, %v3000_v63  ;;  %v2342_v20 = vpop.xlane.xlu0 %2341  ;;  %v17898_v6 = vld [vmem:[#allocation249_spill] sm:$0xff]  ;;  %v17900_v4 = vld [vmem:[#allocation251_spill] sm:$0xff] }
 0x2a7   : > { %v14095_v46 = vrot.slane %v3312_v25, %v3004_v10  ;;  %10070 = vrsqrt.f32 %v2614_v27  ;;  %v2574_v37 = vmul.f32 0.0013020834, %v2328_v31  ;;  %v14097_v2 = vrot.slane %v3312_v25, %v3008_v23  ;;  %v17901_v27 = vld [vmem:[#allocation255_spill] sm:$0xff] }
 0x2a8   : > { %v14099_v17 = vrot.slane %v3312_v25, %v3012_v55  ;;  %10072 = vrsqrt.f32 %v2615_v19  ;;  %v2618_v40 = vadd.f32 1e-12, %v2570_v60  ;;  %v14101_v16 = vrot.slane %v3312_v25, %v3016_v22  ;;  %v17897_v55 = vld [vmem:[#allocation245_spill] sm:$0xff]  ;;  %v17899_v25 = vld [vmem:[#allocation250_spill] sm:$0xff] }
 0x2a9   : > { %10074 = vrsqrt.f32 %v2616_v56  ;;  %v14103_v39 = vadd.f32 1e-12, %v2571_v48  ;;  %v14105_v11 = vmul.f32 0.0013020834, %v2335_v43  ;;  %v14107_v10 = vadd.f32 1e-12, %v2572_v21 }
 0x2aa   : > { %v10059_v63 = vpop.eup %10058  ;;  %10076 = vrsqrt.f32 %v2617_v8  ;;  %v14109_v41 = vadd.f32 1e-12, %v2573_v32  ;;  %v14111_v23 = vadd.f32 1e-12, %v2574_v37  ;;  %v17902_v56 = vld [vmem:[#allocation259_spill] sm:$0xff] }
 0x2ab   : > { %v2704_v51 = vmul.f32 %v10059_v63, %v17897_v55  ;;  %v2705_v59 = vmul.f32 %v10059_v63, %v17898_v6  ;;  %v2706_v22 = vmul.f32 %v10059_v63, %v17899_v25  ;;  %v2707_v31 = vmul.f32 %v10059_v63, %v17900_v4 }
 0x2ac   : > { %17895 = vst [vmem:[#allocation297_spill] sm:$0xff] %v14109_v41  ;;  %17896 = vst [vmem:[#allocation298_spill] sm:$0xff] %v14111_v23  ;;  %v10061_v34 = vpop.eup %10060  ;;  %v2708_v19 = vmul.f32 %v10059_v63, %v17901_v27  ;;  %v2709_v60 = vmul.f32 %v10059_v63, %v17902_v56  ;;  %10078 = vrsqrt.f32 %v2618_v40  ;;  %v14119_v8 = vmul.f32 0.0013020834, %v2342_v20  ;;  %v17908_v23 = vld [vmem:[#allocation273_spill] sm:$0xff] }
 0x2ad   : > { %v10063_v48 = vpop.eup %10062  ;;  %v3024_v21 = vmul.f32 %v14073_v0, %v2704_v51  ;;  %v3025_v32 = vmul.f32 %v14075_v57, %v2705_v59  ;;  %v3026_v43 = vmul.f32 %v14077_v29, %v2706_v22  ;;  %v3027_v37 = vmul.f32 %v14079_v44, %v2707_v31 }
 0x2ae   : > { %v14125_v55 = vpop.eup %10064  ;;  %v3028_v6 = vmul.f32 %v14081_v52, %v2708_v19  ;;  %v3029_v25 = vmul.f32 %v14083_v7, %v2709_v60  ;;  %v2710_v63 = vmul.f32 %v10061_v34, %v12291_v18  ;;  %v2711_v40 = vmul.f32 %v10061_v34, %v12295_v24 }
 0x2af   : > { %v14131_v20 = vpop.eup %10066  ;;  %v3344_v51 = vadd.f32 %v14085_v38, %v3024_v21  ;;  %v3345_v59 = vadd.f32 %v14093_v3, %v3025_v32  ;;  %v3346_v22 = vadd.f32 %v14095_v46, %v3026_v43  ;;  %v3347_v4 = vadd.f32 %v14097_v2, %v3027_v37 }
 0x2b0   : > { %v14137_v31 = vpop.eup %10068  ;;  %v3348_v27 = vadd.f32 %v14099_v17, %v3028_v6  ;;  %v3349_v19 = vadd.f32 %v14101_v16, %v3029_v25  ;;  %v2712_v18 = vmul.f32 %v10061_v34, %v12308_v14  ;;  %v2713_v24 = vmul.f32 %v10061_v34, %v12312_v15 }
 0x2b1   : > { %v14143_v56 = vpop.eup %10070  ;;  %v2714_v60 = vmul.f32 %v10061_v34, %v12322_v50  ;;  %v2715_v21 = vmul.f32 %v10061_v34, %v12333_v26  ;;  %v3030_v32 = vmul.f32 %v14073_v0, %v2710_v63  ;;  %v3031_v43 = vmul.f32 %v14075_v57, %v2711_v40 }
 0x2b2   : > { %v14149_v37 = vpop.eup %10072  ;;  %v3032_v6 = vmul.f32 %v14077_v29, %v2712_v18  ;;  %v3033_v25 = vmul.f32 %v14079_v44, %v2713_v24  ;;  %v2716_v14 = vmul.f32 %v10063_v48, %v17903_v12  ;;  %v2717_v15 = vmul.f32 %v10063_v48, %v17904_v36 }
 0x2b3   : > { %v14155_v13 = vpop.eup %10074  ;;  %v3034_v50 = vmul.f32 %v14081_v52, %v2714_v60  ;;  %v3035_v26 = vmul.f32 %v14083_v7, %v2715_v21  ;;  %v3350_v34 = vadd.f32 %v14085_v38, %v3030_v32  ;;  %v3351_v63 = vadd.f32 %v14093_v3, %v3031_v43 }
 0x2b4   : > { %v14161_v40 = vpop.eup %10076  ;;  %v3352_v18 = vadd.f32 %v14095_v46, %v3032_v6  ;;  %v3353_v24 = vadd.f32 %v14097_v2, %v3033_v25  ;;  %v2718_v12 = vmul.f32 %v10063_v48, %v17905_v33  ;;  %v2719_v36 = vmul.f32 %v10063_v48, %v17906_v9 }
 0x2b5   : > { %v3354_v54 = vadd.f32 %v14099_v17, %v3034_v50  ;;  %v3355_v60 = vadd.f32 %v14101_v16, %v3035_v26  ;;  %v3632_v28 = vpack.c.bf16 %v3350_v34, %v3344_v51  ;;  %v3633_v21 = vpack.c.bf16 %v3351_v63, %v3345_v59 }
 0x2b6   : > { %v14169_v58 = vpop.eup %10078  ;;  %v3634_v32 = vpack.c.bf16 %v3352_v18, %v3346_v22  ;;  %v3635_v43 = vpack.c.bf16 %v3353_v24, %v3347_v4  ;;  %v2720_v30 = vmul.f32 %v10063_v48, %v17907_v49  ;;  %v2721_v6 = vmul.f32 %v10063_v48, %v17908_v23  ;;  %v17909_v24 = vld [vmem:[#allocation280_spill] sm:$0xff] }
 0x2b7   : > { %v3636_v41 = vpack.c.bf16 %v3354_v54, %v3348_v27  ;;  %v3637_v25 = vpack.c.bf16 %v3355_v60, %v3349_v19  ;;  %3776 = vst [vmem:[#allocation2] sm:$0xff] %v3632_v28  ;;  %3777 = vst [vmem:[#allocation2 + $0x8] sm:$0xff] %v3633_v21  ;;  %v3036_v33 = vmul.f32 %v14073_v0, %v2716_v14  ;;  %10080 = vrsqrt.f32 %v14103_v39 }
 0x2b8   : > { %v3037_v9 = vmul.f32 %v14075_v57, %v2717_v15  ;;  %3778 = vst [vmem:[#allocation2 + $0x10] sm:$0xff] %v3634_v32  ;;  %3779 = vst [vmem:[#allocation2 + $0x18] sm:$0xff] %v3635_v43  ;;  %v3038_v51 = vmul.f32 %v14077_v29, %v2718_v12  ;;  %v3039_v59 = vmul.f32 %v14079_v44, %v2719_v36  ;;  %v17910_v43 = vld [vmem:[#allocation281_spill] sm:$0xff]  ;;  %10082 = vrsqrt.f32 %v14107_v10 }
 0x2b9   : > { %v3040_v22 = vmul.f32 %v14081_v52, %v2720_v30  ;;  %v3041_v49 = vmul.f32 %v14083_v7, %v2721_v6  ;;  %3780 = vst [vmem:[#allocation2 + $0x20] sm:$0xff] %v3636_v41  ;;  %3781 = vst [vmem:[#allocation2 + $0x28] sm:$0xff] %v3637_v25  ;;  %v3356_v54 = vadd.f32 %v14085_v38, %v3036_v33  ;;  %v17911_v25 = vld [vmem:[#allocation32_spill] sm:$0xff] }
 0x2ba   : > { %v3357_v28 = vadd.f32 %v14093_v3, %v3037_v9  ;;  %v2722_v23 = vmul.f32 %v14125_v55, %v12344_v1  ;;  %v2723_v48 = vmul.f32 %v14125_v55, %v12348_v47  ;;  %v3358_v4 = vadd.f32 %v14095_v46, %v3038_v51 }
 0x2bb   : > { %v3359_v27 = vadd.f32 %v14097_v2, %v3039_v59  ;;  %v3360_v30 = vadd.f32 %v14099_v17, %v3040_v22  ;;  %v3361_v19 = vadd.f32 %v14101_v16, %v3041_v49  ;;  %v2724_v41 = vmul.f32 %v14125_v55, %v12352_v62 }
 0x2bc   : > { %v2725_v14 = vmul.f32 %v14125_v55, %v12358_v35  ;;  %v2726_v1 = vmul.f32 %v14125_v55, %v12363_v53  ;;  %v2727_v47 = vmul.f32 %v14125_v55, %v12373_v61  ;;  %v3042_v15 = vmul.f32 %v14073_v0, %v2722_v23 }
 0x2bd   : > { %v3043_v50 = vmul.f32 %v14075_v57, %v2723_v48  ;;  %v2728_v26 = vmul.f32 %v14131_v20, %v12381_v42  ;;  %v2729_v34 = vmul.f32 %v14131_v20, %v12385_v5  ;;  %v3044_v62 = vmul.f32 %v14077_v29, %v2724_v41  ;;  %v17912_v48 = vld [vmem:[#allocation263_spill] sm:$0xff] }
 0x2be   : > { %v3045_v35 = vmul.f32 %v14079_v44, %v2725_v14  ;;  %v3046_v63 = vmul.f32 %v14081_v52, %v2726_v1  ;;  %v3047_v53 = vmul.f32 %v14083_v7, %v2727_v47  ;;  %v3362_v61 = vadd.f32 %v14085_v38, %v3042_v15  ;;  %v14235_v47 = vpop.xlane.xlu1 %2348 }
 0x2bf   : > { %v3363_v55 = vadd.f32 %v14093_v3, %v3043_v50  ;;  %v2730_v18 = vmul.f32 %v14131_v20, %v12391_v45  ;;  %v2731_v42 = vmul.f32 %v14131_v20, %v17909_v24  ;;  %v3364_v5 = vadd.f32 %v14095_v46, %v3044_v62  ;;  %v17915_v62 = vld [vmem:[#allocation26_spill] sm:$0xff] }
 0x2c0   : > { %v3365_v12 = vadd.f32 %v14097_v2, %v3045_v35  ;;  %v3366_v36 = vadd.f32 %v14099_v17, %v3046_v63  ;;  %v3367_v60 = vadd.f32 %v14101_v16, %v3047_v53  ;;  %v3638_v21 = vpack.c.bf16 %v3362_v61, %v3356_v54  ;;  %v17916_v63 = vld [vmem:[#allocation27_spill] sm:$0xff]  ;;  %v17917_v61 = vld [vmem:[#allocation28_spill] sm:$0xff] }
 0x2c1   : > { %v3639_v32 = vpack.c.bf16 %v3363_v55, %v3357_v28  ;;  %v2732_v6 = vmul.f32 %v14131_v20, %v17910_v43  ;;  %v2733_v33 = vmul.f32 %v14131_v20, %v17911_v25  ;;  %v3640_v45 = vpack.c.bf16 %v3364_v5, %v3358_v4  ;;  %v14259_v25 = vpop.xlane.xlu0 %2355 }
 0x2c2   : > { %v3641_v9 = vpack.c.bf16 %v3365_v12, %v3359_v27  ;;  %v3642_v51 = vpack.c.bf16 %v3366_v36, %v3360_v30  ;;  %v3643_v59 = vpack.c.bf16 %v3367_v60, %v3361_v19  ;;  %3782 = vst [vmem:[#allocation2 + $0x30] sm:$0xff] %v3638_v21  ;;  %v3048_v22 = vmul.f32 %v14073_v0, %v2728_v26  ;;  %v17913_v27 = vld [vmem:[#allocation24_spill] sm:$0xff]  ;;  %v17914_v26 = vld [vmem:[#allocation25_spill] sm:$0xff] }
 0x2c3   : > { %3783 = vst [vmem:[#allocation2 + $0x38] sm:$0xff] %v3639_v32  ;;  %v3049_v49 = vmul.f32 %v14075_v57, %v2729_v34  ;;  %v3050_v23 = vmul.f32 %v14077_v29, %v2730_v18  ;;  %v3051_v54 = vmul.f32 %v14079_v44, %v2731_v42  ;;  %3784 = vst [vmem:[#allocation2 + $0x40] sm:$0xff] %v3640_v45  ;;  %v17918_v12 = vld [vmem:[#allocation29_spill] sm:$0xff]  ;;  %v17919_v60 = vld [vmem:[#allocation36_spill] sm:$0xff]  ;;  %v2578_v39 = vmul.f32 0.0013020834, %v14259_v25 }
 0x2c4   : > { %3785 = vst [vmem:[#allocation2 + $0x48] sm:$0xff] %v3641_v9  ;;  %3786 = vst [vmem:[#allocation2 + $0x50] sm:$0xff] %v3642_v51  ;;  %v3052_v20 = vmul.f32 %v14081_v52, %v2732_v6  ;;  %v3053_v28 = vmul.f32 %v14083_v7, %v2733_v33  ;;  %v2734_v4 = vmul.f32 %v14137_v31, %v17912_v48  ;;  %v17920_v9 = vld [vmem:[#allocation37_spill] sm:$0xff] }
 0x2c5   : > { %3787 = vst [vmem:[#allocation2 + $0x58] sm:$0xff] %v3643_v59  ;;  %v2735_v30 = vmul.f32 %v14137_v31, %v17913_v27  ;;  %v3368_v19 = vadd.f32 %v14085_v38, %v3048_v22  ;;  %v3369_v41 = vadd.f32 %v14093_v3, %v3049_v49  ;;  %v3370_v14 = vadd.f32 %v14095_v46, %v3050_v23  ;;  %v17921_v59 = vld [vmem:[#allocation39_spill] sm:$0xff]  ;;  %v17922_v27 = vld [vmem:[#allocation40_spill] sm:$0xff] }
 0x2c6   : > { %v3371_v1 = vadd.f32 %v14097_v2, %v3051_v54  ;;  %v3372_v15 = vadd.f32 %v14099_v17, %v3052_v20  ;;  %v3373_v50 = vadd.f32 %v14101_v16, %v3053_v28  ;;  %v2736_v34 = vmul.f32 %v14137_v31, %v17914_v26  ;;  %v14269_v28 = vpop.xlane.xlu1 %2362  ;;  %v17923_v26 = vld [vmem:[#allocation41_spill] sm:$0xff] }
 0x2c7   : > { %v2737_v35 = vmul.f32 %v14137_v31, %v17915_v62  ;;  %v2738_v53 = vmul.f32 %v14137_v31, %v17916_v63  ;;  %v2739_v55 = vmul.f32 %v14137_v31, %v17917_v61  ;;  %v3054_v18 = vmul.f32 %v14073_v0, %v2734_v4 }
 0x2c8   : > { %v3055_v24 = vmul.f32 %v14075_v57, %v2735_v30  ;;  %v3056_v42 = vmul.f32 %v14077_v29, %v2736_v34  ;;  %v2740_v36 = vmul.f32 %v14143_v56, %v17918_v12  ;;  %v2741_v21 = vmul.f32 %v14143_v56, %v17919_v60  ;;  %v17926_v60 = vld [vmem:[#allocation31_spill] sm:$0xff] }
 0x2c9   : > { %v3057_v5 = vmul.f32 %v14079_v44, %v2737_v35  ;;  %v3058_v32 = vmul.f32 %v14081_v52, %v2738_v53  ;;  %v3059_v43 = vmul.f32 %v14083_v7, %v2739_v55  ;;  %v3374_v31 = vadd.f32 %v14085_v38, %v3054_v18  ;;  %v17925_v55 = vld [vmem:[#allocation30_spill] sm:$0xff] }
 0x2ca   : > { %v3375_v6 = vadd.f32 %v14093_v3, %v3055_v24  ;;  %v3376_v33 = vadd.f32 %v14095_v46, %v3056_v42  ;;  %v2742_v51 = vmul.f32 %v14143_v56, %v17920_v9  ;;  %v2743_v22 = vmul.f32 %v14143_v56, %v17921_v59  ;;  %v14287_v24 = vpop.xlane.xlu0 %2369  ;;  %v14301_v9 = vpop.xlane.xlu1 %2376 }
 0x2cb   : > { %v3377_v45 = vadd.f32 %v14097_v2, %v3057_v5  ;;  %v3378_v49 = vadd.f32 %v14099_v17, %v3058_v32  ;;  %v3379_v23 = vadd.f32 %v14101_v16, %v3059_v43  ;;  %v3644_v54 = vpack.c.bf16 %v3374_v31, %v3368_v19  ;;  %v17927_v32 = vld [vmem:[#allocation33_spill] sm:$0xff]  ;;  %v17928_v31 = vld [vmem:[#allocation34_spill] sm:$0xff] }
 0x2cc   : > { %v3645_v20 = vpack.c.bf16 %v3375_v6, %v3369_v41  ;;  %v3646_v48 = vpack.c.bf16 %v3376_v33, %v3370_v14  ;;  %v2744_v30 = vmul.f32 %v14143_v56, %v17922_v27  ;;  %v2745_v34 = vmul.f32 %v14143_v56, %v17923_v26  ;;  %v17929_v33 = vld [vmem:[#allocation35_spill] sm:$0xff]  ;;  %v17932_v26 = vld [vmem:[#allocation49_spill] sm:$0xff] }
 0x2cd   : > { %v3647_v4 = vpack.c.bf16 %v3377_v45, %v3371_v1  ;;  %v3648_v62 = vpack.c.bf16 %v3378_v49, %v3372_v15  ;;  %v3649_v35 = vpack.c.bf16 %v3379_v23, %v3373_v50  ;;  %3788 = vst [vmem:[#allocation2 + $0x60] sm:$0xff] %v3644_v54  ;;  %v3060_v63 = vmul.f32 %v14073_v0, %v2740_v36  ;;  %v17924_v50 = vld [vmem:[#allocation44_spill] sm:$0xff] }
 0x2ce   : > { %3789 = vst [vmem:[#allocation2 + $0x68] sm:$0xff] %v3645_v20  ;;  %v3061_v53 = vmul.f32 %v14075_v57, %v2741_v21  ;;  %3790 = vst [vmem:[#allocation2 + $0x70] sm:$0xff] %v3646_v48  ;;  %v3062_v19 = vmul.f32 %v14077_v29, %v2742_v51  ;;  %v3063_v41 = vmul.f32 %v14079_v44, %v2743_v22  ;;  %v17930_v22 = vld [vmem:[#allocation38_spill] sm:$0xff]  ;;  %v17931_v23 = vld [vmem:[#allocation48_spill] sm:$0xff] }
 0x2cf   : > { %3791 = vst [vmem:[#allocation2 + $0x78] sm:$0xff] %v3647_v4  ;;  %v3064_v14 = vmul.f32 %v14081_v52, %v2744_v30  ;;  %v3065_v1 = vmul.f32 %v14083_v7, %v2745_v34  ;;  %3792 = vst [vmem:[#allocation2 + $0x80] sm:$0xff] %v3648_v62  ;;  %v3380_v56 = vadd.f32 %v14085_v38, %v3060_v63  ;;  %v17933_v62 = vld [vmem:[#allocation51_spill] sm:$0xff] }
 0x2d0   : > { %3793 = vst [vmem:[#allocation2 + $0x88] sm:$0xff] %v3649_v35  ;;  %v3381_v15 = vadd.f32 %v14093_v3, %v3061_v53  ;;  %v2746_v61 = vmul.f32 %v14149_v37, %v17924_v50  ;;  %v2747_v18 = vmul.f32 %v14149_v37, %v17925_v55  ;;  %v3382_v42 = vadd.f32 %v14095_v46, %v3062_v19 }
 0x2d1   : > { %v3383_v5 = vadd.f32 %v14097_v2, %v3063_v41  ;;  %v3384_v12 = vadd.f32 %v14099_v17, %v3064_v14  ;;  %v3385_v36 = vadd.f32 %v14101_v16, %v3065_v1  ;;  %v2748_v21 = vmul.f32 %v14149_v37, %v17926_v60  ;;  %v14323_v14 = vpop.xlane.xlu0 %2383 }
 0x2d2   : > { %v2749_v43 = vmul.f32 %v14149_v37, %v17927_v32  ;;  %v2750_v6 = vmul.f32 %v14149_v37, %v17928_v31  ;;  %v2751_v45 = vmul.f32 %v14149_v37, %v17929_v33  ;;  %v3066_v51 = vmul.f32 %v14073_v0, %v2746_v61  ;;  %v17934_v61 = vld [vmem:[#allocation52_spill] sm:$0xff] }
 0x2d3   : > { %v3067_v59 = vmul.f32 %v14075_v57, %v2747_v18  ;;  %v2752_v49 = vmul.f32 %v14155_v13, %v17930_v22  ;;  %v2753_v54 = vmul.f32 %v14155_v13, %v17931_v23  ;;  %v3068_v20 = vmul.f32 %v14077_v29, %v2748_v21  ;;  %v17935_v18 = vld [vmem:[#allocation53_spill] sm:$0xff] }
 0x2d4   : > { %v3069_v48 = vmul.f32 %v14079_v44, %v2749_v43  ;;  %v3070_v4 = vmul.f32 %v14081_v52, %v2750_v6  ;;  %v3071_v37 = vmul.f32 %v14083_v7, %v2751_v45  ;;  %v3386_v27 = vadd.f32 %v14085_v38, %v3066_v51  ;;  %v14329_v6 = vpop.xlane.xlu1 %2390 }
 0x2d5   : > { %v3387_v30 = vadd.f32 %v14093_v3, %v3067_v59  ;;  %v2754_v34 = vmul.f32 %v14155_v13, %v17932_v26  ;;  %v2755_v35 = vmul.f32 %v14155_v13, %v17933_v62  ;;  %v3388_v63 = vadd.f32 %v14095_v46, %v3068_v20  ;;  %v17940_v26 = vld [vmem:[#allocation46_spill] sm:$0xff]  ;;  %v17941_v62 = vld [vmem:[#allocation47_spill] sm:$0xff] }
 0x2d6   : > { %v3389_v53 = vadd.f32 %v14097_v2, %v3069_v48  ;;  %v3390_v19 = vadd.f32 %v14099_v17, %v3070_v4  ;;  %v3391_v41 = vadd.f32 %v14101_v16, %v3071_v37  ;;  %v3650_v1 = vpack.c.bf16 %v3386_v27, %v3380_v56  ;;  %v17938_v48 = vld [vmem:[#allocation43_spill] sm:$0xff]  ;;  %v17939_v37 = vld [vmem:[#allocation45_spill] sm:$0xff] }
 0x2d7   : > { %v3651_v50 = vpack.c.bf16 %v3387_v30, %v3381_v15  ;;  %v2756_v55 = vmul.f32 %v14155_v13, %v17934_v61  ;;  %v2757_v60 = vmul.f32 %v14155_v13, %v17935_v18  ;;  %v3652_v21 = vpack.c.bf16 %v3388_v63, %v3382_v42  ;;  %v14351_v30 = vpop.xlane.xlu0 %2397  ;;  %v17943_v61 = vld [vmem:[#allocation60_spill] sm:$0xff] }
 0x2d8   : > { %v3653_v32 = vpack.c.bf16 %v3389_v53, %v3383_v5  ;;  %v3654_v43 = vpack.c.bf16 %v3390_v19, %v3384_v12  ;;  %v3655_v31 = vpack.c.bf16 %v3391_v41, %v3385_v36  ;;  %3794 = vst [vmem:[#allocation2 + $0x90] sm:$0xff] %v3650_v1  ;;  %v3072_v33 = vmul.f32 %v14073_v0, %v2752_v49  ;;  %v17936_v5 = vld [vmem:[#allocation56_spill] sm:$0xff]  ;;  %v17937_v36 = vld [vmem:[#allocation42_spill] sm:$0xff]  ;;  %v2405_v18 = vpop.xlane.xlu1 %2404 }
 0x2d9   : > { %3795 = vst [vmem:[#allocation2 + $0x98] sm:$0xff] %v3651_v50  ;;  %v3073_v45 = vmul.f32 %v14075_v57, %v2753_v54  ;;  %v3074_v56 = vmul.f32 %v14077_v29, %v2754_v34  ;;  %v3075_v15 = vmul.f32 %v14079_v44, %v2755_v35  ;;  %3796 = vst [vmem:[#allocation2 + $0xa0] sm:$0xff] %v3652_v21  ;;  %v17942_v1 = vld [vmem:[#allocation50_spill] sm:$0xff] }
 0x2da   : > { %3797 = vst [vmem:[#allocation2 + $0xa8] sm:$0xff] %v3653_v32  ;;  %3798 = vst [vmem:[#allocation2 + $0xb0] sm:$0xff] %v3654_v43  ;;  %v3076_v13 = vmul.f32 %v14081_v52, %v2756_v55  ;;  %v3077_v42 = vmul.f32 %v14083_v7, %v2757_v60  ;;  %v2758_v12 = vmul.f32 %v14161_v40, %v17936_v5 }
 0x2db   : > { %3799 = vst [vmem:[#allocation2 + $0xb8] sm:$0xff] %v3655_v31  ;;  %v2759_v51 = vmul.f32 %v14161_v40, %v17937_v36  ;;  %v3392_v59 = vadd.f32 %v14085_v38, %v3072_v33  ;;  %v3393_v22 = vadd.f32 %v14093_v3, %v3073_v45  ;;  %v3394_v49 = vadd.f32 %v14095_v46, %v3074_v56  ;;  %v17944_v33 = vld [vmem:[#allocation61_spill] sm:$0xff]  ;;  %v17945_v56 = vld [vmem:[#allocation63_spill] sm:$0xff] }
 0x2dc   : > { %v3395_v23 = vadd.f32 %v14097_v2, %v3075_v15  ;;  %v3396_v54 = vadd.f32 %v14099_v17, %v3076_v13  ;;  %v3397_v20 = vadd.f32 %v14101_v16, %v3077_v42  ;;  %v2760_v4 = vmul.f32 %v14161_v40, %v17938_v48  ;;  %v17946_v48 = vld [vmem:[#allocation64_spill] sm:$0xff] }
 0x2dd   : > { %v2761_v27 = vmul.f32 %v14161_v40, %v17939_v37  ;;  %v2762_v34 = vmul.f32 %v14161_v40, %v17940_v26  ;;  %v2763_v35 = vmul.f32 %v14161_v40, %v17941_v62  ;;  %v3078_v63 = vmul.f32 %v14073_v0, %v2758_v12  ;;  %v17947_v37 = vld [vmem:[#allocation65_spill] sm:$0xff]  ;;  %v2412_v26 = vpop.xlane.xlu0 %2411 }
 0x2de   : > { %v3079_v53 = vmul.f32 %v14075_v57, %v2759_v51  ;;  %v3080_v19 = vmul.f32 %v14077_v29, %v2760_v4  ;;  %v2764_v50 = vmul.f32 %v14169_v58, %v17942_v1  ;;  %v2765_v55 = vmul.f32 %v14169_v58, %v17943_v61 }
 0x2df   : > { %v3081_v41 = vmul.f32 %v14079_v44, %v2761_v27  ;;  %v3082_v60 = vmul.f32 %v14081_v52, %v2762_v34  ;;  %v3083_v21 = vmul.f32 %v14083_v7, %v2763_v35  ;;  %v3398_v40 = vadd.f32 %v14085_v38, %v3078_v63 }
 0x2e0   : > { %v3399_v32 = vadd.f32 %v14093_v3, %v3079_v53  ;;  %v3400_v43 = vadd.f32 %v14095_v46, %v3080_v19  ;;  %v2766_v45 = vmul.f32 %v14169_v58, %v17944_v33  ;;  %v2767_v15 = vmul.f32 %v14169_v58, %v17945_v56 }
 0x2e1   : > { %v3401_v31 = vadd.f32 %v14097_v2, %v3081_v41  ;;  %v3402_v13 = vadd.f32 %v14099_v17, %v3082_v60  ;;  %v3403_v42 = vadd.f32 %v14101_v16, %v3083_v21  ;;  %v3656_v5 = vpack.c.bf16 %v3398_v40, %v3392_v59  ;;  %v2426_v21 = vpop.xlane.xlu0 %2425  ;;  %v17949_v40 = vld [vmem:[#allocation298_spill] sm:$0xff] }
 0x2e2   : > { %v3657_v12 = vpack.c.bf16 %v3399_v32, %v3393_v22  ;;  %v3658_v36 = vpack.c.bf16 %v3400_v43, %v3394_v49  ;;  %v2768_v4 = vmul.f32 %v14169_v58, %v17946_v48  ;;  %v2769_v27 = vmul.f32 %v14169_v58, %v17947_v37  ;;  %v2419_v58 = vpop.xlane.xlu1 %2418  ;;  %v17950_v37 = vld [vmem:[#allocation68_spill] sm:$0xff] }
 0x2e3   : > { %v3659_v51 = vpack.c.bf16 %v3401_v31, %v3395_v23  ;;  %v3660_v34 = vpack.c.bf16 %v3402_v13, %v3396_v54  ;;  %v3661_v62 = vpack.c.bf16 %v3403_v42, %v3397_v20  ;;  %3800 = vst [vmem:[#allocation2 + $0xc0] sm:$0xff] %v3656_v5  ;;  %v3084_v35 = vmul.f32 %v14073_v0, %v2764_v50 }
 0x2e4   : > { %3801 = vst [vmem:[#allocation2 + $0xc8] sm:$0xff] %v3657_v12  ;;  %v3085_v63 = vmul.f32 %v14075_v57, %v2765_v55  ;;  %3802 = vst [vmem:[#allocation2 + $0xd0] sm:$0xff] %v3658_v36  ;;  %v3086_v59 = vmul.f32 %v14077_v29, %v2766_v45  ;;  %v3087_v22 = vmul.f32 %v14079_v44, %v2767_v15  ;;  %v2623_v23 = vadd.f32 1e-12, %v14105_v11 }
 0x2e5   : > { %3803 = vst [vmem:[#allocation2 + $0xd8] sm:$0xff] %v3659_v51  ;;  %v3088_v49 = vmul.f32 %v14081_v52, %v2768_v4  ;;  %3804 = vst [vmem:[#allocation2 + $0xe0] sm:$0xff] %v3660_v34  ;;  %v3089_v54 = vmul.f32 %v14083_v7, %v2769_v27  ;;  %v2624_v20 = vadd.f32 1e-12, %v14119_v8  ;;  %v2577_v53 = vmul.f32 0.0013020834, %v14235_v47  ;;  %v2440_v51 = vpop.xlane.xlu0 %2439 }
 0x2e6   : > { %3805 = vst [vmem:[#allocation2 + $0xe8] sm:$0xff] %v3661_v62  ;;  %v14392_v19 = vadd.f32 %v14085_v38, %v3084_v35  ;;  %v14395_v41 = vadd.f32 %v14093_v3, %v3085_v63  ;;  %v14398_v1 = vadd.f32 %v14095_v46, %v3086_v59  ;;  %v14401_v11 = vadd.f32 %v14097_v2, %v3087_v22  ;;  %v17948_v47 = vld [vmem:[#allocation297_spill] sm:$0xff]  ;;  %v2433_v33 = vpop.xlane.xlu1 %2432  ;;  %v17952_v62 = vld [vmem:[#allocation55_spill] sm:$0xff] }
 0x2e7   : > { %v14404_v50 = vadd.f32 %v14099_v17, %v3088_v49  ;;  %v2579_v8 = vmul.f32 0.0013020834, %v14269_v28  ;;  %10084 = vrsqrt.f32 %v17948_v47  ;;  %v2625_v61 = vadd.f32 1e-12, %v2577_v53  ;;  %v17953_v63 = vld [vmem:[#allocation57_spill] sm:$0xff]  ;;  %v17954_v49 = vld [vmem:[#allocation58_spill] sm:$0xff] }
 0x2e8   : > { %v2580_v55 = vmul.f32 0.0013020834, %v14287_v24  ;;  %v2581_v60 = vmul.f32 0.0013020834, %v14301_v9  ;;  %10086 = vrsqrt.f32 %v17949_v40  ;;  %v2626_v32 = vadd.f32 1e-12, %v2578_v39 }
 0x2e9   : > { %v2582_v43 = vmul.f32 0.0013020834, %v14323_v14  ;;  %v2583_v31 = vmul.f32 0.0013020834, %v14329_v6  ;;  %v14416_v10 = vadd.f32 %v14101_v16, %v3089_v54  ;;  %10088 = vrsqrt.f32 %v2623_v23  ;;  %v17956_v40 = vld [vmem:[#allocation62_spill] sm:$0xff] }
 0x2ea   : > { %v2627_v25 = vadd.f32 1e-12, %v2579_v8  ;;  %v2628_v28 = vadd.f32 1e-12, %v2580_v55  ;;  %10090 = vrsqrt.f32 %v2624_v20  ;;  %v2629_v45 = vadd.f32 1e-12, %v2581_v60 }
 0x2eb   : > { %v2584_v24 = vmul.f32 0.0013020834, %v14351_v30  ;;  %v2585_v9 = vmul.f32 0.0013020834, %v2405_v18  ;;  %10092 = vrsqrt.f32 %v2625_v61  ;;  %v2586_v56 = vmul.f32 0.0013020834, %v2412_v26  ;;  %v10081_v30 = vpop.eup %10080 }
 0x2ec   : > { %v2587_v15 = vmul.f32 0.0013020834, %v2419_v58  ;;  %v2588_v13 = vmul.f32 0.0013020834, %v2426_v21  ;;  %10094 = vrsqrt.f32 %v2626_v32  ;;  %v14419_v14 = vadd.f32 1e-12, %v2582_v43  ;;  %v10083_v22 = vpop.eup %10082 }
 0x2ed   : > { %v14421_v6 = vadd.f32 1e-12, %v2583_v31  ;;  %v2589_v42 = vmul.f32 0.0013020834, %v2433_v33  ;;  %10096 = vrsqrt.f32 %v2627_v25  ;;  %v14423_v5 = vadd.f32 1e-12, %v2584_v24 }
 0x2ee   : > { %v14425_v12 = vadd.f32 1e-12, %v2585_v9  ;;  %v14427_v36 = vadd.f32 1e-12, %v2586_v56  ;;  %10098 = vrsqrt.f32 %v2628_v28  ;;  %v14429_v18 = vadd.f32 1e-12, %v2587_v15 }
 0x2ef   : > { %v14431_v48 = vadd.f32 1e-12, %v2588_v13  ;;  %v14433_v4 = vadd.f32 1e-12, %v2589_v42  ;;  %v2770_v27 = vmul.f32 %v10081_v30, %v17950_v37  ;;  %v17951_v26 = vld [vmem:[#allocation54_spill] sm:$0xff]  ;;  %v2772_v35 = vmul.f32 %v10081_v30, %v17952_v62  ;;  %v17955_v58 = vld [vmem:[#allocation59_spill] sm:$0xff] }
 0x2f0   : > { %v2771_v34 = vmul.f32 %v10081_v30, %v17951_v26  ;;  %v2773_v59 = vmul.f32 %v10081_v30, %v17953_v63  ;;  %v2774_v23 = vmul.f32 %v10081_v30, %v17954_v49  ;;  %v2775_v54 = vmul.f32 %v10081_v30, %v17955_v58  ;;  %v17957_v43 = vld [vmem:[#allocation72_spill] sm:$0xff]  ;;  %v17958_v13 = vld [vmem:[#allocation73_spill] sm:$0xff] }
 0x2f1   : > { %10100 = vrsqrt.f32 %v2629_v45  ;;  %v14441_v20 = vmul.f32 0.0013020834, %v2440_v51  ;;  %v10085_v53 = vpop.eup %10084  ;;  %v3090_v39 = vmul.f32 %v14073_v0, %v2770_v27  ;;  %v3092_v47 = vmul.f32 %v14077_v29, %v2772_v35  ;;  %v17959_v51 = vld [vmem:[#allocation75_spill] sm:$0xff]  ;;  %v17960_v49 = vld [vmem:[#allocation76_spill] sm:$0xff]  ;;  %v17961_v58 = vld [vmem:[#allocation77_spill] sm:$0xff] }
 0x2f2   : > { %v3091_v8 = vmul.f32 %v14075_v57, %v2771_v34  ;;  %v3093_v61 = vmul.f32 %v14079_v44, %v2773_v59  ;;  %v14447_v55 = vpop.eup %10086  ;;  %v3094_v60 = vmul.f32 %v14081_v52, %v2774_v23  ;;  %v3095_v21 = vmul.f32 %v14083_v7, %v2775_v54 }
 0x2f3   : > { %v2776_v32 = vmul.f32 %v10083_v22, %v17956_v40  ;;  %v2777_v31 = vmul.f32 %v10083_v22, %v17957_v43  ;;  %v14453_v25 = vpop.eup %10088  ;;  %v3410_v28 = vadd.f32 %v14085_v38, %v3090_v39  ;;  %v3412_v45 = vadd.f32 %v14095_v46, %v3092_v47 }
 0x2f4   : > { %v3411_v33 = vadd.f32 %v14093_v3, %v3091_v8  ;;  %v3413_v24 = vadd.f32 %v14097_v2, %v3093_v61  ;;  %v14459_v9 = vpop.eup %10090  ;;  %v3414_v56 = vadd.f32 %v14099_v17, %v3094_v60  ;;  %v3415_v15 = vadd.f32 %v14101_v16, %v3095_v21  ;;  %v17962_v8 = vld [vmem:[#allocation80_spill] sm:$0xff]  ;;  %v17963_v61 = vld [vmem:[#allocation66_spill] sm:$0xff] }
 0x2f5   : > { %v2778_v42 = vmul.f32 %v10083_v22, %v17958_v13  ;;  %v2779_v30 = vmul.f32 %v10083_v22, %v17959_v51  ;;  %v14465_v37 = vpop.eup %10092  ;;  %v3662_v27 = vpack.c.bf16 %v3410_v28, %v14392_v19  ;;  %v3664_v34 = vpack.c.bf16 %v3412_v45, %v14398_v1  ;;  %v17964_v45 = vld [vmem:[#allocation67_spill] sm:$0xff]  ;;  %v17966_v13 = vld [vmem:[#allocation70_spill] sm:$0xff] }
 0x2f6   : > { %v3663_v26 = vpack.c.bf16 %v3411_v33, %v14395_v41  ;;  %v3665_v62 = vpack.c.bf16 %v3413_v24, %v14401_v11  ;;  %v14471_v35 = vpop.eup %10094  ;;  %v3666_v63 = vpack.c.bf16 %v3414_v56, %v14404_v50  ;;  %v3667_v59 = vpack.c.bf16 %v3415_v15, %v14416_v10  ;;  %v17965_v56 = vld [vmem:[#allocation69_spill] sm:$0xff]  ;;  %v17967_v51 = vld [vmem:[#allocation71_spill] sm:$0xff] }
 0x2f7   : > { %v2780_v23 = vmul.f32 %v10083_v22, %v17960_v49  ;;  %v2781_v54 = vmul.f32 %v10083_v22, %v17961_v58  ;;  %v14477_v39 = vpop.eup %10096  ;;  %3806 = vst [vmem:[#allocation2 + $0xf0] sm:$0xff] %v3662_v27  ;;  %3808 = vst [vmem:[#allocation2 + $0x100] sm:$0xff] %v3664_v34  ;;  %v3096_v19 = vmul.f32 %v14073_v0, %v2776_v32  ;;  %v17969_v49 = vld [vmem:[#allocation84_spill] sm:$0xff]  ;;  %10102 = vrsqrt.f32 %v14419_v14 }
 0x2f8   : > { %3807 = vst [vmem:[#allocation2 + $0xf8] sm:$0xff] %v3663_v26  ;;  %3809 = vst [vmem:[#allocation2 + $0x108] sm:$0xff] %v3665_v62  ;;  %v3097_v41 = vmul.f32 %v14075_v57, %v2777_v31  ;;  %v3098_v1 = vmul.f32 %v14077_v29, %v2778_v42  ;;  %v3099_v11 = vmul.f32 %v14079_v44, %v2779_v30  ;;  %v14483_v50 = vpop.eup %10098  ;;  %10104 = vrsqrt.f32 %v14421_v6 }
 0x2f9   : > { %3810 = vst [vmem:[#allocation2 + $0x110] sm:$0xff] %v3666_v63  ;;  %3811 = vst [vmem:[#allocation2 + $0x118] sm:$0xff] %v3667_v59  ;;  %v3100_v10 = vmul.f32 %v14081_v52, %v2780_v23  ;;  %v3101_v22 = vmul.f32 %v14083_v7, %v2781_v54  ;;  %v2782_v47 = vmul.f32 %v10085_v53, %v17962_v8  ;;  %v17968_v63 = vld [vmem:[#allocation74_spill] sm:$0xff]  ;;  %10106 = vrsqrt.f32 %v14423_v5 }
 0x2fa   : > { %v2783_v60 = vmul.f32 %v10085_v53, %v17963_v61  ;;  %v3416_v21 = vadd.f32 %v14085_v38, %v3096_v19  ;;  %v3417_v40 = vadd.f32 %v14093_v3, %v3097_v41  ;;  %v3418_v32 = vadd.f32 %v14095_v46, %v3098_v1 }
 0x2fb   : > { %v3419_v43 = vadd.f32 %v14097_v2, %v3099_v11  ;;  %v14493_v31 = vpop.eup %10100  ;;  %v3420_v28 = vadd.f32 %v14099_v17, %v3100_v10  ;;  %v3421_v33 = vadd.f32 %v14101_v16, %v3101_v22  ;;  %v2784_v24 = vmul.f32 %v10085_v53, %v17964_v45  ;;  %v17970_v11 = vld [vmem:[#allocation85_spill] sm:$0xff]  ;;  %v17971_v22 = vld [vmem:[#allocation87_spill] sm:$0xff] }
 0x2fc   : > { %v2785_v15 = vmul.f32 %v10085_v53, %v17965_v56  ;;  %v2786_v42 = vmul.f32 %v10085_v53, %v17966_v13  ;;  %v2787_v30 = vmul.f32 %v10085_v53, %v17967_v51  ;;  %v3102_v27 = vmul.f32 %v14073_v0, %v2782_v47 }
 0x2fd   : > { %v3103_v26 = vmul.f32 %v14075_v57, %v2783_v60  ;;  %v3104_v34 = vmul.f32 %v14077_v29, %v2784_v24  ;;  %v2788_v59 = vmul.f32 %v14447_v55, %v17968_v63  ;;  %v2789_v23 = vmul.f32 %v14447_v55, %v17969_v49  ;;  %v17975_v63 = vld [vmem:[#allocation78_spill] sm:$0xff] }
 0x2fe   : > { %v3105_v62 = vmul.f32 %v14079_v44, %v2785_v15  ;;  %v3106_v58 = vmul.f32 %v14081_v52, %v2786_v42  ;;  %v3107_v54 = vmul.f32 %v14083_v7, %v2787_v30  ;;  %v3422_v53 = vadd.f32 %v14085_v38, %v3102_v27  ;;  %v17972_v15 = vld [vmem:[#allocation88_spill] sm:$0xff]  ;;  %v17973_v42 = vld [vmem:[#allocation89_spill] sm:$0xff] }
 0x2ff   : > { %v3423_v19 = vadd.f32 %v14093_v3, %v3103_v26  ;;  %v3424_v41 = vadd.f32 %v14095_v46, %v3104_v34  ;;  %v2790_v10 = vmul.f32 %v14447_v55, %v17970_v11  ;;  %v2791_v8 = vmul.f32 %v14447_v55, %v17971_v22  ;;  %v17978_v11 = vld [vmem:[#allocation82_spill] sm:$0xff]  ;;  %v17979_v22 = vld [vmem:[#allocation83_spill] sm:$0xff] }
 0x300   : > { %v3425_v1 = vadd.f32 %v14097_v2, %v3105_v62  ;;  %v3426_v47 = vadd.f32 %v14099_v17, %v3106_v58  ;;  %v3427_v61 = vadd.f32 %v14101_v16, %v3107_v54  ;;  %v3668_v60 = vpack.c.bf16 %v3422_v53, %v3416_v21  ;;  %v17976_v53 = vld [vmem:[#allocation79_spill] sm:$0xff] }
 0x301   : > { %v3669_v45 = vpack.c.bf16 %v3423_v19, %v3417_v40  ;;  %v3670_v24 = vpack.c.bf16 %v3424_v41, %v3418_v32  ;;  %v2792_v13 = vmul.f32 %v14447_v55, %v17972_v15  ;;  %v2793_v51 = vmul.f32 %v14447_v55, %v17973_v42  ;;  %v17977_v41 = vld [vmem:[#allocation81_spill] sm:$0xff] }
 0x302   : > { %v3671_v56 = vpack.c.bf16 %v3425_v1, %v3419_v43  ;;  %v3672_v30 = vpack.c.bf16 %v3426_v47, %v3420_v28  ;;  %v3673_v27 = vpack.c.bf16 %v3427_v61, %v3421_v33  ;;  %3812 = vst [vmem:[#allocation2 + $0x120] sm:$0xff] %v3668_v60  ;;  %v3108_v26 = vmul.f32 %v14073_v0, %v2788_v59  ;;  %v17974_v33 = vld [vmem:[#allocation92_spill] sm:$0xff]  ;;  %v17980_v60 = vld [vmem:[#allocation86_spill] sm:$0xff] }
 0x303   : > { %3813 = vst [vmem:[#allocation2 + $0x128] sm:$0xff] %v3669_v45  ;;  %v3109_v34 = vmul.f32 %v14075_v57, %v2789_v23  ;;  %3814 = vst [vmem:[#allocation2 + $0x130] sm:$0xff] %v3670_v24  ;;  %v3110_v21 = vmul.f32 %v14077_v29, %v2790_v10  ;;  %v3111_v40 = vmul.f32 %v14079_v44, %v2791_v8  ;;  %v17981_v24 = vld [vmem:[#allocation96_spill] sm:$0xff]  ;;  %10108 = vrsqrt.f32 %v14425_v12 }
 0x304   : > { %3815 = vst [vmem:[#allocation2 + $0x138] sm:$0xff] %v3671_v56  ;;  %v3112_v32 = vmul.f32 %v14081_v52, %v2792_v13  ;;  %v3113_v43 = vmul.f32 %v14083_v7, %v2793_v51  ;;  %3816 = vst [vmem:[#allocation2 + $0x140] sm:$0xff] %v3672_v30  ;;  %v3428_v55 = vadd.f32 %v14085_v38, %v3108_v26  ;;  %10110 = vrsqrt.f32 %v14427_v36 }
 0x305   : > { %3817 = vst [vmem:[#allocation2 + $0x148] sm:$0xff] %v3673_v27  ;;  %v3429_v28 = vadd.f32 %v14093_v3, %v3109_v34  ;;  %v2794_v62 = vmul.f32 %v14453_v25, %v17974_v33  ;;  %v2795_v59 = vmul.f32 %v14453_v25, %v17975_v63  ;;  %v3430_v49 = vadd.f32 %v14095_v46, %v3110_v21  ;;  %v17982_v27 = vld [vmem:[#allocation97_spill] sm:$0xff]  ;;  %v17983_v34 = vld [vmem:[#allocation99_spill] sm:$0xff] }
 0x306   : > { %v3431_v23 = vadd.f32 %v14097_v2, %v3111_v40  ;;  %v3432_v58 = vadd.f32 %v14099_v17, %v3112_v32  ;;  %v3433_v54 = vadd.f32 %v14101_v16, %v3113_v43  ;;  %v2796_v19 = vmul.f32 %v14453_v25, %v17976_v53 }
 0x307   : > { %v2797_v1 = vmul.f32 %v14453_v25, %v17977_v41  ;;  %v2798_v10 = vmul.f32 %v14453_v25, %v17978_v11  ;;  %v2799_v8 = vmul.f32 %v14453_v25, %v17979_v22  ;;  %v3114_v47 = vmul.f32 %v14073_v0, %v2794_v62 }
 0x308   : > { %v3115_v61 = vmul.f32 %v14075_v57, %v2795_v59  ;;  %v2800_v45 = vmul.f32 %v14459_v9, %v17980_v60  ;;  %v2801_v56 = vmul.f32 %v14459_v9, %v17981_v24  ;;  %v3116_v15 = vmul.f32 %v14077_v29, %v2796_v19  ;;  %v17984_v59 = vld [vmem:[#allocation100_spill] sm:$0xff]  ;;  %v17985_v19 = vld [vmem:[#allocation101_spill] sm:$0xff] }
 0x309   : > { %v3117_v13 = vmul.f32 %v14079_v44, %v2797_v1  ;;  %v3118_v42 = vmul.f32 %v14081_v52, %v2798_v10  ;;  %v3119_v51 = vmul.f32 %v14083_v7, %v2799_v8  ;;  %v3434_v25 = vadd.f32 %v14085_v38, %v3114_v47 }
 0x30a   : > { %v3435_v30 = vadd.f32 %v14093_v3, %v3115_v61  ;;  %v2802_v26 = vmul.f32 %v14459_v9, %v17982_v27  ;;  %v2803_v21 = vmul.f32 %v14459_v9, %v17983_v34  ;;  %v3436_v40 = vadd.f32 %v14095_v46, %v3116_v15  ;;  %v17990_v27 = vld [vmem:[#allocation94_spill] sm:$0xff]  ;;  %v17991_v34 = vld [vmem:[#allocation95_spill] sm:$0xff] }
 0x30b   : > { %v3437_v32 = vadd.f32 %v14097_v2, %v3117_v13  ;;  %v3438_v43 = vadd.f32 %v14099_v17, %v3118_v42  ;;  %v3439_v33 = vadd.f32 %v14101_v16, %v3119_v51  ;;  %v3674_v62 = vpack.c.bf16 %v3434_v25, %v3428_v55  ;;  %v17988_v42 = vld [vmem:[#allocation91_spill] sm:$0xff]  ;;  %v17989_v25 = vld [vmem:[#allocation93_spill] sm:$0xff] }
 0x30c   : > { %v3675_v63 = vpack.c.bf16 %v3435_v30, %v3429_v28  ;;  %v2804_v53 = vmul.f32 %v14459_v9, %v17984_v59  ;;  %v2805_v41 = vmul.f32 %v14459_v9, %v17985_v19  ;;  %v3676_v1 = vpack.c.bf16 %v3436_v40, %v3430_v49  ;;  %v17986_v49 = vld [vmem:[#allocation104_spill] sm:$0xff] }
 0x30d   : > { %v3677_v11 = vpack.c.bf16 %v3437_v32, %v3431_v23  ;;  %v3678_v10 = vpack.c.bf16 %v3438_v43, %v3432_v58  ;;  %v3679_v22 = vpack.c.bf16 %v3439_v33, %v3433_v54  ;;  %3818 = vst [vmem:[#allocation2 + $0x150] sm:$0xff] %v3674_v62  ;;  %v3120_v8 = vmul.f32 %v14073_v0, %v2800_v45  ;;  %v17987_v58 = vld [vmem:[#allocation90_spill] sm:$0xff]  ;;  %v17993_v59 = vld [vmem:[#allocation108_spill] sm:$0xff] }
 0x30e   : > { %3819 = vst [vmem:[#allocation2 + $0x158] sm:$0xff] %v3675_v63  ;;  %v3121_v47 = vmul.f32 %v14075_v57, %v2801_v56  ;;  %v3122_v61 = vmul.f32 %v14077_v29, %v2802_v26  ;;  %v3123_v55 = vmul.f32 %v14079_v44, %v2803_v21  ;;  %3820 = vst [vmem:[#allocation2 + $0x160] sm:$0xff] %v3676_v1  ;;  %v17992_v62 = vld [vmem:[#allocation98_spill] sm:$0xff]  ;;  %10112 = vrsqrt.f32 %v14429_v18 }
 0x30f   : > { %3821 = vst [vmem:[#allocation2 + $0x168] sm:$0xff] %v3677_v11  ;;  %3822 = vst [vmem:[#allocation2 + $0x170] sm:$0xff] %v3678_v10  ;;  %v3124_v9 = vmul.f32 %v14081_v52, %v2804_v53  ;;  %v3125_v28 = vmul.f32 %v14083_v7, %v2805_v41  ;;  %v2806_v23 = vmul.f32 %v14465_v37, %v17986_v49  ;;  %10114 = vrsqrt.f32 %v14431_v48  ;;  %v18016_v48 = vld [vmem:[#allocation122_spill] sm:$0xff] }
 0x310   : > { %3823 = vst [vmem:[#allocation2 + $0x178] sm:$0xff] %v3679_v22  ;;  %v2807_v54 = vmul.f32 %v14465_v37, %v17987_v58  ;;  %v3440_v60 = vadd.f32 %v14085_v38, %v3120_v8  ;;  %v3441_v45 = vadd.f32 %v14093_v3, %v3121_v47  ;;  %v3442_v24 = vadd.f32 %v14095_v46, %v3122_v61  ;;  %v17994_v22 = vld [vmem:[#allocation109_spill] sm:$0xff]  ;;  %v17995_v47 = vld [vmem:[#allocation111_spill] sm:$0xff] }
 0x311   : > { %v3443_v56 = vadd.f32 %v14097_v2, %v3123_v55  ;;  %v3444_v15 = vadd.f32 %v14099_v17, %v3124_v9  ;;  %v3445_v13 = vadd.f32 %v14101_v16, %v3125_v28  ;;  %v2808_v51 = vmul.f32 %v14465_v37, %v17988_v42 }
 0x312   : > { %v2809_v30 = vmul.f32 %v14465_v37, %v17989_v25  ;;  %v2810_v26 = vmul.f32 %v14465_v37, %v17990_v27  ;;  %v2811_v21 = vmul.f32 %v14465_v37, %v17991_v34  ;;  %v3126_v40 = vmul.f32 %v14073_v0, %v2806_v23 }
 0x313   : > { %v3127_v32 = vmul.f32 %v14075_v57, %v2807_v54  ;;  %v3128_v43 = vmul.f32 %v14077_v29, %v2808_v51  ;;  %v2812_v63 = vmul.f32 %v14471_v35, %v17992_v62  ;;  %v2813_v53 = vmul.f32 %v14471_v35, %v17993_v59  ;;  %v17996_v54 = vld [vmem:[#allocation112_spill] sm:$0xff]  ;;  %v17997_v51 = vld [vmem:[#allocation113_spill] sm:$0xff] }
 0x314   : > { %v3129_v33 = vmul.f32 %v14079_v44, %v2809_v30  ;;  %v3130_v19 = vmul.f32 %v14081_v52, %v2810_v26  ;;  %v3131_v41 = vmul.f32 %v14083_v7, %v2811_v21  ;;  %v3446_v37 = vadd.f32 %v14085_v38, %v3126_v40  ;;  %v2447_v21 = vpop.xlane.xlu1 %2446 }
 0x315   : > { %v3447_v1 = vadd.f32 %v14093_v3, %v3127_v32  ;;  %v3448_v11 = vadd.f32 %v14095_v46, %v3128_v43  ;;  %v2814_v8 = vmul.f32 %v14471_v35, %v17994_v22  ;;  %v2815_v61 = vmul.f32 %v14471_v35, %v17995_v47  ;;  %v17999_v32 = vld [vmem:[#allocation102_spill] sm:$0xff]  ;;  %v18003_v22 = vld [vmem:[#allocation107_spill] sm:$0xff] }
 0x316   : > { %v3449_v10 = vadd.f32 %v14097_v2, %v3129_v33  ;;  %v3450_v55 = vadd.f32 %v14099_v17, %v3130_v19  ;;  %v3451_v9 = vadd.f32 %v14101_v16, %v3131_v41  ;;  %v3680_v28 = vpack.c.bf16 %v3446_v37, %v3440_v60  ;;  %v14633_v33 = vpop.xlane.xlu0 %2453  ;;  %v18000_v19 = vld [vmem:[#allocation103_spill] sm:$0xff]  ;;  %v18001_v37 = vld [vmem:[#allocation105_spill] sm:$0xff] }
 0x317   : > { %v3681_v49 = vpack.c.bf16 %v3447_v1, %v3441_v45  ;;  %v3682_v23 = vpack.c.bf16 %v3448_v11, %v3442_v24  ;;  %v2816_v42 = vmul.f32 %v14471_v35, %v17996_v54  ;;  %v2817_v25 = vmul.f32 %v14471_v35, %v17997_v51  ;;  %v18002_v11 = vld [vmem:[#allocation106_spill] sm:$0xff] }
 0x318   : > { %v3683_v58 = vpack.c.bf16 %v3449_v10, %v3443_v56  ;;  %v3684_v30 = vpack.c.bf16 %v3450_v55, %v3444_v15  ;;  %v3685_v27 = vpack.c.bf16 %v3451_v9, %v3445_v13  ;;  %3824 = vst [vmem:[#allocation2 + $0x180] sm:$0xff] %v3680_v28  ;;  %v3132_v26 = vmul.f32 %v14073_v0, %v2812_v63  ;;  %v17998_v13 = vld [vmem:[#allocation116_spill] sm:$0xff]  ;;  %v18004_v55 = vld [vmem:[#allocation110_spill] sm:$0xff] }
 0x319   : > { %3825 = vst [vmem:[#allocation2 + $0x188] sm:$0xff] %v3681_v49  ;;  %v3133_v34 = vmul.f32 %v14075_v57, %v2813_v53  ;;  %3826 = vst [vmem:[#allocation2 + $0x190] sm:$0xff] %v3682_v23  ;;  %v3134_v60 = vmul.f32 %v14077_v29, %v2814_v8  ;;  %v3135_v45 = vmul.f32 %v14079_v44, %v2815_v61  ;;  %v18005_v28 = vld [vmem:[#allocation120_spill] sm:$0xff]  ;;  %10116 = vrsqrt.f32 %v14433_v4  ;;  %v18018_v4 = vld [vmem:[#allocation133_spill] sm:$0xff] }
 0x31a   : > { %3827 = vst [vmem:[#allocation2 + $0x198] sm:$0xff] %v3683_v58  ;;  %v3136_v24 = vmul.f32 %v14081_v52, %v2816_v42  ;;  %v3137_v56 = vmul.f32 %v14083_v7, %v2817_v25  ;;  %3828 = vst [vmem:[#allocation2 + $0x1a0] sm:$0xff] %v3684_v30  ;;  %v3452_v35 = vadd.f32 %v14085_v38, %v3132_v26  ;;  %v18006_v25 = vld [vmem:[#allocation121_spill] sm:$0xff] }
 0x31b   : > { %3829 = vst [vmem:[#allocation2 + $0x1a8] sm:$0xff] %v3685_v27  ;;  %v3453_v15 = vadd.f32 %v14093_v3, %v3133_v34  ;;  %v2818_v40 = vmul.f32 %v14477_v39, %v17998_v13  ;;  %v2819_v43 = vmul.f32 %v14477_v39, %v17999_v32  ;;  %v3454_v62 = vadd.f32 %v14095_v46, %v3134_v60  ;;  %v18007_v27 = vld [vmem:[#allocation123_spill] sm:$0xff]  ;;  %v14663_v34 = vpop.xlane.xlu1 %2460  ;;  %v14669_v13 = vpop.xlane.xlu0 %2467 }
 0x31c   : > { %v3455_v63 = vadd.f32 %v14097_v2, %v3135_v45  ;;  %v3456_v59 = vadd.f32 %v14099_v17, %v3136_v24  ;;  %v3457_v53 = vadd.f32 %v14101_v16, %v3137_v56  ;;  %v2820_v41 = vmul.f32 %v14477_v39, %v18000_v19 }
 0x31d   : > { %v2821_v1 = vmul.f32 %v14477_v39, %v18001_v37  ;;  %v2822_v10 = vmul.f32 %v14477_v39, %v18002_v11  ;;  %v2823_v8 = vmul.f32 %v14477_v39, %v18003_v22  ;;  %v3138_v47 = vmul.f32 %v14073_v0, %v2818_v40 }
 0x31e   : > { %v3139_v61 = vmul.f32 %v14075_v57, %v2819_v43  ;;  %v2824_v9 = vmul.f32 %v14483_v50, %v18004_v55  ;;  %v2825_v49 = vmul.f32 %v14483_v50, %v18005_v28  ;;  %v3140_v23 = vmul.f32 %v14077_v29, %v2820_v41  ;;  %v18008_v43 = vld [vmem:[#allocation124_spill] sm:$0xff]  ;;  %v18009_v41 = vld [vmem:[#allocation125_spill] sm:$0xff] }
 0x31f   : > { %v3141_v58 = vmul.f32 %v14079_v44, %v2821_v1  ;;  %v3142_v54 = vmul.f32 %v14081_v52, %v2822_v10  ;;  %v3143_v42 = vmul.f32 %v14083_v7, %v2823_v8  ;;  %v3458_v39 = vadd.f32 %v14085_v38, %v3138_v47 }
 0x320   : > { %v3459_v51 = vadd.f32 %v14093_v3, %v3139_v61  ;;  %v2826_v30 = vmul.f32 %v14483_v50, %v18006_v25  ;;  %v2827_v26 = vmul.f32 %v14483_v50, %v18007_v27  ;;  %v3460_v60 = vadd.f32 %v14095_v46, %v3140_v23  ;;  %v2475_v23 = vpop.xlane.xlu1 %2474 }
 0x321   : > { %v3461_v45 = vadd.f32 %v14097_v2, %v3141_v58  ;;  %v3462_v24 = vadd.f32 %v14099_v17, %v3142_v54  ;;  %v3463_v56 = vadd.f32 %v14101_v16, %v3143_v42  ;;  %v3686_v40 = vpack.c.bf16 %v3458_v39, %v3452_v35  ;;  %v18012_v42 = vld [vmem:[#allocation115_spill] sm:$0xff] }
 0x322   : > { %v3687_v32 = vpack.c.bf16 %v3459_v51, %v3453_v15  ;;  %v2828_v19 = vmul.f32 %v14483_v50, %v18008_v43  ;;  %v2829_v37 = vmul.f32 %v14483_v50, %v18009_v41  ;;  %v3688_v1 = vpack.c.bf16 %v3460_v60, %v3454_v62  ;;  %v18010_v15 = vld [vmem:[#allocation128_spill] sm:$0xff]  ;;  %v18013_v51 = vld [vmem:[#allocation117_spill] sm:$0xff] }
 0x323   : > { %v3689_v11 = vpack.c.bf16 %v3461_v45, %v3455_v63  ;;  %v3690_v10 = vpack.c.bf16 %v3462_v24, %v3456_v59  ;;  %v3691_v22 = vpack.c.bf16 %v3463_v56, %v3457_v53  ;;  %3830 = vst [vmem:[#allocation2 + $0x1b0] sm:$0xff] %v3686_v40  ;;  %v3144_v8 = vmul.f32 %v14073_v0, %v2824_v9  ;;  %v18011_v63 = vld [vmem:[#allocation114_spill] sm:$0xff] }
 0x324   : > { %3831 = vst [vmem:[#allocation2 + $0x1b8] sm:$0xff] %v3687_v32  ;;  %v3145_v47 = vmul.f32 %v14075_v57, %v2825_v49  ;;  %v3146_v61 = vmul.f32 %v14077_v29, %v2826_v30  ;;  %v3147_v35 = vmul.f32 %v14079_v44, %v2827_v26  ;;  %3832 = vst [vmem:[#allocation2 + $0x1c0] sm:$0xff] %v3688_v1  ;;  %v2591_v53 = vmul.f32 0.0013020834, %v2447_v21  ;;  %v2482_v21 = vpop.xlane.xlu0 %2481  ;;  %v18014_v30 = vld [vmem:[#allocation118_spill] sm:$0xff]  ;;  %v18015_v26 = vld [vmem:[#allocation119_spill] sm:$0xff] }
 0x325   : > { %3833 = vst [vmem:[#allocation2 + $0x1c8] sm:$0xff] %v3689_v11  ;;  %3834 = vst [vmem:[#allocation2 + $0x1d0] sm:$0xff] %v3690_v10  ;;  %v3148_v50 = vmul.f32 %v14081_v52, %v2828_v19  ;;  %v2830_v62 = vmul.f32 %v14493_v31, %v18010_v15  ;;  %v2831_v59 = vmul.f32 %v14493_v31, %v18011_v63  ;;  %v2638_v49 = vadd.f32 1e-12, %v14441_v20 }
 0x326   : > { %3835 = vst [vmem:[#allocation2 + $0x1d8] sm:$0xff] %v3691_v22  ;;  %v3149_v55 = vmul.f32 %v14083_v7, %v2829_v37  ;;  %v3464_v9 = vadd.f32 %v14085_v38, %v3144_v8  ;;  %v3465_v28 = vadd.f32 %v14093_v3, %v3145_v47  ;;  %v3466_v58 = vadd.f32 %v14095_v46, %v3146_v61  ;;  %v2489_v8 = vpop.xlane.xlu1 %2488 }
 0x327   : > { %v3467_v54 = vadd.f32 %v14097_v2, %v3147_v35  ;;  %v2832_v39 = vmul.f32 %v14493_v31, %v18012_v42  ;;  %v2833_v25 = vmul.f32 %v14493_v31, %v18013_v51  ;;  %v2834_v27 = vmul.f32 %v14493_v31, %v18014_v30  ;;  %v18017_v42 = vld [vmem:[#allocation132_spill] sm:$0xff] }
 0x328   : > { %v2835_v60 = vmul.f32 %v14493_v31, %v18015_v26  ;;  %v3150_v20 = vmul.f32 %v14073_v0, %v2830_v62  ;;  %v3151_v45 = vmul.f32 %v14075_v57, %v2831_v59  ;;  %v3468_v24 = vadd.f32 %v14099_v17, %v3148_v50  ;;  %v2496_v50 = vpop.xlane.xlu0 %2495 }
 0x329   : > { %v3152_v56 = vmul.f32 %v14077_v29, %v2832_v39  ;;  %v3153_v40 = vmul.f32 %v14079_v44, %v2833_v25  ;;  %v3154_v32 = vmul.f32 %v14081_v52, %v2834_v27  ;;  %v3469_v41 = vadd.f32 %v14101_v16, %v3149_v55  ;;  %v18019_v25 = vld [vmem:[#allocation135_spill] sm:$0xff]  ;;  %v18020_v27 = vld [vmem:[#allocation136_spill] sm:$0xff] }
 0x32a   : > { %v3155_v43 = vmul.f32 %v14083_v7, %v2835_v60  ;;  %v3470_v19 = vadd.f32 %v14085_v38, %v3150_v20  ;;  %v3471_v31 = vadd.f32 %v14093_v3, %v3151_v45  ;;  %v2592_v35 = vmul.f32 0.0013020834, %v14633_v33  ;;  %v18021_v60 = vld [vmem:[#allocation137_spill] sm:$0xff] }
 0x32b   : > { %v3472_v37 = vadd.f32 %v14095_v46, %v3152_v56  ;;  %v3473_v1 = vadd.f32 %v14097_v2, %v3153_v40  ;;  %v3474_v11 = vadd.f32 %v14099_v17, %v3154_v32  ;;  %v2593_v6 = vmul.f32 0.0013020834, %v14663_v34 }
 0x32c   : > { %v3475_v14 = vadd.f32 %v14101_v16, %v3155_v43  ;;  %v3692_v10 = vpack.c.bf16 %v3470_v19, %v3464_v9  ;;  %v3693_v22 = vpack.c.bf16 %v3471_v31, %v3465_v28  ;;  %v2594_v63 = vmul.f32 0.0013020834, %v14669_v13  ;;  %v2503_v28 = vpop.xlane.xlu1 %2502  ;;  %v18022_v31 = vld [vmem:[#allocation140_spill] sm:$0xff] }
 0x32d   : > { %v3694_v47 = vpack.c.bf16 %v3472_v37, %v3466_v58  ;;  %v3695_v61 = vpack.c.bf16 %v3473_v1, %v3467_v54  ;;  %v3696_v15 = vpack.c.bf16 %v3474_v11, %v3468_v24  ;;  %v2595_v59 = vmul.f32 0.0013020834, %v2475_v23  ;;  %v10103_v23 = vpop.eup %10102  ;;  %v18023_v37 = vld [vmem:[#allocation126_spill] sm:$0xff] }
 0x32e   : > { %v3697_v62 = vpack.c.bf16 %v3475_v14, %v3469_v41  ;;  %3836 = vst [vmem:[#allocation2 + $0x1e0] sm:$0xff] %v3692_v10  ;;  %3837 = vst [vmem:[#allocation2 + $0x1e8] sm:$0xff] %v3693_v22  ;;  %v2596_v55 = vmul.f32 0.0013020834, %v2482_v21  ;;  %v2597_v5 = vmul.f32 0.0013020834, %v2489_v8  ;;  %10118 = vrsqrt.f32 %v2638_v49  ;;  %v10105_v30 = vpop.eup %10104 }
 0x32f   : > { %3838 = vst [vmem:[#allocation2 + $0x1f0] sm:$0xff] %v3694_v47  ;;  %3839 = vst [vmem:[#allocation2 + $0x1f8] sm:$0xff] %v3695_v61  ;;  %v2598_v33 = vmul.f32 0.0013020834, %v2496_v50  ;;  %v2639_v9 = vadd.f32 1e-12, %v2591_v53  ;;  %v2836_v53 = vmul.f32 %v10103_v23, %v18016_v48  ;;  %v2837_v39 = vmul.f32 %v10103_v23, %v18017_v42  ;;  %v10107_v32 = vpop.eup %10106 }
 0x330   : > { %3840 = vst [vmem:[#allocation2 + $0x200] sm:$0xff] %v3696_v15  ;;  %3841 = vst [vmem:[#allocation2 + $0x208] sm:$0xff] %v3697_v62  ;;  %v14722_v12 = vadd.f32 1e-12, %v2592_v35  ;;  %v14725_v34 = vadd.f32 1e-12, %v2593_v6  ;;  %v2838_v51 = vmul.f32 %v10103_v23, %v18018_v4  ;;  %v2839_v21 = vmul.f32 %v10103_v23, %v18019_v25  ;;  %v14753_v11 = vpop.eup %10108 }
 0x331   : > { %v14727_v36 = vadd.f32 1e-12, %v2594_v63  ;;  %v14729_v13 = vadd.f32 1e-12, %v2595_v59  ;;  %v14731_v58 = vadd.f32 1e-12, %v2596_v55  ;;  %v2840_v26 = vmul.f32 %v10103_v23, %v18020_v27  ;;  %v14759_v47 = vpop.eup %10110 }
 0x332   : > { %v14733_v18 = vadd.f32 1e-12, %v2597_v5  ;;  %v14735_v54 = vadd.f32 1e-12, %v2598_v33  ;;  %v2841_v20 = vmul.f32 %v10103_v23, %v18021_v60  ;;  %10120 = vrsqrt.f32 %v2639_v9  ;;  %v18024_v50 = vld [vmem:[#allocation127_spill] sm:$0xff]  ;;  %v18025_v62 = vld [vmem:[#allocation129_spill] sm:$0xff]  ;;  %v14765_v63 = vpop.eup %10112 }
 0x333   : > { %v14743_v49 = vmul.f32 0.0013020834, %v2503_v28  ;;  %v3156_v45 = vmul.f32 %v14073_v0, %v2836_v53  ;;  %v3157_v24 = vmul.f32 %v14075_v57, %v2837_v39  ;;  %v3158_v56 = vmul.f32 %v14077_v29, %v2838_v51  ;;  %v18026_v59 = vld [vmem:[#allocation130_spill] sm:$0xff]  ;;  %v18027_v5 = vld [vmem:[#allocation131_spill] sm:$0xff]  ;;  %v14771_v23 = vpop.eup %10114  ;;  %v18029_v4 = vld [vmem:[#allocation144_spill] sm:$0xff] }
 0x334   : > { %v3159_v40 = vmul.f32 %v14079_v44, %v2839_v21  ;;  %v3160_v43 = vmul.f32 %v14081_v52, %v2840_v26  ;;  %v3161_v19 = vmul.f32 %v14083_v7, %v2841_v20  ;;  %v2842_v41 = vmul.f32 %v10105_v30, %v18022_v31  ;;  %v18028_v42 = vld [vmem:[#allocation134_spill] sm:$0xff]  ;;  %v14777_v25 = vpop.eup %10116 }
 0x335   : > { %v2843_v1 = vmul.f32 %v10105_v30, %v18023_v37  ;;  %v3476_v14 = vadd.f32 %v14085_v38, %v3156_v45  ;;  %v3477_v10 = vadd.f32 %v14093_v3, %v3157_v24  ;;  %v3478_v22 = vadd.f32 %v14095_v46, %v3158_v56  ;;  %v18030_v24 = vld [vmem:[#allocation145_spill] sm:$0xff] }
 0x336   : > { %v3479_v8 = vadd.f32 %v14097_v2, %v3159_v40  ;;  %v3480_v61 = vadd.f32 %v14099_v17, %v3160_v43  ;;  %v3481_v35 = vadd.f32 %v14101_v16, %v3161_v19  ;;  %v2844_v15 = vmul.f32 %v10105_v30, %v18024_v50  ;;  %v18031_v40 = vld [vmem:[#allocation147_spill] sm:$0xff] }
 0x337   : > { %v2845_v6 = vmul.f32 %v10105_v30, %v18025_v62  ;;  %v2846_v55 = vmul.f32 %v10105_v30, %v18026_v59  ;;  %v2847_v33 = vmul.f32 %v10105_v30, %v18027_v5  ;;  %v3162_v9 = vmul.f32 %v14073_v0, %v2842_v41  ;;  %v18032_v62 = vld [vmem:[#allocation148_spill] sm:$0xff]  ;;  %v18033_v59 = vld [vmem:[#allocation149_spill] sm:$0xff] }
 0x338   : > { %v3163_v28 = vmul.f32 %v14075_v57, %v2843_v1  ;;  %v3164_v48 = vmul.f32 %v14077_v29, %v2844_v15  ;;  %v2848_v39 = vmul.f32 %v10107_v32, %v18028_v42  ;;  %v2849_v51 = vmul.f32 %v10107_v32, %v18029_v4  ;;  %v14783_v60 = vpop.eup %10118 }
 0x339   : > { %v3165_v53 = vmul.f32 %v14079_v44, %v2845_v6  ;;  %v3166_v21 = vmul.f32 %v14081_v52, %v2846_v55  ;;  %v3167_v30 = vmul.f32 %v14083_v7, %v2847_v33  ;;  %v3482_v27 = vadd.f32 %v14085_v38, %v3162_v9 }
 0x33a   : > { %v3483_v26 = vadd.f32 %v14093_v3, %v3163_v28  ;;  %v3484_v20 = vadd.f32 %v14095_v46, %v3164_v48  ;;  %v2850_v56 = vmul.f32 %v10107_v32, %v18030_v24  ;;  %v2851_v43 = vmul.f32 %v10107_v32, %v18031_v40 }
 0x33b   : > { %v3485_v45 = vadd.f32 %v14097_v2, %v3165_v53  ;;  %v3486_v19 = vadd.f32 %v14099_v17, %v3166_v21  ;;  %v3487_v31 = vadd.f32 %v14101_v16, %v3167_v30  ;;  %v3698_v41 = vpack.c.bf16 %v3482_v27, %v3476_v14  ;;  %v18035_v53 = vld [vmem:[#allocation138_spill] sm:$0xff]  ;;  %v18036_v30 = vld [vmem:[#allocation139_spill] sm:$0xff] }
 0x33c   : > { %v3699_v37 = vpack.c.bf16 %v3483_v26, %v3477_v10  ;;  %v14791_v1 = vpop.eup %10120  ;;  %v3700_v50 = vpack.c.bf16 %v3484_v20, %v3478_v22  ;;  %v2852_v6 = vmul.f32 %v10107_v32, %v18032_v62  ;;  %v2853_v55 = vmul.f32 %v10107_v32, %v18033_v59  ;;  %v18037_v26 = vld [vmem:[#allocation141_spill] sm:$0xff] }
 0x33d   : > { %v3701_v15 = vpack.c.bf16 %v3485_v45, %v3479_v8  ;;  %v3702_v5 = vpack.c.bf16 %v3486_v19, %v3480_v61  ;;  %v3703_v33 = vpack.c.bf16 %v3487_v31, %v3481_v35  ;;  %3842 = vst [vmem:[#allocation2 + $0x210] sm:$0xff] %v3698_v41  ;;  %v3168_v9 = vmul.f32 %v14073_v0, %v2848_v39  ;;  %v18034_v35 = vld [vmem:[#allocation152_spill] sm:$0xff]  ;;  %v18038_v45 = vld [vmem:[#allocation142_spill] sm:$0xff] }
 0x33e   : > { %3843 = vst [vmem:[#allocation2 + $0x218] sm:$0xff] %v3699_v37  ;;  %v3169_v28 = vmul.f32 %v14075_v57, %v2849_v51  ;;  %3844 = vst [vmem:[#allocation2 + $0x220] sm:$0xff] %v3700_v50  ;;  %v3170_v14 = vmul.f32 %v14077_v29, %v2850_v56  ;;  %v3171_v10 = vmul.f32 %v14079_v44, %v2851_v43  ;;  %v18039_v56 = vld [vmem:[#allocation143_spill] sm:$0xff]  ;;  %v18040_v31 = vld [vmem:[#allocation146_spill] sm:$0xff]  ;;  %10122 = vrsqrt.f32 %v14722_v12 }
 0x33f   : > { %3845 = vst [vmem:[#allocation2 + $0x228] sm:$0xff] %v3701_v15  ;;  %v3172_v22 = vmul.f32 %v14081_v52, %v2852_v6  ;;  %v3173_v8 = vmul.f32 %v14083_v7, %v2853_v55  ;;  %3846 = vst [vmem:[#allocation2 + $0x230] sm:$0xff] %v3702_v5  ;;  %v3488_v32 = vadd.f32 %v14085_v38, %v3168_v9  ;;  %v18041_v37 = vld [vmem:[#allocation156_spill] sm:$0xff]  ;;  %v18042_v5 = vld [vmem:[#allocation157_spill] sm:$0xff]  ;;  %10124 = vrsqrt.f32 %v14725_v34 }
 0x340   : > { %3847 = vst [vmem:[#allocation2 + $0x238] sm:$0xff] %v3703_v33  ;;  %v3489_v61 = vadd.f32 %v14093_v3, %v3169_v28  ;;  %v2854_v48 = vmul.f32 %v14753_v11, %v18034_v35  ;;  %v2855_v42 = vmul.f32 %v14753_v11, %v18035_v53  ;;  %v3490_v39 = vadd.f32 %v14095_v46, %v3170_v14  ;;  %v18043_v9 = vld [vmem:[#allocation159_spill] sm:$0xff]  ;;  %v18044_v53 = vld [vmem:[#allocation160_spill] sm:$0xff] }
 0x341   : > { %v3491_v4 = vadd.f32 %v14097_v2, %v3171_v10  ;;  %v3492_v51 = vadd.f32 %v14099_v17, %v3172_v22  ;;  %v3493_v21 = vadd.f32 %v14101_v16, %v3173_v8  ;;  %v2856_v27 = vmul.f32 %v14753_v11, %v18036_v30  ;;  %v18045_v30 = vld [vmem:[#allocation161_spill] sm:$0xff] }
 0x342   : > { %v2857_v20 = vmul.f32 %v14753_v11, %v18037_v26  ;;  %v2858_v24 = vmul.f32 %v14753_v11, %v18038_v45  ;;  %v2859_v40 = vmul.f32 %v14753_v11, %v18039_v56  ;;  %v3174_v43 = vmul.f32 %v14073_v0, %v2854_v48 }
 0x343   : > { %v3175_v19 = vmul.f32 %v14075_v57, %v2855_v42  ;;  %v2860_v41 = vmul.f32 %v14759_v47, %v18040_v31  ;;  %v2861_v50 = vmul.f32 %v14759_v47, %v18041_v37  ;;  %v3176_v15 = vmul.f32 %v14077_v29, %v2856_v27 }
 0x344   : > { %v3177_v62 = vmul.f32 %v14079_v44, %v2857_v20  ;;  %v3178_v6 = vmul.f32 %v14081_v52, %v2858_v24  ;;  %v3179_v59 = vmul.f32 %v14083_v7, %v2859_v40  ;;  %v3494_v11 = vadd.f32 %v14085_v38, %v3174_v43 }
 0x345   : > { %v3495_v55 = vadd.f32 %v14093_v3, %v3175_v19  ;;  %v2862_v33 = vmul.f32 %v14759_v47, %v18042_v5  ;;  %v2863_v28 = vmul.f32 %v14759_v47, %v18043_v9  ;;  %v3496_v14 = vadd.f32 %v14095_v46, %v3176_v15 }
 0x346   : > { %v3497_v10 = vadd.f32 %v14097_v2, %v3177_v62  ;;  %v3498_v22 = vadd.f32 %v14099_v17, %v3178_v6  ;;  %v3499_v8 = vadd.f32 %v14101_v16, %v3179_v59  ;;  %v3704_v35 = vpack.c.bf16 %v3494_v11, %v3488_v32  ;;  %v18048_v62 = vld [vmem:[#allocation151_spill] sm:$0xff]  ;;  %v18049_v59 = vld [vmem:[#allocation153_spill] sm:$0xff] }
 0x347   : > { %v3705_v48 = vpack.c.bf16 %v3495_v55, %v3489_v61  ;;  %v2864_v42 = vmul.f32 %v14759_v47, %v18044_v53  ;;  %v2865_v27 = vmul.f32 %v14759_v47, %v18045_v30  ;;  %v3706_v26 = vpack.c.bf16 %v3496_v14, %v3490_v39  ;;  %v18046_v39 = vld [vmem:[#allocation164_spill] sm:$0xff]  ;;  %v18050_v55 = vld [vmem:[#allocation154_spill] sm:$0xff] }
 0x348   : > { %v3707_v20 = vpack.c.bf16 %v3497_v10, %v3491_v4  ;;  %v3708_v45 = vpack.c.bf16 %v3498_v22, %v3492_v51  ;;  %v3709_v24 = vpack.c.bf16 %v3499_v8, %v3493_v21  ;;  %3848 = vst [vmem:[#allocation2 + $0x240] sm:$0xff] %v3704_v35  ;;  %v3180_v56 = vmul.f32 %v14073_v0, %v2860_v41  ;;  %v18047_v51 = vld [vmem:[#allocation150_spill] sm:$0xff] }
 0x349   : > { %3849 = vst [vmem:[#allocation2 + $0x248] sm:$0xff] %v3705_v48  ;;  %v3181_v40 = vmul.f32 %v14075_v57, %v2861_v50  ;;  %v3182_v43 = vmul.f32 %v14077_v29, %v2862_v33  ;;  %v3183_v32 = vmul.f32 %v14079_v44, %v2863_v28  ;;  %3850 = vst [vmem:[#allocation2 + $0x250] sm:$0xff] %v3706_v26  ;;  %v18051_v33 = vld [vmem:[#allocation155_spill] sm:$0xff]  ;;  %v18052_v8 = vld [vmem:[#allocation158_spill] sm:$0xff]  ;;  %10126 = vrsqrt.f32 %v14727_v36 }
 0x34a   : > { %3851 = vst [vmem:[#allocation2 + $0x258] sm:$0xff] %v3707_v20  ;;  %3852 = vst [vmem:[#allocation2 + $0x260] sm:$0xff] %v3708_v45  ;;  %v3184_v47 = vmul.f32 %v14081_v52, %v2864_v42  ;;  %v3185_v61 = vmul.f32 %v14083_v7, %v2865_v27  ;;  %v2866_v4 = vmul.f32 %v14765_v63, %v18046_v39  ;;  %v18053_v48 = vld [vmem:[#allocation168_spill] sm:$0xff]  ;;  %v18054_v45 = vld [vmem:[#allocation169_spill] sm:$0xff]  ;;  %10128 = vrsqrt.f32 %v14729_v13  ;;  %v10123_v13 = vpop.eup %10122 }
 0x34b   : > { %3853 = vst [vmem:[#allocation2 + $0x268] sm:$0xff] %v3709_v24  ;;  %v2867_v21 = vmul.f32 %v14765_v63, %v18047_v51  ;;  %v3500_v19 = vadd.f32 %v14085_v38, %v3180_v56  ;;  %v3501_v31 = vadd.f32 %v14093_v3, %v3181_v40  ;;  %v3502_v41 = vadd.f32 %v14095_v46, %v3182_v43  ;;  %v18055_v56 = vld [vmem:[#allocation171_spill] sm:$0xff]  ;;  %v18056_v51 = vld [vmem:[#allocation172_spill] sm:$0xff] }
 0x34c   : > { %v3503_v37 = vadd.f32 %v14097_v2, %v3183_v32  ;;  %v3504_v50 = vadd.f32 %v14099_v17, %v3184_v47  ;;  %v3505_v15 = vadd.f32 %v14101_v16, %v3185_v61  ;;  %v2868_v6 = vmul.f32 %v14765_v63, %v18048_v62  ;;  %v18057_v62 = vld [vmem:[#allocation173_spill] sm:$0xff] }
 0x34d   : > { %v2869_v11 = vmul.f32 %v14765_v63, %v18049_v59  ;;  %v2870_v5 = vmul.f32 %v14765_v63, %v18050_v55  ;;  %v2871_v9 = vmul.f32 %v14765_v63, %v18051_v33  ;;  %v3186_v28 = vmul.f32 %v14073_v0, %v2866_v4 }
 0x34e   : > { %v3187_v14 = vmul.f32 %v14075_v57, %v2867_v21  ;;  %v3188_v10 = vmul.f32 %v14077_v29, %v2868_v6  ;;  %v2872_v35 = vmul.f32 %v14771_v23, %v18052_v8  ;;  %v2873_v53 = vmul.f32 %v14771_v23, %v18053_v48 }
 0x34f   : > { %v3189_v22 = vmul.f32 %v14079_v44, %v2869_v11  ;;  %v3190_v42 = vmul.f32 %v14081_v52, %v2870_v5  ;;  %v3191_v30 = vmul.f32 %v14083_v7, %v2871_v9  ;;  %v3506_v63 = vadd.f32 %v14085_v38, %v3186_v28  ;;  %v18059_v9 = vld [vmem:[#allocation162_spill] sm:$0xff] }
 0x350   : > { %v3507_v27 = vadd.f32 %v14093_v3, %v3187_v14  ;;  %v3508_v26 = vadd.f32 %v14095_v46, %v3188_v10  ;;  %v2874_v24 = vmul.f32 %v14771_v23, %v18054_v45  ;;  %v2875_v40 = vmul.f32 %v14771_v23, %v18055_v56 }
 0x351   : > { %v3509_v20 = vadd.f32 %v14097_v2, %v3189_v22  ;;  %v3510_v43 = vadd.f32 %v14099_v17, %v3190_v42  ;;  %v3511_v32 = vadd.f32 %v14101_v16, %v3191_v30  ;;  %v3710_v47 = vpack.c.bf16 %v3506_v63, %v3500_v19  ;;  %v18062_v30 = vld [vmem:[#allocation166_spill] sm:$0xff] }
 0x352   : > { %v3711_v61 = vpack.c.bf16 %v3507_v27, %v3501_v31  ;;  %v3712_v39 = vpack.c.bf16 %v3508_v26, %v3502_v41  ;;  %v2876_v21 = vmul.f32 %v14771_v23, %v18056_v51  ;;  %v2877_v6 = vmul.f32 %v14771_v23, %v18057_v62  ;;  %v18063_v27 = vld [vmem:[#allocation167_spill] sm:$0xff]  ;;  %v18066_v51 = vld [vmem:[#allocation181_spill] sm:$0xff] }
 0x353   : > { %v3713_v4 = vpack.c.bf16 %v3509_v20, %v3503_v37  ;;  %v3714_v59 = vpack.c.bf16 %v3510_v43, %v3504_v50  ;;  %v3715_v11 = vpack.c.bf16 %v3511_v32, %v3505_v15  ;;  %3854 = vst [vmem:[#allocation2 + $0x270] sm:$0xff] %v3710_v47  ;;  %v3192_v55 = vmul.f32 %v14073_v0, %v2872_v35  ;;  %v18058_v15 = vld [vmem:[#allocation176_spill] sm:$0xff]  ;;  %v18060_v35 = vld [vmem:[#allocation163_spill] sm:$0xff] }
 0x354   : > { %3855 = vst [vmem:[#allocation2 + $0x278] sm:$0xff] %v3711_v61  ;;  %v3193_v5 = vmul.f32 %v14075_v57, %v2873_v53  ;;  %3856 = vst [vmem:[#allocation2 + $0x280] sm:$0xff] %v3712_v39  ;;  %v3194_v19 = vmul.f32 %v14077_v29, %v2874_v24  ;;  %v3195_v31 = vmul.f32 %v14079_v44, %v2875_v40  ;;  %v18061_v53 = vld [vmem:[#allocation165_spill] sm:$0xff]  ;;  %v18064_v24 = vld [vmem:[#allocation170_spill] sm:$0xff]  ;;  %v2647_v34 = vadd.f32 1e-12, %v14743_v49 }
 0x355   : > { %3857 = vst [vmem:[#allocation2 + $0x288] sm:$0xff] %v3713_v4  ;;  %v3196_v41 = vmul.f32 %v14081_v52, %v2876_v21  ;;  %v3197_v37 = vmul.f32 %v14083_v7, %v2877_v6  ;;  %3858 = vst [vmem:[#allocation2 + $0x290] sm:$0xff] %v3714_v59  ;;  %v3512_v23 = vadd.f32 %v14085_v38, %v3192_v55  ;;  %v18065_v40 = vld [vmem:[#allocation180_spill] sm:$0xff]  ;;  %v18067_v62 = vld [vmem:[#allocation183_spill] sm:$0xff]  ;;  %v2510_v59 = vpop.xlane.xlu0 %2509  ;;  %10130 = vrsqrt.f32 %v14731_v58 }
 0x356   : > { %3859 = vst [vmem:[#allocation2 + $0x298] sm:$0xff] %v3715_v11  ;;  %v3513_v50 = vadd.f32 %v14093_v3, %v3193_v5  ;;  %v2878_v33 = vmul.f32 %v14777_v25, %v18058_v15  ;;  %v2879_v28 = vmul.f32 %v14777_v25, %v18059_v9  ;;  %v3514_v14 = vadd.f32 %v14095_v46, %v3194_v19 }
 0x357   : > { %v3515_v10 = vadd.f32 %v14097_v2, %v3195_v31  ;;  %v3516_v22 = vadd.f32 %v14099_v17, %v3196_v41  ;;  %v3517_v8 = vadd.f32 %v14101_v16, %v3197_v37  ;;  %v2880_v48 = vmul.f32 %v14777_v25, %v18060_v35  ;;  %v18068_v37 = vld [vmem:[#allocation184_spill] sm:$0xff] }
 0x358   : > { %v2881_v42 = vmul.f32 %v14777_v25, %v18061_v53  ;;  %v2882_v63 = vmul.f32 %v14777_v25, %v18062_v30  ;;  %v2883_v26 = vmul.f32 %v14777_v25, %v18063_v27  ;;  %v3198_v20 = vmul.f32 %v14073_v0, %v2878_v33  ;;  %v18069_v33 = vld [vmem:[#allocation185_spill] sm:$0xff] }
 0x359   : > { %v3199_v45 = vmul.f32 %v14075_v57, %v2879_v28  ;;  %v2884_v56 = vmul.f32 %v14783_v60, %v18064_v24  ;;  %v2885_v43 = vmul.f32 %v14783_v60, %v18065_v40  ;;  %v3200_v32 = vmul.f32 %v14077_v29, %v2880_v48 }
 0x35a   : > { %v3201_v47 = vmul.f32 %v14079_v44, %v2881_v42  ;;  %v3202_v61 = vmul.f32 %v14081_v52, %v2882_v63  ;;  %v3203_v39 = vmul.f32 %v14083_v7, %v2883_v26  ;;  %v3518_v25 = vadd.f32 %v14085_v38, %v3198_v20  ;;  %v2517_v42 = vpop.xlane.xlu1 %2516 }
 0x35b   : > { %v3519_v4 = vadd.f32 %v14093_v3, %v3199_v45  ;;  %v2886_v21 = vmul.f32 %v14783_v60, %v18066_v51  ;;  %v2887_v6 = vmul.f32 %v14783_v60, %v18067_v62  ;;  %v3520_v11 = vadd.f32 %v14095_v46, %v3200_v32  ;;  %v18072_v32 = vld [vmem:[#allocation175_spill] sm:$0xff] }
 0x35c   : > { %v3521_v55 = vadd.f32 %v14097_v2, %v3201_v47  ;;  %v3522_v5 = vadd.f32 %v14099_v17, %v3202_v61  ;;  %v3523_v19 = vadd.f32 %v14101_v16, %v3203_v39  ;;  %v3716_v31 = vpack.c.bf16 %v3518_v25, %v3512_v23  ;;  %v18073_v61 = vld [vmem:[#allocation177_spill] sm:$0xff]  ;;  %v18074_v25 = vld [vmem:[#allocation178_spill] sm:$0xff]  ;;  %v18075_v51 = vld [vmem:[#allocation179_spill] sm:$0xff] }
 0x35d   : > { %v3717_v41 = vpack.c.bf16 %v3519_v4, %v3513_v50  ;;  %v2888_v15 = vmul.f32 %v14783_v60, %v18068_v37  ;;  %v2889_v9 = vmul.f32 %v14783_v60, %v18069_v33  ;;  %v3718_v28 = vpack.c.bf16 %v3520_v11, %v3514_v14  ;;  %v18070_v14 = vld [vmem:[#allocation188_spill] sm:$0xff] }
 0x35e   : > { %v3719_v35 = vpack.c.bf16 %v3521_v55, %v3515_v10  ;;  %v3720_v48 = vpack.c.bf16 %v3522_v5, %v3516_v22  ;;  %v3721_v53 = vpack.c.bf16 %v3523_v19, %v3517_v8  ;;  %3860 = vst [vmem:[#allocation2 + $0x2a0] sm:$0xff] %v3716_v31  ;;  %v3204_v30 = vmul.f32 %v14073_v0, %v2884_v56  ;;  %v18071_v22 = vld [vmem:[#allocation174_spill] sm:$0xff]  ;;  %v2524_v56 = vpop.xlane.xlu0 %2523 }
 0x35f   : > { %3861 = vst [vmem:[#allocation2 + $0x2a8] sm:$0xff] %v3717_v41  ;;  %v3205_v63 = vmul.f32 %v14075_v57, %v2885_v43  ;;  %v3206_v23 = vmul.f32 %v14077_v29, %v2886_v21  ;;  %v3207_v50 = vmul.f32 %v14079_v44, %v2887_v6  ;;  %3862 = vst [vmem:[#allocation2 + $0x2b0] sm:$0xff] %v3718_v28  ;;  %v2600_v27 = vmul.f32 0.0013020834, %v2510_v59  ;;  %v2531_v41 = vpop.xlane.xlu1 %2530 }
 0x360   : > { %3863 = vst [vmem:[#allocation2 + $0x2b8] sm:$0xff] %v3719_v35  ;;  %3864 = vst [vmem:[#allocation2 + $0x2c0] sm:$0xff] %v3720_v48  ;;  %v3208_v60 = vmul.f32 %v14081_v52, %v2888_v15  ;;  %v2890_v10 = vmul.f32 %v14791_v1, %v18070_v14  ;;  %v2891_v8 = vmul.f32 %v14791_v1, %v18071_v22  ;;  %v2601_v24 = vmul.f32 0.0013020834, %v2517_v42 }
 0x361   : > { %3865 = vst [vmem:[#allocation2 + $0x2c8] sm:$0xff] %v3721_v53  ;;  %v3209_v26 = vmul.f32 %v14083_v7, %v2889_v9  ;;  %v3524_v20 = vadd.f32 %v14085_v38, %v3204_v30  ;;  %v3525_v45 = vadd.f32 %v14093_v3, %v3205_v63  ;;  %v3526_v40 = vadd.f32 %v14095_v46, %v3206_v23 }
 0x362   : > { %v3527_v43 = vadd.f32 %v14097_v2, %v3207_v50  ;;  %v2892_v47 = vmul.f32 %v14791_v1, %v18072_v32  ;;  %v2893_v39 = vmul.f32 %v14791_v1, %v18073_v61  ;;  %v2894_v4 = vmul.f32 %v14791_v1, %v18074_v25  ;;  %v2538_v48 = vpop.xlane.xlu0 %2537  ;;  %v18081_v32 = vld [vmem:[#allocation197_spill] sm:$0xff] }
 0x363   : > { %v2895_v21 = vmul.f32 %v14791_v1, %v18075_v51  ;;  %v3210_v62 = vmul.f32 %v14073_v0, %v2890_v10  ;;  %v3211_v6 = vmul.f32 %v14075_v57, %v2891_v8  ;;  %v3528_v59 = vadd.f32 %v14099_v17, %v3208_v60  ;;  %v2545_v60 = vpop.xlane.xlu1 %2544  ;;  %v18076_v8 = vld [vmem:[#allocation182_spill] sm:$0xff] }
 0x364   : > { %v3212_v11 = vmul.f32 %v14077_v29, %v2892_v47  ;;  %v3213_v55 = vmul.f32 %v14079_v44, %v2893_v39  ;;  %v3214_v5 = vmul.f32 %v14081_v52, %v2894_v4  ;;  %v3529_v37 = vadd.f32 %v14101_v16, %v3209_v26  ;;  %v18077_v26 = vld [vmem:[#allocation192_spill] sm:$0xff] }
 0x365   : > { %v3215_v19 = vmul.f32 %v14083_v7, %v2895_v21  ;;  %v3530_v31 = vadd.f32 %v14085_v38, %v3210_v62  ;;  %v3531_v1 = vadd.f32 %v14093_v3, %v3211_v6  ;;  %v2602_v30 = vmul.f32 0.0013020834, %v2524_v56  ;;  %v10125_v56 = vpop.eup %10124 }
 0x366   : > { %v3532_v15 = vadd.f32 %v14095_v46, %v3212_v11  ;;  %v3533_v33 = vadd.f32 %v14097_v2, %v3213_v55  ;;  %v3534_v9 = vadd.f32 %v14099_v17, %v3214_v5  ;;  %v2648_v50 = vadd.f32 1e-12, %v2600_v27  ;;  %v2552_v10 = vpop.xlane.xlu0 %2551  ;;  %v10127_v21 = vpop.eup %10126  ;;  %v18083_v55 = vld [vmem:[#allocation186_spill] sm:$0xff] }
 0x367   : > { %v3535_v12 = vadd.f32 %v14101_v16, %v3215_v19  ;;  %v3722_v28 = vpack.c.bf16 %v3530_v31, %v3524_v20  ;;  %v3723_v35 = vpack.c.bf16 %v3531_v1, %v3525_v45  ;;  %10132 = vrsqrt.f32 %v14733_v18  ;;  %v18078_v20 = vld [vmem:[#allocation193_spill] sm:$0xff]  ;;  %v15007_v19 = vpop.eup %10128 }
 0x368   : > { %v3724_v53 = vpack.c.bf16 %v3532_v15, %v3526_v40  ;;  %v3725_v42 = vpack.c.bf16 %v3533_v33, %v3527_v43  ;;  %v3726_v63 = vpack.c.bf16 %v3534_v9, %v3528_v59  ;;  %10134 = vrsqrt.f32 %v14735_v54  ;;  %v18079_v54 = vld [vmem:[#allocation195_spill] sm:$0xff]  ;;  %v18080_v40 = vld [vmem:[#allocation196_spill] sm:$0xff]  ;;  %v15013_v15 = vpop.eup %10130 }
 0x369   : > { %v3727_v23 = vpack.c.bf16 %v3535_v12, %v3529_v37  ;;  %3866 = vst [vmem:[#allocation2 + $0x2d0] sm:$0xff] %v3722_v28  ;;  %3867 = vst [vmem:[#allocation2 + $0x2d8] sm:$0xff] %v3723_v35  ;;  %v2649_v36 = vadd.f32 1e-12, %v2601_v24  ;;  %10136 = vrsqrt.f32 %v2647_v34  ;;  %v14983_v14 = vadd.f32 1e-12, %v2602_v30 }
 0x36a   : > { %3868 = vst [vmem:[#allocation2 + $0x2e0] sm:$0xff] %v3724_v53  ;;  %3869 = vst [vmem:[#allocation2 + $0x2e8] sm:$0xff] %v3725_v42  ;;  %10138 = vrsqrt.f32 %v2648_v50  ;;  %v14985_v49 = vmul.f32 0.0013020834, %v2531_v41  ;;  %v14987_v22 = vmul.f32 0.0013020834, %v2538_v48  ;;  %v2896_v27 = vmul.f32 %v10123_v13, %v18076_v8 }
 0x36b   : > { %3870 = vst [vmem:[#allocation2 + $0x2f0] sm:$0xff] %v3726_v63  ;;  %3871 = vst [vmem:[#allocation2 + $0x2f8] sm:$0xff] %v3727_v23  ;;  %v14989_v58 = vmul.f32 0.0013020834, %v2545_v60  ;;  %v2897_v18 = vmul.f32 %v10123_v13, %v18077_v26  ;;  %v2898_v45 = vmul.f32 %v10123_v13, %v18078_v20  ;;  %v2899_v24 = vmul.f32 %v10123_v13, %v18079_v54  ;;  %v18082_v59 = vld [vmem:[#allocation200_spill] sm:$0xff]  ;;  %v18084_v12 = vld [vmem:[#allocation187_spill] sm:$0xff] }
 0x36c   : > { %v2900_v43 = vmul.f32 %v10123_v13, %v18080_v40  ;;  %v2901_v47 = vmul.f32 %v10123_v13, %v18081_v32  ;;  %10140 = vrsqrt.f32 %v2649_v36  ;;  %v14997_v61 = vmul.f32 0.0013020834, %v2552_v10  ;;  %v18085_v35 = vld [vmem:[#allocation189_spill] sm:$0xff]  ;;  %v18086_v42 = vld [vmem:[#allocation190_spill] sm:$0xff]  ;;  %v18087_v63 = vld [vmem:[#allocation191_spill] sm:$0xff] }
 0x36d   : > { %v3216_v39 = vmul.f32 %v14073_v0, %v2896_v27  ;;  %v3217_v25 = vmul.f32 %v14075_v57, %v2897_v18  ;;  %v3218_v4 = vmul.f32 %v14077_v29, %v2898_v45  ;;  %v3219_v51 = vmul.f32 %v14079_v44, %v2899_v24  ;;  %v18088_v13 = vld [vmem:[#allocation194_spill] sm:$0xff]  ;;  %v18089_v27 = vld [vmem:[#allocation204_spill] sm:$0xff]  ;;  %v18090_v32 = vld [vmem:[#allocation205_spill] sm:$0xff] }
 0x36e   : > { %v3220_v62 = vmul.f32 %v14081_v52, %v2900_v43  ;;  %v3221_v6 = vmul.f32 %v14083_v7, %v2901_v47  ;;  %v2902_v11 = vmul.f32 %v10125_v56, %v18082_v59  ;;  %v2903_v5 = vmul.f32 %v10125_v56, %v18083_v55 }
 0x36f   : > { %v3536_v31 = vadd.f32 %v14085_v38, %v3216_v39  ;;  %v3537_v1 = vadd.f32 %v14093_v3, %v3217_v25  ;;  %v3538_v41 = vadd.f32 %v14095_v46, %v3218_v4  ;;  %v3539_v37 = vadd.f32 %v14097_v2, %v3219_v51  ;;  %v18091_v39 = vld [vmem:[#allocation207_spill] sm:$0xff] }
 0x370   : > { %v3540_v33 = vadd.f32 %v14099_v17, %v3220_v62  ;;  %v3541_v9 = vadd.f32 %v14101_v16, %v3221_v6  ;;  %v2904_v28 = vmul.f32 %v10125_v56, %v18084_v12  ;;  %v2905_v48 = vmul.f32 %v10125_v56, %v18085_v35 }
 0x371   : > { %v15019_v53 = vpop.eup %10132  ;;  %v2906_v30 = vmul.f32 %v10125_v56, %v18086_v42  ;;  %v2907_v23 = vmul.f32 %v10125_v56, %v18087_v63  ;;  %v3222_v34 = vmul.f32 %v14073_v0, %v2902_v11  ;;  %v3223_v50 = vmul.f32 %v14075_v57, %v2903_v5  ;;  %v18092_v5 = vld [vmem:[#allocation208_spill] sm:$0xff] }
 0x372   : > { %v15025_v60 = vpop.eup %10134  ;;  %v3224_v36 = vmul.f32 %v14077_v29, %v2904_v28  ;;  %v3225_v10 = vmul.f32 %v14079_v44, %v2905_v48  ;;  %v2908_v8 = vmul.f32 %v10127_v21, %v18088_v13  ;;  %v2909_v26 = vmul.f32 %v10127_v21, %v18089_v27  ;;  %v18093_v28 = vld [vmem:[#allocation209_spill] sm:$0xff]  ;;  %v18096_v27 = vld [vmem:[#allocation199_spill] sm:$0xff] }
 0x373   : > { %v15031_v18 = vpop.eup %10136  ;;  %v3226_v20 = vmul.f32 %v14081_v52, %v2906_v30  ;;  %v3227_v45 = vmul.f32 %v14083_v7, %v2907_v23  ;;  %v3542_v54 = vadd.f32 %v14085_v38, %v3222_v34  ;;  %v3543_v24 = vadd.f32 %v14093_v3, %v3223_v50  ;;  %v18095_v34 = vld [vmem:[#allocation198_spill] sm:$0xff] }
 0x374   : > { %v15037_v56 = vpop.eup %10138  ;;  %v3544_v40 = vadd.f32 %v14095_v46, %v3224_v36  ;;  %v3545_v43 = vadd.f32 %v14097_v2, %v3225_v10  ;;  %v2910_v47 = vmul.f32 %v10127_v21, %v18090_v32  ;;  %v2911_v25 = vmul.f32 %v10127_v21, %v18091_v39  ;;  %v18100_v39 = vld [vmem:[#allocation206_spill] sm:$0xff] }
 0x375   : > { %v3546_v4 = vadd.f32 %v14099_v17, %v3226_v20  ;;  %v3547_v51 = vadd.f32 %v14101_v16, %v3227_v45  ;;  %v3728_v62 = vpack.c.bf16 %v3542_v54, %v3536_v31  ;;  %v3729_v6 = vpack.c.bf16 %v3543_v24, %v3537_v1  ;;  %v18097_v20 = vld [vmem:[#allocation201_spill] sm:$0xff]  ;;  %v18098_v54 = vld [vmem:[#allocation202_spill] sm:$0xff] }
 0x376   : > { %v15045_v59 = vpop.eup %10140  ;;  %v3730_v11 = vpack.c.bf16 %v3544_v40, %v3538_v41  ;;  %v3731_v55 = vpack.c.bf16 %v3545_v43, %v3539_v37  ;;  %v2912_v12 = vmul.f32 %v10127_v21, %v18092_v5  ;;  %v2913_v35 = vmul.f32 %v10127_v21, %v18093_v28  ;;  %v18099_v40 = vld [vmem:[#allocation203_spill] sm:$0xff] }
 0x377   : > { %v3732_v48 = vpack.c.bf16 %v3546_v4, %v3540_v33  ;;  %v3733_v42 = vpack.c.bf16 %v3547_v51, %v3541_v9  ;;  %3872 = vst [vmem:[#allocation2 + $0x300] sm:$0xff] %v3728_v62  ;;  %3873 = vst [vmem:[#allocation2 + $0x308] sm:$0xff] %v3729_v6  ;;  %v3228_v30 = vmul.f32 %v14073_v0, %v2908_v8  ;;  %v18094_v9 = vld [vmem:[#allocation212_spill] sm:$0xff]  ;;  %10142 = vrsqrt.f32 %v14983_v14 }
 0x378   : > { %v3229_v63 = vmul.f32 %v14075_v57, %v2909_v26  ;;  %3874 = vst [vmem:[#allocation2 + $0x310] sm:$0xff] %v3730_v11  ;;  %3875 = vst [vmem:[#allocation2 + $0x318] sm:$0xff] %v3731_v55  ;;  %v3230_v31 = vmul.f32 %v14077_v29, %v2910_v47  ;;  %v3231_v1 = vmul.f32 %v14079_v44, %v2911_v25  ;;  %v18101_v4 = vld [vmem:[#allocation216_spill] sm:$0xff] }
 0x379   : > { %v3232_v41 = vmul.f32 %v14081_v52, %v2912_v12  ;;  %v3233_v37 = vmul.f32 %v14083_v7, %v2913_v35  ;;  %3876 = vst [vmem:[#allocation2 + $0x320] sm:$0xff] %v3732_v48  ;;  %3877 = vst [vmem:[#allocation2 + $0x328] sm:$0xff] %v3733_v42  ;;  %v3548_v21 = vadd.f32 %v14085_v38, %v3228_v30  ;;  %v18102_v12 = vld [vmem:[#allocation217_spill] sm:$0xff]  ;;  %v18103_v35 = vld [vmem:[#allocation219_spill] sm:$0xff] }
 0x37a   : > { %v3549_v33 = vadd.f32 %v14093_v3, %v3229_v63  ;;  %v2914_v23 = vmul.f32 %v15007_v19, %v18094_v9  ;;  %v2915_v50 = vmul.f32 %v15007_v19, %v18095_v34  ;;  %v3550_v36 = vadd.f32 %v14095_v46, %v3230_v31 }
 0x37b   : > { %v3551_v10 = vadd.f32 %v14097_v2, %v3231_v1  ;;  %v3552_v13 = vadd.f32 %v14099_v17, %v3232_v41  ;;  %v3553_v8 = vadd.f32 %v14101_v16, %v3233_v37  ;;  %v2916_v26 = vmul.f32 %v15007_v19, %v18096_v27  ;;  %v18104_v37 = vld [vmem:[#allocation220_spill] sm:$0xff] }
 0x37c   : > { %v2917_v45 = vmul.f32 %v15007_v19, %v18097_v20  ;;  %v2918_v24 = vmul.f32 %v15007_v19, %v18098_v54  ;;  %v2919_v43 = vmul.f32 %v15007_v19, %v18099_v40  ;;  %v3234_v32 = vmul.f32 %v14073_v0, %v2914_v23  ;;  %v18105_v23 = vld [vmem:[#allocation221_spill] sm:$0xff] }
 0x37d   : > { %v3235_v47 = vmul.f32 %v14075_v57, %v2915_v50  ;;  %v2920_v25 = vmul.f32 %v15013_v15, %v18100_v39  ;;  %v2921_v51 = vmul.f32 %v15013_v15, %v18101_v4  ;;  %v3236_v62 = vmul.f32 %v14077_v29, %v2916_v26  ;;  %v18108_v4 = vld [vmem:[#allocation211_spill] sm:$0xff] }
 0x37e   : > { %v3237_v6 = vmul.f32 %v14079_v44, %v2917_v45  ;;  %v3238_v11 = vmul.f32 %v14081_v52, %v2918_v24  ;;  %v3239_v55 = vmul.f32 %v14083_v7, %v2919_v43  ;;  %v3554_v19 = vadd.f32 %v14085_v38, %v3234_v32 }
 0x37f   : > { %v3555_v5 = vadd.f32 %v14093_v3, %v3235_v47  ;;  %v2922_v28 = vmul.f32 %v15013_v15, %v18102_v12  ;;  %v2923_v48 = vmul.f32 %v15013_v15, %v18103_v35  ;;  %v3556_v42 = vadd.f32 %v14095_v46, %v3236_v62  ;;  %v18109_v62 = vld [vmem:[#allocation213_spill] sm:$0xff] }
 0x380   : > { %v3557_v30 = vadd.f32 %v14097_v2, %v3237_v6  ;;  %v3558_v63 = vadd.f32 %v14099_v17, %v3238_v11  ;;  %v3559_v31 = vadd.f32 %v14101_v16, %v3239_v55  ;;  %v3734_v1 = vpack.c.bf16 %v3554_v19, %v3548_v21  ;;  %v18110_v11 = vld [vmem:[#allocation214_spill] sm:$0xff]  ;;  %v18111_v19 = vld [vmem:[#allocation215_spill] sm:$0xff] }
 0x381   : > { %v3735_v41 = vpack.c.bf16 %v3555_v5, %v3549_v33  ;;  %v2924_v9 = vmul.f32 %v15013_v15, %v18104_v37  ;;  %v2925_v34 = vmul.f32 %v15013_v15, %v18105_v23  ;;  %v3736_v50 = vpack.c.bf16 %v3556_v42, %v3550_v36  ;;  %v18106_v36 = vld [vmem:[#allocation224_spill] sm:$0xff]  ;;  %v18112_v42 = vld [vmem:[#allocation218_spill] sm:$0xff] }
 0x382   : > { %v3737_v27 = vpack.c.bf16 %v3557_v30, %v3551_v10  ;;  %v3738_v26 = vpack.c.bf16 %v3558_v63, %v3552_v13  ;;  %v3739_v20 = vpack.c.bf16 %v3559_v31, %v3553_v8  ;;  %3878 = vst [vmem:[#allocation2 + $0x330] sm:$0xff] %v3734_v1  ;;  %v3240_v45 = vmul.f32 %v14073_v0, %v2920_v25  ;;  %v18107_v13 = vld [vmem:[#allocation210_spill] sm:$0xff]  ;;  %v18113_v63 = vld [vmem:[#allocation228_spill] sm:$0xff] }
 0x383   : > { %3879 = vst [vmem:[#allocation2 + $0x338] sm:$0xff] %v3735_v41  ;;  %v3241_v54 = vmul.f32 %v14075_v57, %v2921_v51  ;;  %v3242_v24 = vmul.f32 %v14077_v29, %v2922_v28  ;;  %v3243_v21 = vmul.f32 %v14079_v44, %v2923_v48  ;;  %3880 = vst [vmem:[#allocation2 + $0x340] sm:$0xff] %v3736_v50 }
 0x384   : > { %3881 = vst [vmem:[#allocation2 + $0x348] sm:$0xff] %v3737_v27  ;;  %3882 = vst [vmem:[#allocation2 + $0x350] sm:$0xff] %v3738_v26  ;;  %v3244_v15 = vmul.f32 %v14081_v52, %v2924_v9  ;;  %v3245_v33 = vmul.f32 %v14083_v7, %v2925_v34  ;;  %v2926_v10 = vmul.f32 %v15019_v53, %v18106_v36  ;;  %v18114_v34 = vld [vmem:[#allocation229_spill] sm:$0xff]  ;;  %v18115_v27 = vld [vmem:[#allocation231_spill] sm:$0xff] }
 0x385   : > { %3883 = vst [vmem:[#allocation2 + $0x358] sm:$0xff] %v3739_v20  ;;  %v2927_v8 = vmul.f32 %v15019_v53, %v18107_v13  ;;  %v3560_v40 = vadd.f32 %v14085_v38, %v3240_v45  ;;  %v3561_v43 = vadd.f32 %v14093_v3, %v3241_v54  ;;  %v3562_v32 = vadd.f32 %v14095_v46, %v3242_v24 }
 0x386   : > { %v3563_v47 = vadd.f32 %v14097_v2, %v3243_v21  ;;  %v3564_v39 = vadd.f32 %v14099_v17, %v3244_v15  ;;  %v3565_v25 = vadd.f32 %v14101_v16, %v3245_v33  ;;  %v2928_v51 = vmul.f32 %v15019_v53, %v18108_v4  ;;  %v18116_v33 = vld [vmem:[#allocation232_spill] sm:$0xff] }
 0x387   : > { %v2929_v6 = vmul.f32 %v15019_v53, %v18109_v62  ;;  %v2930_v55 = vmul.f32 %v15019_v53, %v18110_v11  ;;  %v2931_v5 = vmul.f32 %v15019_v53, %v18111_v19  ;;  %v3246_v12 = vmul.f32 %v14073_v0, %v2926_v10  ;;  %v18117_v10 = vld [vmem:[#allocation225_spill] sm:$0xff]  ;;  %v18119_v11 = vld [vmem:[#allocation222_spill] sm:$0xff] }
 0x388   : > { %v3247_v28 = vmul.f32 %v14075_v57, %v2927_v8  ;;  %v3248_v35 = vmul.f32 %v14077_v29, %v2928_v51  ;;  %v2932_v30 = vmul.f32 %v15025_v60, %v18112_v42  ;;  %v2933_v31 = vmul.f32 %v15025_v60, %v18113_v63  ;;  %v18121_v42 = vld [vmem:[#allocation234_spill] sm:$0xff] }
 0x389   : > { %v3249_v48 = vmul.f32 %v14079_v44, %v2929_v6  ;;  %v3250_v1 = vmul.f32 %v14081_v52, %v2930_v55  ;;  %v3251_v41 = vmul.f32 %v14083_v7, %v2931_v5  ;;  %v3566_v53 = vadd.f32 %v14085_v38, %v3246_v12  ;;  %v18122_v63 = vld [vmem:[#allocation226_spill] sm:$0xff] }
 0x38a   : > { %v3567_v37 = vadd.f32 %v14093_v3, %v3247_v28  ;;  %v3568_v9 = vadd.f32 %v14095_v46, %v3248_v35  ;;  %v2934_v50 = vmul.f32 %v15025_v60, %v18114_v34  ;;  %v2935_v26 = vmul.f32 %v15025_v60, %v18115_v27  ;;  %v18120_v35 = vld [vmem:[#allocation223_spill] sm:$0xff]  ;;  %v18125_v34 = vld [vmem:[#allocation246_spill] sm:$0xff] }
 0x38b   : > { %v3569_v23 = vadd.f32 %v14097_v2, %v3249_v48  ;;  %v3570_v20 = vadd.f32 %v14099_v17, %v3250_v1  ;;  %v3571_v45 = vadd.f32 %v14101_v16, %v3251_v41  ;;  %v3740_v54 = vpack.c.bf16 %v3566_v53, %v3560_v40  ;;  %v18123_v1 = vld [vmem:[#allocation227_spill] sm:$0xff] }
 0x38c   : > { %v3741_v24 = vpack.c.bf16 %v3567_v37, %v3561_v43  ;;  %v3742_v21 = vpack.c.bf16 %v3568_v9, %v3562_v32  ;;  %v2936_v36 = vmul.f32 %v15025_v60, %v18116_v33  ;;  %v2937_v13 = vmul.f32 %v15025_v60, %v18117_v10  ;;  %v18124_v9 = vld [vmem:[#allocation230_spill] sm:$0xff] }
 0x38d   : > { %v3743_v15 = vpack.c.bf16 %v3569_v23, %v3563_v47  ;;  %v3744_v8 = vpack.c.bf16 %v3570_v20, %v3564_v39  ;;  %v3745_v4 = vpack.c.bf16 %v3571_v45, %v3565_v25  ;;  %3884 = vst [vmem:[#allocation2 + $0x360] sm:$0xff] %v3740_v54  ;;  %v3252_v51 = vmul.f32 %v14073_v0, %v2932_v30  ;;  %v18118_v25 = vld [vmem:[#allocation233_spill] sm:$0xff] }
 0x38e   : > { %3885 = vst [vmem:[#allocation2 + $0x368] sm:$0xff] %v3741_v24  ;;  %v3253_v62 = vmul.f32 %v14075_v57, %v2933_v31  ;;  %3886 = vst [vmem:[#allocation2 + $0x370] sm:$0xff] %v3742_v21  ;;  %v3254_v40 = vmul.f32 %v14077_v29, %v2934_v50  ;;  %v3255_v43 = vmul.f32 %v14079_v44, %v2935_v26  ;;  %v18126_v24 = vld [vmem:[#allocation247_spill] sm:$0xff] }
 0x38f   : > { %3887 = vst [vmem:[#allocation2 + $0x378] sm:$0xff] %v3743_v15  ;;  %v3256_v32 = vmul.f32 %v14081_v52, %v2936_v36  ;;  %v3257_v47 = vmul.f32 %v14083_v7, %v2937_v13  ;;  %3888 = vst [vmem:[#allocation2 + $0x380] sm:$0xff] %v3744_v8  ;;  %v3572_v60 = vadd.f32 %v14085_v38, %v3252_v51  ;;  %v18127_v15 = vld [vmem:[#allocation248_spill] sm:$0xff] }
 0x390   : > { %3889 = vst [vmem:[#allocation2 + $0x388] sm:$0xff] %v3745_v4  ;;  %v3573_v39 = vadd.f32 %v14093_v3, %v3253_v62  ;;  %v2938_v6 = vmul.f32 %v15031_v18, %v18118_v25  ;;  %v2939_v55 = vmul.f32 %v15031_v18, %v18119_v11  ;;  %v3574_v19 = vadd.f32 %v14095_v46, %v3254_v40  ;;  %v18128_v62 = vld [vmem:[#allocation252_spill] sm:$0xff] }
 0x391   : > { %v3575_v5 = vadd.f32 %v14097_v2, %v3255_v43  ;;  %v3576_v12 = vadd.f32 %v14099_v17, %v3256_v32  ;;  %v3577_v28 = vadd.f32 %v14101_v16, %v3257_v47  ;;  %v2940_v48 = vmul.f32 %v15031_v18, %v18120_v35  ;;  %v18129_v43 = vld [vmem:[#allocation236_spill] sm:$0xff] }
 0x392   : > { %v2941_v30 = vmul.f32 %v15031_v18, %v18121_v42  ;;  %v2942_v31 = vmul.f32 %v15031_v18, %v18122_v63  ;;  %v2943_v41 = vmul.f32 %v15031_v18, %v18123_v1  ;;  %v3258_v53 = vmul.f32 %v14073_v0, %v2938_v6 }
 0x393   : > { %v3259_v37 = vmul.f32 %v14075_v57, %v2939_v55  ;;  %v2944_v23 = vmul.f32 %v15037_v56, %v18124_v9  ;;  %v2945_v50 = vmul.f32 %v15037_v56, %v18125_v34  ;;  %v3260_v27 = vmul.f32 %v14077_v29, %v2940_v48  ;;  %v18133_v9 = vld [vmem:[#allocation238_spill] sm:$0xff] }
 0x394   : > { %v3261_v26 = vmul.f32 %v14079_v44, %v2941_v30  ;;  %v3262_v20 = vmul.f32 %v14081_v52, %v2942_v31  ;;  %v3263_v45 = vmul.f32 %v14083_v7, %v2943_v41  ;;  %v3578_v18 = vadd.f32 %v14085_v38, %v3258_v53  ;;  %v18132_v53 = vld [vmem:[#allocation237_spill] sm:$0xff]  ;;  %v18134_v34 = vld [vmem:[#allocation242_spill] sm:$0xff] }
 0x395   : > { %v3579_v54 = vadd.f32 %v14093_v3, %v3259_v37  ;;  %v2946_v21 = vmul.f32 %v15037_v56, %v18126_v24  ;;  %v2947_v33 = vmul.f32 %v15037_v56, %v18127_v15  ;;  %v3580_v36 = vadd.f32 %v14095_v46, %v3260_v27  ;;  %v2559_v15 = vpop.xlane.xlu1 %2558 }
 0x396   : > { %v3581_v10 = vadd.f32 %v14097_v2, %v3261_v26  ;;  %v3582_v13 = vadd.f32 %v14099_v17, %v3262_v20  ;;  %v3583_v8 = vadd.f32 %v14101_v16, %v3263_v45  ;;  %v3746_v4 = vpack.c.bf16 %v3578_v18, %v3572_v60 }
 0x397   : > { %v3747_v51 = vpack.c.bf16 %v3579_v54, %v3573_v39  ;;  %v2948_v40 = vmul.f32 %v15037_v56, %v18128_v62  ;;  %v2949_v32 = vmul.f32 %v15037_v56, %v18129_v43  ;;  %v3748_v47 = vpack.c.bf16 %v3580_v36, %v3574_v19  ;;  %v18130_v39 = vld [vmem:[#allocation253_spill] sm:$0xff] }
 0x398   : > { %v3749_v25 = vpack.c.bf16 %v3581_v10, %v3575_v5  ;;  %v3750_v6 = vpack.c.bf16 %v3582_v13, %v3576_v12  ;;  %v3751_v11 = vpack.c.bf16 %v3583_v8, %v3577_v28  ;;  %3890 = vst [vmem:[#allocation2 + $0x390] sm:$0xff] %v3746_v4  ;;  %v3264_v55 = vmul.f32 %v14073_v0, %v2944_v23  ;;  %v18131_v5 = vld [vmem:[#allocation254_spill] sm:$0xff] }
 0x399   : > { %3891 = vst [vmem:[#allocation2 + $0x398] sm:$0xff] %v3747_v51  ;;  %v3265_v35 = vmul.f32 %v14075_v57, %v2945_v50  ;;  %v3266_v48 = vmul.f32 %v14077_v29, %v2946_v21  ;;  %v3267_v60 = vmul.f32 %v14079_v44, %v2947_v33  ;;  %3892 = vst [vmem:[#allocation2 + $0x3a0] sm:$0xff] %v3748_v47  ;;  %v2651_v28 = vadd.f32 1e-12, %v14985_v49  ;;  %v18135_v50 = vld [vmem:[#allocation243_spill] sm:$0xff] }
 0x39a   : > { %3893 = vst [vmem:[#allocation2 + $0x3a8] sm:$0xff] %v3749_v25  ;;  %3894 = vst [vmem:[#allocation2 + $0x3b0] sm:$0xff] %v3750_v6  ;;  %v3268_v56 = vmul.f32 %v14081_v52, %v2948_v40  ;;  %v2950_v19 = vmul.f32 %v15045_v59, %v18130_v39  ;;  %v2951_v12 = vmul.f32 %v15045_v59, %v18131_v5  ;;  %v2652_v31 = vadd.f32 1e-12, %v14987_v22 }
 0x39b   : > { %3895 = vst [vmem:[#allocation2 + $0x3b8] sm:$0xff] %v3751_v11  ;;  %v3269_v42 = vmul.f32 %v14083_v7, %v2949_v32  ;;  %v3584_v30 = vadd.f32 %v14085_v38, %v3264_v55  ;;  %v3585_v63 = vadd.f32 %v14093_v3, %v3265_v35  ;;  %v3586_v1 = vadd.f32 %v14095_v46, %v3266_v48  ;;  %v10143_v11 = vpop.eup %10142  ;;  %v18136_v55 = vld [vmem:[#allocation244_spill] sm:$0xff] }
 0x39c   : > { %v3587_v41 = vadd.f32 %v14097_v2, %v3267_v60  ;;  %v2952_v37 = vmul.f32 %v15045_v59, %v18132_v53  ;;  %v2953_v23 = vmul.f32 %v15045_v59, %v18133_v9  ;;  %v2954_v49 = vmul.f32 %v15045_v59, %v18134_v34  ;;  %v18137_v48 = vld [vmem:[#allocation264_spill] sm:$0xff] }
 0x39d   : > { %v2955_v27 = vmul.f32 %v15045_v59, %v18135_v50  ;;  %v3270_v26 = vmul.f32 %v14073_v0, %v2950_v19  ;;  %v3271_v22 = vmul.f32 %v14075_v57, %v2951_v12  ;;  %v3588_v20 = vadd.f32 %v14099_v17, %v3268_v56  ;;  %v18138_v56 = vld [vmem:[#allocation265_spill] sm:$0xff]  ;;  %v18139_v19 = vld [vmem:[#allocation266_spill] sm:$0xff] }
 0x39e   : > { %v3272_v45 = vmul.f32 %v14077_v29, %v2952_v37  ;;  %v3273_v18 = vmul.f32 %v14079_v44, %v2953_v23  ;;  %v3274_v54 = vmul.f32 %v14081_v52, %v2954_v49  ;;  %v3589_v33 = vadd.f32 %v14101_v16, %v3269_v42  ;;  %v18141_v42 = vld [vmem:[#allocation268_spill] sm:$0xff]  ;;  %v18143_v23 = vld [vmem:[#allocation257_spill] sm:$0xff] }
 0x39f   : > { %v3275_v24 = vmul.f32 %v14083_v7, %v2955_v27  ;;  %v3590_v21 = vadd.f32 %v14085_v38, %v3270_v26  ;;  %v3591_v59 = vadd.f32 %v14093_v3, %v3271_v22  ;;  %10144 = vrsqrt.f32 %v2651_v28  ;;  %v18142_v37 = vld [vmem:[#allocation256_spill] sm:$0xff] }
 0x3a0   : > { %v3592_v36 = vadd.f32 %v14095_v46, %v3272_v45  ;;  %v3593_v10 = vadd.f32 %v14097_v2, %v3273_v18  ;;  %v3594_v13 = vadd.f32 %v14099_v17, %v3274_v54  ;;  %v2607_v40 = vmul.f32 0.0013020834, %v2559_v15  ;;  %v18144_v18 = vld [vmem:[#allocation258_spill] sm:$0xff] }
 0x3a1   : > { %v3595_v14 = vadd.f32 %v14101_v16, %v3275_v24  ;;  %v3752_v8 = vpack.c.bf16 %v3590_v21, %v3584_v30  ;;  %v3753_v4 = vpack.c.bf16 %v3591_v59, %v3585_v63  ;;  %10146 = vrsqrt.f32 %v2652_v31  ;;  %v18145_v24 = vld [vmem:[#allocation260_spill] sm:$0xff]  ;;  %v18146_v59 = vld [vmem:[#allocation261_spill] sm:$0xff] }
 0x3a2   : > { %v3754_v51 = vpack.c.bf16 %v3592_v36, %v3586_v1  ;;  %v3755_v62 = vpack.c.bf16 %v3593_v10, %v3587_v41  ;;  %v3756_v43 = vpack.c.bf16 %v3594_v13, %v3588_v20  ;;  %v2653_v47 = vadd.f32 1e-12, %v14989_v58  ;;  %v18140_v58 = vld [vmem:[#allocation267_spill] sm:$0xff] }
 0x3a3   : > { %v3757_v32 = vpack.c.bf16 %v3595_v14, %v3589_v33  ;;  %3896 = vst [vmem:[#allocation2 + $0x3c0] sm:$0xff] %v3752_v8  ;;  %3897 = vst [vmem:[#allocation2 + $0x3c8] sm:$0xff] %v3753_v4  ;;  %v2654_v25 = vadd.f32 1e-12, %v14997_v61  ;;  %v2655_v6 = vadd.f32 1e-12, %v2607_v40  ;;  %v2956_v35 = vmul.f32 %v10143_v11, %v18136_v55 }
 0x3a4   : > { %3898 = vst [vmem:[#allocation2 + $0x3d0] sm:$0xff] %v3754_v51  ;;  %3899 = vst [vmem:[#allocation2 + $0x3d8] sm:$0xff] %v3755_v62  ;;  %10148 = vrsqrt.f32 %v2653_v47  ;;  %v2957_v60 = vmul.f32 %v10143_v11, %v18137_v48  ;;  %v2958_v39 = vmul.f32 %v10143_v11, %v18138_v56  ;;  %v2959_v5 = vmul.f32 %v10143_v11, %v18139_v19  ;;  %v18147_v33 = vld [vmem:[#allocation262_spill] sm:$0xff]  ;;  %v18148_v4 = vld [vmem:[#allocation276_spill] sm:$0xff] }
 0x3a5   : > { %3900 = vst [vmem:[#allocation2 + $0x3e0] sm:$0xff] %v3756_v43  ;;  %3901 = vst [vmem:[#allocation2 + $0x3e8] sm:$0xff] %v3757_v32  ;;  %10150 = vrsqrt.f32 %v2654_v25  ;;  %v2960_v28 = vmul.f32 %v10143_v11, %v18140_v58  ;;  %v2961_v30 = vmul.f32 %v10143_v11, %v18141_v42  ;;  %v3276_v61 = vmul.f32 %v14073_v0, %v2956_v35  ;;  %v18149_v62 = vld [vmem:[#allocation277_spill] sm:$0xff]  ;;  %v18150_v48 = vld [vmem:[#allocation282_spill] sm:$0xff] }
 0x3a6   : > { %10152 = vrsqrt.f32 %v2655_v6  ;;  %v3277_v63 = vmul.f32 %v14075_v57, %v2957_v60  ;;  %v3278_v31 = vmul.f32 %v14077_v29, %v2958_v39  ;;  %v3279_v1 = vmul.f32 %v14079_v44, %v2959_v5  ;;  %v18151_v56 = vld [vmem:[#allocation283_spill] sm:$0xff] }
 0x3a7   : > { %v3280_v41 = vmul.f32 %v14081_v52, %v2960_v28  ;;  %v3281_v53 = vmul.f32 %v14083_v7, %v2961_v30  ;;  %v3596_v50 = vadd.f32 %v14085_v38, %v3276_v61  ;;  %v18152_v61 = vld [vmem:[#allocation284_spill] sm:$0xff] }
 0x3a8   : > { %v3597_v27 = vadd.f32 %v14093_v3, %v3277_v63  ;;  %v3598_v26 = vadd.f32 %v14095_v46, %v3278_v31  ;;  %v3599_v22 = vadd.f32 %v14097_v2, %v3279_v1  ;;  %v18153_v31 = vld [vmem:[#allocation285_spill] sm:$0xff] }
 0x3a9   : > { %v10145_v12 = vpop.eup %10144  ;;  %v3600_v20 = vadd.f32 %v14099_v17, %v3280_v41  ;;  %v3601_v45 = vadd.f32 %v14101_v16, %v3281_v53 }
 0x3aa   : > { %v2962_v9 = vmul.f32 %v10145_v12, %v18142_v37  ;;  %v2963_v34 = vmul.f32 %v10145_v12, %v18143_v23  ;;  %v2964_v54 = vmul.f32 %v10145_v12, %v18144_v18  ;;  %v2965_v21 = vmul.f32 %v10145_v12, %v18145_v24 }
 0x3ab   : > { %v10147_v49 = vpop.eup %10146  ;;  %v2966_v15 = vmul.f32 %v10145_v12, %v18146_v59  ;;  %v2967_v36 = vmul.f32 %v10145_v12, %v18147_v33 }
 0x3ac   : > { %v3282_v10 = vmul.f32 %v14073_v0, %v2962_v9  ;;  %v3283_v13 = vmul.f32 %v14075_v57, %v2963_v34  ;;  %v3284_v14 = vmul.f32 %v14077_v29, %v2964_v54  ;;  %v3285_v8 = vmul.f32 %v14079_v44, %v2965_v21 }
 0x3ad   : > { %v2968_v51 = vmul.f32 %v10147_v49, %v18148_v4  ;;  %v2969_v40 = vmul.f32 %v10147_v49, %v18149_v62  ;;  %v3286_v32 = vmul.f32 %v14081_v52, %v2966_v15  ;;  %v3287_v47 = vmul.f32 %v14083_v7, %v2967_v36  ;;  %v18156_v15 = vld [vmem:[#allocation271_spill] sm:$0xff]  ;;  %v18157_v36 = vld [vmem:[#allocation274_spill] sm:$0xff] }
 0x3ae   : > { %v10149_v43 = vpop.eup %10148  ;;  %v3602_v25 = vadd.f32 %v14085_v38, %v3282_v10  ;;  %v3603_v6 = vadd.f32 %v14093_v3, %v3283_v13  ;;  %v3604_v55 = vadd.f32 %v14095_v46, %v3284_v14  ;;  %v3605_v35 = vadd.f32 %v14097_v2, %v3285_v8  ;;  %v18158_v13 = vld [vmem:[#allocation286_spill] sm:$0xff]  ;;  %v18159_v8 = vld [vmem:[#allocation275_spill] sm:$0xff] }
 0x3af   : > { %v10151_v11 = vpop.eup %10150  ;;  %v2970_v60 = vmul.f32 %v10147_v49, %v18150_v48  ;;  %v2971_v39 = vmul.f32 %v10147_v49, %v18151_v56  ;;  %v3606_v19 = vadd.f32 %v14099_v17, %v3286_v32  ;;  %v3607_v5 = vadd.f32 %v14101_v16, %v3287_v47  ;;  %v18161_v47 = vld [vmem:[#allocation288_spill] sm:$0xff]  ;;  %v18162_v56 = vld [vmem:[#allocation289_spill] sm:$0xff] }
 0x3b0   : > { %v3758_v12 = vpack.c.bf16 %v3602_v25, %v3596_v50  ;;  %v3759_v58 = vpack.c.bf16 %v3603_v6, %v3597_v27  ;;  %v15274_v28 = vpop.eup %10152  ;;  %v3760_v42 = vpack.c.bf16 %v3604_v55, %v3598_v26  ;;  %v3761_v30 = vpack.c.bf16 %v3605_v35, %v3599_v22  ;;  %v18154_v22 = vld [vmem:[#allocation269_spill] sm:$0xff] }
 0x3b1   : > { %v2972_v63 = vmul.f32 %v10147_v49, %v18152_v61  ;;  %v2973_v1 = vmul.f32 %v10147_v49, %v18153_v31  ;;  %v3762_v41 = vpack.c.bf16 %v3606_v19, %v3600_v20  ;;  %v3763_v53 = vpack.c.bf16 %v3607_v5, %v3601_v45  ;;  %v18155_v45 = vld [vmem:[#allocation270_spill] sm:$0xff]  ;;  %v18164_v31 = vld [vmem:[#allocation291_spill] sm:$0xff] }
 0x3b2   : > { %3902 = vst [vmem:[#allocation2 + $0x3f0] sm:$0xff] %v3758_v12  ;;  %3903 = vst [vmem:[#allocation2 + $0x3f8] sm:$0xff] %v3759_v58  ;;  %v3288_v37 = vmul.f32 %v14073_v0, %v2968_v51  ;;  %v3289_v9 = vmul.f32 %v14075_v57, %v2969_v40  ;;  %v3290_v23 = vmul.f32 %v14077_v29, %v2970_v60  ;;  %v18160_v40 = vld [vmem:[#allocation287_spill] sm:$0xff]  ;;  %v18163_v19 = vld [vmem:[#allocation290_spill] sm:$0xff] }
 0x3b3   : > { %3904 = vst [vmem:[#allocation2 + $0x400] sm:$0xff] %v3760_v42  ;;  %3905 = vst [vmem:[#allocation2 + $0x408] sm:$0xff] %v3761_v30  ;;  %v3291_v34 = vmul.f32 %v14079_v44, %v2971_v39  ;;  %v3292_v50 = vmul.f32 %v14081_v52, %v2972_v63  ;;  %v3293_v27 = vmul.f32 %v14083_v7, %v2973_v1 }
 0x3b4   : > { %3906 = vst [vmem:[#allocation2 + $0x410] sm:$0xff] %v3762_v41  ;;  %3907 = vst [vmem:[#allocation2 + $0x418] sm:$0xff] %v3763_v53  ;;  %v3608_v49 = vadd.f32 %v14085_v38, %v3288_v37  ;;  %v3609_v26 = vadd.f32 %v14093_v3, %v3289_v9  ;;  %v2974_v20 = vmul.f32 %v10149_v43, %v18154_v22  ;;  %v18165_v41 = vld [vmem:[#allocation293_spill] sm:$0xff]  ;;  %v18166_v22 = vld [vmem:[#allocation278_spill] sm:$0xff] }
 0x3b5   : > { %v2975_v18 = vmul.f32 %v10149_v43, %v18155_v45  ;;  %v3610_v54 = vadd.f32 %v14095_v46, %v3290_v23  ;;  %v3611_v24 = vadd.f32 %v14097_v2, %v3291_v34  ;;  %v3612_v21 = vadd.f32 %v14099_v17, %v3292_v50 }
 0x3b6   : > { %v3613_v59 = vadd.f32 %v14101_v16, %v3293_v27  ;;  %v2976_v33 = vmul.f32 %v10149_v43, %v18156_v15  ;;  %v2977_v10 = vmul.f32 %v10149_v43, %v18157_v36  ;;  %v2978_v14 = vmul.f32 %v10149_v43, %v18158_v13 }
 0x3b7   : > { %v2979_v4 = vmul.f32 %v10149_v43, %v18159_v8  ;;  %v3294_v51 = vmul.f32 %v14073_v0, %v2974_v20  ;;  %v3295_v62 = vmul.f32 %v14075_v57, %v2975_v18  ;;  %v2980_v32 = vmul.f32 %v10151_v11, %v18160_v40  ;;  %v18167_v20 = vld [vmem:[#allocation279_spill] sm:$0xff] }
 0x3b8   : > { %v2981_v25 = vmul.f32 %v10151_v11, %v18161_v47  ;;  %v3296_v6 = vmul.f32 %v14077_v29, %v2976_v33  ;;  %v3297_v55 = vmul.f32 %v14079_v44, %v2977_v10  ;;  %v3298_v35 = vmul.f32 %v14081_v52, %v2978_v14  ;;  %v18169_v33 = vld [vmem:[#allocation294_spill] sm:$0xff]  ;;  %v18170_v10 = vld [vmem:[#allocation295_spill] sm:$0xff]  ;;  %v18171_v14 = vld [vmem:[#allocation296_spill] sm:$0xff] }
 0x3b9   : > { %v3299_v48 = vmul.f32 %v14083_v7, %v2979_v4  ;;  %v3614_v60 = vadd.f32 %v14085_v38, %v3294_v51  ;;  %v3615_v43 = vadd.f32 %v14093_v3, %v3295_v62  ;;  %v2982_v39 = vmul.f32 %v10151_v11, %v18162_v56 }
 0x3ba   : > { %v2983_v5 = vmul.f32 %v10151_v11, %v18163_v19  ;;  %v3616_v12 = vadd.f32 %v14095_v46, %v3296_v6  ;;  %v3617_v58 = vadd.f32 %v14097_v2, %v3297_v55  ;;  %v3618_v42 = vadd.f32 %v14099_v17, %v3298_v35 }
 0x3bb   : > { %v3619_v30 = vadd.f32 %v14101_v16, %v3299_v48  ;;  %v3764_v61 = vpack.c.bf16 %v3614_v60, %v3608_v49  ;;  %v3765_v63 = vpack.c.bf16 %v3615_v43, %v3609_v26  ;;  %v2984_v1 = vmul.f32 %v10151_v11, %v18164_v31 }
 0x3bc   : > { %v2985_v53 = vmul.f32 %v10151_v11, %v18165_v41  ;;  %v3766_v37 = vpack.c.bf16 %v3616_v12, %v3610_v54  ;;  %v3767_v9 = vpack.c.bf16 %v3617_v58, %v3611_v24  ;;  %v3768_v23 = vpack.c.bf16 %v3618_v42, %v3612_v21 }
 0x3bd   : > { %v3769_v34 = vpack.c.bf16 %v3619_v30, %v3613_v59  ;;  %3908 = vst [vmem:[#allocation2 + $0x420] sm:$0xff] %v3764_v61  ;;  %3909 = vst [vmem:[#allocation2 + $0x428] sm:$0xff] %v3765_v63  ;;  %v3300_v50 = vmul.f32 %v14073_v0, %v2980_v32  ;;  %v3301_v27 = vmul.f32 %v14075_v57, %v2981_v25  ;;  %v18168_v59 = vld [vmem:[#allocation292_spill] sm:$0xff] }
 0x3be   : > { %3910 = vst [vmem:[#allocation2 + $0x430] sm:$0xff] %v3766_v37  ;;  %3911 = vst [vmem:[#allocation2 + $0x438] sm:$0xff] %v3767_v9  ;;  %v3302_v49 = vmul.f32 %v14077_v29, %v2982_v39  ;;  %v3303_v26 = vmul.f32 %v14079_v44, %v2983_v5  ;;  %v2986_v11 = vmul.f32 %v15274_v28, %v18166_v22 }
 0x3bf   : > { %3912 = vst [vmem:[#allocation2 + $0x440] sm:$0xff] %v3768_v23  ;;  %3913 = vst [vmem:[#allocation2 + $0x448] sm:$0xff] %v3769_v34  ;;  %v2987_v45 = vmul.f32 %v15274_v28, %v18167_v20  ;;  %v3304_v18 = vmul.f32 %v14081_v52, %v2984_v1  ;;  %v3305_v54 = vmul.f32 %v14083_v7, %v2985_v53 }
 0x3c0   : > { %v3620_v24 = vadd.f32 %v14085_v38, %v3300_v50  ;;  %v3621_v21 = vadd.f32 %v14093_v3, %v3301_v27  ;;  %v2988_v15 = vmul.f32 %v15274_v28, %v18168_v59  ;;  %v2989_v36 = vmul.f32 %v15274_v28, %v18169_v33 }
 0x3c1   : > { %v2990_v13 = vmul.f32 %v15274_v28, %v18170_v10  ;;  %v2991_v8 = vmul.f32 %v15274_v28, %v18171_v14  ;;  %v3306_v4 = vmul.f32 %v14073_v0, %v2986_v11  ;;  %v3307_v51 = vmul.f32 %v14075_v57, %v2987_v45 }
 0x3c2   : > { %v3622_v62 = vadd.f32 %v14095_v46, %v3302_v49  ;;  %v3623_v40 = vadd.f32 %v14097_v2, %v3303_v26  ;;  %v3308_v32 = vmul.f32 %v14077_v29, %v2988_v15  ;;  %v3309_v47 = vmul.f32 %v14079_v44, %v2989_v36 }
 0x3c3   : > { %v3310_v25 = vmul.f32 %v14081_v52, %v2990_v13  ;;  %v3311_v6 = vmul.f32 %v14083_v7, %v2991_v8  ;;  %v3626_v55 = vadd.f32 %v14085_v38, %v3306_v4  ;;  %v3627_v28 = vadd.f32 %v14093_v3, %v3307_v51 }
 0x3c4   : > { %v3624_v0 = vadd.f32 %v14099_v17, %v3304_v18  ;;  %v3625_v57 = vadd.f32 %v14101_v16, %v3305_v54  ;;  %v3628_v35 = vadd.f32 %v14095_v46, %v3308_v32  ;;  %v3629_v48 = vadd.f32 %v14097_v2, %v3309_v47 }
 0x3c5   : > { %v3630_v29 = vadd.f32 %v14099_v17, %v3310_v25  ;;  %v3631_v44 = vadd.f32 %v14101_v16, %v3311_v6  ;;  %v3770_v60 = vpack.c.bf16 %v3626_v55, %v3620_v24  ;;  %v3771_v52 = vpack.c.bf16 %v3627_v28, %v3621_v21 }
 0x3c6   : > { %v3772_v43 = vpack.c.bf16 %v3628_v35, %v3622_v62  ;;  %v3773_v7 = vpack.c.bf16 %v3629_v48, %v3623_v40 }
 0x3c7   : > { %v3774_v56 = vpack.c.bf16 %v3630_v29, %v3624_v0  ;;  %v3775_v38 = vpack.c.bf16 %v3631_v44, %v3625_v57  ;;  %3914 = vst [vmem:[#allocation2 + $0x450] sm:$0xff] %v3770_v60  ;;  %3915 = vst [vmem:[#allocation2 + $0x458] sm:$0xff] %v3771_v52 }
 0x3c8   : > { %3916 = vst [vmem:[#allocation2 + $0x460] sm:$0xff] %v3772_v43  ;;  %3917 = vst [vmem:[#allocation2 + $0x468] sm:$0xff] %v3773_v7 }
 0x3c9   : > { %3918 = vst [vmem:[#allocation2 + $0x470] sm:$0xff] %v3774_v56  ;;  %3919 = vst [vmem:[#allocation2 + $0x478] sm:$0xff] %v3775_v38 }
 0x3ca PF: > { %v10154_v3 = vld [vmem:[%s11326_s19 + $0x4] ss:$24 sps:$4 sm:$0xff]   ;;  %v10158_v2 = vld [vmem:[%s11326_s19] ss:$24 sps:$4 sm:$0xff]   ;;  %v10160_v16 = vld [vmem:[%s11326_s19 + $0x34] ss:$24 sps:$4 sm:$0xff]  }
 0x3cb   : > { %v15352_v46 = vld [vmem:[%s11326_s19 + $0x304] ss:$24 sps:$4 sm:$0xff]   ;;  %5824 = vmatprep.subr.bf16.mxu1 %v10154_v3  ;;  %v15356_v17 = vld [vmem:[%s11326_s19 + $0x300] ss:$24 sps:$4 sm:$0xff]   ;;  %v15362_v39 = vld [vmem:[%s11326_s19 + $0x334] ss:$24 sps:$4 sm:$0xff]  }
 0x3cc   : > { %6097 = vmatprep.subr.bf16.mxu0 %v15352_v46  ;;  %5825 = vmatpush1.bf16.msra.mxu1 %v10158_v2  ;;  %v10164_v19 = vld [vmem:[%s11326_s19 + $0x30] ss:$24 sps:$4 sm:$0xff]   ;;  %v10166_v12 = vld [vmem:[%s11326_s19 + $0x64] ss:$24 sps:$4 sm:$0xff]   ;;  %v10170_v42 = vld [vmem:[%s11326_s19 + $0x60] ss:$24 sps:$4 sm:$0xff]  }
 0x3cd   : > { %6098 = vmatpush1.bf16.msra.mxu0 %v15356_v17  ;;  %5826 = vmatprep.subr.bf16.mxu1 %v10160_v16  ;;  %v15366_v5 = vld [vmem:[%s11326_s19 + $0x330] ss:$24 sps:$4 sm:$0xff]   ;;  %v15371_v58 = vld [vmem:[%s11326_s19 + $0x364] ss:$24 sps:$4 sm:$0xff]   ;;  %v15375_v30 = vld [vmem:[%s11326_s19 + $0x360] ss:$24 sps:$4 sm:$0xff]  }
 0x3ce   : > { %6099 = vmatprep.subr.bf16.mxu0 %v15362_v39  ;;  %v10172_v61 = vld [vmem:[%s11326_s19 + $0x94] ss:$24 sps:$4 sm:$0xff]   ;;  %v10176_v31 = vld [vmem:[%s11326_s19 + $0x90] ss:$24 sps:$4 sm:$0xff]   ;;  %v10178_v41 = vld [vmem:[%s11326_s19 + $0xc4] ss:$24 sps:$4 sm:$0xff]  }
 0x3cf   : > { %v15381_v63 = vld [vmem:[%s11326_s19 + $0x394] ss:$24 sps:$4 sm:$0xff]   ;;  %v15386_v1 = vld [vmem:[%s11326_s19 + $0x390] ss:$24 sps:$4 sm:$0xff]   ;;  %v15391_v53 = vld [vmem:[%s11326_s19 + $0x3c4] ss:$24 sps:$4 sm:$0xff]  }
 0x3d0   : > { %5827 = vmatpush1.bf16.msra.mxu1 %v10164_v19  ;;  %v10182_v37 = vld [vmem:[%s11326_s19 + $0xc0] ss:$24 sps:$4 sm:$0xff]   ;;  %v10184_v23 = vld [vmem:[%s11326_s19 + $0xf4] ss:$24 sps:$4 sm:$0xff]   ;;  %v10188_v50 = vld [vmem:[%s11326_s19 + $0xf0] ss:$24 sps:$4 sm:$0xff]  }
 0x3d1   : > { %6100 = vmatpush1.bf16.msra.mxu0 %v15366_v5  ;;  %5828 = vmatprep.subr.bf16.mxu1 %v10166_v12  ;;  %v15395_v9 = vld [vmem:[%s11326_s19 + $0x3c0] ss:$24 sps:$4 sm:$0xff]   ;;  %v15401_v34 = vld [vmem:[%s11326_s19 + $0x3f4] ss:$24 sps:$4 sm:$0xff]   ;;  %v15406_v27 = vld [vmem:[%s11326_s19 + $0x3f0] ss:$24 sps:$4 sm:$0xff]  }
 0x3d2   : > { %6101 = vmatprep.subr.bf16.mxu0 %v15371_v58  ;;  %v10190_v49 = vld [vmem:[%s11326_s19 + $0x124] ss:$24 sps:$4 sm:$0xff]   ;;  %v10194_v22 = vld [vmem:[%s11326_s19 + $0x120] ss:$24 sps:$4 sm:$0xff]   ;;  %v10196_v20 = vld [vmem:[%s11326_s19 + $0x154] ss:$24 sps:$4 sm:$0xff]  }
 0x3d3   : > { %v15411_v26 = vld [vmem:[%s11326_s19 + $0x424] ss:$24 sps:$4 sm:$0xff]   ;;  %v15415_v11 = vld [vmem:[%s11326_s19 + $0x420] ss:$24 sps:$4 sm:$0xff]   ;;  %v15421_v45 = vld [vmem:[%s11326_s19 + $0x454] ss:$24 sps:$4 sm:$0xff]  }
 0x3d4   : > { %5829 = vmatpush1.bf16.msra.mxu1 %v10170_v42  ;;  %v10200_v18 = vld [vmem:[%s11326_s19 + $0x150] ss:$24 sps:$4 sm:$0xff]   ;;  %v10202_v24 = vld [vmem:[%s11326_s19 + $0x184] ss:$24 sps:$4 sm:$0xff]   ;;  %v10206_v59 = vld [vmem:[%s11326_s19 + $0x180] ss:$24 sps:$4 sm:$0xff]  }
 0x3d5   : > { %6102 = vmatpush1.bf16.msra.mxu0 %v15375_v30  ;;  %5830 = vmatprep.subr.bf16.mxu1 %v10172_v61  ;;  %v15426_v54 = vld [vmem:[%s11326_s19 + $0x450] ss:$24 sps:$4 sm:$0xff]   ;;  %v15431_v21 = vld [vmem:[%s11326_s19 + $0x484] ss:$24 sps:$4 sm:$0xff]   ;;  %v15435_v15 = vld [vmem:[%s11326_s19 + $0x480] ss:$24 sps:$4 sm:$0xff]  }
 0x3d6   : > { %6103 = vmatprep.subr.bf16.mxu0 %v15381_v63  ;;  %v10208_v33 = vld [vmem:[%s11326_s19 + $0x1b4] ss:$24 sps:$4 sm:$0xff]   ;;  %v10212_v10 = vld [vmem:[%s11326_s19 + $0x1b0] ss:$24 sps:$4 sm:$0xff]   ;;  %v10214_v14 = vld [vmem:[%s11326_s19 + $0x1e4] ss:$24 sps:$4 sm:$0xff]  }
 0x3d7   : > { %v15441_v36 = vld [vmem:[%s11326_s19 + $0x4b4] ss:$24 sps:$4 sm:$0xff]   ;;  %v15446_v13 = vld [vmem:[%s11326_s19 + $0x4b0] ss:$24 sps:$4 sm:$0xff]   ;;  %v15451_v8 = vld [vmem:[%s11326_s19 + $0x4e4] ss:$24 sps:$4 sm:$0xff]  }
 0x3d8   : > { %5831 = vmatpush1.bf16.msra.mxu1 %v10176_v31  ;;  %v10218_v4 = vld [vmem:[%s11326_s19 + $0x1e0] ss:$24 sps:$4 sm:$0xff]   ;;  %v10220_v62 = vld [vmem:[%s11326_s19 + $0x214] ss:$24 sps:$4 sm:$0xff]   ;;  %v10224_v47 = vld [vmem:[%s11326_s19 + $0x210] ss:$24 sps:$4 sm:$0xff]  }
 0x3d9   : > { %6104 = vmatpush1.bf16.msra.mxu0 %v15386_v1  ;;  %5832 = vmatprep.subr.bf16.mxu1 %v10178_v41  ;;  %v15455_v51 = vld [vmem:[%s11326_s19 + $0x4e0] ss:$24 sps:$4 sm:$0xff]   ;;  %v15461_v40 = vld [vmem:[%s11326_s19 + $0x514] ss:$24 sps:$4 sm:$0xff]   ;;  %v15465_v25 = vld [vmem:[%s11326_s19 + $0x510] ss:$24 sps:$4 sm:$0xff]  }
 0x3da   : > { %6105 = vmatprep.subr.bf16.mxu0 %v15391_v53  ;;  %v3921_v32 = vld [vmem:[#allocation2 + $0x8] sm:$0xff]  ;;  %v3923_v6 = vld [vmem:[#allocation2 + $0x18] sm:$0xff]  ;;  %v3920_v19 = vld [vmem:[#allocation2] sm:$0xff]  ;;  %s9041_s27 = smul.u32 768, %s10989_s24  ;;  %s8586_s7 = sshll.u32 %s11335_s29, 4  ;;  %s16507_s7 = int_to_ptr.vmem [resolvable:$true] %s8586_s7 }
 0x3db   : > { %5856 = vmatprep.mubr.bf16.mxu1 %v3921_v32  ;;  %v10226_v55 = vld [vmem:[%s11326_s19 + $0x244] ss:$24 sps:$4 sm:$0xff]   ;;  %6129 = vmatprep.mubr.bf16.mxu0 %v3923_v6  ;;  %v10230_v0 = vld [vmem:[%s11326_s19 + $0x240] ss:$24 sps:$4 sm:$0xff]   ;;  %v10232_v35 = vld [vmem:[%s11326_s19 + $0x274] ss:$24 sps:$4 sm:$0xff]  }
 0x3dc   : > { %5833 = vmatpush1.bf16.msra.mxu1 %v10182_v37  ;;  %v15471_v28 = vld [vmem:[%s11326_s19 + $0x544] ss:$24 sps:$4 sm:$0xff]   ;;  %v15476_v57 = vld [vmem:[%s11326_s19 + $0x540] ss:$24 sps:$4 sm:$0xff]   ;;  %v15481_v48 = vld [vmem:[%s11326_s19 + $0x574] ss:$24 sps:$4 sm:$0xff]   ;;  %s16501_s20 = scalar_lea.hbm %s16569_s6, %s9041_s27 }
 0x3dd   : > { %6106 = vmatpush1.bf16.msra.mxu0 %v15395_v9  ;;  %5834 = vmatprep.subr.bf16.mxu1 %v10184_v23  ;;  %v10236_v29 = vld [vmem:[%s11326_s19 + $0x270] ss:$24 sps:$4 sm:$0xff]   ;;  %v10238_v60 = vld [vmem:[%s11326_s19 + $0x2a4] ss:$24 sps:$4 sm:$0xff]   ;;  %v10242_v43 = vld [vmem:[%s11326_s19 + $0x2a0] ss:$24 sps:$4 sm:$0xff]  }
 0x3de   : > { %6107 = vmatprep.subr.bf16.mxu0 %v15401_v34  ;;  %v15486_v44 = vld [vmem:[%s11326_s19 + $0x570] ss:$24 sps:$4 sm:$0xff]   ;;  %v15491_v52 = vld [vmem:[%s11326_s19 + $0x5a4] ss:$24 sps:$4 sm:$0xff]   ;;  %v15496_v7 = vld [vmem:[%s11326_s19 + $0x5a0] ss:$24 sps:$4 sm:$0xff]  }
 0x3df   : > { %v10244_v56 = vld [vmem:[%s11326_s19 + $0x2d4] ss:$24 sps:$4 sm:$0xff]   ;;  %v10248_v3 = vld [vmem:[%s11326_s19 + $0x2d0] ss:$24 sps:$4 sm:$0xff]   ;;  %v10252_v16 = vld [vmem:[%s11326_s19 + $0x604] ss:$24 sps:$4 sm:$0xff]  }
 0x3e0   : > { %5835 = vmatpush1.bf16.msra.mxu1 %v10188_v50  ;;  %v15501_v38 = vld [vmem:[%s11326_s19 + $0x5d4] ss:$24 sps:$4 sm:$0xff]   ;;  %v15506_v2 = vld [vmem:[%s11326_s19 + $0x5d0] ss:$24 sps:$4 sm:$0xff]   ;;  %v10250_v42 = vld [vmem:[%s11326_s19 + $0x600] ss:$24 sps:$4 sm:$0xff]  }
 0x3e1   : > { %6108 = vmatpush1.bf16.msra.mxu0 %v15406_v27  ;;  %5836 = vmatprep.subr.bf16.mxu1 %v10190_v49  ;;  %v3922_v12 = vld [vmem:[#allocation2 + $0x10] sm:$0xff]  ;;  %v10255_v61 = vld [vmem:[%s11326_s19 + $0x634] ss:$24 sps:$4 sm:$0xff]   ;;  %v3929_v41 = vld [vmem:[#allocation2 + $0x48] sm:$0xff]  ;;  %s18176_s14 = sld [smem:[#allocation20_spill]]  ;;  %s8570_s1 = scalar_lea.sflag [#allocation5], %s11323_s10 }
 0x3e2   : > { %6109 = vmatprep.subr.bf16.mxu0 %v15411_v26  ;;  %v3927_v31 = vld [vmem:[#allocation2 + $0x38] sm:$0xff]  ;;  %v10258_v23 = vld [vmem:[%s11326_s19 + $0x664] ss:$24 sps:$4 sm:$0xff]   ;;  %v3928_v50 = vld [vmem:[#allocation2 + $0x40] sm:$0xff]  ;;  %s10903_s30 = scalar_lea.vmem %s16507_s7, 36864  ;;  %s11010_s17 = smov [#allocation13]  }
 0x3e3   : > { %v10253_v37 = vld [vmem:[%s11326_s19 + $0x630] ss:$24 sps:$4 sm:$0xff]   ;;  %v10256_v49 = vld [vmem:[%s11326_s19 + $0x660] ss:$24 sps:$4 sm:$0xff]   ;;  %p10904_p6 = scmp.ne.s32.totalorder %s16507_s7, %s10903_s30  ;;  %s10907_s18 = sshll.u32 %s11010_s17, 4  ;;  %s10908_s18 = int_to_ptr.vmem [resolvable:$false] %s10907_s18 }
 0x3e4   : > { %5837 = vmatpush1.bf16.msra.mxu1 %v10194_v22  ;;  %v3933_v22 = vld [vmem:[#allocation2 + $0x68] sm:$0xff]  ;;  %v3951_v6 = vld [vmem:[#allocation2 + $0xf8] sm:$0xff]  ;;  %s10909_s9 = scalar_lea.vmem %s10908_s18, 73728  ;;  %p10910_p11 = scmp.lt.s32.totalorder %s16507_s7, %s10908_s18 }
 0x3e5   : > { %6110 = vmatpush1.bf16.msra.mxu0 %v15415_v11  ;;  %5838 = vmatprep.subr.bf16.mxu1 %v10196_v20  ;;  %v10261_v20 = vld [vmem:[%s11326_s19 + $0x694] ss:$24 sps:$4 sm:$0xff]   ;;  %v10268_v32 = vld [vmem:[%s11326_s19 + $0x720] ss:$24 sps:$4 sm:$0xff]   ;;  %p10911_p7 = scmp.lt.s32.totalorder %s10909_s9, %s10903_s30 }
 0x3e6   : > { %6111 = vmatprep.subr.bf16.mxu0 %v15421_v45 }
 0x3e7   : > { %p18177_p0 = scmp.ne.s32.totalorder %s18176_s14, 0  ;;  %p10912_p9 = por %p10911_p7, %p10910_p11 }
 0x3e8   : > { %5839 = vmatpush1.bf16.msra.mxu1 %v10200_v18  ;;  %v10264_v18 = vld [vmem:[%s11326_s19 + $0x6c4] ss:$24 sps:$4 sm:$0xff]  }
 0x3e9   : > { %6112 = vmatpush1.bf16.msra.mxu0 %v15426_v54  ;;  %5840 = vmatprep.subr.bf16.mxu1 %v10202_v24  ;;  %v3934_v24 = vld [vmem:[#allocation2 + $0x70] sm:$0xff]  ;;  %p10905_p12 = pnand %p10904_p6, %p18177_p0 }
 0x3ea   : > { %6113 = vmatprep.subr.bf16.mxu0 %v15431_v21 }
 0x3eb   : > { %p10906_p8 = pneg %p10905_p12 }
 0x3ec   : > { %5841 = vmatpush1.bf16.msra.mxu1 %v10206_v59  ;;  %v3941_v59 = vld [vmem:[#allocation2 + $0xa8] sm:$0xff] }
 0x3ed   : > { %6114 = vmatpush1.bf16.msra.mxu0 %v15435_v15  ;;  %5842 = vmatprep.subr.bf16.mxu1 %v10208_v33  ;;  %v10262_v33 = vld [vmem:[%s11326_s19 + $0x6c0] ss:$24 sps:$4 sm:$0xff]   ;;  %p10913_p10 = pnand %p10912_p9, %p10906_p8 }
 0x3ee   : > { %6115 = vmatprep.subr.bf16.mxu0 %v15441_v36 }
 0x3f0   : > { %5843 = vmatpush1.bf16.msra.mxu1 %v10212_v10  ;;  %v10267_v10 = vld [vmem:[%s11326_s19 + $0x6f4] ss:$24 sps:$4 sm:$0xff]  }
 0x3f1   : > { %6116 = vmatpush1.bf16.msra.mxu0 %v15446_v13  ;;  %5844 = vmatprep.subr.bf16.mxu1 %v10214_v14  ;;  %v3938_v14 = vld [vmem:[#allocation2 + $0x90] sm:$0xff] }
 0x3f2   : > { %6117 = vmatprep.subr.bf16.mxu0 %v15451_v8 }
 0x3f4   : > { %5845 = vmatpush1.bf16.msra.mxu1 %v10218_v4  ;;  %v3940_v4 = vld [vmem:[#allocation2 + $0xa0] sm:$0xff] }
 0x3f5   : > { %6118 = vmatpush1.bf16.msra.mxu0 %v15455_v51  ;;  %5846 = vmatprep.subr.bf16.mxu1 %v10220_v62  ;;  %v3947_v62 = vld [vmem:[#allocation2 + $0xd8] sm:$0xff] }
 0x3f6   : > { %6119 = vmatprep.subr.bf16.mxu0 %v15461_v40 }
 0x3f8   : > { %5847 = vmatpush1.bf16.msra.mxu1 %v10224_v47  ;;  %v10273_v47 = vld [vmem:[%s11326_s19 + $0x754] ss:$24 sps:$4 sm:$0xff]  }
 0x3f9   : > { %6120 = vmatpush1.bf16.msra.mxu0 %v15465_v25  ;;  %5848 = vmatprep.subr.bf16.mxu1 %v10226_v55  ;;  %v3953_v55 = vld [vmem:[#allocation2 + $0x108] sm:$0xff] }
 0x3fa   : > { %6121 = vmatprep.subr.bf16.mxu0 %v15471_v28 }
 0x3fc   : > { %5849 = vmatpush1.bf16.msra.mxu1 %v10230_v0  ;;  %v10274_v0 = vld [vmem:[%s11326_s19 + $0x780] ss:$24 sps:$4 sm:$0xff]  }
 0x3fd   : > { %6122 = vmatpush1.bf16.msra.mxu0 %v15476_v57  ;;  %5850 = vmatprep.subr.bf16.mxu1 %v10232_v35  ;;  %v10279_v35 = vld [vmem:[%s11326_s19 + $0x7b4] ss:$24 sps:$4 sm:$0xff]  }
 0x3fe   : > { %6123 = vmatprep.subr.bf16.mxu0 %v15481_v48 }
 0x400   : > { %5851 = vmatpush1.bf16.msra.mxu1 %v10236_v29  ;;  %v3952_v29 = vld [vmem:[#allocation2 + $0x100] sm:$0xff] }
 0x401   : > { %6124 = vmatpush1.bf16.msra.mxu0 %v15486_v44  ;;  %5852 = vmatprep.subr.bf16.mxu1 %v10238_v60  ;;  %v3957_v60 = vld [vmem:[#allocation2 + $0x128] sm:$0xff] }
 0x402   : > { %6125 = vmatprep.subr.bf16.mxu0 %v15491_v52 }
 0x404   : > { %5853 = vmatpush1.bf16.msra.mxu1 %v10242_v43  ;;  %v3959_v43 = vld [vmem:[#allocation2 + $0x138] sm:$0xff] }
 0x405   : > { %6126 = vmatpush1.bf16.msra.mxu0 %v15496_v7  ;;  %5854 = vmatprep.subr.bf16.mxu1 %v10244_v56  ;;  %v10285_v56 = vld [vmem:[%s11326_s19 + $0x814] ss:$24 sps:$4 sm:$0xff]  }
 0x406   : > { %6127 = vmatprep.subr.bf16.mxu0 %v15501_v38 }
 0x408   : > { %5855 = vmatpush1.bf16.msra.mxu1 %v10248_v3  ;;  %v10288_v3 = vld [vmem:[%s11326_s19 + $0x844] ss:$24 sps:$4 sm:$0xff]  }
 0x409   : > { %6128 = vmatpush1.bf16.msra.mxu0 %v15506_v2  ;;  %9042 = vmatprep.subr.bf16.mxu1 %v15352_v46  ;;  %v3926_v46 = vld [vmem:[#allocation2 + $0x30] sm:$0xff] }
 0x40a   : > { %6370 = vmatprep.subr.bf16.mxu0 %v10252_v16  ;;  %v3958_v16 = vld [vmem:[#allocation2 + $0x130] sm:$0xff] }
 0x40b   : > { %5857 = vmatmul.mubr.bf16.vlgmr.msra.gmra.mrb[0].mxu1 %v3920_v19  ;;  %v3965_v19 = vld [vmem:[#allocation2 + $0x168] sm:$0xff] }
 0x40c   : > { %6130 = vmatmul.mubr.bf16.vlgmr.msra.gmra.mrb[0].mxu0 %v3922_v12  ;;  %9058 = vmatpush1.bf16.msra.mxu1 %v15356_v17  ;;  %v3935_v17 = vld [vmem:[#allocation2 + $0x78] sm:$0xff] }
 0x40d   : > { %6371 = vmatpush1.bf16.msra.mxu0 %v10250_v42  ;;  %5866 = vmatprep.mubr.bf16.mxu1 %v3927_v31  ;;  %v10291_v12 = vld [vmem:[%s11326_s19 + $0x874] ss:$24 sps:$4 sm:$0xff]   ;;  %v10294_v42 = vld [vmem:[%s11326_s19 + $0x8a4] ss:$24 sps:$4 sm:$0xff]  }
 0x40e   : > { %6372 = vmatprep.subr.bf16.mxu0 %v10255_v61  ;;  %6139 = vmatprep.mubr.bf16.mxu0 %v3929_v41  ;;  %v3964_v61 = vld [vmem:[#allocation2 + $0x160] sm:$0xff]  ;;  %v3971_v31 = vld [vmem:[#allocation2 + $0x198] sm:$0xff] }
 0x40f   : > { %9043 = vmatprep.subr.bf16.mxu1 %v15362_v39  ;;  %v10259_v39 = vld [vmem:[%s11326_s19 + $0x690] ss:$24 sps:$4 sm:$0xff]   ;;  %v10297_v41 = vld [vmem:[%s11326_s19 + $0x8d4] ss:$24 sps:$4 sm:$0xff]  }
 0x410   : > { %9059 = vmatpush1.bf16.msra.mxu1 %v15366_v5  ;;  %v3932_v5 = vld [vmem:[#allocation2 + $0x60] sm:$0xff] }
 0x411   : > { %6373 = vmatpush1.bf16.msra.mxu0 %v10253_v37  ;;  %9044 = vmatprep.subr.bf16.mxu1 %v15371_v58  ;;  %v3939_v58 = vld [vmem:[#allocation2 + $0x98] sm:$0xff] }
 0x412   : > { %6374 = vmatprep.subr.bf16.mxu0 %v10258_v23  ;;  %v10300_v37 = vld [vmem:[%s11326_s19 + $0x14] ss:$24 sps:$4 sm:$0xff]   ;;  %v3970_v23 = vld [vmem:[#allocation2 + $0x190] sm:$0xff] }
 0x413   : > { %5867 = vmatmul.mubr.bf16.gmra.mrb[4].mxu1 %v3926_v46  ;;  %v3977_v46 = vld [vmem:[#allocation2 + $0x1c8] sm:$0xff] }
 0x414   : > { %6140 = vmatmul.mubr.bf16.gmra.mrb[4].mxu0 %v3928_v50  ;;  %5876 = vmatprep.mubr.bf16.mxu1 %v3933_v22  ;;  %v3976_v50 = vld [vmem:[#allocation2 + $0x1c0] sm:$0xff]  ;;  %v3983_v22 = vld [vmem:[#allocation2 + $0x1f8] sm:$0xff] }
 0x415   : > { %6375 = vmatpush1.bf16.msra.mxu0 %v10256_v49  ;;  %6149 = vmatprep.mubr.bf16.mxu0 %v3935_v17  ;;  %v3981_v49 = vld [vmem:[#allocation2 + $0x1e8] sm:$0xff] }
 0x416   : > { %6376 = vmatprep.subr.bf16.mxu0 %v10261_v20  ;;  %9060 = vmatpush1.bf16.msra.mxu1 %v15375_v30  ;;  %v10265_v30 = vld [vmem:[%s11326_s19 + $0x6f0] ss:$24 sps:$4 sm:$0xff]   ;;  %v3989_v17 = vld [vmem:[#allocation2 + $0x228] sm:$0xff] }
 0x417   : > { %9045 = vmatprep.subr.bf16.mxu1 %v15381_v63  ;;  %v10270_v63 = vld [vmem:[%s11326_s19 + $0x724] ss:$24 sps:$4 sm:$0xff]   ;;  %v3987_v20 = vld [vmem:[#allocation2 + $0x218] sm:$0xff] }
 0x419   : > { %6377 = vmatpush1.bf16.msra.mxu0 %v10259_v39  ;;  %v3988_v39 = vld [vmem:[#allocation2 + $0x220] sm:$0xff] }
 0x41a   : > { %6378 = vmatprep.subr.bf16.mxu0 %v10264_v18  ;;  %9061 = vmatpush1.bf16.msra.mxu1 %v15386_v1  ;;  %v3945_v1 = vld [vmem:[#allocation2 + $0xc8] sm:$0xff] }
 0x41b   : > { %5877 = vmatmul.mubr.bf16.gmra.mrb[8].mxu1 %v3932_v5  ;;  %9046 = vmatprep.subr.bf16.mxu1 %v15391_v53  ;;  %v10271_v53 = vld [vmem:[%s11326_s19 + $0x750] ss:$24 sps:$4 sm:$0xff]   ;;  %v3993_v18 = vld [vmem:[#allocation2 + $0x248] sm:$0xff] }
 0x41c   : > { %6150 = vmatmul.mubr.bf16.gmra.mrb[8].mxu0 %v3934_v24  ;;  %5886 = vmatprep.mubr.bf16.mxu1 %v3939_v58  ;;  %v3925_v5 = vld [vmem:[#allocation2 + $0x28] sm:$0xff]  ;;  %v3992_v24 = vld [vmem:[#allocation2 + $0x240] sm:$0xff] }
 0x41d   : > { %6159 = vmatprep.mubr.bf16.mxu0 %v3941_v59  ;;  %6379 = vmatpush1.bf16.msra.mxu0 %v10262_v33  ;;  %v3924_v58 = vld [vmem:[#allocation2 + $0x20] sm:$0xff]  ;;  %v10298_v59 = vld [vmem:[%s11326_s19 + $0x10] ss:$24 sps:$4 sm:$0xff]  }
 0x41e   : > { %6380 = vmatprep.subr.bf16.mxu0 %v10267_v10  ;;  %9062 = vmatpush1.bf16.msra.mxu1 %v15395_v9  ;;  %v10276_v9 = vld [vmem:[%s11326_s19 + $0x784] ss:$24 sps:$4 sm:$0xff]   ;;  %v3999_v33 = vld [vmem:[#allocation2 + $0x278] sm:$0xff] }
 0x41f   : > { %9047 = vmatprep.subr.bf16.mxu1 %v15401_v34  ;;  %v3944_v34 = vld [vmem:[#allocation2 + $0xc0] sm:$0xff]  ;;  %v10303_v10 = vld [vmem:[%s11326_s19 + $0x44] ss:$24 sps:$4 sm:$0xff]  }
 0x421   : > { %6381 = vmatpush1.bf16.msra.mxu0 %v10265_v30  ;;  %v3931_v30 = vld [vmem:[#allocation2 + $0x58] sm:$0xff] }
 0x422   : > { %6382 = vmatprep.subr.bf16.mxu0 %v10270_v63  ;;  %9063 = vmatpush1.bf16.msra.mxu1 %v15406_v27  ;;  %v3946_v27 = vld [vmem:[#allocation2 + $0xd0] sm:$0xff]  ;;  %v10301_v63 = vld [vmem:[%s11326_s19 + $0x40] ss:$24 sps:$4 sm:$0xff]  }
 0x423   : > { %5887 = vmatmul.mubr.bf16.gmra.mrb[12].mxu1 %v3938_v14  ;;  %9048 = vmatprep.subr.bf16.mxu1 %v15411_v26  ;;  %v10277_v26 = vld [vmem:[%s11326_s19 + $0x7b0] ss:$24 sps:$4 sm:$0xff]   ;;  %v10306_v14 = vld [vmem:[%s11326_s19 + $0x74] ss:$24 sps:$4 sm:$0xff]  }
 0x424   : > { %6160 = vmatmul.mubr.bf16.gmra.mrb[12].mxu0 %v3940_v4  ;;  %5896 = vmatprep.mubr.bf16.mxu1 %v3945_v1  ;;  %v3998_v4 = vld [vmem:[#allocation2 + $0x270] sm:$0xff] }
 0x425   : > { %6169 = vmatprep.mubr.bf16.mxu0 %v3947_v62  ;;  %6383 = vmatpush1.bf16.msra.mxu0 %v10268_v32  ;;  %v3930_v1 = vld [vmem:[#allocation2 + $0x50] sm:$0xff]  ;;  %v4005_v62 = vld [vmem:[#allocation2 + $0x2a8] sm:$0xff] }
 0x426   : > { %6384 = vmatprep.subr.bf16.mxu0 %v10273_v47  ;;  %9064 = vmatpush1.bf16.msra.mxu1 %v15415_v11  ;;  %v10282_v11 = vld [vmem:[%s11326_s19 + $0x7e4] ss:$24 sps:$4 sm:$0xff]   ;;  %v10304_v47 = vld [vmem:[%s11326_s19 + $0x70] ss:$24 sps:$4 sm:$0xff]  }
 0x427   : > { %9049 = vmatprep.subr.bf16.mxu1 %v15421_v45  ;;  %v3950_v45 = vld [vmem:[#allocation2 + $0xf0] sm:$0xff]  ;;  %v3937_v32 = vld [vmem:[#allocation2 + $0x88] sm:$0xff] }
 0x429   : > { %6385 = vmatpush1.bf16.msra.mxu0 %v10271_v53  ;;  %v10309_v53 = vld [vmem:[%s11326_s19 + $0xa4] ss:$24 sps:$4 sm:$0xff]  }
 0x42a   : > { %6386 = vmatprep.subr.bf16.mxu0 %v10276_v9  ;;  %9065 = vmatpush1.bf16.msra.mxu1 %v15426_v54  ;;  %v10280_v54 = vld [vmem:[%s11326_s19 + $0x7e0] ss:$24 sps:$4 sm:$0xff]  }
 0x42b   : > { %5897 = vmatmul.mubr.bf16.gmra.mrb[16].mxu1 %v3944_v34  ;;  %9050 = vmatprep.subr.bf16.mxu1 %v15431_v21  ;;  %v10283_v21 = vld [vmem:[%s11326_s19 + $0x810] ss:$24 sps:$4 sm:$0xff]   ;;  %v10307_v9 = vld [vmem:[%s11326_s19 + $0xa0] ss:$24 sps:$4 sm:$0xff]   ;;  %v10312_v34 = vld [vmem:[%s11326_s19 + $0xd4] ss:$24 sps:$4 sm:$0xff]  }
 0x42c   : > { %6170 = vmatmul.mubr.bf16.gmra.mrb[16].mxu0 %v3946_v27  ;;  %5906 = vmatprep.mubr.bf16.mxu1 %v3951_v6  ;;  %v4004_v27 = vld [vmem:[#allocation2 + $0x2a0] sm:$0xff] }
 0x42d   : > { %6179 = vmatprep.mubr.bf16.mxu0 %v3953_v55  ;;  %6387 = vmatpush1.bf16.msra.mxu0 %v10274_v0  ;;  %v3936_v6 = vld [vmem:[#allocation2 + $0x80] sm:$0xff]  ;;  %v4011_v55 = vld [vmem:[#allocation2 + $0x2d8] sm:$0xff] }
 0x42e   : > { %6388 = vmatprep.subr.bf16.mxu0 %v10279_v35  ;;  %9066 = vmatpush1.bf16.msra.mxu1 %v15435_v15  ;;  %v3956_v15 = vld [vmem:[#allocation2 + $0x120] sm:$0xff]  ;;  %v3943_v0 = vld [vmem:[#allocation2 + $0xb8] sm:$0xff] }
 0x42f   : > { %9051 = vmatprep.subr.bf16.mxu1 %v15441_v36  ;;  %v3963_v36 = vld [vmem:[#allocation2 + $0x158] sm:$0xff] }
 0x430   : > { %v10310_v35 = vld [vmem:[%s11326_s19 + $0xd0] ss:$24 sps:$4 sm:$0xff]  }
 0x431   : > { %6389 = vmatpush1.bf16.msra.mxu0 %v10277_v26  ;;  %v10315_v26 = vld [vmem:[%s11326_s19 + $0x104] ss:$24 sps:$4 sm:$0xff]  }
 0x432   : > { %6390 = vmatprep.subr.bf16.mxu0 %v10282_v11  ;;  %9067 = vmatpush1.bf16.msra.mxu1 %v15446_v13  ;;  %v10286_v13 = vld [vmem:[%s11326_s19 + $0x840] ss:$24 sps:$4 sm:$0xff]  }
 0x433   : > { %5907 = vmatmul.mubr.bf16.gmra.mrb[20].mxu1 %v3950_v45  ;;  %9052 = vmatprep.subr.bf16.mxu1 %v15451_v8  ;;  %v10289_v8 = vld [vmem:[%s11326_s19 + $0x870] ss:$24 sps:$4 sm:$0xff]   ;;  %v10313_v11 = vld [vmem:[%s11326_s19 + $0x100] ss:$24 sps:$4 sm:$0xff]   ;;  %v10318_v45 = vld [vmem:[%s11326_s19 + $0x134] ss:$24 sps:$4 sm:$0xff]  }
 0x434   : > { %6180 = vmatmul.mubr.bf16.gmra.mrb[20].mxu0 %v3952_v29  ;;  %5916 = vmatprep.mubr.bf16.mxu1 %v3957_v60  ;;  %v4010_v29 = vld [vmem:[#allocation2 + $0x2d0] sm:$0xff] }
 0x435   : > { %6189 = vmatprep.mubr.bf16.mxu0 %v3959_v43  ;;  %6391 = vmatpush1.bf16.msra.mxu0 %v10280_v54  ;;  %v3942_v60 = vld [vmem:[#allocation2 + $0xb0] sm:$0xff]  ;;  %v4017_v43 = vld [vmem:[#allocation2 + $0x308] sm:$0xff] }
 0x436   : > { %6392 = vmatprep.subr.bf16.mxu0 %v10285_v56  ;;  %9068 = vmatpush1.bf16.msra.mxu1 %v15455_v51  ;;  %v3962_v51 = vld [vmem:[#allocation2 + $0x150] sm:$0xff]  ;;  %v3949_v54 = vld [vmem:[#allocation2 + $0xe8] sm:$0xff] }
 0x437   : > { %9053 = vmatprep.subr.bf16.mxu1 %v15461_v40  ;;  %v3969_v40 = vld [vmem:[#allocation2 + $0x188] sm:$0xff]  ;;  %v10316_v56 = vld [vmem:[%s11326_s19 + $0x130] ss:$24 sps:$4 sm:$0xff]  }
 0x439   : > { %6393 = vmatpush1.bf16.msra.mxu0 %v10283_v21  ;;  %v10321_v21 = vld [vmem:[%s11326_s19 + $0x164] ss:$24 sps:$4 sm:$0xff]  }
 0x43a   : > { %6394 = vmatprep.subr.bf16.mxu0 %v10288_v3  ;;  %9069 = vmatpush1.bf16.msra.mxu1 %v15465_v25  ;;  %v10292_v25 = vld [vmem:[%s11326_s19 + $0x8a0] ss:$24 sps:$4 sm:$0xff]  }
 0x43b   : > { %5917 = vmatmul.mubr.bf16.gmra.mrb[24].mxu1 %v3956_v15  ;;  %9054 = vmatprep.subr.bf16.mxu1 %v15471_v28  ;;  %v10295_v28 = vld [vmem:[%s11326_s19 + $0x8d0] ss:$24 sps:$4 sm:$0xff]   ;;  %v10319_v3 = vld [vmem:[%s11326_s19 + $0x160] ss:$24 sps:$4 sm:$0xff]   ;;  %v10327_v15 = vld [vmem:[%s11326_s19 + $0x194] ss:$24 sps:$4 sm:$0xff]  }
 0x43c   : > { %6190 = vmatmul.mubr.bf16.gmra.mrb[24].mxu0 %v3958_v16  ;;  %5926 = vmatprep.mubr.bf16.mxu1 %v3963_v36  ;;  %v4016_v16 = vld [vmem:[#allocation2 + $0x300] sm:$0xff] }
 0x43d   : > { %6199 = vmatprep.mubr.bf16.mxu0 %v3965_v19  ;;  %6395 = vmatpush1.bf16.msra.mxu0 %v10286_v13  ;;  %v3948_v36 = vld [vmem:[#allocation2 + $0xe0] sm:$0xff]  ;;  %v4023_v19 = vld [vmem:[#allocation2 + $0x338] sm:$0xff] }
 0x43e   : > { %6396 = vmatprep.subr.bf16.mxu0 %v10291_v12  ;;  %9070 = vmatpush1.bf16.msra.mxu1 %v15476_v57  ;;  %v3968_v57 = vld [vmem:[#allocation2 + $0x180] sm:$0xff]  ;;  %v3955_v13 = vld [vmem:[#allocation2 + $0x118] sm:$0xff] }
 0x43f   : > { %9055 = vmatprep.subr.bf16.mxu1 %v15481_v48  ;;  %v3975_v48 = vld [vmem:[#allocation2 + $0x1b8] sm:$0xff] }
 0x440   : > { %v10325_v12 = vld [vmem:[%s11326_s19 + $0x190] ss:$24 sps:$4 sm:$0xff]  }
 0x441   : > { %6397 = vmatpush1.bf16.msra.mxu0 %v10289_v8  ;;  %v10336_v8 = vld [vmem:[%s11326_s19 + $0x1c4] ss:$24 sps:$4 sm:$0xff]  }
 0x442   : > { %6398 = vmatprep.subr.bf16.mxu0 %v10294_v42  ;;  %9071 = vmatpush1.bf16.msra.mxu1 %v15486_v44  ;;  %v10324_v44 = vld [vmem:[%s11326_s19 + $0xc] ss:$24 sps:$4 sm:$0xff]   ;;  %v10334_v42 = vld [vmem:[%s11326_s19 + $0x1c0] ss:$24 sps:$4 sm:$0xff]  }
 0x443   : > { %5927 = vmatmul.mubr.bf16.gmra.mrb[28].mxu1 %v3962_v51  ;;  %9056 = vmatprep.subr.bf16.mxu1 %v15491_v52  ;;  %v3974_v52 = vld [vmem:[#allocation2 + $0x1b0] sm:$0xff]  ;;  %v10345_v51 = vld [vmem:[%s11326_s19 + $0x1f4] ss:$24 sps:$4 sm:$0xff]  }
 0x444   : > { %6200 = vmatmul.mubr.bf16.gmra.mrb[28].mxu0 %v3964_v61  ;;  %5936 = vmatprep.mubr.bf16.mxu1 %v3969_v40  ;;  %v4022_v61 = vld [vmem:[#allocation2 + $0x330] sm:$0xff] }
 0x445   : > { %6209 = vmatprep.mubr.bf16.mxu0 %v3971_v31  ;;  %6399 = vmatpush1.bf16.msra.mxu0 %v10292_v25  ;;  %v3954_v40 = vld [vmem:[#allocation2 + $0x110] sm:$0xff]  ;;  %v4029_v31 = vld [vmem:[#allocation2 + $0x368] sm:$0xff] }
 0x446   : > { %6400 = vmatprep.subr.bf16.mxu0 %v10297_v41  ;;  %9072 = vmatpush1.bf16.msra.mxu1 %v15496_v7  ;;  %v3980_v7 = vld [vmem:[#allocation2 + $0x1e0] sm:$0xff]  ;;  %v3961_v25 = vld [vmem:[#allocation2 + $0x148] sm:$0xff]  ;;  %v10343_v41 = vld [vmem:[%s11326_s19 + $0x1f0] ss:$24 sps:$4 sm:$0xff]  }
 0x447   : > { %9057 = vmatprep.subr.bf16.mxu1 %v15501_v38  ;;  %v3982_v38 = vld [vmem:[#allocation2 + $0x1f0] sm:$0xff] }
 0x449   : > { %6401 = vmatpush1.bf16.msra.mxu0 %v10295_v28  ;;  %v10354_v28 = vld [vmem:[%s11326_s19 + $0x224] ss:$24 sps:$4 sm:$0xff]  }
 0x44a   : > { %7462 = vmatprep.subr.bf16.mxu0 %v10300_v37  ;;  %9073 = vmatpush1.bf16.msra.mxu1 %v15506_v2  ;;  %v3986_v2 = vld [vmem:[#allocation2 + $0x210] sm:$0xff]  ;;  %v10352_v37 = vld [vmem:[%s11326_s19 + $0x220] ss:$24 sps:$4 sm:$0xff]  }
 0x44b   : > { %5937 = vmatmul.mubr.bf16.gmra.mrb[32].mxu1 %v3968_v57  ;;  %6643 = vmatprep.subr.bf16.mxu1 %v10324_v44  ;;  %v10363_v57 = vld [vmem:[%s11326_s19 + $0x254] ss:$24 sps:$4 sm:$0xff]  }
 0x44c   : > { %6210 = vmatmul.mubr.bf16.gmra.mrb[32].mxu0 %v3970_v23  ;;  %5946 = vmatprep.mubr.bf16.mxu1 %v3975_v48  ;;  %v4028_v23 = vld [vmem:[#allocation2 + $0x360] sm:$0xff]  ;;  %v3967_v44 = vld [vmem:[#allocation2 + $0x178] sm:$0xff] }
 0x44d   : > { %6219 = vmatprep.mubr.bf16.mxu0 %v3977_v46  ;;  %v3960_v48 = vld [vmem:[#allocation2 + $0x140] sm:$0xff]  ;;  %v4035_v46 = vld [vmem:[#allocation2 + $0x398] sm:$0xff] }
 0x453   : > { %5947 = vmatmul.mubr.bf16.gmra.mrb[36].mxu1 %v3974_v52  ;;  %v10361_v52 = vld [vmem:[%s11326_s19 + $0x250] ss:$24 sps:$4 sm:$0xff]  }
 0x454   : > { %6220 = vmatmul.mubr.bf16.gmra.mrb[36].mxu0 %v3976_v50  ;;  %5956 = vmatprep.mubr.bf16.mxu1 %v3981_v49  ;;  %v10372_v50 = vld [vmem:[%s11326_s19 + $0x284] ss:$24 sps:$4 sm:$0xff]   ;;  %v10370_v49 = vld [vmem:[%s11326_s19 + $0x280] ss:$24 sps:$4 sm:$0xff]  }
 0x455   : > { %6229 = vmatprep.mubr.bf16.mxu0 %v3983_v22  ;;  %v10381_v22 = vld [vmem:[%s11326_s19 + $0x2b4] ss:$24 sps:$4 sm:$0xff]  }
 0x45b   : > { %5957 = vmatmul.mubr.bf16.gmra.mrb[40].mxu1 %v3980_v7  ;;  %v4034_v7 = vld [vmem:[#allocation2 + $0x390] sm:$0xff] }
 0x45c   : > { %6230 = vmatmul.mubr.bf16.gmra.mrb[40].mxu0 %v3982_v38  ;;  %5966 = vmatprep.mubr.bf16.mxu1 %v3987_v20  ;;  %v3966_v38 = vld [vmem:[#allocation2 + $0x170] sm:$0xff]  ;;  %v4041_v20 = vld [vmem:[#allocation2 + $0x3c8] sm:$0xff] }
 0x45d   : > { %6239 = vmatprep.mubr.bf16.mxu0 %v3989_v17  ;;  %v3973_v17 = vld [vmem:[#allocation2 + $0x1a8] sm:$0xff] }
 0x463   : > { %5967 = vmatmul.mubr.bf16.gmra.mrb[44].mxu1 %v3986_v2  ;;  %v10379_v2 = vld [vmem:[%s11326_s19 + $0x2b0] ss:$24 sps:$4 sm:$0xff]  }
 0x464   : > { %6240 = vmatmul.mubr.bf16.gmra.mrb[44].mxu0 %v3988_v39  ;;  %5976 = vmatprep.mubr.bf16.mxu1 %v3993_v18  ;;  %v10390_v39 = vld [vmem:[%s11326_s19 + $0x2e4] ss:$24 sps:$4 sm:$0xff]   ;;  %v10388_v18 = vld [vmem:[%s11326_s19 + $0x2e0] ss:$24 sps:$4 sm:$0xff]  }
 0x465   : > { %6402 = vmatprep.mubr.bf16.mxu0 %v3925_v5  ;;  %v4040_v5 = vld [vmem:[#allocation2 + $0x3c0] sm:$0xff] }
 0x46b   : > { %5977 = vmatmul.mubr.bf16.gmra.mrb[48].mxu1 %v3992_v24  ;;  %v3972_v24 = vld [vmem:[#allocation2 + $0x1a0] sm:$0xff] }
 0x46c   : > { %6403 = vmatmul.mubr.bf16.vlgmr.msra.gmra.mrb[0].mxu0 %v3924_v58  ;;  %5986 = vmatprep.mubr.bf16.mxu1 %v3999_v33  ;;  %v4047_v58 = vld [vmem:[#allocation2 + $0x3f8] sm:$0xff] }
 0x46d   : > { %7463 = vmatpush1.bf16.msra.mxu0 %v10298_v59  ;;  %6412 = vmatprep.mubr.bf16.mxu0 %v3931_v30  ;;  %v3979_v59 = vld [vmem:[#allocation2 + $0x1d8] sm:$0xff]  ;;  %v3978_v30 = vld [vmem:[#allocation2 + $0x1d0] sm:$0xff] }
 0x46e   : > { %7464 = vmatprep.subr.bf16.mxu0 %v10303_v10  ;;  %v10399_v33 = vld [vmem:[%s11326_s19 + $0x314] ss:$24 sps:$4 sm:$0xff]   ;;  %v4046_v10 = vld [vmem:[#allocation2 + $0x3f0] sm:$0xff] }
 0x471   : > { %7465 = vmatpush1.bf16.msra.mxu0 %v10301_v63  ;;  %v4053_v63 = vld [vmem:[#allocation2 + $0x428] sm:$0xff] }
 0x472   : > { %7466 = vmatprep.subr.bf16.mxu0 %v10306_v14  ;;  %v3985_v14 = vld [vmem:[#allocation2 + $0x208] sm:$0xff] }
 0x473   : > { %5987 = vmatmul.mubr.bf16.gmra.mrb[52].mxu1 %v3998_v4  ;;  %v4052_v4 = vld [vmem:[#allocation2 + $0x420] sm:$0xff] }
 0x474   : > { %6413 = vmatmul.mubr.bf16.gmra.mrb[4].mxu0 %v3930_v1  ;;  %5996 = vmatprep.mubr.bf16.mxu1 %v4005_v62  ;;  %v3984_v1 = vld [vmem:[#allocation2 + $0x200] sm:$0xff]  ;;  %v4059_v62 = vld [vmem:[#allocation2 + $0x458] sm:$0xff] }
 0x475   : > { %6422 = vmatprep.mubr.bf16.mxu0 %v3937_v32  ;;  %7467 = vmatpush1.bf16.msra.mxu0 %v10304_v47  ;;  %v3991_v32 = vld [vmem:[#allocation2 + $0x238] sm:$0xff]  ;;  %v4058_v47 = vld [vmem:[#allocation2 + $0x450] sm:$0xff] }
 0x476   : > { %7468 = vmatprep.subr.bf16.mxu0 %v10309_v53  ;;  %v3990_v53 = vld [vmem:[#allocation2 + $0x230] sm:$0xff] }
 0x479   : > { %7469 = vmatpush1.bf16.msra.mxu0 %v10307_v9  ;;  %v3995_v9 = vld [vmem:[#allocation2 + $0x258] sm:$0xff] }
 0x47a   : > { %7470 = vmatprep.subr.bf16.mxu0 %v10312_v34  ;;  %v3997_v34 = vld [vmem:[#allocation2 + $0x268] sm:$0xff] }
 0x47b   : > { %5997 = vmatmul.mubr.bf16.gmra.mrb[56].mxu1 %v4004_v27  ;;  %v3994_v27 = vld [vmem:[#allocation2 + $0x250] sm:$0xff] }
 0x47c   : > { %6423 = vmatmul.mubr.bf16.gmra.mrb[8].mxu0 %v3936_v6  ;;  %6006 = vmatprep.mubr.bf16.mxu1 %v4011_v55  ;;  %v3996_v6 = vld [vmem:[#allocation2 + $0x260] sm:$0xff]  ;;  %v10322_v55 = vld [vmem:[%s11326_s19 + $0x8] ss:$24 sps:$4 sm:$0xff]  }
 0x47d   : > { %6432 = vmatprep.mubr.bf16.mxu0 %v3943_v0  ;;  %7471 = vmatpush1.bf16.msra.mxu0 %v10310_v35  ;;  %v10330_v0 = vld [vmem:[%s11326_s19 + $0x3c] ss:$24 sps:$4 sm:$0xff]  }
 0x47e   : > { %7472 = vmatprep.subr.bf16.mxu0 %v10315_v26  ;;  %v4001_v35 = vld [vmem:[#allocation2 + $0x288] sm:$0xff]  ;;  %v4003_v26 = vld [vmem:[#allocation2 + $0x298] sm:$0xff] }
 0x481   : > { %7473 = vmatpush1.bf16.msra.mxu0 %v10313_v11  ;;  %v10328_v11 = vld [vmem:[%s11326_s19 + $0x38] ss:$24 sps:$4 sm:$0xff]  }
 0x482   : > { %7474 = vmatprep.subr.bf16.mxu0 %v10318_v45  ;;  %v10333_v45 = vld [vmem:[%s11326_s19 + $0x6c] ss:$24 sps:$4 sm:$0xff]  }
 0x483   : > { %6007 = vmatmul.mubr.bf16.gmra.mrb[60].mxu1 %v4010_v29  ;;  %v4000_v29 = vld [vmem:[#allocation2 + $0x280] sm:$0xff] }
 0x484   : > { %6433 = vmatmul.mubr.bf16.gmra.mrb[12].mxu0 %v3942_v60  ;;  %6016 = vmatprep.mubr.bf16.mxu1 %v4017_v43  ;;  %v4002_v60 = vld [vmem:[#allocation2 + $0x290] sm:$0xff] }
 0x485   : > { %6442 = vmatprep.mubr.bf16.mxu0 %v3949_v54  ;;  %7475 = vmatpush1.bf16.msra.mxu0 %v10316_v56  ;;  %v10331_v43 = vld [vmem:[%s11326_s19 + $0x68] ss:$24 sps:$4 sm:$0xff]   ;;  %v4007_v54 = vld [vmem:[#allocation2 + $0x2b8] sm:$0xff]  ;;  %v10339_v56 = vld [vmem:[%s11326_s19 + $0x9c] ss:$24 sps:$4 sm:$0xff]  }
 0x486   : > { %7476 = vmatprep.subr.bf16.mxu0 %v10321_v21  ;;  %v4009_v21 = vld [vmem:[#allocation2 + $0x2c8] sm:$0xff] }
 0x489   : > { %7477 = vmatpush1.bf16.msra.mxu0 %v10319_v3  ;;  %v10337_v3 = vld [vmem:[%s11326_s19 + $0x98] ss:$24 sps:$4 sm:$0xff]  }
 0x48a   : > { %7478 = vmatprep.subr.bf16.mxu0 %v10327_v15  ;;  %v10342_v15 = vld [vmem:[%s11326_s19 + $0xcc] ss:$24 sps:$4 sm:$0xff]  }
 0x48b   : > { %6017 = vmatmul.mubr.bf16.gmra.mrb[64].mxu1 %v4016_v16  ;;  %v4006_v16 = vld [vmem:[#allocation2 + $0x2b0] sm:$0xff] }
 0x48c   : > { %6443 = vmatmul.mubr.bf16.gmra.mrb[16].mxu0 %v3948_v36  ;;  %6026 = vmatprep.mubr.bf16.mxu1 %v4023_v19  ;;  %v4008_v36 = vld [vmem:[#allocation2 + $0x2c0] sm:$0xff]  ;;  %v4013_v19 = vld [vmem:[#allocation2 + $0x2e8] sm:$0xff] }
 0x48d   : > { %6452 = vmatprep.mubr.bf16.mxu0 %v3955_v13  ;;  %7479 = vmatpush1.bf16.msra.mxu0 %v10325_v12  ;;  %v4015_v13 = vld [vmem:[#allocation2 + $0x2f8] sm:$0xff]  ;;  %v10340_v12 = vld [vmem:[%s11326_s19 + $0xc8] ss:$24 sps:$4 sm:$0xff]  }
 0x48e   : > { %7480 = vmatprep.subr.bf16.mxu0 %v10336_v8  ;;  %v10348_v8 = vld [vmem:[%s11326_s19 + $0xfc] ss:$24 sps:$4 sm:$0xff]  }
 0x491   : > { %7481 = vmatpush1.bf16.msra.mxu0 %v10334_v42  ;;  %v10346_v42 = vld [vmem:[%s11326_s19 + $0xf8] ss:$24 sps:$4 sm:$0xff]  }
 0x492   : > { %7482 = vmatprep.subr.bf16.mxu0 %v10345_v51 }
 0x493   : > { %6027 = vmatmul.mubr.bf16.gmra.mrb[68].mxu1 %v4022_v61  ;;  %v10351_v61 = vld [vmem:[%s11326_s19 + $0x12c] ss:$24 sps:$4 sm:$0xff]  }
 0x494   : > { %6453 = vmatmul.mubr.bf16.gmra.mrb[20].mxu0 %v3954_v40  ;;  %6036 = vmatprep.mubr.bf16.mxu1 %v4029_v31 }
 0x495   : > { %6462 = vmatprep.mubr.bf16.mxu0 %v3961_v25  ;;  %7483 = vmatpush1.bf16.msra.mxu0 %v10343_v41  ;;  %v4012_v25 = vld [vmem:[#allocation2 + $0x2e0] sm:$0xff]  ;;  %v4014_v41 = vld [vmem:[#allocation2 + $0x2f0] sm:$0xff] }
 0x496   : > { %7484 = vmatprep.subr.bf16.mxu0 %v10354_v28 }
 0x499   : > { %7485 = vmatpush1.bf16.msra.mxu0 %v10352_v37  ;;  %v4019_v37 = vld [vmem:[#allocation2 + $0x318] sm:$0xff] }
 0x49a   : > { %7486 = vmatprep.subr.bf16.mxu0 %v10363_v57  ;;  %v4021_v57 = vld [vmem:[#allocation2 + $0x328] sm:$0xff] }
 0x49b   : > { %6037 = vmatmul.mubr.bf16.gmra.mrb[72].mxu1 %v4028_v23  ;;  %v10349_v23 = vld [vmem:[%s11326_s19 + $0x128] ss:$24 sps:$4 sm:$0xff]  }
 0x49c   : > { %6463 = vmatmul.mubr.bf16.gmra.mrb[24].mxu0 %v3960_v48  ;;  %6046 = vmatprep.mubr.bf16.mxu1 %v4035_v46  ;;  %v10357_v48 = vld [vmem:[%s11326_s19 + $0x15c] ss:$24 sps:$4 sm:$0xff]   ;;  %v10355_v46 = vld [vmem:[%s11326_s19 + $0x158] ss:$24 sps:$4 sm:$0xff]  }
 0x49d   : > { %6472 = vmatprep.mubr.bf16.mxu0 %v3967_v44  ;;  %7487 = vmatpush1.bf16.msra.mxu0 %v10361_v52  ;;  %v10360_v52 = vld [vmem:[%s11326_s19 + $0x18c] ss:$24 sps:$4 sm:$0xff]  }
 0x49e   : > { %7488 = vmatprep.subr.bf16.mxu0 %v10372_v50 }
 0x4a1   : > { %7489 = vmatpush1.bf16.msra.mxu0 %v10370_v49 }
 0x4a2   : > { %7490 = vmatprep.subr.bf16.mxu0 %v10381_v22  ;;  %v4018_v22 = vld [vmem:[#allocation2 + $0x310] sm:$0xff] }
 0x4a3   : > { %6047 = vmatmul.mubr.bf16.gmra.mrb[76].mxu1 %v4034_v7  ;;  %v4020_v7 = vld [vmem:[#allocation2 + $0x320] sm:$0xff] }
 0x4a4   : > { %6473 = vmatmul.mubr.bf16.gmra.mrb[28].mxu0 %v3966_v38  ;;  %6056 = vmatprep.mubr.bf16.mxu1 %v4041_v20  ;;  %v4025_v20 = vld [vmem:[#allocation2 + $0x348] sm:$0xff] }
 0x4a5   : > { %6482 = vmatprep.mubr.bf16.mxu0 %v3973_v17  ;;  %7491 = vmatpush1.bf16.msra.mxu0 %v10379_v2  ;;  %v4027_v17 = vld [vmem:[#allocation2 + $0x358] sm:$0xff]  ;;  %v10358_v2 = vld [vmem:[%s11326_s19 + $0x188] ss:$24 sps:$4 sm:$0xff]  }
 0x4a6   : > { %7492 = vmatprep.subr.bf16.mxu0 %v10390_v39  ;;  %v10366_v39 = vld [vmem:[%s11326_s19 + $0x1bc] ss:$24 sps:$4 sm:$0xff]  }
 0x4a9   : > { %7493 = vmatpush1.bf16.msra.mxu0 %v10388_v18  ;;  %v10364_v18 = vld [vmem:[%s11326_s19 + $0x1b8] ss:$24 sps:$4 sm:$0xff]  }
 0x4aa   : > { %7735 = vmatprep.subr.bf16.mxu0 %v10399_v33  ;;  %v4024_v33 = vld [vmem:[#allocation2 + $0x340] sm:$0xff] }
 0x4ab   : > { %6057 = vmatmul.mubr.bf16.gmra.mrb[80].mxu1 %v4040_v5 }
 0x4ac   : > { %6483 = vmatmul.mubr.bf16.gmra.mrb[32].mxu0 %v3972_v24  ;;  %6066 = vmatprep.mubr.bf16.mxu1 %v4047_v58  ;;  %v10369_v24 = vld [vmem:[%s11326_s19 + $0x1ec] ss:$24 sps:$4 sm:$0xff]  }
 0x4ad   : > { %6492 = vmatprep.mubr.bf16.mxu0 %v3979_v59 }
 0x4b3   : > { %6067 = vmatmul.mubr.bf16.gmra.mrb[84].mxu1 %v4046_v10  ;;  %v4026_v10 = vld [vmem:[#allocation2 + $0x350] sm:$0xff] }
 0x4b4   : > { %6493 = vmatmul.mubr.bf16.gmra.mrb[36].mxu0 %v3978_v30  ;;  %6076 = vmatprep.mubr.bf16.mxu1 %v4053_v63  ;;  %v4031_v63 = vld [vmem:[#allocation2 + $0x378] sm:$0xff] }
 0x4b5   : > { %6502 = vmatprep.mubr.bf16.mxu0 %v3985_v14  ;;  %v4033_v14 = vld [vmem:[#allocation2 + $0x388] sm:$0xff] }
 0x4bb   : > { %6077 = vmatmul.mubr.bf16.gmra.mrb[88].mxu1 %v4052_v4  ;;  %v10367_v4 = vld [vmem:[%s11326_s19 + $0x1e8] ss:$24 sps:$4 sm:$0xff]  }
 0x4bc   : > { %6503 = vmatmul.mubr.bf16.gmra.mrb[40].mxu0 %v3984_v1  ;;  %6086 = vmatprep.mubr.bf16.mxu1 %v4059_v62  ;;  %v10375_v1 = vld [vmem:[%s11326_s19 + $0x21c] ss:$24 sps:$4 sm:$0xff]   ;;  %v10373_v62 = vld [vmem:[%s11326_s19 + $0x218] ss:$24 sps:$4 sm:$0xff]  }
 0x4bd   : > { %6512 = vmatprep.mubr.bf16.mxu0 %v3991_v32 }
 0x4c3   : > { %6087 = vmatmul.mubr.bf16.gmra.mrb[92].mxu1 %v4058_v47  ;;  %v10378_v47 = vld [vmem:[%s11326_s19 + $0x24c] ss:$24 sps:$4 sm:$0xff]  }
 0x4c4   : > { %6513 = vmatmul.mubr.bf16.gmra.mrb[44].mxu0 %v3990_v53  ;;  %6249 = vmatprep.mubr.bf16.mxu1 %v3995_v9 }
 0x4c5   : > { %6522 = vmatprep.mubr.bf16.mxu0 %v3997_v34  ;;  %v4030_v34 = vld [vmem:[#allocation2 + $0x370] sm:$0xff] }
 0x4cb   : > { %6250 = vmatmul.mubr.bf16.vlgmr.msra.gmra.mrb[48].mxu1 %v3994_v27  ;;  %v4032_v27 = vld [vmem:[#allocation2 + $0x380] sm:$0xff] }
 0x4cc   : > { %6523 = vmatmul.mubr.bf16.gmra.mrb[48].mxu0 %v3996_v6  ;;  %6644 = vmatpush1.bf16.msra.mxu1 %v10322_v55  ;;  %v4037_v55 = vld [vmem:[#allocation2 + $0x3a8] sm:$0xff] }
 0x4cd   : > { %6259 = vmatprep.mubr.bf16.mxu1 %v4001_v35  ;;  %6645 = vmatprep.subr.bf16.mxu1 %v10330_v0  ;;  %v4039_v0 = vld [vmem:[#allocation2 + $0x3b8] sm:$0xff]  ;;  %v10376_v35 = vld [vmem:[%s11326_s19 + $0x248] ss:$24 sps:$4 sm:$0xff]  }
 0x4ce   : > { %6532 = vmatprep.mubr.bf16.mxu0 %v4003_v26  ;;  %v10384_v26 = vld [vmem:[%s11326_s19 + $0x27c] ss:$24 sps:$4 sm:$0xff]  }
 0x4d0   : > { %6646 = vmatpush1.bf16.msra.mxu1 %v10328_v11  ;;  %v10382_v11 = vld [vmem:[%s11326_s19 + $0x278] ss:$24 sps:$4 sm:$0xff]  }
 0x4d1   : > { %6647 = vmatprep.subr.bf16.mxu1 %v10333_v45 }
 0x4d3   : > { %6260 = vmatmul.mubr.bf16.gmra.mrb[52].mxu1 %v4000_v29  ;;  %v10387_v29 = vld [vmem:[%s11326_s19 + $0x2ac] ss:$24 sps:$4 sm:$0xff]  }
 0x4d4   : > { %6533 = vmatmul.mubr.bf16.gmra.mrb[52].mxu0 %v4002_v60  ;;  %6648 = vmatpush1.bf16.msra.mxu1 %v10331_v43 }
 0x4d5   : > { %6269 = vmatprep.mubr.bf16.mxu1 %v4007_v54  ;;  %6542 = vmatprep.mubr.bf16.mxu0 %v4009_v21  ;;  %v4036_v54 = vld [vmem:[#allocation2 + $0x3a0] sm:$0xff] }
 0x4d6   : > { %6649 = vmatprep.subr.bf16.mxu1 %v10339_v56  ;;  %v4038_v56 = vld [vmem:[#allocation2 + $0x3b0] sm:$0xff] }
 0x4d8   : > { %6650 = vmatpush1.bf16.msra.mxu1 %v10337_v3  ;;  %v4043_v3 = vld [vmem:[#allocation2 + $0x3d8] sm:$0xff] }
 0x4d9   : > { %6651 = vmatprep.subr.bf16.mxu1 %v10342_v15  ;;  %v4045_v15 = vld [vmem:[#allocation2 + $0x3e8] sm:$0xff] }
 0x4db   : > { %6270 = vmatmul.mubr.bf16.gmra.mrb[56].mxu1 %v4006_v16  ;;  %v10385_v16 = vld [vmem:[%s11326_s19 + $0x2a8] ss:$24 sps:$4 sm:$0xff]  }
 0x4dc   : > { %6543 = vmatmul.mubr.bf16.gmra.mrb[56].mxu0 %v4008_v36  ;;  %6279 = vmatprep.mubr.bf16.mxu1 %v4013_v19  ;;  %v10393_v36 = vld [vmem:[%s11326_s19 + $0x2dc] ss:$24 sps:$4 sm:$0xff]   ;;  %v10391_v19 = vld [vmem:[%s11326_s19 + $0x2d8] ss:$24 sps:$4 sm:$0xff]  }
 0x4dd   : > { %6552 = vmatprep.mubr.bf16.mxu0 %v4015_v13  ;;  %6652 = vmatpush1.bf16.msra.mxu1 %v10340_v12  ;;  %v10396_v12 = vld [vmem:[%s11326_s19 + $0x30c] ss:$24 sps:$4 sm:$0xff]  }
 0x4de   : > { %v15619_v51 = vpop.f32.mrb[0].mxu1  ;;  %6653 = vmatprep.subr.bf16.mxu1 %v10348_v8 }
 0x4df   : > { %v15622_v40 = vpop.f32.mrb[1].mxu1 }
 0x4e0   : > { %v15624_v31 = vpop.f32.mrb[2].mxu1 }
 0x4e1   : > { %v15626_v28 = vpop.f32.mrb[3].mxu1  ;;  %6654 = vmatpush1.bf16.msra.mxu1 %v10346_v42 }
 0x4e2   : > { %6655 = vmatprep.subr.bf16.mxu1 %v10351_v61  ;;  %v4042_v61 = vld [vmem:[#allocation2 + $0x3d0] sm:$0xff] }
 0x4e3   : > { %6280 = vmatmul.mubr.bf16.gmra.mrb[60].mxu1 %v4012_v25  ;;  %v4044_v25 = vld [vmem:[#allocation2 + $0x3e0] sm:$0xff] }
 0x4e4   : > { %6553 = vmatmul.mubr.bf16.gmra.mrb[60].mxu0 %v4014_v41  ;;  %6289 = vmatprep.mubr.bf16.mxu1 %v4019_v37  ;;  %v4049_v37 = vld [vmem:[#allocation2 + $0x408] sm:$0xff] }
 0x4e5   : > { %6562 = vmatprep.mubr.bf16.mxu0 %v4021_v57  ;;  %6656 = vmatpush1.bf16.msra.mxu1 %v10349_v23  ;;  %v4051_v57 = vld [vmem:[#allocation2 + $0x418] sm:$0xff] }
 0x4e6   : > { %v15631_v44 = vpop.f32.mrb[4].mxu1  ;;  %6657 = vmatprep.subr.bf16.mxu1 %v10357_v48 }
 0x4e7   : > { %v15634_v50 = vpop.f32.mrb[5].mxu1 }
 0x4e8   : > { %v15636_v49 = vpop.f32.mrb[6].mxu1 }
 0x4e9   : > { %v15638_v38 = vpop.f32.mrb[7].mxu1  ;;  %6658 = vmatpush1.bf16.msra.mxu1 %v10355_v46 }
 0x4ea   : > { %6659 = vmatprep.subr.bf16.mxu1 %v10360_v52  ;;  %v4048_v52 = vld [vmem:[#allocation2 + $0x400] sm:$0xff] }
 0x4eb   : > { %6290 = vmatmul.mubr.bf16.gmra.mrb[64].mxu1 %v4018_v22  ;;  %v4050_v22 = vld [vmem:[#allocation2 + $0x410] sm:$0xff] }
 0x4ec   : > { %6563 = vmatmul.mubr.bf16.gmra.mrb[64].mxu0 %v4020_v7  ;;  %6299 = vmatprep.mubr.bf16.mxu1 %v4025_v20  ;;  %v4055_v20 = vld [vmem:[#allocation2 + $0x438] sm:$0xff] }
 0x4ed   : > { %6572 = vmatprep.mubr.bf16.mxu0 %v4027_v17  ;;  %6660 = vmatpush1.bf16.msra.mxu1 %v10358_v2  ;;  %v4057_v17 = vld [vmem:[#allocation2 + $0x448] sm:$0xff] }
 0x4ee   : > { %v15643_v5 = vpop.f32.mrb[8].mxu1  ;;  %6661 = vmatprep.subr.bf16.mxu1 %v10366_v39 }
 0x4ef   : > { %v15646_v58 = vpop.f32.mrb[9].mxu1 }
 0x4f0   : > { %v15648_v59 = vpop.f32.mrb[10].mxu1 }
 0x4f1   : > { %v15650_v30 = vpop.f32.mrb[11].mxu1  ;;  %6662 = vmatpush1.bf16.msra.mxu1 %v10364_v18 }
 0x4f2   : > { %6663 = vmatprep.subr.bf16.mxu1 %v10369_v24  ;;  %v4054_v24 = vld [vmem:[#allocation2 + $0x430] sm:$0xff] }
 0x4f3   : > { %6300 = vmatmul.mubr.bf16.gmra.mrb[68].mxu1 %v4024_v33  ;;  %v4056_v33 = vld [vmem:[#allocation2 + $0x440] sm:$0xff] }
 0x4f4   : > { %6573 = vmatmul.mubr.bf16.gmra.mrb[68].mxu0 %v4026_v10  ;;  %6309 = vmatprep.mubr.bf16.mxu1 %v4031_v63  ;;  %v4061_v63 = vld [vmem:[#allocation2 + $0x468] sm:$0xff] }
 0x4f5   : > { %6582 = vmatprep.mubr.bf16.mxu0 %v4033_v14  ;;  %6664 = vmatpush1.bf16.msra.mxu1 %v10367_v4  ;;  %v4063_v14 = vld [vmem:[#allocation2 + $0x478] sm:$0xff] }
 0x4f6   : > { %v15655_v32 = vpop.f32.mrb[12].mxu1  ;;  %6665 = vmatprep.subr.bf16.mxu1 %v10375_v1 }
 0x4f7   : > { %v15658_v53 = vpop.f32.mrb[13].mxu1 }
 0x4f8   : > { %v15660_v9 = vpop.f32.mrb[14].mxu1 }
 0x4f9   : > { %v15662_v6 = vpop.f32.mrb[15].mxu1  ;;  %6666 = vmatpush1.bf16.msra.mxu1 %v10373_v62 }
 0x4fa   : > { %6667 = vmatprep.subr.bf16.mxu1 %v10378_v47  ;;  %v4060_v47 = vld [vmem:[#allocation2 + $0x460] sm:$0xff] }
 0x4fb   : > { %6310 = vmatmul.mubr.bf16.gmra.mrb[72].mxu1 %v4030_v34  ;;  %v4062_v34 = vld [vmem:[#allocation2 + $0x470] sm:$0xff] }
 0x4fc   : > { %6583 = vmatmul.mubr.bf16.gmra.mrb[72].mxu0 %v4032_v27  ;;  %6319 = vmatprep.mubr.bf16.mxu1 %v4037_v55  ;;  %v10586_v55 = vld [vmem:[#allocation2 + $0x8] sm:$0xff] }
 0x4fd   : > { %6592 = vmatprep.mubr.bf16.mxu0 %v4039_v0  ;;  %6668 = vmatpush1.bf16.msra.mxu1 %v10376_v35 }
 0x4fe   : > { %v15667_v45 = vpop.f32.mrb[16].mxu1  ;;  %6669 = vmatprep.subr.bf16.mxu1 %v10384_v26 }
 0x4ff   : > { %v15670_v60 = vpop.f32.mrb[17].mxu1 }
 0x500   : > { %v15672_v43 = vpop.f32.mrb[18].mxu1 }
 0x501   : > { %v15674_v21 = vpop.f32.mrb[19].mxu1  ;;  %6670 = vmatpush1.bf16.msra.mxu1 %v10382_v11  ;;  %v10394_v11 = vld [vmem:[%s11326_s19 + $0x308] ss:$24 sps:$4 sm:$0xff]  }
 0x502   : > { %6671 = vmatprep.subr.bf16.mxu1 %v10387_v29  ;;  %v10397_v29 = vld [vmem:[%s11326_s19 + $0x310] ss:$24 sps:$4 sm:$0xff]  }
 0x503   : > { %6320 = vmatmul.mubr.bf16.gmra.mrb[76].mxu1 %v4036_v54 }
 0x504   : > { %6593 = vmatmul.mubr.bf16.gmra.mrb[76].mxu0 %v4038_v56  ;;  %6329 = vmatprep.mubr.bf16.mxu1 %v4043_v3  ;;  %v10402_v56 = vld [vmem:[%s11326_s19 + $0x33c] ss:$24 sps:$4 sm:$0xff]  }
 0x505   : > { %6602 = vmatprep.mubr.bf16.mxu0 %v4045_v15  ;;  %6672 = vmatpush1.bf16.msra.mxu1 %v10385_v16  ;;  %v10405_v3 = vld [vmem:[%s11326_s19 + $0x344] ss:$24 sps:$4 sm:$0xff]   ;;  %v10587_v15 = vld [vmem:[#allocation2] sm:$0xff] }
 0x506   : > { %v15679_v13 = vpop.f32.mrb[20].mxu1  ;;  %6673 = vmatprep.subr.bf16.mxu1 %v10393_v36  ;;  %v10400_v16 = vld [vmem:[%s11326_s19 + $0x338] ss:$24 sps:$4 sm:$0xff]  }
 0x507   : > { %v15682_v8 = vpop.f32.mrb[21].mxu1  ;;  %v10403_v36 = vld [vmem:[%s11326_s19 + $0x340] ss:$24 sps:$4 sm:$0xff]  }
 0x508   : > { %v15684_v42 = vpop.f32.mrb[22].mxu1 }
 0x509   : > { %v15686_v41 = vpop.f32.mrb[23].mxu1  ;;  %6674 = vmatpush1.bf16.msra.mxu1 %v10391_v19  ;;  %v4354_v19 = vlaneseq }
 0x50a   : > { %6916 = vmatprep.subr.bf16.mxu1 %v10396_v12  ;;  %v10588_v12 = vld [vmem:[#allocation2 + $0x38] sm:$0xff] }
 0x50b   : > { %6330 = vmatmul.mubr.bf16.gmra.mrb[80].mxu1 %v4042_v61  ;;  %v10408_v61 = vld [vmem:[%s11326_s19 + $0x36c] ss:$24 sps:$4 sm:$0xff]  }
 0x50c   : > { %6603 = vmatmul.mubr.bf16.gmra.mrb[80].mxu0 %v4044_v25  ;;  %6339 = vmatprep.mubr.bf16.mxu1 %v4049_v37  ;;  %v10411_v25 = vld [vmem:[%s11326_s19 + $0x374] ss:$24 sps:$4 sm:$0xff]  }
 0x50d   : > { %6612 = vmatprep.mubr.bf16.mxu0 %v4051_v57 }
 0x50e   : > { %v15688_v23 = vpop.f32.mrb[24].mxu1 }
 0x50f   : > { %v15690_v48 = vpop.f32.mrb[25].mxu1 }
 0x510   : > { %v15692_v46 = vpop.f32.mrb[26].mxu1 }
 0x511   : > { %v15694_v7 = vpop.f32.mrb[27].mxu1 }
 0x513   : > { %6340 = vmatmul.mubr.bf16.gmra.mrb[84].mxu1 %v4048_v52 }
 0x514   : > { %6613 = vmatmul.mubr.bf16.gmra.mrb[84].mxu0 %v4050_v22  ;;  %6349 = vmatprep.mubr.bf16.mxu1 %v4055_v20  ;;  %v15734_v22 = vshrl.u32 %v4354_v19, 7 }
 0x515   : > { %6622 = vmatprep.mubr.bf16.mxu0 %v4057_v17  ;;  %v10406_v17 = vld [vmem:[%s11326_s19 + $0x368] ss:$24 sps:$4 sm:$0xff]  }
 0x516   : > { %v15696_v2 = vpop.f32.mrb[28].mxu1  ;;  %18172 = vst [vmem:[#allocation299_spill] sm:$0xff] %v15734_v22 }
 0x517   : > { %v15698_v39 = vpop.f32.mrb[29].mxu1 }
 0x518   : > { %v15700_v18 = vpop.f32.mrb[30].mxu1 }
 0x519   : > { %v15702_v10 = vpop.f32.mrb[31].mxu1 }
 0x51b   : > { %6350 = vmatmul.mubr.bf16.gmra.mrb[88].mxu1 %v4054_v24  ;;  %v10409_v24 = vld [vmem:[%s11326_s19 + $0x370] ss:$24 sps:$4 sm:$0xff]  }
 0x51c   : > { %6623 = vmatmul.mubr.bf16.gmra.mrb[88].mxu0 %v4056_v33  ;;  %6359 = vmatprep.mubr.bf16.mxu1 %v4061_v63  ;;  %v10414_v33 = vld [vmem:[%s11326_s19 + $0x39c] ss:$24 sps:$4 sm:$0xff]  }
 0x51d   : > { %6632 = vmatprep.mubr.bf16.mxu0 %v4063_v14  ;;  %v10417_v63 = vld [vmem:[%s11326_s19 + $0x3a4] ss:$24 sps:$4 sm:$0xff]  }
 0x51e   : > { %v15704_v4 = vpop.f32.mrb[32].mxu1  ;;  %v10589_v14 = vld [vmem:[#allocation2 + $0x30] sm:$0xff] }
 0x51f   : > { %v15706_v1 = vpop.f32.mrb[33].mxu1 }
 0x520   : > { %v15708_v62 = vpop.f32.mrb[34].mxu1 }
 0x521   : > { %v15710_v27 = vpop.f32.mrb[35].mxu1 }
 0x523   : > { %6360 = vmatmul.mubr.bf16.gmra.mrb[92].mxu1 %v4060_v47  ;;  %v4352_v47 = vld [vmem:[%s11333_s8] sm:$0x3f] }
 0x524   : > { %6633 = vmatmul.mubr.bf16.gmra.mrb[92].mxu0 %v4062_v34  ;;  %6675 = vmatprep.mubr.bf16.mxu1 %v10586_v55  ;;  %v10590_v34 = vld [vmem:[#allocation2 + $0x68] sm:$0xff] }
 0x525   : > { %7494 = vmatprep.mubr.bf16.mxu0 %v10586_v55  ;;  %v4356_v55 = vsub.s32 0, %v15734_v22 }
 0x526   : > { %v15712_v0 = vpop.f32.mrb[36].mxu1 }
 0x527   : > { %v15714_v35 = vpop.f32.mrb[37].mxu1 }
 0x528   : > { %v15716_v26 = vpop.f32.mrb[38].mxu1 }
 0x529   : > { %v15720_v54 = vpop.f32.mrb[39].mxu1 }
 0x52b   : > { %6676 = vmatmul.mubr.bf16.vlgmr.msra.gmra.mrb[96].mxu1 %v10587_v15 }
 0x52c   : > { %7495 = vmatmul.mubr.bf16.vlgmr.msra.gmra.mrb[96].mxu0 %v10587_v15  ;;  %6917 = vmatpush1.bf16.msra.mxu1 %v10394_v11  ;;  %v10412_v11 = vld [vmem:[%s11326_s19 + $0x398] ss:$24 sps:$4 sm:$0xff]   ;;  %v10420_v15 = vld [vmem:[%s11326_s19 + $0x3cc] ss:$24 sps:$4 sm:$0xff]  }
 0x52d   : > { %7736 = vmatpush1.bf16.msra.mxu0 %v10397_v29  ;;  %6685 = vmatprep.mubr.bf16.mxu1 %v10588_v12  ;;  %v10415_v29 = vld [vmem:[%s11326_s19 + $0x3a0] ss:$24 sps:$4 sm:$0xff]  }
 0x52e   : > { %7504 = vmatprep.mubr.bf16.mxu0 %v10588_v12  ;;  %v15728_v37 = vpop.f32.mrb[40].mxu1  ;;  %6918 = vmatprep.subr.bf16.mxu1 %v10402_v56  ;;  %v4360_v56 = vsub.s32 1, %v15734_v22  ;;  %v15755_v12 = vrot.slane %v4352_v47, %v4356_v55  ;;  %v10430_v22 = vld [vmem:[%s11326_s19 + $0x428] ss:$24 sps:$4 sm:$0xff]  }
 0x52f   : > { %7737 = vmatprep.subr.bf16.mxu0 %v10405_v3  ;;  %v15730_v57 = vpop.f32.mrb[41].mxu1 }
 0x530   : > { %v15732_v52 = vpop.f32.mrb[42].mxu1  ;;  %6919 = vmatpush1.bf16.msra.mxu1 %v10400_v16  ;;  %v10423_v16 = vld [vmem:[%s11326_s19 + $0x3d4] ss:$24 sps:$4 sm:$0xff]   ;;  %v5859_v55 = vadd.f32 %v15619_v51, %v15755_v12 }
 0x531   : > { %7738 = vmatpush1.bf16.msra.mxu0 %v10403_v36  ;;  %v15736_v20 = vpop.f32.mrb[43].mxu1  ;;  %6920 = vmatprep.subr.bf16.mxu1 %v10408_v61 }
 0x532   : > { %7739 = vmatprep.subr.bf16.mxu0 %v10411_v25  ;;  %v10418_v25 = vld [vmem:[%s11326_s19 + $0x3c8] ss:$24 sps:$4 sm:$0xff]  }
 0x533   : > { %6686 = vmatmul.mubr.bf16.gmra.mrb[100].mxu1 %v10589_v14 }
 0x534   : > { %7505 = vmatmul.mubr.bf16.gmra.mrb[100].mxu0 %v10589_v14  ;;  %6695 = vmatprep.mubr.bf16.mxu1 %v10590_v34  ;;  %v10591_v14 = vld [vmem:[#allocation2 + $0x60] sm:$0xff] }
 0x535   : > { %7514 = vmatprep.mubr.bf16.mxu0 %v10590_v34  ;;  %6921 = vmatpush1.bf16.msra.mxu1 %v10406_v17  ;;  %v10421_v17 = vld [vmem:[%s11326_s19 + $0x3d0] ss:$24 sps:$4 sm:$0xff]  }
 0x536   : > { %7740 = vmatpush1.bf16.msra.mxu0 %v10409_v24  ;;  %v15747_v3 = vpop.f32.mrb[44].mxu1  ;;  %6922 = vmatprep.subr.bf16.mxu1 %v10414_v33  ;;  %v15761_v24 = vrot.slane %v4352_v47, %v4360_v56  ;;  %v10426_v33 = vld [vmem:[%s11326_s19 + $0x3fc] ss:$24 sps:$4 sm:$0xff]   ;;  %v10592_v34 = vld [vmem:[#allocation2 + $0x98] sm:$0xff] }
 0x537   : > { %7741 = vmatprep.subr.bf16.mxu0 %v10417_v63  ;;  %v15751_v36 = vpop.f32.mrb[45].mxu1  ;;  %v10429_v63 = vld [vmem:[%s11326_s19 + $0x404] ss:$24 sps:$4 sm:$0xff]   ;;  %v10424_v47 = vld [vmem:[%s11326_s19 + $0x3f8] ss:$24 sps:$4 sm:$0xff]  }
 0x538   : > { %v15753_v19 = vpop.f32.mrb[46].mxu1 }
 0x539   : > { %v15757_v61 = vpop.f32.mrb[47].mxu1  ;;  %6923 = vmatpush1.bf16.msra.mxu1 %v10412_v11  ;;  %v10427_v11 = vld [vmem:[%s11326_s19 + $0x400] ss:$24 sps:$4 sm:$0xff]  }
 0x53a   : > { %18173 = vst [vmem:[#allocation300_spill] sm:$0xff] %v15757_v61  ;;  %7742 = vmatpush1.bf16.msra.mxu0 %v10415_v29  ;;  %6924 = vmatprep.subr.bf16.mxu1 %v10420_v15  ;;  %v5861_v29 = vadd.f32 %v15622_v40, %v15761_v24  ;;  %v10432_v15 = vld [vmem:[%s11326_s19 + $0x42c] ss:$24 sps:$4 sm:$0xff]   ;;  %v10433_v61 = vld [vmem:[%s11326_s19 + $0x430] ss:$24 sps:$4 sm:$0xff]  }
 0x53b   : > { %7743 = vmatprep.subr.bf16.mxu0 %v10423_v16  ;;  %6696 = vmatmul.mubr.bf16.gmra.mrb[104].mxu1 %v10591_v14  ;;  %v10435_v16 = vld [vmem:[%s11326_s19 + $0x434] ss:$24 sps:$4 sm:$0xff]  }
 0x53c   : > { %7515 = vmatmul.mubr.bf16.gmra.mrb[104].mxu0 %v10591_v14  ;;  %6705 = vmatprep.mubr.bf16.mxu1 %v10592_v34  ;;  %v5863_v14 = vadd.f32 %v15624_v31, %v15755_v12 }
 0x53d   : > { %7524 = vmatprep.mubr.bf16.mxu0 %v10592_v34  ;;  %6925 = vmatpush1.bf16.msra.mxu1 %v10418_v25 }
 0x53e   : > { %7744 = vmatpush1.bf16.msra.mxu0 %v10421_v17  ;;  %6926 = vmatprep.subr.bf16.mxu1 %v10426_v33  ;;  %v5865_v17 = vadd.f32 %v15626_v28, %v15761_v24  ;;  %v10593_v28 = vld [vmem:[#allocation2 + $0x90] sm:$0xff] }
 0x53f   : > { %v6404_v56 = vpop.f32.mrb[0].mxu0  ;;  %7745 = vmatprep.subr.bf16.mxu0 %v10429_v63 }
 0x540   : > { %v9075_v51 = vadd.f32 %v6404_v56, %v5859_v55  ;;  %v6406_v25 = vpop.f32.mrb[1].mxu0  ;;  %v10438_v55 = vld [vmem:[%s11326_s19 + $0x45c] ss:$24 sps:$4 sm:$0xff]  }
 0x541   : > { %v9077_v40 = vadd.f32 %v6406_v25, %v5861_v29  ;;  %v6408_v34 = vpop.f32.mrb[2].mxu0  ;;  %6927 = vmatpush1.bf16.msra.mxu1 %v10424_v47  ;;  %v10441_v56 = vld [vmem:[%s11326_s19 + $0x464] ss:$24 sps:$4 sm:$0xff]   ;;  %v5869_v47 = vadd.f32 %v15631_v44, %v15755_v12  ;;  %v10447_v25 = vld [vmem:[%s11326_s19 + $0x494] ss:$24 sps:$4 sm:$0xff]  }
 0x542   : > { %8281 = vst [vmem:[%s11335_s29] sm:$0xff] %v9075_v51  ;;  %v9079_v33 = vadd.f32 %v6408_v34, %v5863_v14  ;;  %v6410_v63 = vpop.f32.mrb[3].mxu0  ;;  %7746 = vmatpush1.bf16.msra.mxu0 %v10427_v11  ;;  %6928 = vmatprep.subr.bf16.mxu1 %v10432_v15  ;;  %v10594_v29 = vld [vmem:[#allocation2 + $0xc8] sm:$0xff]  ;;  %v10436_v11 = vld [vmem:[%s11326_s19 + $0x458] ss:$24 sps:$4 sm:$0xff]   ;;  %v10444_v51 = vld [vmem:[%s11326_s19 + $0x48c] ss:$24 sps:$4 sm:$0xff]  }
 0x543   : > { %8282 = vst [vmem:[%s11335_s29 + $0x8] sm:$0xff] %v9077_v40  ;;  %v9081_v31 = vadd.f32 %v6410_v63, %v5865_v17  ;;  %7747 = vmatprep.subr.bf16.mxu0 %v10435_v16  ;;  %6706 = vmatmul.mubr.bf16.gmra.mrb[108].mxu1 %v10593_v28  ;;  %v10439_v15 = vld [vmem:[%s11326_s19 + $0x460] ss:$24 sps:$4 sm:$0xff]   ;;  %v5871_v16 = vadd.f32 %v15634_v50, %v15761_v24 }
 0x544   : > { %8287 = vst [vmem:[%s11335_s29 + $0x30] sm:$0xff] %v9079_v33  ;;  %7525 = vmatmul.mubr.bf16.gmra.mrb[108].mxu0 %v10593_v28  ;;  %6715 = vmatprep.mubr.bf16.mxu1 %v10594_v29  ;;  %v5873_v17 = vadd.f32 %v15636_v49, %v15755_v12  ;;  %v10442_v63 = vld [vmem:[%s11326_s19 + $0x488] ss:$24 sps:$4 sm:$0xff]   ;;  %v10596_v28 = vld [vmem:[#allocation2 + $0xf8] sm:$0xff] }
 0x545   : > { %8288 = vst [vmem:[%s11335_s29 + $0x38] sm:$0xff] %v9081_v31  ;;  %7534 = vmatprep.mubr.bf16.mxu0 %v10594_v29  ;;  %6929 = vmatpush1.bf16.msra.mxu1 %v10430_v22  ;;  %v10445_v31 = vld [vmem:[%s11326_s19 + $0x490] ss:$24 sps:$4 sm:$0xff]   ;;  %v5879_v29 = vadd.f32 %v15643_v5, %v15755_v12 }
 0x546   : > { %7748 = vmatpush1.bf16.msra.mxu0 %v10433_v61  ;;  %6930 = vmatprep.subr.bf16.mxu1 %v10438_v55  ;;  %v5875_v61 = vadd.f32 %v15638_v38, %v15761_v24  ;;  %v10450_v55 = vld [vmem:[%s11326_s19 + $0x4bc] ss:$24 sps:$4 sm:$0xff]  }
 0x547   : > { %v6414_v14 = vpop.f32.mrb[4].mxu0  ;;  %7749 = vmatprep.subr.bf16.mxu0 %v10441_v56  ;;  %v10453_v56 = vld [vmem:[%s11326_s19 + $0x4c4] ss:$24 sps:$4 sm:$0xff]   ;;  %v10595_v38 = vld [vmem:[#allocation2 + $0xc0] sm:$0xff] }
 0x548   : > { %v9083_v44 = vadd.f32 %v6414_v14, %v5869_v47  ;;  %v6416_v22 = vpop.f32.mrb[5].mxu0  ;;  %v10448_v47 = vld [vmem:[%s11326_s19 + $0x4b8] ss:$24 sps:$4 sm:$0xff]   ;;  %v10456_v14 = vld [vmem:[%s11326_s19 + $0x4ec] ss:$24 sps:$4 sm:$0xff]  }
 0x549   : > { %v9085_v50 = vadd.f32 %v6416_v22, %v5871_v16  ;;  %v6418_v40 = vpop.f32.mrb[6].mxu0  ;;  %6931 = vmatpush1.bf16.msra.mxu1 %v10436_v11  ;;  %v10451_v11 = vld [vmem:[%s11326_s19 + $0x4c0] ss:$24 sps:$4 sm:$0xff]  }
 0x54a   : > { %8293 = vst [vmem:[%s11335_s29 + $0x60] sm:$0xff] %v9083_v44  ;;  %v9087_v34 = vadd.f32 %v6418_v40, %v5873_v17  ;;  %v6420_v33 = vpop.f32.mrb[7].mxu0  ;;  %7750 = vmatpush1.bf16.msra.mxu0 %v10439_v15  ;;  %6932 = vmatprep.subr.bf16.mxu1 %v10444_v51  ;;  %v5881_v15 = vadd.f32 %v15646_v58, %v15761_v24  ;;  %v10459_v51 = vld [vmem:[%s11326_s19 + $0x4f4] ss:$24 sps:$4 sm:$0xff]   ;;  %v10454_v40 = vld [vmem:[%s11326_s19 + $0x4e8] ss:$24 sps:$4 sm:$0xff]  }
 0x54b   : > { %8294 = vst [vmem:[%s11335_s29 + $0x68] sm:$0xff] %v9085_v50  ;;  %v9089_v49 = vadd.f32 %v6420_v33, %v5875_v61  ;;  %7751 = vmatprep.subr.bf16.mxu0 %v10447_v25  ;;  %6716 = vmatmul.mubr.bf16.gmra.mrb[112].mxu1 %v10595_v38  ;;  %v5883_v25 = vadd.f32 %v15648_v59, %v15755_v12  ;;  %v10462_v33 = vld [vmem:[%s11326_s19 + $0x51c] ss:$24 sps:$4 sm:$0xff]  }
 0x54c   : > { %8299 = vst [vmem:[%s11335_s29 + $0x90] sm:$0xff] %v9087_v34  ;;  %7535 = vmatmul.mubr.bf16.gmra.mrb[112].mxu0 %v10595_v38  ;;  %6725 = vmatprep.mubr.bf16.mxu1 %v10596_v28  ;;  %v5885_v44 = vadd.f32 %v15650_v30, %v15761_v24  ;;  %v10457_v34 = vld [vmem:[%s11326_s19 + $0x4f0] ss:$24 sps:$4 sm:$0xff]   ;;  %v5891_v38 = vadd.f32 %v15658_v53, %v15761_v24 }
 0x54d   : > { %8300 = vst [vmem:[%s11335_s29 + $0x98] sm:$0xff] %v9089_v49  ;;  %7544 = vmatprep.mubr.bf16.mxu0 %v10596_v28  ;;  %6933 = vmatpush1.bf16.msra.mxu1 %v10442_v63  ;;  %v10465_v63 = vld [vmem:[%s11326_s19 + $0x524] ss:$24 sps:$4 sm:$0xff]   ;;  %v5889_v49 = vadd.f32 %v15655_v32, %v15755_v12 }
 0x54e   : > { %7752 = vmatpush1.bf16.msra.mxu0 %v10445_v31  ;;  %6934 = vmatprep.subr.bf16.mxu1 %v10450_v55  ;;  %v10597_v30 = vld [vmem:[#allocation2 + $0xf0] sm:$0xff]  ;;  %v10598_v31 = vld [vmem:[#allocation2 + $0x128] sm:$0xff]  ;;  %v10460_v55 = vld [vmem:[%s11326_s19 + $0x518] ss:$24 sps:$4 sm:$0xff]  }
 0x54f   : > { %v6424_v16 = vpop.f32.mrb[8].mxu0  ;;  %7753 = vmatprep.subr.bf16.mxu0 %v10453_v56  ;;  %v10463_v56 = vld [vmem:[%s11326_s19 + $0x520] ss:$24 sps:$4 sm:$0xff]  }
 0x550   : > { %v9091_v5 = vadd.f32 %v6424_v16, %v5879_v29  ;;  %v6426_v17 = vpop.f32.mrb[9].mxu0  ;;  %v10468_v29 = vld [vmem:[%s11326_s19 + $0x54c] ss:$24 sps:$4 sm:$0xff]   ;;  %v5895_v16 = vadd.f32 %v15662_v6, %v15761_v24  ;;  %v10599_v6 = vld [vmem:[#allocation2 + $0x120] sm:$0xff] }
 0x551   : > { %v9093_v58 = vadd.f32 %v6426_v17, %v5881_v15  ;;  %v6428_v22 = vpop.f32.mrb[10].mxu0  ;;  %6935 = vmatpush1.bf16.msra.mxu1 %v10448_v47  ;;  %v10471_v47 = vld [vmem:[%s11326_s19 + $0x554] ss:$24 sps:$4 sm:$0xff]   ;;  %v10469_v17 = vld [vmem:[%s11326_s19 + $0x550] ss:$24 sps:$4 sm:$0xff]  }
 0x552   : > { %8305 = vst [vmem:[%s11335_s29 + $0xc0] sm:$0xff] %v9091_v5  ;;  %v9095_v61 = vadd.f32 %v6428_v22, %v5883_v25  ;;  %v6430_v50 = vpop.f32.mrb[11].mxu0  ;;  %7754 = vmatpush1.bf16.msra.mxu0 %v10451_v11  ;;  %6936 = vmatprep.subr.bf16.mxu1 %v10456_v14  ;;  %v5893_v11 = vadd.f32 %v15660_v9, %v15755_v12  ;;  %v10466_v5 = vld [vmem:[%s11326_s19 + $0x548] ss:$24 sps:$4 sm:$0xff]   ;;  %v10600_v22 = vld [vmem:[#allocation2 + $0x158] sm:$0xff] }
 0x553   : > { %8306 = vst [vmem:[%s11335_s29 + $0xc8] sm:$0xff] %v9093_v58  ;;  %v9097_v59 = vadd.f32 %v6430_v50, %v5885_v44  ;;  %7755 = vmatprep.subr.bf16.mxu0 %v10459_v51  ;;  %6726 = vmatmul.mubr.bf16.gmra.mrb[116].mxu1 %v10597_v30  ;;  %v10474_v44 = vld [vmem:[%s11326_s19 + $0x57c] ss:$24 sps:$4 sm:$0xff]   ;;  %v10472_v50 = vld [vmem:[%s11326_s19 + $0x578] ss:$24 sps:$4 sm:$0xff]  }
 0x554   : > { %8311 = vst [vmem:[%s11335_s29 + $0xf0] sm:$0xff] %v9095_v61  ;;  %7545 = vmatmul.mubr.bf16.gmra.mrb[116].mxu0 %v10597_v30  ;;  %6735 = vmatprep.mubr.bf16.mxu1 %v10598_v31  ;;  %v10477_v58 = vld [vmem:[%s11326_s19 + $0x584] ss:$24 sps:$4 sm:$0xff]   ;;  %v5899_v61 = vadd.f32 %v15667_v45, %v15755_v12  ;;  %v5903_v30 = vadd.f32 %v15672_v43, %v15755_v12 }
 0x555   : > { %8312 = vst [vmem:[%s11335_s29 + $0xf8] sm:$0xff] %v9097_v59  ;;  %7554 = vmatprep.mubr.bf16.mxu0 %v10598_v31  ;;  %6937 = vmatpush1.bf16.msra.mxu1 %v10454_v40  ;;  %v10475_v40 = vld [vmem:[%s11326_s19 + $0x580] ss:$24 sps:$4 sm:$0xff]  }
 0x556   : > { %7756 = vmatpush1.bf16.msra.mxu0 %v10457_v34  ;;  %6938 = vmatprep.subr.bf16.mxu1 %v10462_v33  ;;  %v5901_v34 = vadd.f32 %v15670_v60, %v15761_v24  ;;  %v10480_v33 = vld [vmem:[%s11326_s19 + $0x5ac] ss:$24 sps:$4 sm:$0xff]  }
 0x557   : > { %v6434_v28 = vpop.f32.mrb[12].mxu0  ;;  %7757 = vmatprep.subr.bf16.mxu0 %v10465_v63  ;;  %v10483_v63 = vld [vmem:[%s11326_s19 + $0x5b4] ss:$24 sps:$4 sm:$0xff]  }
 0x558   : > { %v9099_v32 = vadd.f32 %v6434_v28, %v5889_v49  ;;  %v6436_v15 = vpop.f32.mrb[13].mxu0  ;;  %v5905_v49 = vadd.f32 %v15674_v21, %v15761_v24  ;;  %v10478_v28 = vld [vmem:[%s11326_s19 + $0x5a8] ss:$24 sps:$4 sm:$0xff]  }
 0x559   : > { %v9101_v53 = vadd.f32 %v6436_v15, %v5891_v38  ;;  %v6438_v14 = vpop.f32.mrb[14].mxu0  ;;  %6939 = vmatpush1.bf16.msra.mxu1 %v10460_v55  ;;  %v10601_v21 = vld [vmem:[#allocation2 + $0x150] sm:$0xff]  ;;  %v10484_v15 = vld [vmem:[%s11326_s19 + $0x5d8] ss:$24 sps:$4 sm:$0xff]  }
 0x55a   : > { %8317 = vst [vmem:[%s11335_s29 + $0x120] sm:$0xff] %v9099_v32  ;;  %v9103_v51 = vadd.f32 %v6438_v14, %v5893_v11  ;;  %v6440_v25 = vpop.f32.mrb[15].mxu0  ;;  %7758 = vmatpush1.bf16.msra.mxu0 %v10463_v56  ;;  %6940 = vmatprep.subr.bf16.mxu1 %v10468_v29  ;;  %v10481_v29 = vld [vmem:[%s11326_s19 + $0x5b0] ss:$24 sps:$4 sm:$0xff]   ;;  %v10486_v11 = vld [vmem:[%s11326_s19 + $0x5dc] ss:$24 sps:$4 sm:$0xff]   ;;  %v5909_v32 = vadd.f32 %v15679_v13, %v15755_v12 }
 0x55b   : > { %8318 = vst [vmem:[%s11335_s29 + $0x128] sm:$0xff] %v9101_v53  ;;  %v9105_v9 = vadd.f32 %v6440_v25, %v5895_v16  ;;  %7759 = vmatprep.subr.bf16.mxu0 %v10471_v47  ;;  %6736 = vmatmul.mubr.bf16.gmra.mrb[120].mxu1 %v10599_v6  ;;  %v10602_v47 = vld [vmem:[#allocation2 + $0x188] sm:$0xff]  ;;  %v5911_v14 = vadd.f32 %v15682_v8, %v15761_v24 }
 0x55c   : > { %8323 = vst [vmem:[%s11335_s29 + $0x150] sm:$0xff] %v9103_v51  ;;  %7555 = vmatmul.mubr.bf16.gmra.mrb[120].mxu0 %v10599_v6  ;;  %6745 = vmatprep.mubr.bf16.mxu1 %v10600_v22  ;;  %v10487_v16 = vld [vmem:[%s11326_s19 + $0x5e0] ss:$24 sps:$4 sm:$0xff]   ;;  %v10489_v53 = vld [vmem:[%s11326_s19 + $0x5e4] ss:$24 sps:$4 sm:$0xff]   ;;  %v5913_v25 = vadd.f32 %v15684_v42, %v15755_v12  ;;  %v5915_v13 = vadd.f32 %v15686_v41, %v15761_v24 }
 0x55d   : > { %8324 = vst [vmem:[%s11335_s29 + $0x158] sm:$0xff] %v9105_v9  ;;  %7564 = vmatprep.mubr.bf16.mxu0 %v10600_v22  ;;  %6941 = vmatpush1.bf16.msra.mxu1 %v10466_v5  ;;  %v10603_v42 = vld [vmem:[#allocation2 + $0x180] sm:$0xff]  ;;  %v10604_v22 = vld [vmem:[#allocation2 + $0x1b8] sm:$0xff]  ;;  %v5919_v41 = vadd.f32 %v15688_v23, %v15755_v12 }
 0x55e   : > { %7760 = vmatpush1.bf16.msra.mxu0 %v10469_v17  ;;  %6942 = vmatprep.subr.bf16.mxu1 %v10474_v44 }
 0x55f   : > { %v6444_v59 = vpop.f32.mrb[16].mxu0  ;;  %7761 = vmatprep.subr.bf16.mxu0 %v10477_v58 }
 0x560   : > { %v9107_v45 = vadd.f32 %v6444_v59, %v5899_v61  ;;  %v6446_v31 = vpop.f32.mrb[17].mxu0  ;;  %v5921_v61 = vadd.f32 %v15690_v48, %v15761_v24 }
 0x561   : > { %v9109_v55 = vadd.f32 %v6446_v31, %v5901_v34  ;;  %v6448_v56 = vpop.f32.mrb[18].mxu0  ;;  %6943 = vmatpush1.bf16.msra.mxu1 %v10472_v50  ;;  %v5923_v34 = vadd.f32 %v15692_v46, %v15755_v12  ;;  %v10606_v46 = vld [vmem:[#allocation2 + $0x1e8] sm:$0xff] }
 0x562   : > { %8329 = vst [vmem:[%s11335_s29 + $0x180] sm:$0xff] %v9107_v45  ;;  %v9111_v60 = vadd.f32 %v6448_v56, %v5903_v30  ;;  %v6450_v38 = vpop.f32.mrb[19].mxu0  ;;  %7762 = vmatpush1.bf16.msra.mxu0 %v10475_v40  ;;  %6944 = vmatprep.subr.bf16.mxu1 %v10480_v33  ;;  %v10492_v40 = vld [vmem:[%s11326_s19 + $0x60c] ss:$24 sps:$4 sm:$0xff]   ;;  %v5925_v30 = vadd.f32 %v15694_v7, %v15761_v24 }
 0x563   : > { %8330 = vst [vmem:[%s11335_s29 + $0x188] sm:$0xff] %v9109_v55  ;;  %v9113_v43 = vadd.f32 %v6450_v38, %v5905_v49  ;;  %7763 = vmatprep.subr.bf16.mxu0 %v10483_v63  ;;  %6746 = vmatmul.mubr.bf16.gmra.mrb[124].mxu1 %v10601_v21  ;;  %v10495_v63 = vld [vmem:[%s11326_s19 + $0x614] ss:$24 sps:$4 sm:$0xff]   ;;  %v10605_v55 = vld [vmem:[#allocation2 + $0x1b0] sm:$0xff]  ;;  %v5929_v7 = vadd.f32 %v15696_v2, %v15755_v12 }
 0x564   : > { %8335 = vst [vmem:[%s11335_s29 + $0x1b0] sm:$0xff] %v9111_v60  ;;  %7565 = vmatmul.mubr.bf16.gmra.mrb[124].mxu0 %v10601_v21  ;;  %6755 = vmatprep.mubr.bf16.mxu1 %v10602_v47  ;;  %v5931_v56 = vadd.f32 %v15698_v39, %v15761_v24  ;;  %v5933_v38 = vadd.f32 %v15700_v18, %v15755_v12  ;;  %v10608_v39 = vld [vmem:[#allocation2 + $0x218] sm:$0xff] }
 0x565   : > { %8336 = vst [vmem:[%s11335_s29 + $0x1b8] sm:$0xff] %v9113_v43  ;;  %7574 = vmatprep.mubr.bf16.mxu0 %v10602_v47  ;;  %6945 = vmatpush1.bf16.msra.mxu1 %v10478_v28  ;;  %v5935_v43 = vadd.f32 %v15702_v10, %v15761_v24  ;;  %v5939_v18 = vadd.f32 %v15704_v4, %v15755_v12 }
 0x566   : > { %7764 = vmatpush1.bf16.msra.mxu0 %v10481_v29  ;;  %6946 = vmatprep.subr.bf16.mxu1 %v10486_v11  ;;  %v5941_v10 = vadd.f32 %v15706_v1, %v15761_v24  ;;  %v10610_v1 = vld [vmem:[#allocation2 + $0x248] sm:$0xff] }
 0x567   : > { %v6454_v51 = vpop.f32.mrb[20].mxu0  ;;  %7765 = vmatprep.subr.bf16.mxu0 %v10489_v53  ;;  %v5943_v53 = vadd.f32 %v15708_v62, %v15755_v12  ;;  %v5949_v62 = vadd.f32 %v15712_v0, %v15755_v12 }
 0x568   : > { %v9115_v5 = vadd.f32 %v6454_v51, %v5909_v32  ;;  %v6456_v17 = vpop.f32.mrb[21].mxu0 }
 0x569   : > { %v9117_v9 = vadd.f32 %v6456_v17, %v5911_v14  ;;  %v6458_v44 = vpop.f32.mrb[22].mxu0  ;;  %6947 = vmatpush1.bf16.msra.mxu1 %v10484_v15  ;;  %v10607_v15 = vld [vmem:[#allocation2 + $0x1e0] sm:$0xff] }
 0x56a   : > { %8341 = vst [vmem:[%s11335_s29 + $0x1e0] sm:$0xff] %v9115_v5  ;;  %v9119_v58 = vadd.f32 %v6458_v44, %v5913_v25  ;;  %v6460_v6 = vpop.f32.mrb[23].mxu0  ;;  %7766 = vmatpush1.bf16.msra.mxu0 %v10487_v16  ;;  %7189 = vmatprep.subr.bf16.mxu1 %v10492_v40  ;;  %v5945_v25 = vadd.f32 %v15710_v27, %v15761_v24  ;;  %v10609_v44 = vld [vmem:[#allocation2 + $0x210] sm:$0xff] }
 0x56b   : > { %8342 = vst [vmem:[%s11335_s29 + $0x1e8] sm:$0xff] %v9117_v9  ;;  %v9121_v8 = vadd.f32 %v6460_v6, %v5915_v13  ;;  %6756 = vmatmul.mubr.bf16.gmra.mrb[128].mxu1 %v10603_v42  ;;  %8008 = vmatprep.subr.bf16.mxu0 %v10495_v63  ;;  %v5951_v27 = vadd.f32 %v15714_v35, %v15761_v24  ;;  %v10612_v35 = vld [vmem:[#allocation2 + $0x278] sm:$0xff] }
 0x56c   : > { %8347 = vst [vmem:[%s11335_s29 + $0x210] sm:$0xff] %v9119_v58  ;;  %7575 = vmatmul.mubr.bf16.gmra.mrb[128].mxu0 %v10603_v42  ;;  %6765 = vmatprep.mubr.bf16.mxu1 %v10604_v22  ;;  %v5953_v6 = vadd.f32 %v15716_v26, %v15755_v12  ;;  %v5959_v26 = vadd.f32 %v15728_v37, %v15755_v12 }
 0x56d   : > { %8348 = vst [vmem:[%s11335_s29 + $0x218] sm:$0xff] %v9121_v8  ;;  %7584 = vmatprep.mubr.bf16.mxu0 %v10604_v22  ;;  %v5955_v22 = vadd.f32 %v15720_v54, %v15761_v24  ;;  %v5961_v54 = vadd.f32 %v15730_v57, %v15761_v24  ;;  %v10614_v57 = vld [vmem:[#allocation2 + $0x2a8] sm:$0xff] }
 0x56f   : > { %v6464_v50 = vpop.f32.mrb[24].mxu0 }
 0x570   : > { %v9123_v59 = vadd.f32 %v6464_v50, %v5919_v41  ;;  %v6466_v33 = vpop.f32.mrb[25].mxu0 }
 0x571   : > { %v9125_v45 = vadd.f32 %v6466_v33, %v5921_v61  ;;  %v6468_v31 = vpop.f32.mrb[26].mxu0  ;;  %v5963_v33 = vadd.f32 %v15732_v52, %v15755_v12  ;;  %v5969_v52 = vadd.f32 %v15747_v3, %v15755_v12 }
 0x572   : > { %8353 = vst [vmem:[%s11335_s29 + $0x240] sm:$0xff] %v9123_v59  ;;  %v9127_v23 = vadd.f32 %v6468_v31, %v5923_v34  ;;  %v6470_v49 = vpop.f32.mrb[27].mxu0  ;;  %v10611_v34 = vld [vmem:[#allocation2 + $0x240] sm:$0xff] }
 0x573   : > { %8354 = vst [vmem:[%s11335_s29 + $0x248] sm:$0xff] %v9125_v45  ;;  %v9129_v48 = vadd.f32 %v6470_v49, %v5925_v30  ;;  %6766 = vmatmul.mubr.bf16.gmra.mrb[132].mxu1 %v10605_v55  ;;  %v5965_v45 = vadd.f32 %v15736_v20, %v15761_v24  ;;  %v5971_v20 = vadd.f32 %v15751_v36, %v15761_v24  ;;  %v10616_v36 = vld [vmem:[#allocation2 + $0x2d8] sm:$0xff] }
 0x574   : > { %8359 = vst [vmem:[%s11335_s29 + $0x270] sm:$0xff] %v9127_v23  ;;  %7585 = vmatmul.mubr.bf16.gmra.mrb[132].mxu0 %v10605_v55  ;;  %6775 = vmatprep.mubr.bf16.mxu1 %v10606_v46  ;;  %v10613_v55 = vld [vmem:[#allocation2 + $0x270] sm:$0xff] }
 0x575   : > { %8360 = vst [vmem:[%s11335_s29 + $0x278] sm:$0xff] %v9129_v48  ;;  %7594 = vmatprep.mubr.bf16.mxu0 %v10606_v46 }
 0x577   : > { %v6474_v60 = vpop.f32.mrb[28].mxu0 }
 0x578   : > { %v9131_v28 = vadd.f32 %v6474_v60, %v5929_v7  ;;  %v6476_v29 = vpop.f32.mrb[29].mxu0  ;;  %v5973_v7 = vadd.f32 %v15753_v19, %v15755_v12 }
 0x579   : > { %v9133_v21 = vadd.f32 %v6476_v29, %v5931_v56  ;;  %v6478_v47 = vpop.f32.mrb[30].mxu0 }
 0x57a   : > { %8365 = vst [vmem:[%s11335_s29 + $0x2a0] sm:$0xff] %v9131_v28  ;;  %v9135_v11 = vadd.f32 %v6478_v47, %v5933_v38  ;;  %v6480_v32 = vpop.f32.mrb[31].mxu0  ;;  %v18174_v38 = vld [vmem:[#allocation300_spill] sm:$0xff] }
 0x57b   : > { %8366 = vst [vmem:[%s11335_s29 + $0x2a8] sm:$0xff] %v9133_v21  ;;  %v9137_v2 = vadd.f32 %v6480_v32, %v5935_v43  ;;  %6776 = vmatmul.mubr.bf16.gmra.mrb[136].mxu1 %v10607_v15  ;;  %v5975_v28 = vadd.f32 %v18174_v38, %v15761_v24  ;;  %v10622_v38 = vld [vmem:[#allocation2 + $0x368] sm:$0xff] }
 0x57c   : > { %8371 = vst [vmem:[%s11335_s29 + $0x2d0] sm:$0xff] %v9135_v11  ;;  %7595 = vmatmul.mubr.bf16.gmra.mrb[136].mxu0 %v10607_v15  ;;  %6785 = vmatprep.mubr.bf16.mxu1 %v10608_v39  ;;  %v10615_v11 = vld [vmem:[#allocation2 + $0x2a0] sm:$0xff] }
 0x57d   : > { %8372 = vst [vmem:[%s11335_s29 + $0x2d8] sm:$0xff] %v9137_v2  ;;  %7604 = vmatprep.mubr.bf16.mxu0 %v10608_v39 }
 0x57f   : > { %v6484_v16 = vpop.f32.mrb[32].mxu0 }
 0x580   : > { %v9139_v14 = vadd.f32 %v6484_v16, %v5939_v18  ;;  %v6486_v51 = vpop.f32.mrb[33].mxu0 }
 0x581   : > { %v9141_v5 = vadd.f32 %v6486_v51, %v5941_v10  ;;  %v6488_v17 = vpop.f32.mrb[34].mxu0 }
 0x582   : > { %8377 = vst [vmem:[%s11335_s29 + $0x300] sm:$0xff] %v9139_v14  ;;  %v9143_v13 = vadd.f32 %v6488_v17, %v5943_v53  ;;  %v6490_v9 = vpop.f32.mrb[35].mxu0 }
 0x583   : > { %8378 = vst [vmem:[%s11335_s29 + $0x308] sm:$0xff] %v9141_v5  ;;  %v9145_v4 = vadd.f32 %v6490_v9, %v5945_v25  ;;  %6786 = vmatmul.mubr.bf16.gmra.mrb[140].mxu1 %v10609_v44  ;;  %v10617_v9 = vld [vmem:[#allocation2 + $0x2d0] sm:$0xff] }
 0x584   : > { %8383 = vst [vmem:[%s11335_s29 + $0x330] sm:$0xff] %v9143_v13  ;;  %7605 = vmatmul.mubr.bf16.gmra.mrb[140].mxu0 %v10609_v44  ;;  %6795 = vmatprep.mubr.bf16.mxu1 %v10610_v1  ;;  %v10618_v44 = vld [vmem:[#allocation2 + $0x308] sm:$0xff] }
 0x585   : > { %8384 = vst [vmem:[%s11335_s29 + $0x338] sm:$0xff] %v9145_v4  ;;  %7614 = vmatprep.mubr.bf16.mxu0 %v10610_v1 }
 0x587   : > { %v6494_v58 = vpop.f32.mrb[36].mxu0 }
 0x588   : > { %v9147_v8 = vadd.f32 %v6494_v58, %v5949_v62  ;;  %v6496_v42 = vpop.f32.mrb[37].mxu0 }
 0x589   : > { %v9149_v41 = vadd.f32 %v6496_v42, %v5951_v27  ;;  %v6498_v61 = vpop.f32.mrb[38].mxu0 }
 0x58a   : > { %8389 = vst [vmem:[%s11335_s29 + $0x360] sm:$0xff] %v9147_v8  ;;  %v9151_v50 = vadd.f32 %v6498_v61, %v5953_v6  ;;  %v6500_v40 = vpop.f32.mrb[39].mxu0 }
 0x58b   : > { %8390 = vst [vmem:[%s11335_s29 + $0x368] sm:$0xff] %v9149_v41  ;;  %v9153_v0 = vadd.f32 %v6500_v40, %v5955_v22  ;;  %6796 = vmatmul.mubr.bf16.gmra.mrb[144].mxu1 %v10611_v34 }
 0x58c   : > { %8395 = vst [vmem:[%s11335_s29 + $0x390] sm:$0xff] %v9151_v50  ;;  %7615 = vmatmul.mubr.bf16.gmra.mrb[144].mxu0 %v10611_v34  ;;  %6805 = vmatprep.mubr.bf16.mxu1 %v10612_v35 }
 0x58d   : > { %8396 = vst [vmem:[%s11335_s29 + $0x398] sm:$0xff] %v9153_v0  ;;  %7624 = vmatprep.mubr.bf16.mxu0 %v10612_v35 }
 0x58f   : > { %v6504_v59 = vpop.f32.mrb[40].mxu0 }
 0x590   : > { %v9155_v63 = vadd.f32 %v6504_v59, %v5959_v26  ;;  %v6506_v30 = vpop.f32.mrb[41].mxu0  ;;  %v10619_v26 = vld [vmem:[#allocation2 + $0x300] sm:$0xff]  ;;  %v10620_v59 = vld [vmem:[#allocation2 + $0x338] sm:$0xff] }
 0x591   : > { %v9157_v31 = vadd.f32 %v6506_v30, %v5961_v54  ;;  %v6508_v23 = vpop.f32.mrb[42].mxu0 }
 0x592   : > { %8401 = vst [vmem:[%s11335_s29 + $0x3c0] sm:$0xff] %v9155_v63  ;;  %v9159_v49 = vadd.f32 %v6508_v23, %v5963_v33  ;;  %v6510_v48 = vpop.f32.mrb[43].mxu0 }
 0x593   : > { %8402 = vst [vmem:[%s11335_s29 + $0x3c8] sm:$0xff] %v9157_v31  ;;  %v9161_v37 = vadd.f32 %v6510_v48, %v5965_v45  ;;  %6806 = vmatmul.mubr.bf16.gmra.mrb[148].mxu1 %v10613_v55 }
 0x594   : > { %8407 = vst [vmem:[%s11335_s29 + $0x3f0] sm:$0xff] %v9159_v49  ;;  %7625 = vmatmul.mubr.bf16.gmra.mrb[148].mxu0 %v10613_v55  ;;  %6815 = vmatprep.mubr.bf16.mxu1 %v10614_v57 }
 0x595   : > { %8408 = vst [vmem:[%s11335_s29 + $0x3f8] sm:$0xff] %v9161_v37  ;;  %7634 = vmatprep.mubr.bf16.mxu0 %v10614_v57 }
 0x597   : > { %v6514_v46 = vpop.f32.mrb[44].mxu0 }
 0x598   : > { %v9163_v56 = vadd.f32 %v6514_v46, %v5969_v52  ;;  %v6516_v60 = vpop.f32.mrb[45].mxu0 }
 0x599   : > { %v9165_v29 = vadd.f32 %v6516_v60, %v5971_v20  ;;  %v6518_v43 = vpop.f32.mrb[46].mxu0 }
 0x59a   : > { %8413 = vst [vmem:[%s11335_s29 + $0x420] sm:$0xff] %v9163_v56  ;;  %v9167_v21 = vadd.f32 %v6518_v43, %v5973_v7  ;;  %v6520_v47 = vpop.f32.mrb[47].mxu0  ;;  %v10621_v56 = vld [vmem:[#allocation2 + $0x330] sm:$0xff] }
 0x59b   : > { %8414 = vst [vmem:[%s11335_s29 + $0x428] sm:$0xff] %v9165_v29  ;;  %v9169_v3 = vadd.f32 %v6520_v47, %v5975_v28  ;;  %6816 = vmatmul.mubr.bf16.gmra.mrb[152].mxu1 %v10615_v11 }
 0x59c   : > { %8419 = vst [vmem:[%s11335_s29 + $0x450] sm:$0xff] %v9167_v21  ;;  %7635 = vmatmul.mubr.bf16.gmra.mrb[152].mxu0 %v10615_v11  ;;  %6825 = vmatprep.mubr.bf16.mxu1 %v10616_v36 }
 0x59d   : > { %8420 = vst [vmem:[%s11335_s29 + $0x458] sm:$0xff] %v9169_v3  ;;  %7644 = vmatprep.mubr.bf16.mxu0 %v10616_v36 }
 0x59e   : > { %v6251_v19 = vpop.f32.mrb[48].mxu1 }
 0x59f   : > { %v6524_v32 = vpop.f32.mrb[48].mxu0  ;;  %v9170_v2 = vadd.f32 %v6251_v19, %v15755_v12  ;;  %v6253_v15 = vpop.f32.mrb[49].mxu1 }
 0x5a0   : > { %v6526_v39 = vpop.f32.mrb[49].mxu0  ;;  %v9172_v18 = vadd.f32 %v6253_v15, %v15761_v24  ;;  %v6255_v10 = vpop.f32.mrb[50].mxu1 }
 0x5a1   : > { %v6528_v16 = vpop.f32.mrb[50].mxu0  ;;  %v9171_v53 = vadd.f32 %v9170_v2, %v6524_v32  ;;  %v9174_v14 = vadd.f32 %v6255_v10, %v15755_v12  ;;  %v6257_v51 = vpop.f32.mrb[51].mxu1 }
 0x5a2   : > { %v6530_v25 = vpop.f32.mrb[51].mxu0  ;;  %v9173_v5 = vadd.f32 %v9172_v18, %v6526_v39  ;;  %v9176_v17 = vadd.f32 %v6257_v51, %v15761_v24 }
 0x5a3   : > { %8425 = vst [vmem:[%s11335_s29 + $0x480] sm:$0xff] %v9171_v53  ;;  %v9175_v13 = vadd.f32 %v9174_v14, %v6528_v16  ;;  %6826 = vmatmul.mubr.bf16.gmra.mrb[156].mxu1 %v10617_v9  ;;  %v10623_v16 = vld [vmem:[#allocation2 + $0x360] sm:$0xff]  ;;  %v10624_v14 = vld [vmem:[#allocation2 + $0x398] sm:$0xff] }
 0x5a4   : > { %7645 = vmatmul.mubr.bf16.gmra.mrb[156].mxu0 %v10617_v9  ;;  %8426 = vst [vmem:[%s11335_s29 + $0x488] sm:$0xff] %v9173_v5  ;;  %v9177_v4 = vadd.f32 %v9176_v17, %v6530_v25  ;;  %6835 = vmatprep.mubr.bf16.mxu1 %v10618_v44 }
 0x5a5   : > { %7654 = vmatprep.mubr.bf16.mxu0 %v10618_v44  ;;  %8431 = vst [vmem:[%s11335_s29 + $0x4b0] sm:$0xff] %v9175_v13 }
 0x5a6   : > { %8432 = vst [vmem:[%s11335_s29 + $0x4b8] sm:$0xff] %v9177_v4  ;;  %v6261_v1 = vpop.f32.mrb[52].mxu1 }
 0x5a7   : > { %v6534_v62 = vpop.f32.mrb[52].mxu0  ;;  %v9178_v27 = vadd.f32 %v6261_v1, %v15755_v12  ;;  %v6263_v58 = vpop.f32.mrb[53].mxu1 }
 0x5a8   : > { %v6536_v6 = vpop.f32.mrb[53].mxu0  ;;  %v9180_v8 = vadd.f32 %v6263_v58, %v15761_v24  ;;  %v6265_v42 = vpop.f32.mrb[54].mxu1 }
 0x5a9   : > { %v6538_v22 = vpop.f32.mrb[54].mxu0  ;;  %v9179_v41 = vadd.f32 %v9178_v27, %v6534_v62  ;;  %v9182_v61 = vadd.f32 %v6265_v42, %v15755_v12  ;;  %v6267_v50 = vpop.f32.mrb[55].mxu1 }
 0x5aa   : > { %v6540_v40 = vpop.f32.mrb[55].mxu0  ;;  %v9181_v0 = vadd.f32 %v9180_v8, %v6536_v6  ;;  %v9184_v34 = vadd.f32 %v6267_v50, %v15761_v24 }
 0x5ab   : > { %8437 = vst [vmem:[%s11335_s29 + $0x4e0] sm:$0xff] %v9179_v41  ;;  %v9183_v35 = vadd.f32 %v9182_v61, %v6538_v22  ;;  %6836 = vmatmul.mubr.bf16.gmra.mrb[160].mxu1 %v10619_v26  ;;  %v10625_v22 = vld [vmem:[#allocation2 + $0x390] sm:$0xff]  ;;  %v10626_v61 = vld [vmem:[#allocation2 + $0x3c8] sm:$0xff] }
 0x5ac   : > { %7655 = vmatmul.mubr.bf16.gmra.mrb[160].mxu0 %v10619_v26  ;;  %8438 = vst [vmem:[%s11335_s29 + $0x4e8] sm:$0xff] %v9181_v0  ;;  %v9185_v54 = vadd.f32 %v9184_v34, %v6540_v40  ;;  %6845 = vmatprep.mubr.bf16.mxu1 %v10620_v59 }
 0x5ad   : > { %7664 = vmatprep.mubr.bf16.mxu0 %v10620_v59  ;;  %8443 = vst [vmem:[%s11335_s29 + $0x510] sm:$0xff] %v9183_v35 }
 0x5ae   : > { %8444 = vst [vmem:[%s11335_s29 + $0x518] sm:$0xff] %v9185_v54  ;;  %v6271_v33 = vpop.f32.mrb[56].mxu1 }
 0x5af   : > { %v6544_v63 = vpop.f32.mrb[56].mxu0  ;;  %v9186_v30 = vadd.f32 %v6271_v33, %v15755_v12  ;;  %v6273_v45 = vpop.f32.mrb[57].mxu1 }
 0x5b0   : > { %v6546_v31 = vpop.f32.mrb[57].mxu0  ;;  %v9188_v23 = vadd.f32 %v6273_v45, %v15761_v24  ;;  %v6275_v49 = vpop.f32.mrb[58].mxu1 }
 0x5b1   : > { %v6548_v48 = vpop.f32.mrb[58].mxu0  ;;  %v9187_v37 = vadd.f32 %v9186_v30, %v6544_v63  ;;  %v9190_v55 = vadd.f32 %v6275_v49, %v15755_v12  ;;  %v6277_v57 = vpop.f32.mrb[59].mxu1 }
 0x5b2   : > { %v6550_v52 = vpop.f32.mrb[59].mxu0  ;;  %v9189_v20 = vadd.f32 %v9188_v23, %v6546_v31  ;;  %v9192_v46 = vadd.f32 %v6277_v57, %v15761_v24 }
 0x5b3   : > { %8449 = vst [vmem:[%s11335_s29 + $0x540] sm:$0xff] %v9187_v37  ;;  %v9191_v7 = vadd.f32 %v9190_v55, %v6548_v48  ;;  %6846 = vmatmul.mubr.bf16.gmra.mrb[164].mxu1 %v10621_v56  ;;  %v10627_v48 = vld [vmem:[#allocation2 + $0x3c0] sm:$0xff]  ;;  %v10628_v55 = vld [vmem:[#allocation2 + $0x3f8] sm:$0xff] }
 0x5b4   : > { %7665 = vmatmul.mubr.bf16.gmra.mrb[164].mxu0 %v10621_v56  ;;  %8450 = vst [vmem:[%s11335_s29 + $0x548] sm:$0xff] %v9189_v20  ;;  %v9193_v60 = vadd.f32 %v9192_v46, %v6550_v52  ;;  %6855 = vmatprep.mubr.bf16.mxu1 %v10622_v38 }
 0x5b5   : > { %7674 = vmatprep.mubr.bf16.mxu0 %v10622_v38  ;;  %8455 = vst [vmem:[%s11335_s29 + $0x570] sm:$0xff] %v9191_v7 }
 0x5b6   : > { %8456 = vst [vmem:[%s11335_s29 + $0x578] sm:$0xff] %v9193_v60  ;;  %v6281_v28 = vpop.f32.mrb[60].mxu1 }
 0x5b7   : > { %v6554_v29 = vpop.f32.mrb[60].mxu0  ;;  %v9194_v43 = vadd.f32 %v6281_v28, %v15755_v12  ;;  %v6283_v21 = vpop.f32.mrb[61].mxu1 }
 0x5b8   : > { %v6556_v47 = vpop.f32.mrb[61].mxu0  ;;  %v9196_v3 = vadd.f32 %v6283_v21, %v15761_v24  ;;  %v6285_v11 = vpop.f32.mrb[62].mxu1 }
 0x5b9   : > { %v6558_v36 = vpop.f32.mrb[62].mxu0  ;;  %v9195_v19 = vadd.f32 %v9194_v43, %v6554_v29  ;;  %v9198_v32 = vadd.f32 %v6285_v11, %v15755_v12  ;;  %v6287_v2 = vpop.f32.mrb[63].mxu1 }
 0x5ba   : > { %v6560_v15 = vpop.f32.mrb[63].mxu0  ;;  %v9197_v39 = vadd.f32 %v9196_v3, %v6556_v47  ;;  %v9200_v18 = vadd.f32 %v6287_v2, %v15761_v24 }
 0x5bb   : > { %8461 = vst [vmem:[%s11335_s29 + $0x5a0] sm:$0xff] %v9195_v19  ;;  %v9199_v10 = vadd.f32 %v9198_v32, %v6558_v36  ;;  %6856 = vmatmul.mubr.bf16.gmra.mrb[168].mxu1 %v10623_v16  ;;  %v10629_v36 = vld [vmem:[#allocation2 + $0x3f0] sm:$0xff]  ;;  %v10630_v32 = vld [vmem:[#allocation2 + $0x428] sm:$0xff] }
 0x5bc   : > { %7675 = vmatmul.mubr.bf16.gmra.mrb[168].mxu0 %v10623_v16  ;;  %8462 = vst [vmem:[%s11335_s29 + $0x5a8] sm:$0xff] %v9197_v39  ;;  %v9201_v53 = vadd.f32 %v9200_v18, %v6560_v15  ;;  %6865 = vmatprep.mubr.bf16.mxu1 %v10624_v14 }
 0x5bd   : > { %7684 = vmatprep.mubr.bf16.mxu0 %v10624_v14  ;;  %8467 = vst [vmem:[%s11335_s29 + $0x5d0] sm:$0xff] %v9199_v10 }
 0x5be   : > { %8468 = vst [vmem:[%s11335_s29 + $0x5d8] sm:$0xff] %v9201_v53  ;;  %v6291_v51 = vpop.f32.mrb[64].mxu1 }
 0x5bf   : > { %v6564_v25 = vpop.f32.mrb[64].mxu0  ;;  %v9202_v5 = vadd.f32 %v6291_v51, %v15755_v12  ;;  %v6293_v17 = vpop.f32.mrb[65].mxu1 }
 0x5c0   : > { %v6566_v13 = vpop.f32.mrb[65].mxu0  ;;  %v9204_v9 = vadd.f32 %v6293_v17, %v15761_v24  ;;  %v6295_v4 = vpop.f32.mrb[66].mxu1 }
 0x5c1   : > { %v6568_v44 = vpop.f32.mrb[66].mxu0  ;;  %v9203_v1 = vadd.f32 %v9202_v5, %v6564_v25  ;;  %v9206_v62 = vadd.f32 %v6295_v4, %v15755_v12  ;;  %v6297_v27 = vpop.f32.mrb[67].mxu1 }
 0x5c2   : > { %v6570_v58 = vpop.f32.mrb[67].mxu0  ;;  %v9205_v6 = vadd.f32 %v9204_v9, %v6566_v13  ;;  %v9208_v8 = vadd.f32 %v6297_v27, %v15761_v24 }
 0x5c3   : > { %8473 = vst [vmem:[%s11335_s29 + $0x600] sm:$0xff] %v9203_v1  ;;  %v9207_v42 = vadd.f32 %v9206_v62, %v6568_v44  ;;  %6866 = vmatmul.mubr.bf16.gmra.mrb[172].mxu1 %v10625_v22  ;;  %v10631_v44 = vld [vmem:[#allocation2 + $0x420] sm:$0xff]  ;;  %v10632_v62 = vld [vmem:[#allocation2 + $0x458] sm:$0xff] }
 0x5c4   : > { %7685 = vmatmul.mubr.bf16.gmra.mrb[172].mxu0 %v10625_v22  ;;  %8474 = vst [vmem:[%s11335_s29 + $0x608] sm:$0xff] %v9205_v6  ;;  %v9209_v41 = vadd.f32 %v9208_v8, %v6570_v58  ;;  %6875 = vmatprep.mubr.bf16.mxu1 %v10626_v61 }
 0x5c5   : > { %7694 = vmatprep.mubr.bf16.mxu0 %v10626_v61  ;;  %8479 = vst [vmem:[%s11335_s29 + $0x630] sm:$0xff] %v9207_v42 }
 0x5c6   : > { %8480 = vst [vmem:[%s11335_s29 + $0x638] sm:$0xff] %v9209_v41  ;;  %v6301_v50 = vpop.f32.mrb[68].mxu1 }
 0x5c7   : > { %v6574_v40 = vpop.f32.mrb[68].mxu0  ;;  %v9210_v0 = vadd.f32 %v6301_v50, %v15755_v12  ;;  %v6303_v34 = vpop.f32.mrb[69].mxu1 }
 0x5c8   : > { %v6576_v35 = vpop.f32.mrb[69].mxu0  ;;  %v9212_v26 = vadd.f32 %v6303_v34, %v15761_v24  ;;  %v6305_v54 = vpop.f32.mrb[70].mxu1 }
 0x5c9   : > { %v6578_v59 = vpop.f32.mrb[70].mxu0  ;;  %v9211_v33 = vadd.f32 %v9210_v0, %v6574_v40  ;;  %v9214_v63 = vadd.f32 %v6305_v54, %v15755_v12  ;;  %v6307_v30 = vpop.f32.mrb[71].mxu1 }
 0x5ca   : > { %v6580_v45 = vpop.f32.mrb[71].mxu0  ;;  %v9213_v31 = vadd.f32 %v9212_v26, %v6576_v35  ;;  %v9216_v23 = vadd.f32 %v6307_v30, %v15761_v24 }
 0x5cb   : > { %8485 = vst [vmem:[%s11335_s29 + $0x660] sm:$0xff] %v9211_v33  ;;  %v9215_v49 = vadd.f32 %v9214_v63, %v6578_v59  ;;  %6876 = vmatmul.mubr.bf16.gmra.mrb[176].mxu1 %v10627_v48  ;;  %v10633_v59 = vld [vmem:[#allocation2 + $0x450] sm:$0xff]  ;;  %v10634_v63 = vld [vmem:[#allocation2 + $0x18] sm:$0xff] }
 0x5cc   : > { %7695 = vmatmul.mubr.bf16.gmra.mrb[176].mxu0 %v10627_v48  ;;  %8486 = vst [vmem:[%s11335_s29 + $0x668] sm:$0xff] %v9213_v31  ;;  %v9217_v37 = vadd.f32 %v9216_v23, %v6580_v45  ;;  %6885 = vmatprep.mubr.bf16.mxu1 %v10628_v55 }
 0x5cd   : > { %7704 = vmatprep.mubr.bf16.mxu0 %v10628_v55  ;;  %8491 = vst [vmem:[%s11335_s29 + $0x690] sm:$0xff] %v9215_v49 }
 0x5ce   : > { %8492 = vst [vmem:[%s11335_s29 + $0x698] sm:$0xff] %v9217_v37  ;;  %v6311_v57 = vpop.f32.mrb[72].mxu1 }
 0x5cf   : > { %v6584_v52 = vpop.f32.mrb[72].mxu0  ;;  %v9218_v20 = vadd.f32 %v6311_v57, %v15755_v12  ;;  %v6313_v46 = vpop.f32.mrb[73].mxu1  ;;  %v10490_v57 = vld [vmem:[%s11326_s19 + $0x608] ss:$24 sps:$4 sm:$0xff]  }
 0x5d0   : > { %v6586_v7 = vpop.f32.mrb[73].mxu0  ;;  %v9220_v56 = vadd.f32 %v6313_v46, %v15761_v24  ;;  %v6315_v60 = vpop.f32.mrb[74].mxu1 }
 0x5d1   : > { %v6588_v38 = vpop.f32.mrb[74].mxu0  ;;  %v9219_v28 = vadd.f32 %v9218_v20, %v6584_v52  ;;  %v9222_v29 = vadd.f32 %v6315_v60, %v15755_v12  ;;  %v6317_v43 = vpop.f32.mrb[75].mxu1  ;;  %v10493_v52 = vld [vmem:[%s11326_s19 + $0x610] ss:$24 sps:$4 sm:$0xff]  }
 0x5d2   : > { %v6590_v21 = vpop.f32.mrb[75].mxu0  ;;  %v9221_v47 = vadd.f32 %v9220_v56, %v6586_v7  ;;  %v9224_v3 = vadd.f32 %v6317_v43, %v15761_v24 }
 0x5d3   : > { %8497 = vst [vmem:[%s11335_s29 + $0x6c0] sm:$0xff] %v9219_v28  ;;  %v9223_v11 = vadd.f32 %v9222_v29, %v6588_v38  ;;  %6886 = vmatmul.mubr.bf16.gmra.mrb[180].mxu1 %v10629_v36  ;;  %v10498_v28 = vld [vmem:[%s11326_s19 + $0x63c] ss:$24 sps:$4 sm:$0xff]  }
 0x5d4   : > { %7705 = vmatmul.mubr.bf16.gmra.mrb[180].mxu0 %v10629_v36  ;;  %8498 = vst [vmem:[%s11335_s29 + $0x6c8] sm:$0xff] %v9221_v47  ;;  %v9225_v19 = vadd.f32 %v9224_v3, %v6590_v21  ;;  %6895 = vmatprep.mubr.bf16.mxu1 %v10630_v32  ;;  %v10501_v29 = vld [vmem:[%s11326_s19 + $0x644] ss:$24 sps:$4 sm:$0xff]   ;;  %v10496_v3 = vld [vmem:[%s11326_s19 + $0x638] ss:$24 sps:$4 sm:$0xff]  }
 0x5d5   : > { %7714 = vmatprep.mubr.bf16.mxu0 %v10630_v32  ;;  %8503 = vst [vmem:[%s11335_s29 + $0x6f0] sm:$0xff] %v9223_v11  ;;  %v10635_v21 = vld [vmem:[#allocation2 + $0x10] sm:$0xff]  ;;  %v10499_v11 = vld [vmem:[%s11326_s19 + $0x640] ss:$24 sps:$4 sm:$0xff]   ;;  %v10507_v32 = vld [vmem:[%s11326_s19 + $0x674] ss:$24 sps:$4 sm:$0xff]  }
 0x5d6   : > { %8504 = vst [vmem:[%s11335_s29 + $0x6f8] sm:$0xff] %v9225_v19  ;;  %v6321_v2 = vpop.f32.mrb[76].mxu1  ;;  %v10636_v36 = vld [vmem:[#allocation2 + $0x48] sm:$0xff]  ;;  %v10504_v19 = vld [vmem:[%s11326_s19 + $0x66c] ss:$24 sps:$4 sm:$0xff]  }
 0x5d7   : > { %v6594_v15 = vpop.f32.mrb[76].mxu0  ;;  %v9226_v39 = vadd.f32 %v6321_v2, %v15755_v12  ;;  %v6323_v18 = vpop.f32.mrb[77].mxu1 }
 0x5d8   : > { %v6596_v10 = vpop.f32.mrb[77].mxu0  ;;  %v9228_v16 = vadd.f32 %v6323_v18, %v15761_v24  ;;  %v6325_v53 = vpop.f32.mrb[78].mxu1 }
 0x5d9   : > { %v6598_v14 = vpop.f32.mrb[78].mxu0  ;;  %v9227_v51 = vadd.f32 %v9226_v39, %v6594_v15  ;;  %v9230_v25 = vadd.f32 %v6325_v53, %v15755_v12  ;;  %v6327_v5 = vpop.f32.mrb[79].mxu1 }
 0x5da   : > { %v6600_v17 = vpop.f32.mrb[79].mxu0  ;;  %v9229_v13 = vadd.f32 %v9228_v16, %v6596_v10  ;;  %v9232_v9 = vadd.f32 %v6327_v5, %v15761_v24 }
 0x5db   : > { %8509 = vst [vmem:[%s11335_s29 + $0x720] sm:$0xff] %v9227_v51  ;;  %v9231_v4 = vadd.f32 %v9230_v25, %v6598_v14  ;;  %6896 = vmatmul.mubr.bf16.gmra.mrb[184].mxu1 %v10631_v44 }
 0x5dc   : > { %7715 = vmatmul.mubr.bf16.gmra.mrb[184].mxu0 %v10631_v44  ;;  %8510 = vst [vmem:[%s11335_s29 + $0x728] sm:$0xff] %v9229_v13  ;;  %v9233_v1 = vadd.f32 %v9232_v9, %v6600_v17  ;;  %6905 = vmatprep.mubr.bf16.mxu1 %v10632_v62  ;;  %v10502_v13 = vld [vmem:[%s11326_s19 + $0x668] ss:$24 sps:$4 sm:$0xff]  }
 0x5dd   : > { %7724 = vmatprep.mubr.bf16.mxu0 %v10632_v62  ;;  %8515 = vst [vmem:[%s11335_s29 + $0x750] sm:$0xff] %v9231_v4  ;;  %v10505_v9 = vld [vmem:[%s11326_s19 + $0x670] ss:$24 sps:$4 sm:$0xff]   ;;  %v10513_v62 = vld [vmem:[%s11326_s19 + $0x6a4] ss:$24 sps:$4 sm:$0xff]  }
 0x5de   : > { %8516 = vst [vmem:[%s11335_s29 + $0x758] sm:$0xff] %v9233_v1  ;;  %v6331_v27 = vpop.f32.mrb[80].mxu1  ;;  %v10510_v1 = vld [vmem:[%s11326_s19 + $0x69c] ss:$24 sps:$4 sm:$0xff]  }
 0x5df   : > { %v6604_v58 = vpop.f32.mrb[80].mxu0  ;;  %v9234_v6 = vadd.f32 %v6331_v27, %v15755_v12  ;;  %v6333_v8 = vpop.f32.mrb[81].mxu1 }
 0x5e0   : > { %v6606_v42 = vpop.f32.mrb[81].mxu0  ;;  %v9236_v22 = vadd.f32 %v6333_v8, %v15761_v24  ;;  %v6335_v41 = vpop.f32.mrb[82].mxu1  ;;  %v10638_v8 = vld [vmem:[#allocation2 + $0x78] sm:$0xff] }
 0x5e1   : > { %v6608_v61 = vpop.f32.mrb[82].mxu0  ;;  %v9235_v50 = vadd.f32 %v9234_v6, %v6604_v58  ;;  %v9238_v40 = vadd.f32 %v6335_v41, %v15755_v12  ;;  %v6337_v0 = vpop.f32.mrb[83].mxu1  ;;  %v10637_v58 = vld [vmem:[#allocation2 + $0x40] sm:$0xff] }
 0x5e2   : > { %v6610_v34 = vpop.f32.mrb[83].mxu0  ;;  %v9237_v35 = vadd.f32 %v9236_v22, %v6606_v42  ;;  %v9240_v26 = vadd.f32 %v6337_v0, %v15761_v24  ;;  %v10508_v42 = vld [vmem:[%s11326_s19 + $0x698] ss:$24 sps:$4 sm:$0xff]  }
 0x5e3   : > { %8521 = vst [vmem:[%s11335_s29 + $0x780] sm:$0xff] %v9235_v50  ;;  %v9239_v54 = vadd.f32 %v9238_v40, %v6608_v61  ;;  %6906 = vmatmul.mubr.bf16.gmra.mrb[188].mxu1 %v10633_v59  ;;  %v10511_v22 = vld [vmem:[%s11326_s19 + $0x6a0] ss:$24 sps:$4 sm:$0xff]   ;;  %v10516_v50 = vld [vmem:[%s11326_s19 + $0x6cc] ss:$24 sps:$4 sm:$0xff]  }
 0x5e4   : > { %7725 = vmatmul.mubr.bf16.gmra.mrb[188].mxu0 %v10633_v59  ;;  %8522 = vst [vmem:[%s11335_s29 + $0x788] sm:$0xff] %v9237_v35  ;;  %v9241_v33 = vadd.f32 %v9240_v26, %v6610_v34  ;;  %6948 = vmatprep.mubr.bf16.mxu1 %v10634_v63  ;;  %v10519_v40 = vld [vmem:[%s11326_s19 + $0x6d4] ss:$24 sps:$4 sm:$0xff]  }
 0x5e5   : > { %7767 = vmatprep.mubr.bf16.mxu0 %v10634_v63  ;;  %8527 = vst [vmem:[%s11335_s29 + $0x7b0] sm:$0xff] %v9239_v54 }
 0x5e6   : > { %8528 = vst [vmem:[%s11335_s29 + $0x7b8] sm:$0xff] %v9241_v33  ;;  %v6341_v30 = vpop.f32.mrb[84].mxu1 }
 0x5e7   : > { %v6614_v45 = vpop.f32.mrb[84].mxu0  ;;  %v9242_v31 = vadd.f32 %v6341_v30, %v15755_v12  ;;  %v6343_v23 = vpop.f32.mrb[85].mxu1 }
 0x5e8   : > { %v6616_v49 = vpop.f32.mrb[85].mxu0  ;;  %v9244_v48 = vadd.f32 %v6343_v23, %v15761_v24  ;;  %v6345_v37 = vpop.f32.mrb[86].mxu1  ;;  %v10517_v23 = vld [vmem:[%s11326_s19 + $0x6d0] ss:$24 sps:$4 sm:$0xff]  }
 0x5e9   : > { %v6618_v55 = vpop.f32.mrb[86].mxu0  ;;  %v9243_v20 = vadd.f32 %v9242_v31, %v6614_v45  ;;  %v9246_v46 = vadd.f32 %v6345_v37, %v15755_v12  ;;  %v6347_v7 = vpop.f32.mrb[87].mxu1  ;;  %v10514_v31 = vld [vmem:[%s11326_s19 + $0x6c8] ss:$24 sps:$4 sm:$0xff]   ;;  %v10522_v37 = vld [vmem:[%s11326_s19 + $0x6fc] ss:$24 sps:$4 sm:$0xff]  }
 0x5ea   : > { %v6620_v56 = vpop.f32.mrb[87].mxu0  ;;  %v9245_v60 = vadd.f32 %v9244_v48, %v6616_v49  ;;  %v9248_v38 = vadd.f32 %v6347_v7, %v15761_v24  ;;  %v10528_v7 = vld [vmem:[%s11326_s19 + $0x72c] ss:$24 sps:$4 sm:$0xff]  }
 0x5eb   : > { %8533 = vst [vmem:[%s11335_s29 + $0x7e0] sm:$0xff] %v9243_v20  ;;  %v9247_v43 = vadd.f32 %v9246_v46, %v6618_v55  ;;  %6949 = vmatmul.mubr.bf16.vlgmr.msra.gmra.mrb[96].mxu1 %v10635_v21  ;;  %v10525_v55 = vld [vmem:[%s11326_s19 + $0x704] ss:$24 sps:$4 sm:$0xff]   ;;  %v10523_v46 = vld [vmem:[%s11326_s19 + $0x700] ss:$24 sps:$4 sm:$0xff]  }
 0x5ec   : > { %7768 = vmatmul.mubr.bf16.vlgmr.msra.gmra.mrb[96].mxu0 %v10635_v21  ;;  %8534 = vst [vmem:[%s11335_s29 + $0x7e8] sm:$0xff] %v9245_v60  ;;  %v9249_v47 = vadd.f32 %v9248_v38, %v6620_v56  ;;  %7190 = vmatpush1.bf16.msra.mxu1 %v10490_v57  ;;  %v10639_v57 = vld [vmem:[#allocation2 + $0x70] sm:$0xff]  ;;  %v10640_v20 = vld [vmem:[#allocation2 + $0xa8] sm:$0xff]  ;;  %v10531_v56 = vld [vmem:[%s11326_s19 + $0x734] ss:$24 sps:$4 sm:$0xff]  }
 0x5ed   : > { %8009 = vmatpush1.bf16.msra.mxu0 %v10493_v52  ;;  %8539 = vst [vmem:[%s11335_s29 + $0x810] sm:$0xff] %v9247_v43  ;;  %6958 = vmatprep.mubr.bf16.mxu1 %v10636_v36  ;;  %v10526_v60 = vld [vmem:[%s11326_s19 + $0x728] ss:$24 sps:$4 sm:$0xff]   ;;  %v10641_v43 = vld [vmem:[#allocation2 + $0xa0] sm:$0xff]  ;;  %v10642_v21 = vld [vmem:[#allocation2 + $0xd8] sm:$0xff] }
 0x5ee   : > { %7777 = vmatprep.mubr.bf16.mxu0 %v10636_v36  ;;  %8540 = vst [vmem:[%s11335_s29 + $0x818] sm:$0xff] %v9249_v47  ;;  %v6351_v2 = vpop.f32.mrb[88].mxu1  ;;  %7191 = vmatprep.subr.bf16.mxu1 %v10498_v28  ;;  %v10529_v38 = vld [vmem:[%s11326_s19 + $0x730] ss:$24 sps:$4 sm:$0xff]   ;;  %v10534_v28 = vld [vmem:[%s11326_s19 + $0x75c] ss:$24 sps:$4 sm:$0xff]  }
 0x5ef   : > { %v6624_v15 = vpop.f32.mrb[88].mxu0  ;;  %8010 = vmatprep.subr.bf16.mxu0 %v10501_v29  ;;  %v9250_v39 = vadd.f32 %v6351_v2, %v15755_v12  ;;  %v6353_v18 = vpop.f32.mrb[89].mxu1  ;;  %v10537_v29 = vld [vmem:[%s11326_s19 + $0x764] ss:$24 sps:$4 sm:$0xff]   ;;  %v10532_v47 = vld [vmem:[%s11326_s19 + $0x758] ss:$24 sps:$4 sm:$0xff]  }
 0x5f0   : > { %v6626_v10 = vpop.f32.mrb[89].mxu0  ;;  %v9252_v16 = vadd.f32 %v6353_v18, %v15761_v24  ;;  %v6355_v53 = vpop.f32.mrb[90].mxu1  ;;  %7192 = vmatpush1.bf16.msra.mxu1 %v10496_v3  ;;  %v10535_v3 = vld [vmem:[%s11326_s19 + $0x760] ss:$24 sps:$4 sm:$0xff]   ;;  %v10543_v36 = vld [vmem:[%s11326_s19 + $0x794] ss:$24 sps:$4 sm:$0xff]  }
 0x5f1   : > { %v6628_v14 = vpop.f32.mrb[90].mxu0  ;;  %8011 = vmatpush1.bf16.msra.mxu0 %v10499_v11  ;;  %v9251_v51 = vadd.f32 %v9250_v39, %v6624_v15  ;;  %v9254_v25 = vadd.f32 %v6355_v53, %v15755_v12  ;;  %v6357_v5 = vpop.f32.mrb[91].mxu1  ;;  %7193 = vmatprep.subr.bf16.mxu1 %v10504_v19  ;;  %v10540_v11 = vld [vmem:[%s11326_s19 + $0x78c] ss:$24 sps:$4 sm:$0xff]   ;;  %v10538_v19 = vld [vmem:[%s11326_s19 + $0x788] ss:$24 sps:$4 sm:$0xff]  }
 0x5f2   : > { %v6630_v17 = vpop.f32.mrb[91].mxu0  ;;  %8012 = vmatprep.subr.bf16.mxu0 %v10507_v32  ;;  %v9253_v4 = vadd.f32 %v9252_v16, %v6626_v10  ;;  %v9256_v44 = vadd.f32 %v6357_v5, %v15761_v24  ;;  %v10541_v32 = vld [vmem:[%s11326_s19 + $0x790] ss:$24 sps:$4 sm:$0xff]   ;;  %v10546_v2 = vld [vmem:[%s11326_s19 + $0x7bc] ss:$24 sps:$4 sm:$0xff]  }
 0x5f3   : > { %8545 = vst [vmem:[%s11335_s29 + $0x840] sm:$0xff] %v9251_v51  ;;  %v9255_v27 = vadd.f32 %v9254_v25, %v6628_v14  ;;  %6959 = vmatmul.mubr.bf16.gmra.mrb[100].mxu1 %v10637_v58  ;;  %v10549_v15 = vld [vmem:[%s11326_s19 + $0x7c4] ss:$24 sps:$4 sm:$0xff]   ;;  %v10544_v10 = vld [vmem:[%s11326_s19 + $0x7b8] ss:$24 sps:$4 sm:$0xff]  }
 0x5f4   : > { %7778 = vmatmul.mubr.bf16.gmra.mrb[100].mxu0 %v10637_v58  ;;  %8546 = vst [vmem:[%s11335_s29 + $0x848] sm:$0xff] %v9253_v4  ;;  %v9257_v6 = vadd.f32 %v9256_v44, %v6630_v17  ;;  %6968 = vmatprep.mubr.bf16.mxu1 %v10638_v8  ;;  %v10643_v39 = vld [vmem:[#allocation2 + $0xd0] sm:$0xff]  ;;  %v10644_v18 = vld [vmem:[#allocation2 + $0x108] sm:$0xff]  ;;  %v10555_v14 = vld [vmem:[%s11326_s19 + $0x7f4] ss:$24 sps:$4 sm:$0xff]  }
 0x5f5   : > { %7787 = vmatprep.mubr.bf16.mxu0 %v10638_v8  ;;  %8551 = vst [vmem:[%s11335_s29 + $0x870] sm:$0xff] %v9255_v27  ;;  %7194 = vmatpush1.bf16.msra.mxu1 %v10502_v13  ;;  %v10547_v16 = vld [vmem:[%s11326_s19 + $0x7c0] ss:$24 sps:$4 sm:$0xff]   ;;  %v10552_v53 = vld [vmem:[%s11326_s19 + $0x7ec] ss:$24 sps:$4 sm:$0xff]  }
 0x5f6   : > { %8013 = vmatpush1.bf16.msra.mxu0 %v10505_v9  ;;  %8552 = vst [vmem:[%s11335_s29 + $0x878] sm:$0xff] %v9257_v6  ;;  %v6361_v41 = vpop.f32.mrb[92].mxu1  ;;  %7195 = vmatprep.subr.bf16.mxu1 %v10510_v1  ;;  %v10550_v51 = vld [vmem:[%s11326_s19 + $0x7e8] ss:$24 sps:$4 sm:$0xff]   ;;  %v10558_v5 = vld [vmem:[%s11326_s19 + $0x81c] ss:$24 sps:$4 sm:$0xff]  }
 0x5f7   : > { %v6634_v61 = vpop.f32.mrb[92].mxu0  ;;  %8014 = vmatprep.subr.bf16.mxu0 %v10513_v62  ;;  %v9258_v0 = vadd.f32 %v6361_v41, %v15755_v12  ;;  %v6363_v34 = vpop.f32.mrb[93].mxu1  ;;  %v10553_v25 = vld [vmem:[%s11326_s19 + $0x7f0] ss:$24 sps:$4 sm:$0xff]   ;;  %v10561_v17 = vld [vmem:[%s11326_s19 + $0x824] ss:$24 sps:$4 sm:$0xff]  }
 0x5f8   : > { %v6636_v35 = vpop.f32.mrb[93].mxu0  ;;  %v9260_v26 = vadd.f32 %v6363_v34, %v15761_v24  ;;  %v6365_v54 = vpop.f32.mrb[94].mxu1  ;;  %v10645_v13 = vld [vmem:[#allocation2 + $0x100] sm:$0xff]  ;;  %v10646_v9 = vld [vmem:[#allocation2 + $0x138] sm:$0xff]  ;;  %v10562_v27 = vld [vmem:[%s11326_s19 + $0x848] ss:$24 sps:$4 sm:$0xff]  }
 0x5f9   : > { %v6638_v59 = vpop.f32.mrb[94].mxu0  ;;  %v9259_v33 = vadd.f32 %v9258_v0, %v6634_v61  ;;  %v9262_v63 = vadd.f32 %v6365_v54, %v15755_v12  ;;  %v6367_v30 = vpop.f32.mrb[95].mxu1  ;;  %7196 = vmatpush1.bf16.msra.mxu1 %v10508_v42  ;;  %v10556_v4 = vld [vmem:[%s11326_s19 + $0x818] ss:$24 sps:$4 sm:$0xff]   ;;  %v10564_v1 = vld [vmem:[%s11326_s19 + $0x84c] ss:$24 sps:$4 sm:$0xff]  }
 0x5fa   : > { %v6640_v45 = vpop.f32.mrb[95].mxu0  ;;  %8015 = vmatpush1.bf16.msra.mxu0 %v10511_v22  ;;  %v9261_v49 = vadd.f32 %v9260_v26, %v6636_v35  ;;  %v9264_v48 = vadd.f32 %v6367_v30, %v15761_v24  ;;  %7197 = vmatprep.subr.bf16.mxu1 %v10516_v50  ;;  %v10520_v24 = vld [vmem:[%s11326_s19 + $0x6f8] ss:$24 sps:$4 sm:$0xff]   ;;  %v10567_v62 = vld [vmem:[%s11326_s19 + $0x854] ss:$24 sps:$4 sm:$0xff]   ;;  %v10647_v42 = vld [vmem:[#allocation2 + $0x130] sm:$0xff] }
 0x5fb   : > { %8016 = vmatprep.subr.bf16.mxu0 %v10519_v40  ;;  %8557 = vst [vmem:[%s11335_s29 + $0x8a0] sm:$0xff] %v9259_v33  ;;  %v9263_v12 = vadd.f32 %v9262_v63, %v6638_v59  ;;  %6969 = vmatmul.mubr.bf16.gmra.mrb[104].mxu1 %v10639_v57  ;;  %v10559_v44 = vld [vmem:[%s11326_s19 + $0x820] ss:$24 sps:$4 sm:$0xff]   ;;  %v10565_v58 = vld [vmem:[%s11326_s19 + $0x850] ss:$24 sps:$4 sm:$0xff]  }
 0x5fc   : > { %7788 = vmatmul.mubr.bf16.gmra.mrb[104].mxu0 %v10639_v57  ;;  %8558 = vst [vmem:[%s11335_s29 + $0x8a8] sm:$0xff] %v9261_v49  ;;  %v9265_v52 = vadd.f32 %v9264_v48, %v6640_v45  ;;  %6978 = vmatprep.mubr.bf16.mxu1 %v10640_v20  ;;  %v10570_v6 = vld [vmem:[%s11326_s19 + $0x87c] ss:$24 sps:$4 sm:$0xff]   ;;  %v10568_v41 = vld [vmem:[%s11326_s19 + $0x878] ss:$24 sps:$4 sm:$0xff]   ;;  %v10651_v30 = vld [vmem:[#allocation2 + $0x190] sm:$0xff] }
 0x5fd   : > { %7797 = vmatprep.mubr.bf16.mxu0 %v10640_v20  ;;  %8563 = vst [vmem:[%s11335_s29 + $0x8d0] sm:$0xff] %v9263_v12  ;;  %7198 = vmatpush1.bf16.msra.mxu1 %v10514_v31  ;;  %v10573_v8 = vld [vmem:[%s11326_s19 + $0x884] ss:$24 sps:$4 sm:$0xff]   ;;  %v10571_v61 = vld [vmem:[%s11326_s19 + $0x880] ss:$24 sps:$4 sm:$0xff]   ;;  %v10650_v59 = vld [vmem:[#allocation2 + $0x198] sm:$0xff] }
 0x5fe   : > { %8017 = vmatpush1.bf16.msra.mxu0 %v10517_v23  ;;  %8564 = vst [vmem:[%s11335_s29 + $0x8d8] sm:$0xff] %v9265_v52  ;;  %7199 = vmatprep.subr.bf16.mxu1 %v10522_v37  ;;  %v10648_v22 = vld [vmem:[#allocation2 + $0x168] sm:$0xff]  ;;  %v10576_v50 = vld [vmem:[%s11326_s19 + $0x8ac] ss:$24 sps:$4 sm:$0xff]   ;;  %v10577_v34 = vld [vmem:[%s11326_s19 + $0x8b0] ss:$24 sps:$4 sm:$0xff]  }
 0x5ff   : > { %8018 = vmatprep.subr.bf16.mxu0 %v10525_v55  ;;  %v10579_v40 = vld [vmem:[%s11326_s19 + $0x8b4] ss:$24 sps:$4 sm:$0xff]   ;;  %v10574_v0 = vld [vmem:[%s11326_s19 + $0x8a8] ss:$24 sps:$4 sm:$0xff]   ;;  %v10585_v26 = vld [vmem:[%s11326_s19 + $0x8e4] ss:$24 sps:$4 sm:$0xff]  }
 0x600   : > { %v10582_v35 = vld [vmem:[%s11326_s19 + $0x8dc] ss:$24 sps:$4 sm:$0xff]   ;;  %v10580_v33 = vld [vmem:[%s11326_s19 + $0x8d8] ss:$24 sps:$4 sm:$0xff]   ;;  %v10655_v49 = vld [vmem:[#allocation2 + $0x1f0] sm:$0xff] }
 0x601   : > { %7200 = vmatpush1.bf16.msra.mxu1 %v10520_v24  ;;  %v10649_v54 = vld [vmem:[#allocation2 + $0x160] sm:$0xff]  ;;  %v10652_v45 = vld [vmem:[#allocation2 + $0x1c8] sm:$0xff]  ;;  %v10654_v23 = vld [vmem:[#allocation2 + $0x1f8] sm:$0xff] }
 0x602   : > { %8019 = vmatpush1.bf16.msra.mxu0 %v10523_v46  ;;  %7201 = vmatprep.subr.bf16.mxu1 %v10528_v7  ;;  %v10583_v63 = vld [vmem:[%s11326_s19 + $0x8e0] ss:$24 sps:$4 sm:$0xff]   ;;  %v10658_v55 = vld [vmem:[#allocation2 + $0x258] sm:$0xff]  ;;  %v10659_v12 = vld [vmem:[#allocation2 + $0x250] sm:$0xff] }
 0x603   : > { %8020 = vmatprep.subr.bf16.mxu0 %v10531_v56  ;;  %6979 = vmatmul.mubr.bf16.gmra.mrb[108].mxu1 %v10641_v43  ;;  %v10653_v31 = vld [vmem:[#allocation2 + $0x1c0] sm:$0xff]  ;;  %v10656_v48 = vld [vmem:[#allocation2 + $0x228] sm:$0xff]  ;;  %v10662_v20 = vld [vmem:[#allocation2 + $0x2b8] sm:$0xff] }
 0x604   : > { %7798 = vmatmul.mubr.bf16.gmra.mrb[108].mxu0 %v10641_v43  ;;  %6988 = vmatprep.mubr.bf16.mxu1 %v10642_v21  ;;  %v10657_v37 = vld [vmem:[#allocation2 + $0x220] sm:$0xff]  ;;  %v10660_v57 = vld [vmem:[#allocation2 + $0x288] sm:$0xff]  ;;  %v10663_v24 = vld [vmem:[#allocation2 + $0x2b0] sm:$0xff] }
 0x605   : > { %7807 = vmatprep.mubr.bf16.mxu0 %v10642_v21  ;;  %7202 = vmatpush1.bf16.msra.mxu1 %v10526_v60  ;;  %v10661_v52 = vld [vmem:[#allocation2 + $0x280] sm:$0xff]  ;;  %v10664_v46 = vld [vmem:[#allocation2 + $0x2e8] sm:$0xff]  ;;  %v10666_v56 = vld [vmem:[#allocation2 + $0x318] sm:$0xff] }
 0x606   : > { %8021 = vmatpush1.bf16.msra.mxu0 %v10529_v38  ;;  %7203 = vmatprep.subr.bf16.mxu1 %v10534_v28  ;;  %v10665_v7 = vld [vmem:[#allocation2 + $0x2e0] sm:$0xff]  ;;  %v10667_v60 = vld [vmem:[#allocation2 + $0x310] sm:$0xff]  ;;  %v10668_v38 = vld [vmem:[#allocation2 + $0x348] sm:$0xff] }
 0x607   : > { %8022 = vmatprep.subr.bf16.mxu0 %v10537_v29  ;;  %v10669_v28 = vld [vmem:[#allocation2 + $0x340] sm:$0xff]  ;;  %v10670_v29 = vld [vmem:[#allocation2 + $0x378] sm:$0xff]  ;;  %v10671_v43 = vld [vmem:[#allocation2 + $0x370] sm:$0xff] }
 0x608   : > { %v10672_v21 = vld [vmem:[#allocation2 + $0x3a8] sm:$0xff] }
 0x609   : > { %7204 = vmatpush1.bf16.msra.mxu1 %v10532_v47  ;;  %v10673_v47 = vld [vmem:[#allocation2 + $0x3a0] sm:$0xff] }
 0x60a   : > { %8023 = vmatpush1.bf16.msra.mxu0 %v10535_v3  ;;  %7205 = vmatprep.subr.bf16.mxu1 %v10540_v11  ;;  %v10674_v3 = vld [vmem:[#allocation2 + $0x3d8] sm:$0xff]  ;;  %v10675_v11 = vld [vmem:[#allocation2 + $0x3d0] sm:$0xff] }
 0x60b   : > { %8024 = vmatprep.subr.bf16.mxu0 %v10543_v36  ;;  %6989 = vmatmul.mubr.bf16.gmra.mrb[112].mxu1 %v10643_v39  ;;  %v10676_v36 = vld [vmem:[#allocation2 + $0x408] sm:$0xff] }
 0x60c   : > { %7808 = vmatmul.mubr.bf16.gmra.mrb[112].mxu0 %v10643_v39  ;;  %6998 = vmatprep.mubr.bf16.mxu1 %v10644_v18  ;;  %v10681_v39 = vld [vmem:[#allocation2 + $0x460] sm:$0xff] }
 0x60d   : > { %7817 = vmatprep.mubr.bf16.mxu0 %v10644_v18  ;;  %7206 = vmatpush1.bf16.msra.mxu1 %v10538_v19  ;;  %v10677_v19 = vld [vmem:[#allocation2 + $0x400] sm:$0xff]  ;;  %v10682_v18 = vld [vmem:[#allocation2 + $0x28] sm:$0xff] }
 0x60e   : > { %8025 = vmatpush1.bf16.msra.mxu0 %v10541_v32  ;;  %7207 = vmatprep.subr.bf16.mxu1 %v10546_v2  ;;  %v10678_v32 = vld [vmem:[#allocation2 + $0x438] sm:$0xff]  ;;  %v10679_v2 = vld [vmem:[#allocation2 + $0x430] sm:$0xff] }
 0x60f   : > { %8026 = vmatprep.subr.bf16.mxu0 %v10549_v15  ;;  %v10680_v15 = vld [vmem:[#allocation2 + $0x468] sm:$0xff] }
 0x611   : > { %7208 = vmatpush1.bf16.msra.mxu1 %v10544_v10  ;;  %v10683_v10 = vld [vmem:[#allocation2 + $0x20] sm:$0xff] }
 0x612   : > { %8027 = vmatpush1.bf16.msra.mxu0 %v10547_v16  ;;  %7209 = vmatprep.subr.bf16.mxu1 %v10552_v53  ;;  %v10684_v16 = vld [vmem:[#allocation2 + $0x58] sm:$0xff]  ;;  %v10685_v53 = vld [vmem:[#allocation2 + $0x50] sm:$0xff] }
 0x613   : > { %8028 = vmatprep.subr.bf16.mxu0 %v10555_v14  ;;  %6999 = vmatmul.mubr.bf16.gmra.mrb[116].mxu1 %v10645_v13  ;;  %v10686_v14 = vld [vmem:[#allocation2 + $0x88] sm:$0xff] }
 0x614   : > { %7818 = vmatmul.mubr.bf16.gmra.mrb[116].mxu0 %v10645_v13  ;;  %7008 = vmatprep.mubr.bf16.mxu1 %v10646_v9  ;;  %v10691_v13 = vld [vmem:[#allocation2 + $0xe0] sm:$0xff] }
 0x615   : > { %7827 = vmatprep.mubr.bf16.mxu0 %v10646_v9  ;;  %7210 = vmatpush1.bf16.msra.mxu1 %v10550_v51  ;;  %v10687_v51 = vld [vmem:[#allocation2 + $0x80] sm:$0xff]  ;;  %v10692_v9 = vld [vmem:[#allocation2 + $0x118] sm:$0xff] }
 0x616   : > { %8029 = vmatpush1.bf16.msra.mxu0 %v10553_v25  ;;  %7211 = vmatprep.subr.bf16.mxu1 %v10558_v5  ;;  %v10688_v25 = vld [vmem:[#allocation2 + $0xb8] sm:$0xff]  ;;  %v10689_v5 = vld [vmem:[#allocation2 + $0xb0] sm:$0xff] }
 0x617   : > { %8030 = vmatprep.subr.bf16.mxu0 %v10561_v17  ;;  %v10690_v17 = vld [vmem:[#allocation2 + $0xe8] sm:$0xff] }
 0x619   : > { %7212 = vmatpush1.bf16.msra.mxu1 %v10556_v4  ;;  %v10693_v4 = vld [vmem:[#allocation2 + $0x110] sm:$0xff] }
 0x61a   : > { %8031 = vmatpush1.bf16.msra.mxu0 %v10559_v44  ;;  %7213 = vmatprep.subr.bf16.mxu1 %v10564_v1  ;;  %v10694_v44 = vld [vmem:[#allocation2 + $0x148] sm:$0xff]  ;;  %v10695_v1 = vld [vmem:[#allocation2 + $0x140] sm:$0xff] }
 0x61b   : > { %8032 = vmatprep.subr.bf16.mxu0 %v10567_v62  ;;  %7009 = vmatmul.mubr.bf16.gmra.mrb[120].mxu1 %v10647_v42  ;;  %v10696_v62 = vld [vmem:[#allocation2 + $0x178] sm:$0xff] }
 0x61c   : > { %7828 = vmatmul.mubr.bf16.gmra.mrb[120].mxu0 %v10647_v42  ;;  %7018 = vmatprep.mubr.bf16.mxu1 %v10648_v22  ;;  %v10701_v42 = vld [vmem:[#allocation2 + $0x1d0] sm:$0xff] }
 0x61d   : > { %7837 = vmatprep.mubr.bf16.mxu0 %v10648_v22  ;;  %7214 = vmatpush1.bf16.msra.mxu1 %v10562_v27  ;;  %v10697_v27 = vld [vmem:[#allocation2 + $0x170] sm:$0xff]  ;;  %v10702_v22 = vld [vmem:[#allocation2 + $0x208] sm:$0xff] }
 0x61e   : > { %8033 = vmatpush1.bf16.msra.mxu0 %v10565_v58  ;;  %7215 = vmatprep.subr.bf16.mxu1 %v10570_v6  ;;  %v10698_v58 = vld [vmem:[#allocation2 + $0x1a8] sm:$0xff]  ;;  %v10699_v6 = vld [vmem:[#allocation2 + $0x1a0] sm:$0xff] }
 0x61f   : > { %8034 = vmatprep.subr.bf16.mxu0 %v10573_v8  ;;  %v10700_v8 = vld [vmem:[#allocation2 + $0x1d8] sm:$0xff] }
 0x621   : > { %7216 = vmatpush1.bf16.msra.mxu1 %v10568_v41  ;;  %v10703_v41 = vld [vmem:[#allocation2 + $0x200] sm:$0xff] }
 0x622   : > { %8035 = vmatpush1.bf16.msra.mxu0 %v10571_v61  ;;  %7217 = vmatprep.subr.bf16.mxu1 %v10576_v50  ;;  %v10704_v61 = vld [vmem:[#allocation2 + $0x238] sm:$0xff]  ;;  %v10705_v50 = vld [vmem:[#allocation2 + $0x230] sm:$0xff] }
 0x623   : > { %8036 = vmatprep.subr.bf16.mxu0 %v10579_v40  ;;  %7019 = vmatmul.mubr.bf16.gmra.mrb[124].mxu1 %v10649_v54  ;;  %v10706_v40 = vld [vmem:[#allocation2 + $0x268] sm:$0xff] }
 0x624   : > { %7838 = vmatmul.mubr.bf16.gmra.mrb[124].mxu0 %v10649_v54  ;;  %7028 = vmatprep.mubr.bf16.mxu1 %v10650_v59  ;;  %v10711_v54 = vld [vmem:[#allocation2 + $0x2c0] sm:$0xff] }
 0x625   : > { %7847 = vmatprep.mubr.bf16.mxu0 %v10650_v59  ;;  %7218 = vmatpush1.bf16.msra.mxu1 %v10574_v0  ;;  %v10707_v0 = vld [vmem:[#allocation2 + $0x260] sm:$0xff]  ;;  %v10712_v59 = vld [vmem:[#allocation2 + $0x2f8] sm:$0xff] }
 0x626   : > { %8037 = vmatpush1.bf16.msra.mxu0 %v10577_v34  ;;  %7219 = vmatprep.subr.bf16.mxu1 %v10582_v35  ;;  %v10708_v34 = vld [vmem:[#allocation2 + $0x298] sm:$0xff]  ;;  %v10709_v35 = vld [vmem:[#allocation2 + $0x290] sm:$0xff] }
 0x627   : > { %8038 = vmatprep.subr.bf16.mxu0 %v10585_v26  ;;  %v10710_v26 = vld [vmem:[#allocation2 + $0x2c8] sm:$0xff] }
 0x629   : > { %7220 = vmatpush1.bf16.msra.mxu1 %v10580_v33  ;;  %v10713_v33 = vld [vmem:[#allocation2 + $0x2f0] sm:$0xff] }
 0x62a   : > { %8039 = vmatpush1.bf16.msra.mxu0 %v10583_v63  ;;  %v10714_v63 = vld [vmem:[#allocation2 + $0x328] sm:$0xff] }
 0x62b   : > { %7029 = vmatmul.mubr.bf16.gmra.mrb[128].mxu1 %v10651_v30 }
 0x62c   : > { %7848 = vmatmul.mubr.bf16.gmra.mrb[128].mxu0 %v10651_v30  ;;  %7038 = vmatprep.mubr.bf16.mxu1 %v10652_v45  ;;  %v10715_v30 = vld [vmem:[#allocation2 + $0x320] sm:$0xff] }
 0x62d   : > { %7857 = vmatprep.mubr.bf16.mxu0 %v10652_v45  ;;  %v10716_v45 = vld [vmem:[#allocation2 + $0x358] sm:$0xff] }
 0x633   : > { %7039 = vmatmul.mubr.bf16.gmra.mrb[132].mxu1 %v10653_v31 }
 0x634   : > { %7858 = vmatmul.mubr.bf16.gmra.mrb[132].mxu0 %v10653_v31  ;;  %7048 = vmatprep.mubr.bf16.mxu1 %v10654_v23  ;;  %v10717_v31 = vld [vmem:[#allocation2 + $0x350] sm:$0xff] }
 0x635   : > { %7867 = vmatprep.mubr.bf16.mxu0 %v10654_v23  ;;  %v10718_v23 = vld [vmem:[#allocation2 + $0x388] sm:$0xff] }
 0x63b   : > { %7049 = vmatmul.mubr.bf16.gmra.mrb[136].mxu1 %v10655_v49 }
 0x63c   : > { %7868 = vmatmul.mubr.bf16.gmra.mrb[136].mxu0 %v10655_v49  ;;  %7058 = vmatprep.mubr.bf16.mxu1 %v10656_v48  ;;  %v10719_v49 = vld [vmem:[#allocation2 + $0x380] sm:$0xff] }
 0x63d   : > { %7877 = vmatprep.mubr.bf16.mxu0 %v10656_v48  ;;  %v10720_v48 = vld [vmem:[#allocation2 + $0x3b8] sm:$0xff] }
 0x643   : > { %7059 = vmatmul.mubr.bf16.gmra.mrb[140].mxu1 %v10657_v37 }
 0x644   : > { %7878 = vmatmul.mubr.bf16.gmra.mrb[140].mxu0 %v10657_v37  ;;  %7068 = vmatprep.mubr.bf16.mxu1 %v10658_v55  ;;  %v10721_v37 = vld [vmem:[#allocation2 + $0x3b0] sm:$0xff] }
 0x645   : > { %7887 = vmatprep.mubr.bf16.mxu0 %v10658_v55  ;;  %v10722_v55 = vld [vmem:[#allocation2 + $0x3e8] sm:$0xff] }
 0x64b   : > { %7069 = vmatmul.mubr.bf16.gmra.mrb[144].mxu1 %v10659_v12 }
 0x64c   : > { %7888 = vmatmul.mubr.bf16.gmra.mrb[144].mxu0 %v10659_v12  ;;  %7078 = vmatprep.mubr.bf16.mxu1 %v10660_v57  ;;  %v10723_v12 = vld [vmem:[#allocation2 + $0x3e0] sm:$0xff] }
 0x64d   : > { %7897 = vmatprep.mubr.bf16.mxu0 %v10660_v57  ;;  %v10724_v57 = vld [vmem:[#allocation2 + $0x418] sm:$0xff] }
 0x653   : > { %7079 = vmatmul.mubr.bf16.gmra.mrb[148].mxu1 %v10661_v52 }
 0x654   : > { %7898 = vmatmul.mubr.bf16.gmra.mrb[148].mxu0 %v10661_v52  ;;  %7088 = vmatprep.mubr.bf16.mxu1 %v10662_v20  ;;  %v10725_v52 = vld [vmem:[#allocation2 + $0x410] sm:$0xff] }
 0x655   : > { %7907 = vmatprep.mubr.bf16.mxu0 %v10662_v20  ;;  %v10726_v20 = vld [vmem:[#allocation2 + $0x448] sm:$0xff] }
 0x65b   : > { %7089 = vmatmul.mubr.bf16.gmra.mrb[152].mxu1 %v10663_v24 }
 0x65c   : > { %7908 = vmatmul.mubr.bf16.gmra.mrb[152].mxu0 %v10663_v24  ;;  %7098 = vmatprep.mubr.bf16.mxu1 %v10664_v46  ;;  %v10727_v24 = vld [vmem:[#allocation2 + $0x440] sm:$0xff] }
 0x65d   : > { %7917 = vmatprep.mubr.bf16.mxu0 %v10664_v46  ;;  %v10728_v46 = vld [vmem:[#allocation2 + $0x478] sm:$0xff] }
 0x663   : > { %7099 = vmatmul.mubr.bf16.gmra.mrb[156].mxu1 %v10665_v7 }
 0x664   : > { %7918 = vmatmul.mubr.bf16.gmra.mrb[156].mxu0 %v10665_v7  ;;  %7108 = vmatprep.mubr.bf16.mxu1 %v10666_v56  ;;  %v10729_v7 = vld [vmem:[#allocation2 + $0x470] sm:$0xff] }
 0x665   : > { %7927 = vmatprep.mubr.bf16.mxu0 %v10666_v56  ;;  %v18175_v56 = vld [vmem:[#allocation299_spill] sm:$0xff] }
 0x66b   : > { %7109 = vmatmul.mubr.bf16.gmra.mrb[160].mxu1 %v10667_v60 }
 0x66c   : > { %7928 = vmatmul.mubr.bf16.gmra.mrb[160].mxu0 %v10667_v60  ;;  %7118 = vmatprep.mubr.bf16.mxu1 %v10668_v38  ;;  %v4364_v60 = vsub.s32 2, %v18175_v56 }
 0x66d   : > { %7937 = vmatprep.mubr.bf16.mxu0 %v10668_v38  ;;  %v4372_v38 = vsub.s32 4, %v18175_v56 }
 0x673   : > { %7119 = vmatmul.mubr.bf16.gmra.mrb[164].mxu1 %v10669_v28 }
 0x674   : > { %7938 = vmatmul.mubr.bf16.gmra.mrb[164].mxu0 %v10669_v28  ;;  %7128 = vmatprep.mubr.bf16.mxu1 %v10670_v29  ;;  %v4368_v28 = vsub.s32 3, %v18175_v56 }
 0x675   : > { %7947 = vmatprep.mubr.bf16.mxu0 %v10670_v29  ;;  %v4376_v29 = vsub.s32 5, %v18175_v56 }
 0x67b   : > { %7129 = vmatmul.mubr.bf16.gmra.mrb[168].mxu1 %v10671_v43 }
 0x67c   : > { %7948 = vmatmul.mubr.bf16.gmra.mrb[168].mxu0 %v10671_v43  ;;  %7138 = vmatprep.mubr.bf16.mxu1 %v10672_v21  ;;  %v10730_v43 = vld [vmem:[%s11333_s8] sm:$0x3f] }
 0x67d   : > { %7957 = vmatprep.mubr.bf16.mxu0 %v10672_v21  ;;  %v16116_v21 = vrot.slane %v10730_v43, %v4364_v60 }
 0x683   : > { %7139 = vmatmul.mubr.bf16.gmra.mrb[172].mxu1 %v10673_v47 }
 0x684   : > { %7958 = vmatmul.mubr.bf16.gmra.mrb[172].mxu0 %v10673_v47  ;;  %7148 = vmatprep.mubr.bf16.mxu1 %v10674_v3  ;;  %v16118_v47 = vrot.slane %v10730_v43, %v4372_v38 }
 0x685   : > { %7967 = vmatprep.mubr.bf16.mxu0 %v10674_v3  ;;  %v16120_v3 = vrot.slane %v10730_v43, %v4368_v28 }
 0x68b   : > { %7149 = vmatmul.mubr.bf16.gmra.mrb[176].mxu1 %v10675_v11 }
 0x68c   : > { %7968 = vmatmul.mubr.bf16.gmra.mrb[176].mxu0 %v10675_v11  ;;  %7158 = vmatprep.mubr.bf16.mxu1 %v10676_v36  ;;  %v16122_v11 = vrot.slane %v10730_v43, %v4376_v29 }
 0x68d   : > { %7977 = vmatprep.mubr.bf16.mxu0 %v10676_v36 }
 0x693   : > { %7159 = vmatmul.mubr.bf16.gmra.mrb[180].mxu1 %v10677_v19 }
 0x694   : > { %7978 = vmatmul.mubr.bf16.gmra.mrb[180].mxu0 %v10677_v19  ;;  %7168 = vmatprep.mubr.bf16.mxu1 %v10678_v32 }
 0x695   : > { %7987 = vmatprep.mubr.bf16.mxu0 %v10678_v32 }
 0x69b   : > { %7169 = vmatmul.mubr.bf16.gmra.mrb[184].mxu1 %v10679_v2 }
 0x69c   : > { %7988 = vmatmul.mubr.bf16.gmra.mrb[184].mxu0 %v10679_v2  ;;  %7178 = vmatprep.mubr.bf16.mxu1 %v10680_v15 }
 0x69d   : > { %7997 = vmatprep.mubr.bf16.mxu0 %v10680_v15 }
 0x6a3   : > { %7179 = vmatmul.mubr.bf16.gmra.mrb[188].mxu1 %v10681_v39 }
 0x6a4   : > { %7998 = vmatmul.mubr.bf16.gmra.mrb[188].mxu0 %v10681_v39  ;;  %7221 = vmatprep.mubr.bf16.mxu1 %v10682_v18 }
 0x6a5   : > { %8040 = vmatprep.mubr.bf16.mxu0 %v10682_v18 }
 0x6ab   : > { %7222 = vmatmul.mubr.bf16.vlgmr.msra.gmra.mrb[96].mxu1 %v10683_v10 }
 0x6ac   : > { %8041 = vmatmul.mubr.bf16.vlgmr.msra.gmra.mrb[96].mxu0 %v10683_v10  ;;  %7231 = vmatprep.mubr.bf16.mxu1 %v10684_v16 }
 0x6ad   : > { %8050 = vmatprep.mubr.bf16.mxu0 %v10684_v16 }
 0x6b3   : > { %7232 = vmatmul.mubr.bf16.gmra.mrb[100].mxu1 %v10685_v53 }
 0x6b4   : > { %8051 = vmatmul.mubr.bf16.gmra.mrb[100].mxu0 %v10685_v53  ;;  %7241 = vmatprep.mubr.bf16.mxu1 %v10686_v14 }
 0x6b5   : > { %8060 = vmatprep.mubr.bf16.mxu0 %v10686_v14 }
 0x6bb   : > { %7242 = vmatmul.mubr.bf16.gmra.mrb[104].mxu1 %v10687_v51 }
 0x6bc   : > { %8061 = vmatmul.mubr.bf16.gmra.mrb[104].mxu0 %v10687_v51  ;;  %7251 = vmatprep.mubr.bf16.mxu1 %v10688_v25 }
 0x6bd   : > { %8070 = vmatprep.mubr.bf16.mxu0 %v10688_v25 }
 0x6c3   : > { %7252 = vmatmul.mubr.bf16.gmra.mrb[108].mxu1 %v10689_v5 }
 0x6c4   : > { %8071 = vmatmul.mubr.bf16.gmra.mrb[108].mxu0 %v10689_v5  ;;  %7261 = vmatprep.mubr.bf16.mxu1 %v10690_v17 }
 0x6c5   : > { %8080 = vmatprep.mubr.bf16.mxu0 %v10690_v17 }
 0x6cb   : > { %7262 = vmatmul.mubr.bf16.gmra.mrb[112].mxu1 %v10691_v13 }
 0x6cc   : > { %8081 = vmatmul.mubr.bf16.gmra.mrb[112].mxu0 %v10691_v13  ;;  %7271 = vmatprep.mubr.bf16.mxu1 %v10692_v9 }
 0x6cd   : > { %8090 = vmatprep.mubr.bf16.mxu0 %v10692_v9 }
 0x6d3   : > { %7272 = vmatmul.mubr.bf16.gmra.mrb[116].mxu1 %v10693_v4 }
 0x6d4   : > { %8091 = vmatmul.mubr.bf16.gmra.mrb[116].mxu0 %v10693_v4  ;;  %7281 = vmatprep.mubr.bf16.mxu1 %v10694_v44 }
 0x6d5   : > { %8100 = vmatprep.mubr.bf16.mxu0 %v10694_v44 }
 0x6db   : > { %7282 = vmatmul.mubr.bf16.gmra.mrb[120].mxu1 %v10695_v1 }
 0x6dc   : > { %8101 = vmatmul.mubr.bf16.gmra.mrb[120].mxu0 %v10695_v1  ;;  %7291 = vmatprep.mubr.bf16.mxu1 %v10696_v62 }
 0x6dd   : > { %8110 = vmatprep.mubr.bf16.mxu0 %v10696_v62 }
 0x6e3   : > { %7292 = vmatmul.mubr.bf16.gmra.mrb[124].mxu1 %v10697_v27 }
 0x6e4   : > { %8111 = vmatmul.mubr.bf16.gmra.mrb[124].mxu0 %v10697_v27  ;;  %7301 = vmatprep.mubr.bf16.mxu1 %v10698_v58 }
 0x6e5   : > { %8120 = vmatprep.mubr.bf16.mxu0 %v10698_v58 }
 0x6eb   : > { %7302 = vmatmul.mubr.bf16.gmra.mrb[128].mxu1 %v10699_v6 }
 0x6ec   : > { %8121 = vmatmul.mubr.bf16.gmra.mrb[128].mxu0 %v10699_v6  ;;  %7311 = vmatprep.mubr.bf16.mxu1 %v10700_v8 }
 0x6ed   : > { %8130 = vmatprep.mubr.bf16.mxu0 %v10700_v8 }
 0x6f3   : > { %7312 = vmatmul.mubr.bf16.gmra.mrb[132].mxu1 %v10701_v42 }
 0x6f4   : > { %8131 = vmatmul.mubr.bf16.gmra.mrb[132].mxu0 %v10701_v42  ;;  %7321 = vmatprep.mubr.bf16.mxu1 %v10702_v22 }
 0x6f5   : > { %8140 = vmatprep.mubr.bf16.mxu0 %v10702_v22 }
 0x6fb   : > { %7322 = vmatmul.mubr.bf16.gmra.mrb[136].mxu1 %v10703_v41 }
 0x6fc   : > { %8141 = vmatmul.mubr.bf16.gmra.mrb[136].mxu0 %v10703_v41  ;;  %7331 = vmatprep.mubr.bf16.mxu1 %v10704_v61 }
 0x6fd   : > { %8150 = vmatprep.mubr.bf16.mxu0 %v10704_v61 }
 0x703   : > { %7332 = vmatmul.mubr.bf16.gmra.mrb[140].mxu1 %v10705_v50 }
 0x704   : > { %8151 = vmatmul.mubr.bf16.gmra.mrb[140].mxu0 %v10705_v50  ;;  %7341 = vmatprep.mubr.bf16.mxu1 %v10706_v40 }
 0x705   : > { %8160 = vmatprep.mubr.bf16.mxu0 %v10706_v40 }
 0x70b   : > { %7342 = vmatmul.mubr.bf16.gmra.mrb[144].mxu1 %v10707_v0 }
 0x70c   : > { %8161 = vmatmul.mubr.bf16.gmra.mrb[144].mxu0 %v10707_v0  ;;  %7351 = vmatprep.mubr.bf16.mxu1 %v10708_v34 }
 0x70d   : > { %8170 = vmatprep.mubr.bf16.mxu0 %v10708_v34 }
 0x713   : > { %7352 = vmatmul.mubr.bf16.gmra.mrb[148].mxu1 %v10709_v35 }
 0x714   : > { %8171 = vmatmul.mubr.bf16.gmra.mrb[148].mxu0 %v10709_v35  ;;  %7361 = vmatprep.mubr.bf16.mxu1 %v10710_v26 }
 0x715   : > { %8180 = vmatprep.mubr.bf16.mxu0 %v10710_v26 }
 0x71b   : > { %7362 = vmatmul.mubr.bf16.gmra.mrb[152].mxu1 %v10711_v54 }
 0x71c   : > { %8181 = vmatmul.mubr.bf16.gmra.mrb[152].mxu0 %v10711_v54  ;;  %7371 = vmatprep.mubr.bf16.mxu1 %v10712_v59 }
 0x71d   : > { %8190 = vmatprep.mubr.bf16.mxu0 %v10712_v59 }
 0x723   : > { %7372 = vmatmul.mubr.bf16.gmra.mrb[156].mxu1 %v10713_v33 }
 0x724   : > { %8191 = vmatmul.mubr.bf16.gmra.mrb[156].mxu0 %v10713_v33  ;;  %7381 = vmatprep.mubr.bf16.mxu1 %v10714_v63 }
 0x725   : > { %8200 = vmatprep.mubr.bf16.mxu0 %v10714_v63 }
 0x72b   : > { %7382 = vmatmul.mubr.bf16.gmra.mrb[160].mxu1 %v10715_v30 }
 0x72c   : > { %8201 = vmatmul.mubr.bf16.gmra.mrb[160].mxu0 %v10715_v30  ;;  %7391 = vmatprep.mubr.bf16.mxu1 %v10716_v45 }
 0x72d   : > { %8210 = vmatprep.mubr.bf16.mxu0 %v10716_v45 }
 0x733   : > { %7392 = vmatmul.mubr.bf16.gmra.mrb[164].mxu1 %v10717_v31 }
 0x734   : > { %8211 = vmatmul.mubr.bf16.gmra.mrb[164].mxu0 %v10717_v31  ;;  %7401 = vmatprep.mubr.bf16.mxu1 %v10718_v23 }
 0x735   : > { %8220 = vmatprep.mubr.bf16.mxu0 %v10718_v23 }
 0x73b   : > { %7402 = vmatmul.mubr.bf16.gmra.mrb[168].mxu1 %v10719_v49 }
 0x73c   : > { %8221 = vmatmul.mubr.bf16.gmra.mrb[168].mxu0 %v10719_v49  ;;  %7411 = vmatprep.mubr.bf16.mxu1 %v10720_v48 }
 0x73d   : > { %8230 = vmatprep.mubr.bf16.mxu0 %v10720_v48 }
 0x743   : > { %7412 = vmatmul.mubr.bf16.gmra.mrb[172].mxu1 %v10721_v37 }
 0x744   : > { %8231 = vmatmul.mubr.bf16.gmra.mrb[172].mxu0 %v10721_v37  ;;  %7421 = vmatprep.mubr.bf16.mxu1 %v10722_v55 }
 0x745   : > { %8240 = vmatprep.mubr.bf16.mxu0 %v10722_v55 }
 0x74b   : > { %7422 = vmatmul.mubr.bf16.gmra.mrb[176].mxu1 %v10723_v12 }
 0x74c   : > { %8241 = vmatmul.mubr.bf16.gmra.mrb[176].mxu0 %v10723_v12  ;;  %7431 = vmatprep.mubr.bf16.mxu1 %v10724_v57 }
 0x74d   : > { %8250 = vmatprep.mubr.bf16.mxu0 %v10724_v57 }
 0x753   : > { %7432 = vmatmul.mubr.bf16.gmra.mrb[180].mxu1 %v10725_v52 }
 0x754   : > { %8251 = vmatmul.mubr.bf16.gmra.mrb[180].mxu0 %v10725_v52  ;;  %7441 = vmatprep.mubr.bf16.mxu1 %v10726_v20 }
 0x755   : > { %8260 = vmatprep.mubr.bf16.mxu0 %v10726_v20 }
 0x75b   : > { %7442 = vmatmul.mubr.bf16.gmra.mrb[184].mxu1 %v10727_v24 }
 0x75c   : > { %8261 = vmatmul.mubr.bf16.gmra.mrb[184].mxu0 %v10727_v24  ;;  %7451 = vmatprep.mubr.bf16.mxu1 %v10728_v46 }
 0x75d   : > { %8270 = vmatprep.mubr.bf16.mxu0 %v10728_v46 }
 0x763   : > { %7452 = vmatmul.mubr.bf16.gmra.mrb[188].mxu1 %v10729_v7 }
 0x764   : > { %8271 = vmatmul.mubr.bf16.gmra.mrb[188].mxu0 %v10729_v7 }
 0x77e   : > { %v7223_v36 = vpop.f32.mrb[96].mxu1 }
 0x77f   : > { %v8042_v19 = vpop.f32.mrb[96].mxu0  ;;  %v9266_v32 = vadd.f32 %v7223_v36, %v16116_v21  ;;  %v7225_v15 = vpop.f32.mrb[97].mxu1 }
 0x780   : > { %v9362_v2 = vadd.f32 %v8042_v19, %v16118_v47  ;;  %v8044_v39 = vpop.f32.mrb[97].mxu0  ;;  %v9267_v18 = vadd.f32 %v7225_v15, %v16120_v3  ;;  %v7227_v16 = vpop.f32.mrb[98].mxu1 }
 0x781   : > { %v9363_v10 = vadd.f32 %v8044_v39, %v16122_v11  ;;  %v8046_v53 = vpop.f32.mrb[98].mxu0  ;;  %8283 = vst [vmem:[%s11335_s29 + $0x10] sm:$0xff] %v9266_v32  ;;  %v9268_v14 = vadd.f32 %v7227_v16, %v16116_v21  ;;  %v7229_v25 = vpop.f32.mrb[99].mxu1 }
 0x782   : > { %8285 = vst [vmem:[%s11335_s29 + $0x20] sm:$0xff] %v9362_v2  ;;  %v9364_v51 = vadd.f32 %v8046_v53, %v16118_v47  ;;  %v8048_v5 = vpop.f32.mrb[99].mxu0  ;;  %8284 = vst [vmem:[%s11335_s29 + $0x18] sm:$0xff] %v9267_v18  ;;  %v9269_v17 = vadd.f32 %v7229_v25, %v16120_v3 }
 0x783   : > { %8286 = vst [vmem:[%s11335_s29 + $0x28] sm:$0xff] %v9363_v10  ;;  %v9365_v13 = vadd.f32 %v8048_v5, %v16122_v11  ;;  %8289 = vst [vmem:[%s11335_s29 + $0x40] sm:$0xff] %v9268_v14 }
 0x784   : > { %8291 = vst [vmem:[%s11335_s29 + $0x50] sm:$0xff] %v9364_v51  ;;  %8290 = vst [vmem:[%s11335_s29 + $0x48] sm:$0xff] %v9269_v17 }
 0x785   : > { %8292 = vst [vmem:[%s11335_s29 + $0x58] sm:$0xff] %v9365_v13 }
 0x786   : > { %v7233_v9 = vpop.f32.mrb[100].mxu1 }
 0x787   : > { %v8052_v4 = vpop.f32.mrb[100].mxu0  ;;  %v9270_v44 = vadd.f32 %v7233_v9, %v16116_v21  ;;  %v7235_v62 = vpop.f32.mrb[101].mxu1 }
 0x788   : > { %v9366_v1 = vadd.f32 %v8052_v4, %v16118_v47  ;;  %v8054_v27 = vpop.f32.mrb[101].mxu0  ;;  %v9271_v58 = vadd.f32 %v7235_v62, %v16120_v3  ;;  %v7237_v8 = vpop.f32.mrb[102].mxu1 }
 0x789   : > { %v9367_v6 = vadd.f32 %v8054_v27, %v16122_v11  ;;  %v8056_v42 = vpop.f32.mrb[102].mxu0  ;;  %8295 = vst [vmem:[%s11335_s29 + $0x70] sm:$0xff] %v9270_v44  ;;  %v9272_v22 = vadd.f32 %v7237_v8, %v16116_v21  ;;  %v7239_v61 = vpop.f32.mrb[103].mxu1 }
 0x78a   : > { %8297 = vst [vmem:[%s11335_s29 + $0x80] sm:$0xff] %v9366_v1  ;;  %v9368_v41 = vadd.f32 %v8056_v42, %v16118_v47  ;;  %v8058_v50 = vpop.f32.mrb[103].mxu0  ;;  %8296 = vst [vmem:[%s11335_s29 + $0x78] sm:$0xff] %v9271_v58  ;;  %v9273_v40 = vadd.f32 %v7239_v61, %v16120_v3 }
 0x78b   : > { %8298 = vst [vmem:[%s11335_s29 + $0x88] sm:$0xff] %v9367_v6  ;;  %v9369_v0 = vadd.f32 %v8058_v50, %v16122_v11  ;;  %8301 = vst [vmem:[%s11335_s29 + $0xa0] sm:$0xff] %v9272_v22 }
 0x78c   : > { %8303 = vst [vmem:[%s11335_s29 + $0xb0] sm:$0xff] %v9368_v41  ;;  %8302 = vst [vmem:[%s11335_s29 + $0xa8] sm:$0xff] %v9273_v40 }
 0x78d   : > { %8304 = vst [vmem:[%s11335_s29 + $0xb8] sm:$0xff] %v9369_v0 }
 0x78e   : > { %v7243_v34 = vpop.f32.mrb[104].mxu1 }
 0x78f   : > { %v8062_v35 = vpop.f32.mrb[104].mxu0  ;;  %v9274_v26 = vadd.f32 %v7243_v34, %v16116_v21  ;;  %v7245_v59 = vpop.f32.mrb[105].mxu1 }
 0x790   : > { %v9370_v54 = vadd.f32 %v8062_v35, %v16118_v47  ;;  %v8064_v33 = vpop.f32.mrb[105].mxu0  ;;  %v9275_v63 = vadd.f32 %v7245_v59, %v16120_v3  ;;  %v7247_v45 = vpop.f32.mrb[106].mxu1 }
 0x791   : > { %v9371_v30 = vadd.f32 %v8064_v33, %v16122_v11  ;;  %v8066_v31 = vpop.f32.mrb[106].mxu0  ;;  %8307 = vst [vmem:[%s11335_s29 + $0xd0] sm:$0xff] %v9274_v26  ;;  %v9276_v23 = vadd.f32 %v7247_v45, %v16116_v21  ;;  %v7249_v48 = vpop.f32.mrb[107].mxu1 }
 0x792   : > { %8309 = vst [vmem:[%s11335_s29 + $0xe0] sm:$0xff] %v9370_v54  ;;  %v9372_v49 = vadd.f32 %v8066_v31, %v16118_v47  ;;  %v8068_v37 = vpop.f32.mrb[107].mxu0  ;;  %8308 = vst [vmem:[%s11335_s29 + $0xd8] sm:$0xff] %v9275_v63  ;;  %v9277_v55 = vadd.f32 %v7249_v48, %v16120_v3 }
 0x793   : > { %8310 = vst [vmem:[%s11335_s29 + $0xe8] sm:$0xff] %v9371_v30  ;;  %v9373_v12 = vadd.f32 %v8068_v37, %v16122_v11  ;;  %8313 = vst [vmem:[%s11335_s29 + $0x100] sm:$0xff] %v9276_v23 }
 0x794   : > { %8315 = vst [vmem:[%s11335_s29 + $0x110] sm:$0xff] %v9372_v49  ;;  %8314 = vst [vmem:[%s11335_s29 + $0x108] sm:$0xff] %v9277_v55 }
 0x795   : > { %8316 = vst [vmem:[%s11335_s29 + $0x118] sm:$0xff] %v9373_v12 }
 0x796   : > { %v7253_v57 = vpop.f32.mrb[108].mxu1 }
 0x797   : > { %v8072_v52 = vpop.f32.mrb[108].mxu0  ;;  %v9278_v20 = vadd.f32 %v7253_v57, %v16116_v21  ;;  %v7255_v46 = vpop.f32.mrb[109].mxu1 }
 0x798   : > { %v9374_v24 = vadd.f32 %v8072_v52, %v16118_v47  ;;  %v8074_v7 = vpop.f32.mrb[109].mxu0  ;;  %v9279_v56 = vadd.f32 %v7255_v46, %v16120_v3  ;;  %v7257_v38 = vpop.f32.mrb[110].mxu1 }
 0x799   : > { %v9375_v60 = vadd.f32 %v8074_v7, %v16122_v11  ;;  %v8076_v28 = vpop.f32.mrb[110].mxu0  ;;  %8319 = vst [vmem:[%s11335_s29 + $0x130] sm:$0xff] %v9278_v20  ;;  %v9280_v29 = vadd.f32 %v7257_v38, %v16116_v21  ;;  %v7259_v36 = vpop.f32.mrb[111].mxu1 }
 0x79a   : > { %8321 = vst [vmem:[%s11335_s29 + $0x140] sm:$0xff] %v9374_v24  ;;  %v9376_v43 = vadd.f32 %v8076_v28, %v16118_v47  ;;  %v8078_v19 = vpop.f32.mrb[111].mxu0  ;;  %8320 = vst [vmem:[%s11335_s29 + $0x138] sm:$0xff] %v9279_v56  ;;  %v9281_v32 = vadd.f32 %v7259_v36, %v16120_v3 }
 0x79b   : > { %8322 = vst [vmem:[%s11335_s29 + $0x148] sm:$0xff] %v9375_v60  ;;  %v9377_v2 = vadd.f32 %v8078_v19, %v16122_v11  ;;  %8325 = vst [vmem:[%s11335_s29 + $0x160] sm:$0xff] %v9280_v29 }
 0x79c   : > { %8327 = vst [vmem:[%s11335_s29 + $0x170] sm:$0xff] %v9376_v43  ;;  %8326 = vst [vmem:[%s11335_s29 + $0x168] sm:$0xff] %v9281_v32 }
 0x79d   : > { %8328 = vst [vmem:[%s11335_s29 + $0x178] sm:$0xff] %v9377_v2 }
 0x79e   : > { %v7263_v15 = vpop.f32.mrb[112].mxu1 }
 0x79f   : > { %v8082_v39 = vpop.f32.mrb[112].mxu0  ;;  %v9282_v18 = vadd.f32 %v7263_v15, %v16116_v21  ;;  %v7265_v16 = vpop.f32.mrb[113].mxu1 }
 0x7a0   : > { %v9378_v10 = vadd.f32 %v8082_v39, %v16118_v47  ;;  %v8084_v53 = vpop.f32.mrb[113].mxu0  ;;  %v9283_v14 = vadd.f32 %v7265_v16, %v16120_v3  ;;  %v7267_v25 = vpop.f32.mrb[114].mxu1 }
 0x7a1   : > { %v9379_v51 = vadd.f32 %v8084_v53, %v16122_v11  ;;  %v8086_v5 = vpop.f32.mrb[114].mxu0  ;;  %8331 = vst [vmem:[%s11335_s29 + $0x190] sm:$0xff] %v9282_v18  ;;  %v9284_v17 = vadd.f32 %v7267_v25, %v16116_v21  ;;  %v7269_v9 = vpop.f32.mrb[115].mxu1 }
 0x7a2   : > { %8333 = vst [vmem:[%s11335_s29 + $0x1a0] sm:$0xff] %v9378_v10  ;;  %v9380_v13 = vadd.f32 %v8086_v5, %v16118_v47  ;;  %v8088_v4 = vpop.f32.mrb[115].mxu0  ;;  %8332 = vst [vmem:[%s11335_s29 + $0x198] sm:$0xff] %v9283_v14  ;;  %v9285_v44 = vadd.f32 %v7269_v9, %v16120_v3 }
 0x7a3   : > { %8334 = vst [vmem:[%s11335_s29 + $0x1a8] sm:$0xff] %v9379_v51  ;;  %v9381_v1 = vadd.f32 %v8088_v4, %v16122_v11  ;;  %8337 = vst [vmem:[%s11335_s29 + $0x1c0] sm:$0xff] %v9284_v17 }
 0x7a4   : > { %8339 = vst [vmem:[%s11335_s29 + $0x1d0] sm:$0xff] %v9380_v13  ;;  %8338 = vst [vmem:[%s11335_s29 + $0x1c8] sm:$0xff] %v9285_v44 }
 0x7a5   : > { %8340 = vst [vmem:[%s11335_s29 + $0x1d8] sm:$0xff] %v9381_v1 }
 0x7a6   : > { %v7273_v62 = vpop.f32.mrb[116].mxu1 }
 0x7a7   : > { %v8092_v27 = vpop.f32.mrb[116].mxu0  ;;  %v9286_v58 = vadd.f32 %v7273_v62, %v16116_v21  ;;  %v7275_v8 = vpop.f32.mrb[117].mxu1 }
 0x7a8   : > { %v9382_v6 = vadd.f32 %v8092_v27, %v16118_v47  ;;  %v8094_v42 = vpop.f32.mrb[117].mxu0  ;;  %v9287_v22 = vadd.f32 %v7275_v8, %v16120_v3  ;;  %v7277_v61 = vpop.f32.mrb[118].mxu1 }
 0x7a9   : > { %v9383_v41 = vadd.f32 %v8094_v42, %v16122_v11  ;;  %v8096_v50 = vpop.f32.mrb[118].mxu0  ;;  %8343 = vst [vmem:[%s11335_s29 + $0x1f0] sm:$0xff] %v9286_v58  ;;  %v9288_v40 = vadd.f32 %v7277_v61, %v16116_v21  ;;  %v7279_v34 = vpop.f32.mrb[119].mxu1 }
 0x7aa   : > { %8345 = vst [vmem:[%s11335_s29 + $0x200] sm:$0xff] %v9382_v6  ;;  %v9384_v0 = vadd.f32 %v8096_v50, %v16118_v47  ;;  %v8098_v35 = vpop.f32.mrb[119].mxu0  ;;  %8344 = vst [vmem:[%s11335_s29 + $0x1f8] sm:$0xff] %v9287_v22  ;;  %v9289_v26 = vadd.f32 %v7279_v34, %v16120_v3 }
 0x7ab   : > { %8346 = vst [vmem:[%s11335_s29 + $0x208] sm:$0xff] %v9383_v41  ;;  %v9385_v54 = vadd.f32 %v8098_v35, %v16122_v11  ;;  %8349 = vst [vmem:[%s11335_s29 + $0x220] sm:$0xff] %v9288_v40 }
 0x7ac   : > { %8351 = vst [vmem:[%s11335_s29 + $0x230] sm:$0xff] %v9384_v0  ;;  %8350 = vst [vmem:[%s11335_s29 + $0x228] sm:$0xff] %v9289_v26 }
 0x7ad   : > { %8352 = vst [vmem:[%s11335_s29 + $0x238] sm:$0xff] %v9385_v54 }
 0x7ae   : > { %v7283_v59 = vpop.f32.mrb[120].mxu1 }
 0x7af   : > { %v8102_v33 = vpop.f32.mrb[120].mxu0  ;;  %v9290_v63 = vadd.f32 %v7283_v59, %v16116_v21  ;;  %v7285_v45 = vpop.f32.mrb[121].mxu1 }
 0x7b0   : > { %v9386_v30 = vadd.f32 %v8102_v33, %v16118_v47  ;;  %v8104_v31 = vpop.f32.mrb[121].mxu0  ;;  %v9291_v23 = vadd.f32 %v7285_v45, %v16120_v3  ;;  %v7287_v48 = vpop.f32.mrb[122].mxu1 }
 0x7b1   : > { %v9387_v49 = vadd.f32 %v8104_v31, %v16122_v11  ;;  %v8106_v37 = vpop.f32.mrb[122].mxu0  ;;  %8355 = vst [vmem:[%s11335_s29 + $0x250] sm:$0xff] %v9290_v63  ;;  %v9292_v55 = vadd.f32 %v7287_v48, %v16116_v21  ;;  %v7289_v57 = vpop.f32.mrb[123].mxu1 }
 0x7b2   : > { %8357 = vst [vmem:[%s11335_s29 + $0x260] sm:$0xff] %v9386_v30  ;;  %v9388_v12 = vadd.f32 %v8106_v37, %v16118_v47  ;;  %v8108_v52 = vpop.f32.mrb[123].mxu0  ;;  %8356 = vst [vmem:[%s11335_s29 + $0x258] sm:$0xff] %v9291_v23  ;;  %v9293_v20 = vadd.f32 %v7289_v57, %v16120_v3 }
 0x7b3   : > { %8358 = vst [vmem:[%s11335_s29 + $0x268] sm:$0xff] %v9387_v49  ;;  %v9389_v24 = vadd.f32 %v8108_v52, %v16122_v11  ;;  %8361 = vst [vmem:[%s11335_s29 + $0x280] sm:$0xff] %v9292_v55 }
 0x7b4   : > { %8363 = vst [vmem:[%s11335_s29 + $0x290] sm:$0xff] %v9388_v12  ;;  %8362 = vst [vmem:[%s11335_s29 + $0x288] sm:$0xff] %v9293_v20 }
 0x7b5   : > { %8364 = vst [vmem:[%s11335_s29 + $0x298] sm:$0xff] %v9389_v24 }
 0x7b6   : > { %v7293_v46 = vpop.f32.mrb[124].mxu1 }
 0x7b7   : > { %v8112_v7 = vpop.f32.mrb[124].mxu0  ;;  %v9294_v56 = vadd.f32 %v7293_v46, %v16116_v21  ;;  %v7295_v38 = vpop.f32.mrb[125].mxu1 }
 0x7b8   : > { %v9390_v60 = vadd.f32 %v8112_v7, %v16118_v47  ;;  %v8114_v28 = vpop.f32.mrb[125].mxu0  ;;  %v9295_v29 = vadd.f32 %v7295_v38, %v16120_v3  ;;  %v7297_v36 = vpop.f32.mrb[126].mxu1 }
 0x7b9   : > { %v9391_v43 = vadd.f32 %v8114_v28, %v16122_v11  ;;  %v8116_v19 = vpop.f32.mrb[126].mxu0  ;;  %8367 = vst [vmem:[%s11335_s29 + $0x2b0] sm:$0xff] %v9294_v56  ;;  %v9296_v32 = vadd.f32 %v7297_v36, %v16116_v21  ;;  %v7299_v15 = vpop.f32.mrb[127].mxu1 }
 0x7ba   : > { %8369 = vst [vmem:[%s11335_s29 + $0x2c0] sm:$0xff] %v9390_v60  ;;  %v9392_v2 = vadd.f32 %v8116_v19, %v16118_v47  ;;  %v8118_v39 = vpop.f32.mrb[127].mxu0  ;;  %8368 = vst [vmem:[%s11335_s29 + $0x2b8] sm:$0xff] %v9295_v29  ;;  %v9297_v18 = vadd.f32 %v7299_v15, %v16120_v3 }
 0x7bb   : > { %8370 = vst [vmem:[%s11335_s29 + $0x2c8] sm:$0xff] %v9391_v43  ;;  %v9393_v10 = vadd.f32 %v8118_v39, %v16122_v11  ;;  %8373 = vst [vmem:[%s11335_s29 + $0x2e0] sm:$0xff] %v9296_v32 }
 0x7bc   : > { %8375 = vst [vmem:[%s11335_s29 + $0x2f0] sm:$0xff] %v9392_v2  ;;  %8374 = vst [vmem:[%s11335_s29 + $0x2e8] sm:$0xff] %v9297_v18 }
 0x7bd   : > { %8376 = vst [vmem:[%s11335_s29 + $0x2f8] sm:$0xff] %v9393_v10 }
 0x7be   : > { %v7303_v16 = vpop.f32.mrb[128].mxu1 }
 0x7bf   : > { %v8122_v53 = vpop.f32.mrb[128].mxu0  ;;  %v9298_v14 = vadd.f32 %v7303_v16, %v16116_v21  ;;  %v7305_v25 = vpop.f32.mrb[129].mxu1 }
 0x7c0   : > { %v9394_v51 = vadd.f32 %v8122_v53, %v16118_v47  ;;  %v8124_v5 = vpop.f32.mrb[129].mxu0  ;;  %v9299_v17 = vadd.f32 %v7305_v25, %v16120_v3  ;;  %v7307_v9 = vpop.f32.mrb[130].mxu1 }
 0x7c1   : > { %v9395_v13 = vadd.f32 %v8124_v5, %v16122_v11  ;;  %v8126_v4 = vpop.f32.mrb[130].mxu0  ;;  %8379 = vst [vmem:[%s11335_s29 + $0x310] sm:$0xff] %v9298_v14  ;;  %v9300_v44 = vadd.f32 %v7307_v9, %v16116_v21  ;;  %v7309_v62 = vpop.f32.mrb[131].mxu1 }
 0x7c2   : > { %8381 = vst [vmem:[%s11335_s29 + $0x320] sm:$0xff] %v9394_v51  ;;  %v9396_v1 = vadd.f32 %v8126_v4, %v16118_v47  ;;  %v8128_v27 = vpop.f32.mrb[131].mxu0  ;;  %8380 = vst [vmem:[%s11335_s29 + $0x318] sm:$0xff] %v9299_v17  ;;  %v9301_v58 = vadd.f32 %v7309_v62, %v16120_v3 }
 0x7c3   : > { %8382 = vst [vmem:[%s11335_s29 + $0x328] sm:$0xff] %v9395_v13  ;;  %v9397_v6 = vadd.f32 %v8128_v27, %v16122_v11  ;;  %8385 = vst [vmem:[%s11335_s29 + $0x340] sm:$0xff] %v9300_v44 }
 0x7c4   : > { %8387 = vst [vmem:[%s11335_s29 + $0x350] sm:$0xff] %v9396_v1  ;;  %8386 = vst [vmem:[%s11335_s29 + $0x348] sm:$0xff] %v9301_v58 }
 0x7c5   : > { %8388 = vst [vmem:[%s11335_s29 + $0x358] sm:$0xff] %v9397_v6 }
 0x7c6   : > { %v7313_v8 = vpop.f32.mrb[132].mxu1 }
 0x7c7   : > { %v8132_v42 = vpop.f32.mrb[132].mxu0  ;;  %v9302_v22 = vadd.f32 %v7313_v8, %v16116_v21  ;;  %v7315_v61 = vpop.f32.mrb[133].mxu1 }
 0x7c8   : > { %v9398_v41 = vadd.f32 %v8132_v42, %v16118_v47  ;;  %v8134_v50 = vpop.f32.mrb[133].mxu0  ;;  %v9303_v40 = vadd.f32 %v7315_v61, %v16120_v3  ;;  %v7317_v34 = vpop.f32.mrb[134].mxu1 }
 0x7c9   : > { %v9399_v0 = vadd.f32 %v8134_v50, %v16122_v11  ;;  %v8136_v35 = vpop.f32.mrb[134].mxu0  ;;  %8391 = vst [vmem:[%s11335_s29 + $0x370] sm:$0xff] %v9302_v22  ;;  %v9304_v26 = vadd.f32 %v7317_v34, %v16116_v21  ;;  %v7319_v59 = vpop.f32.mrb[135].mxu1 }
 0x7ca   : > { %8393 = vst [vmem:[%s11335_s29 + $0x380] sm:$0xff] %v9398_v41  ;;  %v9400_v54 = vadd.f32 %v8136_v35, %v16118_v47  ;;  %v8138_v33 = vpop.f32.mrb[135].mxu0  ;;  %8392 = vst [vmem:[%s11335_s29 + $0x378] sm:$0xff] %v9303_v40  ;;  %v9305_v63 = vadd.f32 %v7319_v59, %v16120_v3 }
 0x7cb   : > { %8394 = vst [vmem:[%s11335_s29 + $0x388] sm:$0xff] %v9399_v0  ;;  %v9401_v30 = vadd.f32 %v8138_v33, %v16122_v11  ;;  %8397 = vst [vmem:[%s11335_s29 + $0x3a0] sm:$0xff] %v9304_v26 }
 0x7cc   : > { %8399 = vst [vmem:[%s11335_s29 + $0x3b0] sm:$0xff] %v9400_v54  ;;  %8398 = vst [vmem:[%s11335_s29 + $0x3a8] sm:$0xff] %v9305_v63 }
 0x7cd   : > { %8400 = vst [vmem:[%s11335_s29 + $0x3b8] sm:$0xff] %v9401_v30 }
 0x7ce   : > { %v7323_v45 = vpop.f32.mrb[136].mxu1 }
 0x7cf   : > { %v8142_v31 = vpop.f32.mrb[136].mxu0  ;;  %v9306_v23 = vadd.f32 %v7323_v45, %v16116_v21  ;;  %v7325_v48 = vpop.f32.mrb[137].mxu1 }
 0x7d0   : > { %v9402_v49 = vadd.f32 %v8142_v31, %v16118_v47  ;;  %v8144_v37 = vpop.f32.mrb[137].mxu0  ;;  %v9307_v55 = vadd.f32 %v7325_v48, %v16120_v3  ;;  %v7327_v57 = vpop.f32.mrb[138].mxu1 }
 0x7d1   : > { %v9403_v12 = vadd.f32 %v8144_v37, %v16122_v11  ;;  %v8146_v52 = vpop.f32.mrb[138].mxu0  ;;  %8403 = vst [vmem:[%s11335_s29 + $0x3d0] sm:$0xff] %v9306_v23  ;;  %v9308_v20 = vadd.f32 %v7327_v57, %v16116_v21  ;;  %v7329_v46 = vpop.f32.mrb[139].mxu1 }
 0x7d2   : > { %8405 = vst [vmem:[%s11335_s29 + $0x3e0] sm:$0xff] %v9402_v49  ;;  %v9404_v24 = vadd.f32 %v8146_v52, %v16118_v47  ;;  %v8148_v7 = vpop.f32.mrb[139].mxu0  ;;  %8404 = vst [vmem:[%s11335_s29 + $0x3d8] sm:$0xff] %v9307_v55  ;;  %v9309_v56 = vadd.f32 %v7329_v46, %v16120_v3 }
 0x7d3   : > { %8406 = vst [vmem:[%s11335_s29 + $0x3e8] sm:$0xff] %v9403_v12  ;;  %v9405_v60 = vadd.f32 %v8148_v7, %v16122_v11  ;;  %8409 = vst [vmem:[%s11335_s29 + $0x400] sm:$0xff] %v9308_v20 }
 0x7d4   : > { %8411 = vst [vmem:[%s11335_s29 + $0x410] sm:$0xff] %v9404_v24  ;;  %8410 = vst [vmem:[%s11335_s29 + $0x408] sm:$0xff] %v9309_v56 }
 0x7d5   : > { %8412 = vst [vmem:[%s11335_s29 + $0x418] sm:$0xff] %v9405_v60 }
 0x7d6   : > { %v7333_v38 = vpop.f32.mrb[140].mxu1 }
 0x7d7   : > { %v8152_v28 = vpop.f32.mrb[140].mxu0  ;;  %v9310_v29 = vadd.f32 %v7333_v38, %v16116_v21  ;;  %v7335_v36 = vpop.f32.mrb[141].mxu1 }
 0x7d8   : > { %v9406_v43 = vadd.f32 %v8152_v28, %v16118_v47  ;;  %v8154_v19 = vpop.f32.mrb[141].mxu0  ;;  %v9311_v32 = vadd.f32 %v7335_v36, %v16120_v3  ;;  %v7337_v15 = vpop.f32.mrb[142].mxu1 }
 0x7d9   : > { %v9407_v2 = vadd.f32 %v8154_v19, %v16122_v11  ;;  %v8156_v39 = vpop.f32.mrb[142].mxu0  ;;  %8415 = vst [vmem:[%s11335_s29 + $0x430] sm:$0xff] %v9310_v29  ;;  %v9312_v18 = vadd.f32 %v7337_v15, %v16116_v21  ;;  %v7339_v16 = vpop.f32.mrb[143].mxu1 }
 0x7da   : > { %8417 = vst [vmem:[%s11335_s29 + $0x440] sm:$0xff] %v9406_v43  ;;  %v9408_v10 = vadd.f32 %v8156_v39, %v16118_v47  ;;  %v8158_v53 = vpop.f32.mrb[143].mxu0  ;;  %8416 = vst [vmem:[%s11335_s29 + $0x438] sm:$0xff] %v9311_v32  ;;  %v9313_v14 = vadd.f32 %v7339_v16, %v16120_v3 }
 0x7db   : > { %8418 = vst [vmem:[%s11335_s29 + $0x448] sm:$0xff] %v9407_v2  ;;  %v9409_v51 = vadd.f32 %v8158_v53, %v16122_v11  ;;  %8421 = vst [vmem:[%s11335_s29 + $0x460] sm:$0xff] %v9312_v18 }
 0x7dc   : > { %8423 = vst [vmem:[%s11335_s29 + $0x470] sm:$0xff] %v9408_v10  ;;  %8422 = vst [vmem:[%s11335_s29 + $0x468] sm:$0xff] %v9313_v14 }
 0x7dd   : > { %8424 = vst [vmem:[%s11335_s29 + $0x478] sm:$0xff] %v9409_v51 }
 0x7de   : > { %v7343_v25 = vpop.f32.mrb[144].mxu1 }
 0x7df   : > { %v8162_v5 = vpop.f32.mrb[144].mxu0  ;;  %v9314_v17 = vadd.f32 %v7343_v25, %v16116_v21  ;;  %v7345_v9 = vpop.f32.mrb[145].mxu1 }
 0x7e0   : > { %v9410_v13 = vadd.f32 %v8162_v5, %v16118_v47  ;;  %v8164_v4 = vpop.f32.mrb[145].mxu0  ;;  %v9315_v44 = vadd.f32 %v7345_v9, %v16120_v3  ;;  %v7347_v62 = vpop.f32.mrb[146].mxu1 }
 0x7e1   : > { %v9411_v1 = vadd.f32 %v8164_v4, %v16122_v11  ;;  %v8166_v27 = vpop.f32.mrb[146].mxu0  ;;  %8427 = vst [vmem:[%s11335_s29 + $0x490] sm:$0xff] %v9314_v17  ;;  %v9316_v58 = vadd.f32 %v7347_v62, %v16116_v21  ;;  %v7349_v8 = vpop.f32.mrb[147].mxu1 }
 0x7e2   : > { %8429 = vst [vmem:[%s11335_s29 + $0x4a0] sm:$0xff] %v9410_v13  ;;  %v9412_v6 = vadd.f32 %v8166_v27, %v16118_v47  ;;  %v8168_v42 = vpop.f32.mrb[147].mxu0  ;;  %8428 = vst [vmem:[%s11335_s29 + $0x498] sm:$0xff] %v9315_v44  ;;  %v9317_v22 = vadd.f32 %v7349_v8, %v16120_v3 }
 0x7e3   : > { %8430 = vst [vmem:[%s11335_s29 + $0x4a8] sm:$0xff] %v9411_v1  ;;  %v9413_v41 = vadd.f32 %v8168_v42, %v16122_v11  ;;  %8433 = vst [vmem:[%s11335_s29 + $0x4c0] sm:$0xff] %v9316_v58 }
 0x7e4   : > { %8435 = vst [vmem:[%s11335_s29 + $0x4d0] sm:$0xff] %v9412_v6  ;;  %8434 = vst [vmem:[%s11335_s29 + $0x4c8] sm:$0xff] %v9317_v22 }
 0x7e5   : > { %8436 = vst [vmem:[%s11335_s29 + $0x4d8] sm:$0xff] %v9413_v41 }
 0x7e6   : > { %v7353_v61 = vpop.f32.mrb[148].mxu1 }
 0x7e7   : > { %v8172_v50 = vpop.f32.mrb[148].mxu0  ;;  %v9318_v40 = vadd.f32 %v7353_v61, %v16116_v21  ;;  %v7355_v34 = vpop.f32.mrb[149].mxu1 }
 0x7e8   : > { %v9414_v0 = vadd.f32 %v8172_v50, %v16118_v47  ;;  %v8174_v35 = vpop.f32.mrb[149].mxu0  ;;  %v9319_v26 = vadd.f32 %v7355_v34, %v16120_v3  ;;  %v7357_v59 = vpop.f32.mrb[150].mxu1 }
 0x7e9   : > { %v9415_v54 = vadd.f32 %v8174_v35, %v16122_v11  ;;  %v8176_v33 = vpop.f32.mrb[150].mxu0  ;;  %8439 = vst [vmem:[%s11335_s29 + $0x4f0] sm:$0xff] %v9318_v40  ;;  %v9320_v63 = vadd.f32 %v7357_v59, %v16116_v21  ;;  %v7359_v45 = vpop.f32.mrb[151].mxu1 }
 0x7ea   : > { %8441 = vst [vmem:[%s11335_s29 + $0x500] sm:$0xff] %v9414_v0  ;;  %v9416_v30 = vadd.f32 %v8176_v33, %v16118_v47  ;;  %v8178_v31 = vpop.f32.mrb[151].mxu0  ;;  %8440 = vst [vmem:[%s11335_s29 + $0x4f8] sm:$0xff] %v9319_v26  ;;  %v9321_v23 = vadd.f32 %v7359_v45, %v16120_v3 }
 0x7eb   : > { %8442 = vst [vmem:[%s11335_s29 + $0x508] sm:$0xff] %v9415_v54  ;;  %v9417_v49 = vadd.f32 %v8178_v31, %v16122_v11  ;;  %8445 = vst [vmem:[%s11335_s29 + $0x520] sm:$0xff] %v9320_v63 }
 0x7ec   : > { %8447 = vst [vmem:[%s11335_s29 + $0x530] sm:$0xff] %v9416_v30  ;;  %8446 = vst [vmem:[%s11335_s29 + $0x528] sm:$0xff] %v9321_v23 }
 0x7ed   : > { %8448 = vst [vmem:[%s11335_s29 + $0x538] sm:$0xff] %v9417_v49 }
 0x7ee   : > { %v7363_v48 = vpop.f32.mrb[152].mxu1 }
 0x7ef   : > { %v8182_v37 = vpop.f32.mrb[152].mxu0  ;;  %v9322_v55 = vadd.f32 %v7363_v48, %v16116_v21  ;;  %v7365_v57 = vpop.f32.mrb[153].mxu1 }
 0x7f0   : > { %v9418_v12 = vadd.f32 %v8182_v37, %v16118_v47  ;;  %v8184_v52 = vpop.f32.mrb[153].mxu0  ;;  %v9323_v20 = vadd.f32 %v7365_v57, %v16120_v3  ;;  %v7367_v46 = vpop.f32.mrb[154].mxu1 }
 0x7f1   : > { %v9419_v24 = vadd.f32 %v8184_v52, %v16122_v11  ;;  %v8186_v7 = vpop.f32.mrb[154].mxu0  ;;  %8451 = vst [vmem:[%s11335_s29 + $0x550] sm:$0xff] %v9322_v55  ;;  %v9324_v56 = vadd.f32 %v7367_v46, %v16116_v21  ;;  %v7369_v38 = vpop.f32.mrb[155].mxu1 }
 0x7f2   : > { %8453 = vst [vmem:[%s11335_s29 + $0x560] sm:$0xff] %v9418_v12  ;;  %v9420_v60 = vadd.f32 %v8186_v7, %v16118_v47  ;;  %v8188_v28 = vpop.f32.mrb[155].mxu0  ;;  %8452 = vst [vmem:[%s11335_s29 + $0x558] sm:$0xff] %v9323_v20  ;;  %v9325_v29 = vadd.f32 %v7369_v38, %v16120_v3 }
 0x7f3   : > { %8454 = vst [vmem:[%s11335_s29 + $0x568] sm:$0xff] %v9419_v24  ;;  %v9421_v43 = vadd.f32 %v8188_v28, %v16122_v11  ;;  %8457 = vst [vmem:[%s11335_s29 + $0x580] sm:$0xff] %v9324_v56 }
 0x7f4   : > { %8459 = vst [vmem:[%s11335_s29 + $0x590] sm:$0xff] %v9420_v60  ;;  %8458 = vst [vmem:[%s11335_s29 + $0x588] sm:$0xff] %v9325_v29 }
 0x7f5   : > { %8460 = vst [vmem:[%s11335_s29 + $0x598] sm:$0xff] %v9421_v43 }
 0x7f6   : > { %v7373_v36 = vpop.f32.mrb[156].mxu1 }
 0x7f7   : > { %v8192_v19 = vpop.f32.mrb[156].mxu0  ;;  %v9326_v32 = vadd.f32 %v7373_v36, %v16116_v21  ;;  %v7375_v15 = vpop.f32.mrb[157].mxu1 }
 0x7f8   : > { %v9422_v2 = vadd.f32 %v8192_v19, %v16118_v47  ;;  %v8194_v39 = vpop.f32.mrb[157].mxu0  ;;  %v9327_v18 = vadd.f32 %v7375_v15, %v16120_v3  ;;  %v7377_v16 = vpop.f32.mrb[158].mxu1 }
 0x7f9   : > { %v9423_v10 = vadd.f32 %v8194_v39, %v16122_v11  ;;  %v8196_v53 = vpop.f32.mrb[158].mxu0  ;;  %8463 = vst [vmem:[%s11335_s29 + $0x5b0] sm:$0xff] %v9326_v32  ;;  %v9328_v14 = vadd.f32 %v7377_v16, %v16116_v21  ;;  %v7379_v25 = vpop.f32.mrb[159].mxu1 }
 0x7fa   : > { %8465 = vst [vmem:[%s11335_s29 + $0x5c0] sm:$0xff] %v9422_v2  ;;  %v9424_v51 = vadd.f32 %v8196_v53, %v16118_v47  ;;  %v8198_v5 = vpop.f32.mrb[159].mxu0  ;;  %8464 = vst [vmem:[%s11335_s29 + $0x5b8] sm:$0xff] %v9327_v18  ;;  %v9329_v17 = vadd.f32 %v7379_v25, %v16120_v3 }
 0x7fb   : > { %8466 = vst [vmem:[%s11335_s29 + $0x5c8] sm:$0xff] %v9423_v10  ;;  %v9425_v13 = vadd.f32 %v8198_v5, %v16122_v11  ;;  %8469 = vst [vmem:[%s11335_s29 + $0x5e0] sm:$0xff] %v9328_v14 }
 0x7fc   : > { %8471 = vst [vmem:[%s11335_s29 + $0x5f0] sm:$0xff] %v9424_v51  ;;  %8470 = vst [vmem:[%s11335_s29 + $0x5e8] sm:$0xff] %v9329_v17 }
 0x7fd   : > { %8472 = vst [vmem:[%s11335_s29 + $0x5f8] sm:$0xff] %v9425_v13 }
 0x7fe   : > { %v7383_v9 = vpop.f32.mrb[160].mxu1 }
 0x7ff   : > { %v8202_v4 = vpop.f32.mrb[160].mxu0  ;;  %v9330_v44 = vadd.f32 %v7383_v9, %v16116_v21  ;;  %v7385_v62 = vpop.f32.mrb[161].mxu1 }
 0x800   : > { %v9426_v1 = vadd.f32 %v8202_v4, %v16118_v47  ;;  %v8204_v27 = vpop.f32.mrb[161].mxu0  ;;  %v9331_v58 = vadd.f32 %v7385_v62, %v16120_v3  ;;  %v7387_v8 = vpop.f32.mrb[162].mxu1 }
 0x801   : > { %v9427_v6 = vadd.f32 %v8204_v27, %v16122_v11  ;;  %v8206_v42 = vpop.f32.mrb[162].mxu0  ;;  %8475 = vst [vmem:[%s11335_s29 + $0x610] sm:$0xff] %v9330_v44  ;;  %v9332_v22 = vadd.f32 %v7387_v8, %v16116_v21  ;;  %v7389_v61 = vpop.f32.mrb[163].mxu1 }
 0x802   : > { %8477 = vst [vmem:[%s11335_s29 + $0x620] sm:$0xff] %v9426_v1  ;;  %v9428_v41 = vadd.f32 %v8206_v42, %v16118_v47  ;;  %v8208_v50 = vpop.f32.mrb[163].mxu0  ;;  %8476 = vst [vmem:[%s11335_s29 + $0x618] sm:$0xff] %v9331_v58  ;;  %v9333_v40 = vadd.f32 %v7389_v61, %v16120_v3 }
 0x803   : > { %8478 = vst [vmem:[%s11335_s29 + $0x628] sm:$0xff] %v9427_v6  ;;  %v9429_v0 = vadd.f32 %v8208_v50, %v16122_v11  ;;  %8481 = vst [vmem:[%s11335_s29 + $0x640] sm:$0xff] %v9332_v22 }
 0x804   : > { %8483 = vst [vmem:[%s11335_s29 + $0x650] sm:$0xff] %v9428_v41  ;;  %8482 = vst [vmem:[%s11335_s29 + $0x648] sm:$0xff] %v9333_v40 }
 0x805   : > { %8484 = vst [vmem:[%s11335_s29 + $0x658] sm:$0xff] %v9429_v0 }
 0x806   : > { %v7393_v34 = vpop.f32.mrb[164].mxu1 }
 0x807   : > { %v8212_v35 = vpop.f32.mrb[164].mxu0  ;;  %v9334_v26 = vadd.f32 %v7393_v34, %v16116_v21  ;;  %v7395_v59 = vpop.f32.mrb[165].mxu1 }
 0x808   : > { %v9430_v54 = vadd.f32 %v8212_v35, %v16118_v47  ;;  %v8214_v33 = vpop.f32.mrb[165].mxu0  ;;  %v9335_v63 = vadd.f32 %v7395_v59, %v16120_v3  ;;  %v7397_v45 = vpop.f32.mrb[166].mxu1 }
 0x809   : > { %v9431_v30 = vadd.f32 %v8214_v33, %v16122_v11  ;;  %v8216_v31 = vpop.f32.mrb[166].mxu0  ;;  %8487 = vst [vmem:[%s11335_s29 + $0x670] sm:$0xff] %v9334_v26  ;;  %v9336_v23 = vadd.f32 %v7397_v45, %v16116_v21  ;;  %v7399_v48 = vpop.f32.mrb[167].mxu1 }
 0x80a   : > { %8489 = vst [vmem:[%s11335_s29 + $0x680] sm:$0xff] %v9430_v54  ;;  %v9432_v49 = vadd.f32 %v8216_v31, %v16118_v47  ;;  %v8218_v37 = vpop.f32.mrb[167].mxu0  ;;  %8488 = vst [vmem:[%s11335_s29 + $0x678] sm:$0xff] %v9335_v63  ;;  %v9337_v55 = vadd.f32 %v7399_v48, %v16120_v3 }
 0x80b   : > { %8490 = vst [vmem:[%s11335_s29 + $0x688] sm:$0xff] %v9431_v30  ;;  %v9433_v12 = vadd.f32 %v8218_v37, %v16122_v11  ;;  %8493 = vst [vmem:[%s11335_s29 + $0x6a0] sm:$0xff] %v9336_v23 }
 0x80c   : > { %8495 = vst [vmem:[%s11335_s29 + $0x6b0] sm:$0xff] %v9432_v49  ;;  %8494 = vst [vmem:[%s11335_s29 + $0x6a8] sm:$0xff] %v9337_v55 }
 0x80d   : > { %8496 = vst [vmem:[%s11335_s29 + $0x6b8] sm:$0xff] %v9433_v12 }
 0x80e   : > { %v7403_v57 = vpop.f32.mrb[168].mxu1 }
 0x80f   : > { %v8222_v52 = vpop.f32.mrb[168].mxu0  ;;  %v9338_v20 = vadd.f32 %v7403_v57, %v16116_v21  ;;  %v7405_v46 = vpop.f32.mrb[169].mxu1 }
 0x810   : > { %v9434_v24 = vadd.f32 %v8222_v52, %v16118_v47  ;;  %v8224_v7 = vpop.f32.mrb[169].mxu0  ;;  %v9339_v56 = vadd.f32 %v7405_v46, %v16120_v3  ;;  %v7407_v38 = vpop.f32.mrb[170].mxu1 }
 0x811   : > { %v9435_v60 = vadd.f32 %v8224_v7, %v16122_v11  ;;  %v8226_v28 = vpop.f32.mrb[170].mxu0  ;;  %8499 = vst [vmem:[%s11335_s29 + $0x6d0] sm:$0xff] %v9338_v20  ;;  %v9340_v29 = vadd.f32 %v7407_v38, %v16116_v21  ;;  %v7409_v36 = vpop.f32.mrb[171].mxu1 }
 0x812   : > { %8501 = vst [vmem:[%s11335_s29 + $0x6e0] sm:$0xff] %v9434_v24  ;;  %v9436_v43 = vadd.f32 %v8226_v28, %v16118_v47  ;;  %v8228_v19 = vpop.f32.mrb[171].mxu0  ;;  %8500 = vst [vmem:[%s11335_s29 + $0x6d8] sm:$0xff] %v9339_v56  ;;  %v9341_v32 = vadd.f32 %v7409_v36, %v16120_v3 }
 0x813   : > { %8502 = vst [vmem:[%s11335_s29 + $0x6e8] sm:$0xff] %v9435_v60  ;;  %v9437_v2 = vadd.f32 %v8228_v19, %v16122_v11  ;;  %8505 = vst [vmem:[%s11335_s29 + $0x700] sm:$0xff] %v9340_v29 }
 0x814   : > { %8507 = vst [vmem:[%s11335_s29 + $0x710] sm:$0xff] %v9436_v43  ;;  %8506 = vst [vmem:[%s11335_s29 + $0x708] sm:$0xff] %v9341_v32 }
 0x815   : > { %8508 = vst [vmem:[%s11335_s29 + $0x718] sm:$0xff] %v9437_v2 }
 0x816   : > { %v7413_v15 = vpop.f32.mrb[172].mxu1 }
 0x817   : > { %v8232_v39 = vpop.f32.mrb[172].mxu0  ;;  %v9342_v18 = vadd.f32 %v7413_v15, %v16116_v21  ;;  %v7415_v16 = vpop.f32.mrb[173].mxu1 }
 0x818   : > { %v9438_v10 = vadd.f32 %v8232_v39, %v16118_v47  ;;  %v8234_v53 = vpop.f32.mrb[173].mxu0  ;;  %v9343_v14 = vadd.f32 %v7415_v16, %v16120_v3  ;;  %v7417_v25 = vpop.f32.mrb[174].mxu1 }
 0x819   : > { %v9439_v51 = vadd.f32 %v8234_v53, %v16122_v11  ;;  %v8236_v5 = vpop.f32.mrb[174].mxu0  ;;  %8511 = vst [vmem:[%s11335_s29 + $0x730] sm:$0xff] %v9342_v18  ;;  %v9344_v17 = vadd.f32 %v7417_v25, %v16116_v21  ;;  %v7419_v9 = vpop.f32.mrb[175].mxu1 }
 0x81a   : > { %8513 = vst [vmem:[%s11335_s29 + $0x740] sm:$0xff] %v9438_v10  ;;  %v9440_v13 = vadd.f32 %v8236_v5, %v16118_v47  ;;  %v8238_v4 = vpop.f32.mrb[175].mxu0  ;;  %8512 = vst [vmem:[%s11335_s29 + $0x738] sm:$0xff] %v9343_v14  ;;  %v9345_v44 = vadd.f32 %v7419_v9, %v16120_v3 }
 0x81b   : > { %8514 = vst [vmem:[%s11335_s29 + $0x748] sm:$0xff] %v9439_v51  ;;  %v9441_v1 = vadd.f32 %v8238_v4, %v16122_v11  ;;  %8517 = vst [vmem:[%s11335_s29 + $0x760] sm:$0xff] %v9344_v17 }
 0x81c   : > { %8519 = vst [vmem:[%s11335_s29 + $0x770] sm:$0xff] %v9440_v13  ;;  %8518 = vst [vmem:[%s11335_s29 + $0x768] sm:$0xff] %v9345_v44 }
 0x81d   : > { %8520 = vst [vmem:[%s11335_s29 + $0x778] sm:$0xff] %v9441_v1 }
 0x81e   : > { %v7423_v62 = vpop.f32.mrb[176].mxu1 }
 0x81f   : > { %v8242_v27 = vpop.f32.mrb[176].mxu0  ;;  %v9346_v58 = vadd.f32 %v7423_v62, %v16116_v21  ;;  %v7425_v8 = vpop.f32.mrb[177].mxu1 }
 0x820   : > { %v9442_v6 = vadd.f32 %v8242_v27, %v16118_v47  ;;  %v8244_v42 = vpop.f32.mrb[177].mxu0  ;;  %v9347_v22 = vadd.f32 %v7425_v8, %v16120_v3  ;;  %v7427_v61 = vpop.f32.mrb[178].mxu1 }
 0x821   : > { %v9443_v41 = vadd.f32 %v8244_v42, %v16122_v11  ;;  %v8246_v50 = vpop.f32.mrb[178].mxu0  ;;  %8523 = vst [vmem:[%s11335_s29 + $0x790] sm:$0xff] %v9346_v58  ;;  %v9348_v40 = vadd.f32 %v7427_v61, %v16116_v21  ;;  %v7429_v34 = vpop.f32.mrb[179].mxu1 }
 0x822   : > { %8525 = vst [vmem:[%s11335_s29 + $0x7a0] sm:$0xff] %v9442_v6  ;;  %v9444_v0 = vadd.f32 %v8246_v50, %v16118_v47  ;;  %v8248_v35 = vpop.f32.mrb[179].mxu0  ;;  %8524 = vst [vmem:[%s11335_s29 + $0x798] sm:$0xff] %v9347_v22  ;;  %v9349_v26 = vadd.f32 %v7429_v34, %v16120_v3 }
 0x823   : > { %8526 = vst [vmem:[%s11335_s29 + $0x7a8] sm:$0xff] %v9443_v41  ;;  %v9445_v54 = vadd.f32 %v8248_v35, %v16122_v11  ;;  %8529 = vst [vmem:[%s11335_s29 + $0x7c0] sm:$0xff] %v9348_v40 }
 0x824   : > { %8531 = vst [vmem:[%s11335_s29 + $0x7d0] sm:$0xff] %v9444_v0  ;;  %8530 = vst [vmem:[%s11335_s29 + $0x7c8] sm:$0xff] %v9349_v26 }
 0x825   : > { %8532 = vst [vmem:[%s11335_s29 + $0x7d8] sm:$0xff] %v9445_v54 }
 0x826   : > { %v7433_v59 = vpop.f32.mrb[180].mxu1 }
 0x827   : > { %v8252_v33 = vpop.f32.mrb[180].mxu0  ;;  %v9350_v63 = vadd.f32 %v7433_v59, %v16116_v21  ;;  %v7435_v45 = vpop.f32.mrb[181].mxu1 }
 0x828   : > { %v9446_v30 = vadd.f32 %v8252_v33, %v16118_v47  ;;  %v8254_v31 = vpop.f32.mrb[181].mxu0  ;;  %v9351_v23 = vadd.f32 %v7435_v45, %v16120_v3  ;;  %v7437_v48 = vpop.f32.mrb[182].mxu1 }
 0x829   : > { %v9447_v49 = vadd.f32 %v8254_v31, %v16122_v11  ;;  %v8256_v37 = vpop.f32.mrb[182].mxu0  ;;  %8535 = vst [vmem:[%s11335_s29 + $0x7f0] sm:$0xff] %v9350_v63  ;;  %v9352_v55 = vadd.f32 %v7437_v48, %v16116_v21  ;;  %v7439_v57 = vpop.f32.mrb[183].mxu1 }
 0x82a   : > { %8537 = vst [vmem:[%s11335_s29 + $0x800] sm:$0xff] %v9446_v30  ;;  %v9448_v12 = vadd.f32 %v8256_v37, %v16118_v47  ;;  %v8258_v52 = vpop.f32.mrb[183].mxu0  ;;  %8536 = vst [vmem:[%s11335_s29 + $0x7f8] sm:$0xff] %v9351_v23  ;;  %v9353_v20 = vadd.f32 %v7439_v57, %v16120_v3 }
 0x82b   : > { %8538 = vst [vmem:[%s11335_s29 + $0x808] sm:$0xff] %v9447_v49  ;;  %v9449_v24 = vadd.f32 %v8258_v52, %v16122_v11  ;;  %8541 = vst [vmem:[%s11335_s29 + $0x820] sm:$0xff] %v9352_v55 }
 0x82c   : > { %8543 = vst [vmem:[%s11335_s29 + $0x830] sm:$0xff] %v9448_v12  ;;  %8542 = vst [vmem:[%s11335_s29 + $0x828] sm:$0xff] %v9353_v20 }
 0x82d   : > { %8544 = vst [vmem:[%s11335_s29 + $0x838] sm:$0xff] %v9449_v24 }
 0x82e   : > { %v7443_v46 = vpop.f32.mrb[184].mxu1 }
 0x82f   : > { %v8262_v7 = vpop.f32.mrb[184].mxu0  ;;  %v9354_v56 = vadd.f32 %v7443_v46, %v16116_v21  ;;  %v7445_v38 = vpop.f32.mrb[185].mxu1 }
 0x830   : > { %v9450_v60 = vadd.f32 %v8262_v7, %v16118_v47  ;;  %v8264_v28 = vpop.f32.mrb[185].mxu0  ;;  %v9355_v29 = vadd.f32 %v7445_v38, %v16120_v3  ;;  %v7447_v36 = vpop.f32.mrb[186].mxu1 }
 0x831   : > { %v9451_v43 = vadd.f32 %v8264_v28, %v16122_v11  ;;  %v8266_v19 = vpop.f32.mrb[186].mxu0  ;;  %8547 = vst [vmem:[%s11335_s29 + $0x850] sm:$0xff] %v9354_v56  ;;  %v9356_v32 = vadd.f32 %v7447_v36, %v16116_v21  ;;  %v7449_v15 = vpop.f32.mrb[187].mxu1 }
 0x832   : > { %8549 = vst [vmem:[%s11335_s29 + $0x860] sm:$0xff] %v9450_v60  ;;  %v9452_v2 = vadd.f32 %v8266_v19, %v16118_v47  ;;  %v8268_v39 = vpop.f32.mrb[187].mxu0  ;;  %8548 = vst [vmem:[%s11335_s29 + $0x858] sm:$0xff] %v9355_v29  ;;  %v9357_v18 = vadd.f32 %v7449_v15, %v16120_v3 }
 0x833   : > { %8550 = vst [vmem:[%s11335_s29 + $0x868] sm:$0xff] %v9451_v43  ;;  %v9453_v10 = vadd.f32 %v8268_v39, %v16122_v11  ;;  %8553 = vst [vmem:[%s11335_s29 + $0x880] sm:$0xff] %v9356_v32 }
 0x834   : > { %8555 = vst [vmem:[%s11335_s29 + $0x890] sm:$0xff] %v9452_v2  ;;  %8554 = vst [vmem:[%s11335_s29 + $0x888] sm:$0xff] %v9357_v18 }
 0x835   : > { %8556 = vst [vmem:[%s11335_s29 + $0x898] sm:$0xff] %v9453_v10 }
 0x836   : > { %v7453_v16 = vpop.f32.mrb[188].mxu1 }
 0x837   : > { %v8272_v53 = vpop.f32.mrb[188].mxu0  ;;  %v9358_v14 = vadd.f32 %v7453_v16, %v16116_v21  ;;  %v7455_v25 = vpop.f32.mrb[189].mxu1 }
 0x838   : > { %v9454_v51 = vadd.f32 %v8272_v53, %v16118_v47  ;;  %v8274_v5 = vpop.f32.mrb[189].mxu0  ;;  %v9359_v17 = vadd.f32 %v7455_v25, %v16120_v3  ;;  %v7457_v9 = vpop.f32.mrb[190].mxu1 }
 0x839   : > { %v9455_v13 = vadd.f32 %v8274_v5, %v16122_v11  ;;  %v8276_v4 = vpop.f32.mrb[190].mxu0  ;;  %8559 = vst [vmem:[%s11335_s29 + $0x8b0] sm:$0xff] %v9358_v14  ;;  %v9360_v44 = vadd.f32 %v7457_v9, %v16116_v21  ;;  %v7459_v62 = vpop.f32.mrb[191].mxu1 }
 0x83a   : > { %8561 = vst [vmem:[%s11335_s29 + $0x8c0] sm:$0xff] %v9454_v51  ;;  %v9456_v1 = vadd.f32 %v8276_v4, %v16118_v47  ;;  %v8278_v27 = vpop.f32.mrb[191].mxu0  ;;  %8560 = vst [vmem:[%s11335_s29 + $0x8b8] sm:$0xff] %v9359_v17  ;;  %v9361_v58 = vadd.f32 %v7459_v62, %v16120_v3 }
 0x83b   : > { %8562 = vst [vmem:[%s11335_s29 + $0x8c8] sm:$0xff] %v9455_v13  ;;  %v9457_v6 = vadd.f32 %v8278_v27, %v16122_v11  ;;  %8565 = vst [vmem:[%s11335_s29 + $0x8e0] sm:$0xff] %v9360_v44 }
 0x83c   : > { %8567 = vst [vmem:[%s11335_s29 + $0x8f0] sm:$0xff] %v9456_v1  ;;  %8566 = vst [vmem:[%s11335_s29 + $0x8e8] sm:$0xff] %v9361_v58 }
 0x83d   : > { %8568 = vst [vmem:[%s11335_s29 + $0x8f8] sm:$0xff] %v9457_v6 }
 0x83e   : > { %10916 = shalt.err (!%p10913_p10)
}
 0x83f   : > { %s10917_s15 = scalar_lea.hbm %s16501_s20, 36864  ;;  %s10921_s12 = scalar_lea.hbm %s16569_s6, 147456 }
 0x840   : > { %p10918_p13 = scmp.ne.s32.totalorder %s16501_s20, %s10917_s15  ;;  %p10922_p2 = scmp.lt.u32.totalorder %s16501_s20, %s16569_s6 }
 0x841   : > { %p10923_p3 = scmp.lt.u32.totalorder %s10921_s12, %s10917_s15  ;;  %p10925_p6 = scmp.lt.u32.totalorder %s10917_s15, %s16501_s20 }
 0x842   : > { %p10919_p4 = pnand %p10918_p13, %p18177_p0 }
 0x843   : > { %p10924_p1 = por %p10923_p3, %p10922_p2 }
 0x844   : > { %p10920_p5 = pneg %p10919_p4 }
 0x845   : > { %p10926_p12 = por %p10925_p6, %p10924_p1 }
 0x847   : > { %p10927_p8 = pnand %p10926_p12, %p10920_p5 }
 0x849   : > { %10930 = shalt.err (!%p10927_p8)
}
 0x84a   : > { %s11011_s11 = smov 768   ;;  %s11012_s19 = smov 3072  }
 0x84b   : > { %s11013_s4 = smov 48  }
 0x84c   : > { %9962 = dma.vmem_to_hbm [thread:$0]  (%p18177_p0), %s16507_s7, 36864, %s16501_s20, %s8570_s1, %s11011_s11, %s11012_s19, %s11013_s4  }
 0x84d PF: > { %s18178_s8 = sld [smem:[#allocation19_spill]]  ;;  %s18179_s29 = sld [smem:[#allocation21_spill]] }
 0x84e   : > { %p9997_p11 = scmp.ge.s32.totalorder %s10997_s26, 2 }
 0x853   : > { %s8601_s27 = sand.u32 1, %s18178_s8   ;;  %p18180_p7 = scmp.ne.s32.totalorder %s18179_s29, 0 }
 0x854   : > { %s8602_s24 = scalar_lea.sflag [#allocation5], %s8601_s27 }
 0x855   : > { %p9985_p9 = pnand %p9997_p11, %p18180_p7 }
 0x857   : > { %10972 = dma.done.wait (!%p9985_p9), %s8602_s24, 36864  }
 0x858   : > { %10974 = vsyncadd (!%p9985_p9), %s8602_s24, 4294930432  ;;  %s22_s26 = sadd.s32 1, %s10997_s26   ;;  %s18181_s13 = sld [smem:[#allocation23_spill]] }
 0x859   : > { %p19_p10 = scmp.ge.s32.totalorder %s22_s26, 6   ;;  %s18182_s10 = sld [smem:[#allocation22_spill]] }
 0x85a   : > { %s18183_s21 = smov %s10981_s22  ;;  %s18184_s22 = smov %s10985_s23 }
 0x85b   : > { %s18186_s24 = smov %s10993_s25  ;;  %21 = sbr.rel (!%p19_p10) target bundleno = 11 (0xb), region = 121 }
 0x85e   : > { %s18185_s23 = smov %s18181_s13 }
 0x85f   : > { %s18187_s25 = smov %s18182_s10 }
 0x862   :  { %8607 = vsyncpa [#allocation4], 1 }
 0x863   :  { %8609 = vsyncpa [#allocation4 + $0x1], 1 }
 0x864   :  { %8610 = vsyncpa [#allocation7], 1 }
 0x865   :  { %8611 = vsyncpa [#allocation10], 1 }
 0x866   :  { %8612 = vsyncpa [#allocation5], 1 }
 0x867   :  { %8614 = vsyncpa [#allocation5 + $0x1], 1 }

</bundles_post_ra>
